<compile_context>
chip_gen: v5e
topology: v5e:2x2
jax: 0.10.0
libtpu: 0.0.40
codegen_flags: <defaults>
</compile_context>

<pallas_src>
import functools
import math

import jax
import jax.numpy as jnp
from jax import lax
from jax.experimental import pallas as pl
from jax.experimental.pallas import tpu as pltpu

_BN_EPS = 1e-5


def _round_up(x, m):
    return (x + m - 1) // m * m


def _plan_m(m):
    """Pick (padded M, TM).  Keep >=2 M blocks when M is large enough so the
    single 'parallel' grid axis can shard across v7x's two TensorCores."""
    if m >= 512:
        tm = 256
    elif m >= 256:
        tm = 128
    elif m >= 128:
        tm = 64
    else:
        mp = _round_up(m, 16)          # bf16 sublane multiple; single block
        return mp, mp
    return _round_up(m, tm), tm


def _pad2d(x, rows, cols):
    r, c = x.shape
    if (r, c) == (rows, cols):
        return x
    return jnp.pad(x, ((0, rows - r), (0, cols - c)))


def _pad_row(v, cols):
    v = v.astype(jnp.float32).reshape(1, -1)
    if v.shape[1] == cols:
        return v
    return jnp.pad(v, ((0, 0), (0, cols - v.shape[1])))


def _bn_fold(bn):
    scale = bn["gamma"] * lax.rsqrt(bn["var"] + _BN_EPS)
    shift = bn["beta"] - bn["mean"] * scale
    return scale, shift


# --------------------------------------------------------------------------
# The single Pallas kernel: matmul with fused BN / bias / ReLU pro+epilogue
# --------------------------------------------------------------------------
def _mm_kernel(prologue, epi_relu, *refs):
    if prologue:
        a_ref, b_ref, ksc_ref, ksh_ref, nsc_ref, nsh_ref, o_ref = refs
    else:
        a_ref, b_ref, nsc_ref, nsh_ref, o_ref = refs

    a = a_ref[...]                                              # bf16 tile
    if prologue:
        # pre-activation BN + ReLU per K (input-channel) column, f32 VPU math
        a = jnp.maximum(a.astype(jnp.float32) * ksc_ref[...] + ksh_ref[...], 0.0)
        a = a.astype(jnp.bfloat16)

    # full-K, full-N MXU matmul with f32 accumulation (single reduction step)
    y = jnp.dot(a, b_ref[...], preferred_element_type=jnp.float32)
    y = y * nsc_ref[...] + nsh_ref[...]                         # BN / bias, f32
    if epi_relu:
        y = jnp.maximum(y, 0.0)
    o_ref[...] = y


def fused_matmul(a, b, *, k_scale=None, k_shift=None,
                 n_scale=None, n_shift=None, relu=False):
    """o = [relu]( f(a) @ b * n_scale + n_shift );  f = relu(a*ks+kh) if given."""
    m, k = a.shape
    k2, n = b.shape
    assert k == k2
    kp = _round_up(k, 128)
    npad = _round_up(n, 128)
    mp, tm = _plan_m(m)
    prologue = k_scale is not None

    a_p = _pad2d(a.astype(jnp.bfloat16), mp, kp)
    b_p = _pad2d(b.astype(jnp.bfloat16), kp, npad)
    if n_scale is None:
        n_scale = jnp.ones((n,), jnp.float32)
    if n_shift is None:
        n_shift = jnp.zeros((n,), jnp.float32)

    inputs = [a_p, b_p]
    in_specs = [pl.BlockSpec((tm, kp), lambda i: (i, 0)),
                pl.BlockSpec((kp, npad), lambda i: (0, 0))]
    if prologue:
        inputs += [_pad_row(k_scale, kp), _pad_row(k_shift, kp)]
        in_specs += [pl.BlockSpec((1, kp), lambda i: (0, 0)),
                     pl.BlockSpec((1, kp), lambda i: (0, 0))]
    inputs += [_pad_row(n_scale, npad), _pad_row(n_shift, npad)]
    in_specs += [pl.BlockSpec((1, npad), lambda i: (0, 0)),
                 pl.BlockSpec((1, npad), lambda i: (0, 0))]

    out = pl.pallas_call(
        functools.partial(_mm_kernel, prologue, relu),
        out_shape=jax.ShapeDtypeStruct((mp, npad), jnp.float32),
        grid_spec=pltpu.PrefetchScalarGridSpec(
            num_scalar_prefetch=0,
            grid=(mp // tm,),
            in_specs=in_specs,
            out_specs=pl.BlockSpec((tm, npad), lambda i: (i, 0)),
        ),
        compiler_params=pltpu.CompilerParams(
            dimension_semantics=("parallel",)),
    )(*inputs)
    return out[:m, :n]


# --------------------------------------------------------------------------
# Convolution = patch extraction (plain-JAX glue) + fused Pallas matmul
# --------------------------------------------------------------------------
def conv2d_fused(x_nhwc, w_oihw, *, stride=1, pad=0, bias=None,
                 pre_bn=None, post_bn=None, relu=False):
    cout, cin, kh, kw = w_oihw.shape
    n, h, w, c = x_nhwc.shape
    assert c == cin
    x_bf = x_nhwc.astype(jnp.bfloat16)
    if kh == 1 and kw == 1 and stride == 1 and pad == 0:
        ho, wo = h, w
        patches = x_bf.reshape(n * h * w, cin)
    else:
        patches = lax.conv_general_dilated_patches(
            x_bf, (kh, kw), (stride, stride), ((pad, pad), (pad, pad)),
            dimension_numbers=("NHWC", "HWIO", "NHWC"))
        _, ho, wo, _ = patches.shape
        patches = patches.reshape(n * ho * wo, cin * kh * kw)
    # patch feature ordering is (cin, kh, kw)  ->  weight rows must match
    wmat = jnp.transpose(w_oihw, (1, 2, 3, 0)).reshape(cin * kh * kw, cout)

    k_scale = k_shift = None
    if pre_bn is not None:                  # pre-activation BN + ReLU (prologue)
        sc, sh = _bn_fold(pre_bn)
        if kh == 1 and kw == 1:
            k_scale, k_shift = sc, sh
        else:
            k_scale = jnp.repeat(sc, kh * kw)
            k_shift = jnp.repeat(sh, kh * kw)
    n_scale = n_shift = None
    if post_bn is not None:                 # conv -> (bias) -> BN -> ReLU (epilogue)
        sc, sh = _bn_fold(post_bn)
        n_scale = sc
        n_shift = (sh + sc * bias) if bias is not None else sh
    elif bias is not None:
        n_shift = bias

    out = fused_matmul(patches, wmat, k_scale=k_scale, k_shift=k_shift,
                       n_scale=n_scale, n_shift=n_shift, relu=relu)
    return out.reshape(n, ho, wo, cout)


# Small pooling reductions kept in plain JAX (negligible next to the matmuls).
def _pool2x2(x, reduce_fn):
    n, h, w, c = x.shape
    return reduce_fn(x.reshape(n, h // 2, 2, w // 2, 2, c), axis=(2, 4))


def _adaptive_avg_pool_4x4(x):
    n, h, w, c = x.shape
    assert h % 4 == 0 and w % 4 == 0   # uniform bins == exact AdaptiveAvgPool2d
    return jnp.mean(x.reshape(n, 4, h // 4, 4, w // 4, c), axis=(2, 4))


# --------------------------------------------------------------------------
# Deterministic parameter construction
# --------------------------------------------------------------------------
class _KeyGen:
    def __init__(self, key):
        self._key = key

    def __call__(self):
        self._key, k = jax.random.split(self._key)
        return k


def _conv_init(kg, cout, cin, kh, kw, use_bias=False):
    fan_in = cin * kh * kw
    p = {"w": jax.random.normal(kg(), (cout, cin, kh, kw), jnp.float32)
              / math.sqrt(fan_in)}
    if use_bias:
        p["b"] = 0.01 * jax.random.normal(kg(), (cout,), jnp.float32)
    return p


def _bn_init(kg, c):
    return {
        "gamma": 1.0 + 0.05 * jax.random.normal(kg(), (c,), jnp.float32),
        "beta": 0.05 * jax.random.normal(kg(), (c,), jnp.float32),
        "mean": 0.05 * jax.random.normal(kg(), (c,), jnp.float32),
        "var": 1.0 + 0.1 * jax.random.uniform(kg(), (c,), jnp.float32),
    }


def _linear_init(kg, cin, cout):
    return {"w": jax.random.normal(kg(), (cout, cin), jnp.float32) / math.sqrt(cin),
            "b": 0.01 * jax.random.normal(kg(), (cout,), jnp.float32)}


def init_rot_prediction_params(key, rgb=1):
    kg = _KeyGen(key)
    num_in, growth, depth, output_channel = 48, 24, 16, 300
    params = {"conv0": _conv_init(kg, num_in, rgb, 7, 7),
              "norm0": _bn_init(kg, num_in)}

    def dense_block(c_in):
        blocks, c = [], c_in
        for _ in range(depth):
            blocks.append({
                "norm1": _bn_init(kg, c),
                "conv1": _conv_init(kg, 4 * growth, c, 1, 1),
                "norm2": _bn_init(kg, 4 * growth),
                "conv2": _conv_init(kg, growth, 4 * growth, 3, 3),
            })
            c += growth
        return blocks, c

    params["block1"], c = dense_block(num_in)
    params["trans1"] = {"norm": _bn_init(kg, c),
                        "conv": _conv_init(kg, c // 2, c, 1, 1)}
    c = c // 2
    params["block2"], c = dense_block(c)
    params["trans2_norm"] = _bn_init(kg, c)
    params["trans2_conv"] = _conv_init(kg, output_channel, c, 1, 1)
    params["mid_conv"] = _conv_init(kg, 16, output_channel, 1, 1, use_bias=True)
    params["mid_bn"] = _bn_init(kg, 16)
    params["rot_head"] = _linear_init(kg, 256, 4)
    params["flip_head"] = _linear_init(kg, 256, 2)
    return params


# --------------------------------------------------------------------------
# Forward pass (matches RotPrediction.forward in eval mode)
# --------------------------------------------------------------------------
@jax.jit
def rot_prediction_forward(params, x_nchw):
    x = jnp.transpose(x_nchw.astype(jnp.float32), (0, 2, 3, 1))    # NCHW -> NHWC

    # ---- DeepCNN300 backbone ----
    # conv0 (7x7/2) with BN(norm0)+ReLU fused into the matmul epilogue
    x = conv2d_fused(x, params["conv0"]["w"], stride=2, pad=3,
                     post_bn=params["norm0"], relu=True)
    x = _pool2x2(x, jnp.max)                         # MaxPool2d(2, 2)

    def bottleneck(x, p):                            # pre-activation dense layer
        # 1x1 conv: BN(norm1)+ReLU fused as prologue, BN(norm2)+ReLU as epilogue
        out = conv2d_fused(x, p["conv1"]["w"],
                           pre_bn=p["norm1"], post_bn=p["norm2"], relu=True)
        # 3x3 conv, no bias; Dropout(dropout_rate) is identity in eval mode
        out = conv2d_fused(out, p["conv2"]["w"], pad=1)
        return jnp.concatenate([x, out], axis=-1)

    for p in params["block1"]:
        x = bottleneck(x, p)
    # transition1: BN+ReLU fused as prologue of the 1x1 conv, then AvgPool2d(2,2)
    x = conv2d_fused(x, params["trans1"]["conv"]["w"], pre_bn=params["trans1"]["norm"])
    x = _pool2x2(x, jnp.mean)
    for p in params["block2"]:
        x = bottleneck(x, p)
    # transition2: BN+ReLU fused as prologue of the 1x1 conv -> 300 channels
    x = conv2d_fused(x, params["trans2_conv"]["w"], pre_bn=params["trans2_norm"])

    # ---- middle: Conv1x1(+bias) -> Dropout(0.1) -> BN -> ReLU fused; then pool/flatten
    x = conv2d_fused(x, params["mid_conv"]["w"], bias=params["mid_conv"]["b"],
                     post_bn=params["mid_bn"], relu=True)
    x = _adaptive_avg_pool_4x4(x)
    n, h, w, c = x.shape
    x = jnp.transpose(x, (0, 3, 1, 2)).reshape(n, c * h * w)   # nn.Flatten on NCHW

    # ---- heads: rotation + flip fused into a single [256, 6] matmul
    w_heads = jnp.concatenate([params["rot_head"]["w"],
                               params["flip_head"]["w"]], axis=0).T     # (256, 6)
    b_heads = jnp.concatenate([params["rot_head"]["b"],
                               params["flip_head"]["b"]], axis=0)       # (6,)
    logits = fused_matmul(x, w_heads, n_shift=b_heads)
    return logits[:, :4], logits[:, 4:6]


if __name__ == "__main__":
    key = jax.random.PRNGKey(0)
    pkey, xkey = jax.random.split(key)
    params = init_rot_prediction_params(pkey, rgb=1)
    x = jax.random.normal(xkey, (2, 1, 32, 32), jnp.float32)   # NCHW, like torch
    rot, flip = rot_prediction_forward(params, x)
    rot, flip = jax.block_until_ready((rot, flip))
    assert rot.shape == (2, 4) and flip.shape == (2, 2)
    assert bool(jnp.isfinite(rot).all()) and bool(jnp.isfinite(flip).all())
    print("KERNEL_OK")
</pallas_src>

<mosaic_0001>
module attributes {stable_mosaic.version = 11 : i64} {
  func.func @_mm_kernel(%arg0: i32, %arg1: memref<256x128xbf16, #tpu.memory_space<vmem>>, %arg2: memref<128x128xbf16, #tpu.memory_space<vmem>>, %arg3: memref<1x128xf32, #tpu.memory_space<vmem>>, %arg4: memref<1x128xf32, #tpu.memory_space<vmem>>, %arg5: memref<256x128xf32, #tpu.memory_space<vmem>>) attributes {dimension_semantics = [#tpu.dimension_semantics<parallel>], iteration_bounds = array<i64: 2>, scalar_prefetch = 0 : i64, scratch_operands = 0 : i64, tpu.core_type = #tpu.core_type<tc>, window_params = [{transform_indices = @transform_0, window_bounds = array<i64: 256, 128>}, {pipeline_mode = #tpu.pipeline_mode<synchronous>, transform_indices = @transform_1, window_bounds = array<i64: 128, 128>}, {pipeline_mode = #tpu.pipeline_mode<synchronous>, transform_indices = @transform_2, window_bounds = array<i64: 1, 128>}, {pipeline_mode = #tpu.pipeline_mode<synchronous>, transform_indices = @transform_3, window_bounds = array<i64: 1, 128>}, {transform_indices = @transform_4, window_bounds = array<i64: 256, 128>}]} {
    %c0 = arith.constant 0 : index
    %c0_0 = arith.constant 0 : index
    %0 = vector.load %arg1[%c0, %c0_0] : memref<256x128xbf16, #tpu.memory_space<vmem>>, vector<256x128xbf16>
    %c0_1 = arith.constant 0 : index
    %c0_2 = arith.constant 0 : index
    %1 = vector.load %arg2[%c0_1, %c0_2] : memref<128x128xbf16, #tpu.memory_space<vmem>>, vector<128x128xbf16>
    %cst = arith.constant dense<0.000000e+00> : vector<256x128xf32>
    %2 = tpu.matmul %0, %1, %cst {dimension_numbers = #tpu.dot_dimension_numbers<[1], [0], [0], [1], [0, 0, 1, 1], [], []>} : vector<256x128xbf16>, vector<128x128xbf16>, vector<256x128xf32> -> vector<256x128xf32>
    %c0_3 = arith.constant 0 : index
    %c0_4 = arith.constant 0 : index
    %3 = vector.load %arg3[%c0_3, %c0_4] : memref<1x128xf32, #tpu.memory_space<vmem>>, vector<1x128xf32>
    %4 = vector.broadcast %3 : vector<1x128xf32> to vector<256x128xf32>
    %5 = arith.mulf %2, %4 : vector<256x128xf32>
    %c0_5 = arith.constant 0 : index
    %c0_6 = arith.constant 0 : index
    %6 = vector.load %arg4[%c0_5, %c0_6] : memref<1x128xf32, #tpu.memory_space<vmem>>, vector<1x128xf32>
    %7 = vector.broadcast %6 : vector<1x128xf32> to vector<256x128xf32>
    %8 = arith.addf %5, %7 : vector<256x128xf32>
    %cst_7 = arith.constant 0.000000e+00 : f32
    %9 = vector.broadcast %cst_7 : f32 to vector<256x128xf32>
    %10 = arith.maximumf %8, %9 : vector<256x128xf32>
    %c0_8 = arith.constant 0 : index
    %c0_9 = arith.constant 0 : index
    %11 = vector.load %arg5[%c0_8, %c0_9] : memref<256x128xf32, #tpu.memory_space<vmem>>, vector<256x128xf32>
    tpu.vector_store %arg5[%c0_8, %c0_9], %10 {strides = array<i32>} : memref<256x128xf32, #tpu.memory_space<vmem>>, vector<256x128xf32>,
    return
  }
  func.func @transform_0(%arg0: i32) -> (i32, i32) {
    %c0_i32 = arith.constant 0 : i32
    %c0_i32_0 = arith.constant 0 : i32
    return %arg0, %c0_i32 : i32, i32
  }
  func.func @transform_1(%arg0: i32) -> (i32, i32) {
    %c0_i32 = arith.constant 0 : i32
    %c0_i32_0 = arith.constant 0 : i32
    %c0_i32_1 = arith.constant 0 : i32
    return %c0_i32, %c0_i32_0 : i32, i32
  }
  func.func @transform_2(%arg0: i32) -> (i32, i32) {
    %c0_i32 = arith.constant 0 : i32
    %c0_i32_0 = arith.constant 0 : i32
    %c0_i32_1 = arith.constant 0 : i32
    return %c0_i32, %c0_i32_0 : i32, i32
  }
  func.func @transform_3(%arg0: i32) -> (i32, i32) {
    %c0_i32 = arith.constant 0 : i32
    %c0_i32_0 = arith.constant 0 : i32
    %c0_i32_1 = arith.constant 0 : i32
    return %c0_i32, %c0_i32_0 : i32, i32
  }
  func.func @transform_4(%arg0: i32) -> (i32, i32) {
    %c0_i32 = arith.constant 0 : i32
    %c0_i32_0 = arith.constant 0 : i32
    return %arg0, %c0_i32 : i32, i32
  }
}

module attributes {stable_mosaic.version = 11 : i64} {
  func.func @_mm_kernel(%arg0: i32, %arg1: memref<64x128xbf16, #tpu.memory_space<vmem>>, %arg2: memref<128x128xbf16, #tpu.memory_space<vmem>>, %arg3: memref<1x128xf32, #tpu.memory_space<vmem>>, %arg4: memref<1x128xf32, #tpu.memory_space<vmem>>, %arg5: memref<1x128xf32, #tpu.memory_space<vmem>>, %arg6: memref<1x128xf32, #tpu.memory_space<vmem>>, %arg7: memref<64x128xf32, #tpu.memory_space<vmem>>) attributes {dimension_semantics = [#tpu.dimension_semantics<parallel>], iteration_bounds = array<i64: 2>, scalar_prefetch = 0 : i64, scratch_operands = 0 : i64, tpu.core_type = #tpu.core_type<tc>, window_params = [{transform_indices = @transform_0, window_bounds = array<i64: 64, 128>}, {pipeline_mode = #tpu.pipeline_mode<synchronous>, transform_indices = @transform_1, window_bounds = array<i64: 128, 128>}, {pipeline_mode = #tpu.pipeline_mode<synchronous>, transform_indices = @transform_2, window_bounds = array<i64: 1, 128>}, {pipeline_mode = #tpu.pipeline_mode<synchronous>, transform_indices = @transform_3, window_bounds = array<i64: 1, 128>}, {pipeline_mode = #tpu.pipeline_mode<synchronous>, transform_indices = @transform_4, window_bounds = array<i64: 1, 128>}, {pipeline_mode = #tpu.pipeline_mode<synchronous>, transform_indices = @transform_5, window_bounds = array<i64: 1, 128>}, {transform_indices = @transform_6, window_bounds = array<i64: 64, 128>}]} {
    %c0 = arith.constant 0 : index
    %c0_0 = arith.constant 0 : index
    %0 = vector.load %arg1[%c0, %c0_0] : memref<64x128xbf16, #tpu.memory_space<vmem>>, vector<64x128xbf16>
    %1 = arith.extf %0 : vector<64x128xbf16> to vector<64x128xf32>
    %c0_1 = arith.constant 0 : index
    %c0_2 = arith.constant 0 : index
    %2 = vector.load %arg3[%c0_1, %c0_2] : memref<1x128xf32, #tpu.memory_space<vmem>>, vector<1x128xf32>
    %3 = vector.broadcast %2 : vector<1x128xf32> to vector<64x128xf32>
    %4 = arith.mulf %1, %3 : vector<64x128xf32>
    %c0_3 = arith.constant 0 : index
    %c0_4 = arith.constant 0 : index
    %5 = vector.load %arg4[%c0_3, %c0_4] : memref<1x128xf32, #tpu.memory_space<vmem>>, vector<1x128xf32>
    %6 = vector.broadcast %5 : vector<1x128xf32> to vector<64x128xf32>
    %7 = arith.addf %4, %6 : vector<64x128xf32>
    %cst = arith.constant 0.000000e+00 : f32
    %8 = vector.broadcast %cst : f32 to vector<64x128xf32>
    %9 = arith.maximumf %7, %8 : vector<64x128xf32>
    %10 = arith.truncf %9 : vector<64x128xf32> to vector<64x128xbf16>
    %c0_5 = arith.constant 0 : index
    %c0_6 = arith.constant 0 : index
    %11 = vector.load %arg2[%c0_5, %c0_6] : memref<128x128xbf16, #tpu.memory_space<vmem>>, vector<128x128xbf16>
    %cst_7 = arith.constant dense<0.000000e+00> : vector<64x128xf32>
    %12 = tpu.matmul %10, %11, %cst_7 {dimension_numbers = #tpu.dot_dimension_numbers<[1], [0], [0], [1], [0, 0, 1, 1], [], []>} : vector<64x128xbf16>, vector<128x128xbf16>, vector<64x128xf32> -> vector<64x128xf32>
    %c0_8 = arith.constant 0 : index
    %c0_9 = arith.constant 0 : index
    %13 = vector.load %arg5[%c0_8, %c0_9] : memref<1x128xf32, #tpu.memory_space<vmem>>, vector<1x128xf32>
    %14 = vector.broadcast %13 : vector<1x128xf32> to vector<64x128xf32>
    %15 = arith.mulf %12, %14 : vector<64x128xf32>
    %c0_10 = arith.constant 0 : index
    %c0_11 = arith.constant 0 : index
    %16 = vector.load %arg6[%c0_10, %c0_11] : memref<1x128xf32, #tpu.memory_space<vmem>>, vector<1x128xf32>
    %17 = vector.broadcast %16 : vector<1x128xf32> to vector<64x128xf32>
    %18 = arith.addf %15, %17 : vector<64x128xf32>
    %cst_12 = arith.constant 0.000000e+00 : f32
    %19 = vector.broadcast %cst_12 : f32 to vector<64x128xf32>
    %20 = arith.maximumf %18, %19 : vector<64x128xf32>
    %c0_13 = arith.constant 0 : index
    %c0_14 = arith.constant 0 : index
    %21 = vector.load %arg7[%c0_13, %c0_14] : memref<64x128xf32, #tpu.memory_space<vmem>>, vector<64x128xf32>
    tpu.vector_store %arg7[%c0_13, %c0_14], %20 {strides = array<i32>} : memref<64x128xf32, #tpu.memory_space<vmem>>, vector<64x128xf32>,
    return
  }
  func.func @transform_0(%arg0: i32) -> (i32, i32) {
    %c0_i32 = arith.constant 0 : i32
    %c0_i32_0 = arith.constant 0 : i32
    return %arg0, %c0_i32 : i32, i32
  }
  func.func @transform_1(%arg0: i32) -> (i32, i32) {
    %c0_i32 = arith.constant 0 : i32
    %c0_i32_0 = arith.constant 0 : i32
    %c0_i32_1 = arith.constant 0 : i32
    return %c0_i32, %c0_i32_0 : i32, i32
  }
  func.func @transform_2(%arg0: i32) -> (i32, i32) {
    %c0_i32 = arith.constant 0 : i32
    %c0_i32_0 = arith.constant 0 : i32
    %c0_i32_1 = arith.constant 0 : i32
    return %c0_i32, %c0_i32_0 : i32, i32
  }
  func.func @transform_3(%arg0: i32) -> (i32, i32) {
    %c0_i32 = arith.constant 0 : i32
    %c0_i32_0 = arith.constant 0 : i32
    %c0_i32_1 = arith.constant 0 : i32
    return %c0_i32, %c0_i32_0 : i32, i32
  }
  func.func @transform_4(%arg0: i32) -> (i32, i32) {
    %c0_i32 = arith.constant 0 : i32
    %c0_i32_0 = arith.constant 0 : i32
    %c0_i32_1 = arith.constant 0 : i32
    return %c0_i32, %c0_i32_0 : i32, i32
  }
  func.func @transform_5(%arg0: i32) -> (i32, i32) {
    %c0_i32 = arith.constant 0 : i32
    %c0_i32_0 = arith.constant 0 : i32
    %c0_i32_1 = arith.constant 0 : i32
    return %c0_i32, %c0_i32_0 : i32, i32
  }
  func.func @transform_6(%arg0: i32) -> (i32, i32) {
    %c0_i32 = arith.constant 0 : i32
    %c0_i32_0 = arith.constant 0 : i32
    return %arg0, %c0_i32 : i32, i32
  }
}

module attributes {stable_mosaic.version = 11 : i64} {
  func.func @_mm_kernel(%arg0: i32, %arg1: memref<64x896xbf16, #tpu.memory_space<vmem>>, %arg2: memref<896x128xbf16, #tpu.memory_space<vmem>>, %arg3: memref<1x128xf32, #tpu.memory_space<vmem>>, %arg4: memref<1x128xf32, #tpu.memory_space<vmem>>, %arg5: memref<64x128xf32, #tpu.memory_space<vmem>>) attributes {dimension_semantics = [#tpu.dimension_semantics<parallel>], iteration_bounds = array<i64: 2>, scalar_prefetch = 0 : i64, scratch_operands = 0 : i64, tpu.core_type = #tpu.core_type<tc>, window_params = [{transform_indices = @transform_0, window_bounds = array<i64: 64, 896>}, {pipeline_mode = #tpu.pipeline_mode<synchronous>, transform_indices = @transform_1, window_bounds = array<i64: 896, 128>}, {pipeline_mode = #tpu.pipeline_mode<synchronous>, transform_indices = @transform_2, window_bounds = array<i64: 1, 128>}, {pipeline_mode = #tpu.pipeline_mode<synchronous>, transform_indices = @transform_3, window_bounds = array<i64: 1, 128>}, {transform_indices = @transform_4, window_bounds = array<i64: 64, 128>}]} {
    %c0 = arith.constant 0 : index
    %c0_0 = arith.constant 0 : index
    %0 = vector.load %arg1[%c0, %c0_0] : memref<64x896xbf16, #tpu.memory_space<vmem>>, vector<64x896xbf16>
    %c0_1 = arith.constant 0 : index
    %c0_2 = arith.constant 0 : index
    %1 = vector.load %arg2[%c0_1, %c0_2] : memref<896x128xbf16, #tpu.memory_space<vmem>>, vector<896x128xbf16>
    %cst = arith.constant dense<0.000000e+00> : vector<64x128xf32>
    %2 = tpu.matmul %0, %1, %cst {dimension_numbers = #tpu.dot_dimension_numbers<[1], [0], [0], [1], [0, 0, 1, 1], [], []>} : vector<64x896xbf16>, vector<896x128xbf16>, vector<64x128xf32> -> vector<64x128xf32>
    %c0_3 = arith.constant 0 : index
    %c0_4 = arith.constant 0 : index
    %3 = vector.load %arg3[%c0_3, %c0_4] : memref<1x128xf32, #tpu.memory_space<vmem>>, vector<1x128xf32>
    %4 = vector.broadcast %3 : vector<1x128xf32> to vector<64x128xf32>
    %5 = arith.mulf %2, %4 : vector<64x128xf32>
    %c0_5 = arith.constant 0 : index
    %c0_6 = arith.constant 0 : index
    %6 = vector.load %arg4[%c0_5, %c0_6] : memref<1x128xf32, #tpu.memory_space<vmem>>, vector<1x128xf32>
    %7 = vector.broadcast %6 : vector<1x128xf32> to vector<64x128xf32>
    %8 = arith.addf %5, %7 : vector<64x128xf32>
    %c0_7 = arith.constant 0 : index
    %c0_8 = arith.constant 0 : index
    %9 = vector.load %arg5[%c0_7, %c0_8] : memref<64x128xf32, #tpu.memory_space<vmem>>, vector<64x128xf32>
    tpu.vector_store %arg5[%c0_7, %c0_8], %8 {strides = array<i32>} : memref<64x128xf32, #tpu.memory_space<vmem>>, vector<64x128xf32>,
    return
  }
  func.func @transform_0(%arg0: i32) -> (i32, i32) {
    %c0_i32 = arith.constant 0 : i32
    %c0_i32_0 = arith.constant 0 : i32
    return %arg0, %c0_i32 : i32, i32
  }
  func.func @transform_1(%arg0: i32) -> (i32, i32) {
    %c0_i32 = arith.constant 0 : i32
    %c0_i32_0 = arith.constant 0 : i32
    %c0_i32_1 = arith.constant 0 : i32
    return %c0_i32, %c0_i32_0 : i32, i32
  }
  func.func @transform_2(%arg0: i32) -> (i32, i32) {
    %c0_i32 = arith.constant 0 : i32
    %c0_i32_0 = arith.constant 0 : i32
    %c0_i32_1 = arith.constant 0 : i32
    return %c0_i32, %c0_i32_0 : i32, i32
  }
  func.func @transform_3(%arg0: i32) -> (i32, i32) {
    %c0_i32 = arith.constant 0 : i32
    %c0_i32_0 = arith.constant 0 : i32
    %c0_i32_1 = arith.constant 0 : i32
    return %c0_i32, %c0_i32_0 : i32, i32
  }
  func.func @transform_4(%arg0: i32) -> (i32, i32) {
    %c0_i32 = arith.constant 0 : i32
    %c0_i32_0 = arith.constant 0 : i32
    return %arg0, %c0_i32 : i32, i32
  }
}

module attributes {stable_mosaic.version = 11 : i64} {
  func.func @_mm_kernel(%arg0: i32, %arg1: memref<64x256xbf16, #tpu.memory_space<vmem>>, %arg2: memref<256x128xbf16, #tpu.memory_space<vmem>>, %arg3: memref<1x256xf32, #tpu.memory_space<vmem>>, %arg4: memref<1x256xf32, #tpu.memory_space<vmem>>, %arg5: memref<1x128xf32, #tpu.memory_space<vmem>>, %arg6: memref<1x128xf32, #tpu.memory_space<vmem>>, %arg7: memref<64x128xf32, #tpu.memory_space<vmem>>) attributes {dimension_semantics = [#tpu.dimension_semantics<parallel>], iteration_bounds = array<i64: 2>, scalar_prefetch = 0 : i64, scratch_operands = 0 : i64, tpu.core_type = #tpu.core_type<tc>, window_params = [{transform_indices = @transform_0, window_bounds = array<i64: 64, 256>}, {pipeline_mode = #tpu.pipeline_mode<synchronous>, transform_indices = @transform_1, window_bounds = array<i64: 256, 128>}, {pipeline_mode = #tpu.pipeline_mode<synchronous>, transform_indices = @transform_2, window_bounds = array<i64: 1, 256>}, {pipeline_mode = #tpu.pipeline_mode<synchronous>, transform_indices = @transform_3, window_bounds = array<i64: 1, 256>}, {pipeline_mode = #tpu.pipeline_mode<synchronous>, transform_indices = @transform_4, window_bounds = array<i64: 1, 128>}, {pipeline_mode = #tpu.pipeline_mode<synchronous>, transform_indices = @transform_5, window_bounds = array<i64: 1, 128>}, {transform_indices = @transform_6, window_bounds = array<i64: 64, 128>}]} {
    %c0 = arith.constant 0 : index
    %c0_0 = arith.constant 0 : index
    %0 = vector.load %arg1[%c0, %c0_0] : memref<64x256xbf16, #tpu.memory_space<vmem>>, vector<64x256xbf16>
    %1 = arith.extf %0 : vector<64x256xbf16> to vector<64x256xf32>
    %c0_1 = arith.constant 0 : index
    %c0_2 = arith.constant 0 : index
    %2 = vector.load %arg3[%c0_1, %c0_2] : memref<1x256xf32, #tpu.memory_space<vmem>>, vector<1x256xf32>
    %3 = vector.broadcast %2 : vector<1x256xf32> to vector<64x256xf32>
    %4 = arith.mulf %1, %3 : vector<64x256xf32>
    %c0_3 = arith.constant 0 : index
    %c0_4 = arith.constant 0 : index
    %5 = vector.load %arg4[%c0_3, %c0_4] : memref<1x256xf32, #tpu.memory_space<vmem>>, vector<1x256xf32>
    %6 = vector.broadcast %5 : vector<1x256xf32> to vector<64x256xf32>
    %7 = arith.addf %4, %6 : vector<64x256xf32>
    %cst = arith.constant 0.000000e+00 : f32
    %8 = vector.broadcast %cst : f32 to vector<64x256xf32>
    %9 = arith.maximumf %7, %8 : vector<64x256xf32>
    %10 = arith.truncf %9 : vector<64x256xf32> to vector<64x256xbf16>
    %c0_5 = arith.constant 0 : index
    %c0_6 = arith.constant 0 : index
    %11 = vector.load %arg2[%c0_5, %c0_6] : memref<256x128xbf16, #tpu.memory_space<vmem>>, vector<256x128xbf16>
    %cst_7 = arith.constant dense<0.000000e+00> : vector<64x128xf32>
    %12 = tpu.matmul %10, %11, %cst_7 {dimension_numbers = #tpu.dot_dimension_numbers<[1], [0], [0], [1], [0, 0, 1, 1], [], []>} : vector<64x256xbf16>, vector<256x128xbf16>, vector<64x128xf32> -> vector<64x128xf32>
    %c0_8 = arith.constant 0 : index
    %c0_9 = arith.constant 0 : index
    %13 = vector.load %arg5[%c0_8, %c0_9] : memref<1x128xf32, #tpu.memory_space<vmem>>, vector<1x128xf32>
    %14 = vector.broadcast %13 : vector<1x128xf32> to vector<64x128xf32>
    %15 = arith.mulf %12, %14 : vector<64x128xf32>
    %c0_10 = arith.constant 0 : index
    %c0_11 = arith.constant 0 : index
    %16 = vector.load %arg6[%c0_10, %c0_11] : memref<1x128xf32, #tpu.memory_space<vmem>>, vector<1x128xf32>
    %17 = vector.broadcast %16 : vector<1x128xf32> to vector<64x128xf32>
    %18 = arith.addf %15, %17 : vector<64x128xf32>
    %cst_12 = arith.constant 0.000000e+00 : f32
    %19 = vector.broadcast %cst_12 : f32 to vector<64x128xf32>
    %20 = arith.maximumf %18, %19 : vector<64x128xf32>
    %c0_13 = arith.constant 0 : index
    %c0_14 = arith.constant 0 : index
    %21 = vector.load %arg7[%c0_13, %c0_14] : memref<64x128xf32, #tpu.memory_space<vmem>>, vector<64x128xf32>
    tpu.vector_store %arg7[%c0_13, %c0_14], %20 {strides = array<i32>} : memref<64x128xf32, #tpu.memory_space<vmem>>, vector<64x128xf32>,
    return
  }
  func.func @transform_0(%arg0: i32) -> (i32, i32) {
    %c0_i32 = arith.constant 0 : i32
    %c0_i32_0 = arith.constant 0 : i32
    return %arg0, %c0_i32 : i32, i32
  }
  func.func @transform_1(%arg0: i32) -> (i32, i32) {
    %c0_i32 = arith.constant 0 : i32
    %c0_i32_0 = arith.constant 0 : i32
    %c0_i32_1 = arith.constant 0 : i32
    return %c0_i32, %c0_i32_0 : i32, i32
  }
  func.func @transform_2(%arg0: i32) -> (i32, i32) {
    %c0_i32 = arith.constant 0 : i32
    %c0_i32_0 = arith.constant 0 : i32
    %c0_i32_1 = arith.constant 0 : i32
    return %c0_i32, %c0_i32_0 : i32, i32
  }
  func.func @transform_3(%arg0: i32) -> (i32, i32) {
    %c0_i32 = arith.constant 0 : i32
    %c0_i32_0 = arith.constant 0 : i32
    %c0_i32_1 = arith.constant 0 : i32
    return %c0_i32, %c0_i32_0 : i32, i32
  }
  func.func @transform_4(%arg0: i32) -> (i32, i32) {
    %c0_i32 = arith.constant 0 : i32
    %c0_i32_0 = arith.constant 0 : i32
    %c0_i32_1 = arith.constant 0 : i32
    return %c0_i32, %c0_i32_0 : i32, i32
  }
  func.func @transform_5(%arg0: i32) -> (i32, i32) {
    %c0_i32 = arith.constant 0 : i32
    %c0_i32_0 = arith.constant 0 : i32
    %c0_i32_1 = arith.constant 0 : i32
    return %c0_i32, %c0_i32_0 : i32, i32
  }
  func.func @transform_6(%arg0: i32) -> (i32, i32) {
    %c0_i32 = arith.constant 0 : i32
    %c0_i32_0 = arith.constant 0 : i32
    return %arg0, %c0_i32 : i32, i32
  }
}

module attributes {stable_mosaic.version = 11 : i64} {
  func.func @_mm_kernel(%arg0: i32, %arg1: memref<64x384xbf16, #tpu.memory_space<vmem>>, %arg2: memref<384x128xbf16, #tpu.memory_space<vmem>>, %arg3: memref<1x384xf32, #tpu.memory_space<vmem>>, %arg4: memref<1x384xf32, #tpu.memory_space<vmem>>, %arg5: memref<1x128xf32, #tpu.memory_space<vmem>>, %arg6: memref<1x128xf32, #tpu.memory_space<vmem>>, %arg7: memref<64x128xf32, #tpu.memory_space<vmem>>) attributes {dimension_semantics = [#tpu.dimension_semantics<parallel>], iteration_bounds = array<i64: 2>, scalar_prefetch = 0 : i64, scratch_operands = 0 : i64, tpu.core_type = #tpu.core_type<tc>, window_params = [{transform_indices = @transform_0, window_bounds = array<i64: 64, 384>}, {pipeline_mode = #tpu.pipeline_mode<synchronous>, transform_indices = @transform_1, window_bounds = array<i64: 384, 128>}, {pipeline_mode = #tpu.pipeline_mode<synchronous>, transform_indices = @transform_2, window_bounds = array<i64: 1, 384>}, {pipeline_mode = #tpu.pipeline_mode<synchronous>, transform_indices = @transform_3, window_bounds = array<i64: 1, 384>}, {pipeline_mode = #tpu.pipeline_mode<synchronous>, transform_indices = @transform_4, window_bounds = array<i64: 1, 128>}, {pipeline_mode = #tpu.pipeline_mode<synchronous>, transform_indices = @transform_5, window_bounds = array<i64: 1, 128>}, {transform_indices = @transform_6, window_bounds = array<i64: 64, 128>}]} {
    %c0 = arith.constant 0 : index
    %c0_0 = arith.constant 0 : index
    %0 = vector.load %arg1[%c0, %c0_0] : memref<64x384xbf16, #tpu.memory_space<vmem>>, vector<64x384xbf16>
    %1 = arith.extf %0 : vector<64x384xbf16> to vector<64x384xf32>
    %c0_1 = arith.constant 0 : index
    %c0_2 = arith.constant 0 : index
    %2 = vector.load %arg3[%c0_1, %c0_2] : memref<1x384xf32, #tpu.memory_space<vmem>>, vector<1x384xf32>
    %3 = vector.broadcast %2 : vector<1x384xf32> to vector<64x384xf32>
    %4 = arith.mulf %1, %3 : vector<64x384xf32>
    %c0_3 = arith.constant 0 : index
    %c0_4 = arith.constant 0 : index
    %5 = vector.load %arg4[%c0_3, %c0_4] : memref<1x384xf32, #tpu.memory_space<vmem>>, vector<1x384xf32>
    %6 = vector.broadcast %5 : vector<1x384xf32> to vector<64x384xf32>
    %7 = arith.addf %4, %6 : vector<64x384xf32>
    %cst = arith.constant 0.000000e+00 : f32
    %8 = vector.broadcast %cst : f32 to vector<64x384xf32>
    %9 = arith.maximumf %7, %8 : vector<64x384xf32>
    %10 = arith.truncf %9 : vector<64x384xf32> to vector<64x384xbf16>
    %c0_5 = arith.constant 0 : index
    %c0_6 = arith.constant 0 : index
    %11 = vector.load %arg2[%c0_5, %c0_6] : memref<384x128xbf16, #tpu.memory_space<vmem>>, vector<384x128xbf16>
    %cst_7 = arith.constant dense<0.000000e+00> : vector<64x128xf32>
    %12 = tpu.matmul %10, %11, %cst_7 {dimension_numbers = #tpu.dot_dimension_numbers<[1], [0], [0], [1], [0, 0, 1, 1], [], []>} : vector<64x384xbf16>, vector<384x128xbf16>, vector<64x128xf32> -> vector<64x128xf32>
    %c0_8 = arith.constant 0 : index
    %c0_9 = arith.constant 0 : index
    %13 = vector.load %arg5[%c0_8, %c0_9] : memref<1x128xf32, #tpu.memory_space<vmem>>, vector<1x128xf32>
    %14 = vector.broadcast %13 : vector<1x128xf32> to vector<64x128xf32>
    %15 = arith.mulf %12, %14 : vector<64x128xf32>
    %c0_10 = arith.constant 0 : index
    %c0_11 = arith.constant 0 : index
    %16 = vector.load %arg6[%c0_10, %c0_11] : memref<1x128xf32, #tpu.memory_space<vmem>>, vector<1x128xf32>
    %17 = vector.broadcast %16 : vector<1x128xf32> to vector<64x128xf32>
    %18 = arith.addf %15, %17 : vector<64x128xf32>
    %cst_12 = arith.constant 0.000000e+00 : f32
    %19 = vector.broadcast %cst_12 : f32 to vector<64x128xf32>
    %20 = arith.maximumf %18, %19 : vector<64x128xf32>
    %c0_13 = arith.constant 0 : index
    %c0_14 = arith.constant 0 : index
    %21 = vector.load %arg7[%c0_13, %c0_14] : memref<64x128xf32, #tpu.memory_space<vmem>>, vector<64x128xf32>
    tpu.vector_store %arg7[%c0_13, %c0_14], %20 {strides = array<i32>} : memref<64x128xf32, #tpu.memory_space<vmem>>, vector<64x128xf32>,
    return
  }
  func.func @transform_0(%arg0: i32) -> (i32, i32) {
    %c0_i32 = arith.constant 0 : i32
    %c0_i32_0 = arith.constant 0 : i32
    return %arg0, %c0_i32 : i32, i32
  }
  func.func @transform_1(%arg0: i32) -> (i32, i32) {
    %c0_i32 = arith.constant 0 : i32
    %c0_i32_0 = arith.constant 0 : i32
    %c0_i32_1 = arith.constant 0 : i32
    return %c0_i32, %c0_i32_0 : i32, i32
  }
  func.func @transform_2(%arg0: i32) -> (i32, i32) {
    %c0_i32 = arith.constant 0 : i32
    %c0_i32_0 = arith.constant 0 : i32
    %c0_i32_1 = arith.constant 0 : i32
    return %c0_i32, %c0_i32_0 : i32, i32
  }
  func.func @transform_3(%arg0: i32) -> (i32, i32) {
    %c0_i32 = arith.constant 0 : i32
    %c0_i32_0 = arith.constant 0 : i32
    %c0_i32_1 = arith.constant 0 : i32
    return %c0_i32, %c0_i32_0 : i32, i32
  }
  func.func @transform_4(%arg0: i32) -> (i32, i32) {
    %c0_i32 = arith.constant 0 : i32
    %c0_i32_0 = arith.constant 0 : i32
    %c0_i32_1 = arith.constant 0 : i32
    return %c0_i32, %c0_i32_0 : i32, i32
  }
  func.func @transform_5(%arg0: i32) -> (i32, i32) {
    %c0_i32 = arith.constant 0 : i32
    %c0_i32_0 = arith.constant 0 : i32
    %c0_i32_1 = arith.constant 0 : i32
    return %c0_i32, %c0_i32_0 : i32, i32
  }
  func.func @transform_6(%arg0: i32) -> (i32, i32) {
    %c0_i32 = arith.constant 0 : i32
    %c0_i32_0 = arith.constant 0 : i32
    return %arg0, %c0_i32 : i32, i32
  }
}

module attributes {stable_mosaic.version = 11 : i64} {
  func.func @_mm_kernel(%arg0: i32, %arg1: memref<64x512xbf16, #tpu.memory_space<vmem>>, %arg2: memref<512x128xbf16, #tpu.memory_space<vmem>>, %arg3: memref<1x512xf32, #tpu.memory_space<vmem>>, %arg4: memref<1x512xf32, #tpu.memory_space<vmem>>, %arg5: memref<1x128xf32, #tpu.memory_space<vmem>>, %arg6: memref<1x128xf32, #tpu.memory_space<vmem>>, %arg7: memref<64x128xf32, #tpu.memory_space<vmem>>) attributes {dimension_semantics = [#tpu.dimension_semantics<parallel>], iteration_bounds = array<i64: 2>, scalar_prefetch = 0 : i64, scratch_operands = 0 : i64, tpu.core_type = #tpu.core_type<tc>, window_params = [{transform_indices = @transform_0, window_bounds = array<i64: 64, 512>}, {pipeline_mode = #tpu.pipeline_mode<synchronous>, transform_indices = @transform_1, window_bounds = array<i64: 512, 128>}, {pipeline_mode = #tpu.pipeline_mode<synchronous>, transform_indices = @transform_2, window_bounds = array<i64: 1, 512>}, {pipeline_mode = #tpu.pipeline_mode<synchronous>, transform_indices = @transform_3, window_bounds = array<i64: 1, 512>}, {pipeline_mode = #tpu.pipeline_mode<synchronous>, transform_indices = @transform_4, window_bounds = array<i64: 1, 128>}, {pipeline_mode = #tpu.pipeline_mode<synchronous>, transform_indices = @transform_5, window_bounds = array<i64: 1, 128>}, {transform_indices = @transform_6, window_bounds = array<i64: 64, 128>}]} {
    %c0 = arith.constant 0 : index
    %c0_0 = arith.constant 0 : index
    %0 = vector.load %arg1[%c0, %c0_0] : memref<64x512xbf16, #tpu.memory_space<vmem>>, vector<64x512xbf16>
    %1 = arith.extf %0 : vector<64x512xbf16> to vector<64x512xf32>
    %c0_1 = arith.constant 0 : index
    %c0_2 = arith.constant 0 : index
    %2 = vector.load %arg3[%c0_1, %c0_2] : memref<1x512xf32, #tpu.memory_space<vmem>>, vector<1x512xf32>
    %3 = vector.broadcast %2 : vector<1x512xf32> to vector<64x512xf32>
    %4 = arith.mulf %1, %3 : vector<64x512xf32>
    %c0_3 = arith.constant 0 : index
    %c0_4 = arith.constant 0 : index
    %5 = vector.load %arg4[%c0_3, %c0_4] : memref<1x512xf32, #tpu.memory_space<vmem>>, vector<1x512xf32>
    %6 = vector.broadcast %5 : vector<1x512xf32> to vector<64x512xf32>
    %7 = arith.addf %4, %6 : vector<64x512xf32>
    %cst = arith.constant 0.000000e+00 : f32
    %8 = vector.broadcast %cst : f32 to vector<64x512xf32>
    %9 = arith.maximumf %7, %8 : vector<64x512xf32>
    %10 = arith.truncf %9 : vector<64x512xf32> to vector<64x512xbf16>
    %c0_5 = arith.constant 0 : index
    %c0_6 = arith.constant 0 : index
    %11 = vector.load %arg2[%c0_5, %c0_6] : memref<512x128xbf16, #tpu.memory_space<vmem>>, vector<512x128xbf16>
    %cst_7 = arith.constant dense<0.000000e+00> : vector<64x128xf32>
    %12 = tpu.matmul %10, %11, %cst_7 {dimension_numbers = #tpu.dot_dimension_numbers<[1], [0], [0], [1], [0, 0, 1, 1], [], []>} : vector<64x512xbf16>, vector<512x128xbf16>, vector<64x128xf32> -> vector<64x128xf32>
    %c0_8 = arith.constant 0 : index
    %c0_9 = arith.constant 0 : index
    %13 = vector.load %arg5[%c0_8, %c0_9] : memref<1x128xf32, #tpu.memory_space<vmem>>, vector<1x128xf32>
    %14 = vector.broadcast %13 : vector<1x128xf32> to vector<64x128xf32>
    %15 = arith.mulf %12, %14 : vector<64x128xf32>
    %c0_10 = arith.constant 0 : index
    %c0_11 = arith.constant 0 : index
    %16 = vector.load %arg6[%c0_10, %c0_11] : memref<1x128xf32, #tpu.memory_space<vmem>>, vector<1x128xf32>
    %17 = vector.broadcast %16 : vector<1x128xf32> to vector<64x128xf32>
    %18 = arith.addf %15, %17 : vector<64x128xf32>
    %cst_12 = arith.constant 0.000000e+00 : f32
    %19 = vector.broadcast %cst_12 : f32 to vector<64x128xf32>
    %20 = arith.maximumf %18, %19 : vector<64x128xf32>
    %c0_13 = arith.constant 0 : index
    %c0_14 = arith.constant 0 : index
    %21 = vector.load %arg7[%c0_13, %c0_14] : memref<64x128xf32, #tpu.memory_space<vmem>>, vector<64x128xf32>
    tpu.vector_store %arg7[%c0_13, %c0_14], %20 {strides = array<i32>} : memref<64x128xf32, #tpu.memory_space<vmem>>, vector<64x128xf32>,
    return
  }
  func.func @transform_0(%arg0: i32) -> (i32, i32) {
    %c0_i32 = arith.constant 0 : i32
    %c0_i32_0 = arith.constant 0 : i32
    return %arg0, %c0_i32 : i32, i32
  }
  func.func @transform_1(%arg0: i32) -> (i32, i32) {
    %c0_i32 = arith.constant 0 : i32
    %c0_i32_0 = arith.constant 0 : i32
    %c0_i32_1 = arith.constant 0 : i32
    return %c0_i32, %c0_i32_0 : i32, i32
  }
  func.func @transform_2(%arg0: i32) -> (i32, i32) {
    %c0_i32 = arith.constant 0 : i32
    %c0_i32_0 = arith.constant 0 : i32
    %c0_i32_1 = arith.constant 0 : i32
    return %c0_i32, %c0_i32_0 : i32, i32
  }
  func.func @transform_3(%arg0: i32) -> (i32, i32) {
    %c0_i32 = arith.constant 0 : i32
    %c0_i32_0 = arith.constant 0 : i32
    %c0_i32_1 = arith.constant 0 : i32
    return %c0_i32, %c0_i32_0 : i32, i32
  }
  func.func @transform_4(%arg0: i32) -> (i32, i32) {
    %c0_i32 = arith.constant 0 : i32
    %c0_i32_0 = arith.constant 0 : i32
    %c0_i32_1 = arith.constant 0 : i32
    return %c0_i32, %c0_i32_0 : i32, i32
  }
  func.func @transform_5(%arg0: i32) -> (i32, i32) {
    %c0_i32 = arith.constant 0 : i32
    %c0_i32_0 = arith.constant 0 : i32
    %c0_i32_1 = arith.constant 0 : i32
    return %c0_i32, %c0_i32_0 : i32, i32
  }
  func.func @transform_6(%arg0: i32) -> (i32, i32) {
    %c0_i32 = arith.constant 0 : i32
    %c0_i32_0 = arith.constant 0 : i32
    return %arg0, %c0_i32 : i32, i32
  }
}

module attributes {stable_mosaic.version = 11 : i64} {
  func.func @_mm_kernel(%arg0: i32, %arg1: memref<64x512xbf16, #tpu.memory_space<vmem>>, %arg2: memref<512x256xbf16, #tpu.memory_space<vmem>>, %arg3: memref<1x512xf32, #tpu.memory_space<vmem>>, %arg4: memref<1x512xf32, #tpu.memory_space<vmem>>, %arg5: memref<1x256xf32, #tpu.memory_space<vmem>>, %arg6: memref<1x256xf32, #tpu.memory_space<vmem>>, %arg7: memref<64x256xf32, #tpu.memory_space<vmem>>) attributes {dimension_semantics = [#tpu.dimension_semantics<parallel>], iteration_bounds = array<i64: 2>, scalar_prefetch = 0 : i64, scratch_operands = 0 : i64, tpu.core_type = #tpu.core_type<tc>, window_params = [{transform_indices = @transform_0, window_bounds = array<i64: 64, 512>}, {pipeline_mode = #tpu.pipeline_mode<synchronous>, transform_indices = @transform_1, window_bounds = array<i64: 512, 256>}, {pipeline_mode = #tpu.pipeline_mode<synchronous>, transform_indices = @transform_2, window_bounds = array<i64: 1, 512>}, {pipeline_mode = #tpu.pipeline_mode<synchronous>, transform_indices = @transform_3, window_bounds = array<i64: 1, 512>}, {pipeline_mode = #tpu.pipeline_mode<synchronous>, transform_indices = @transform_4, window_bounds = array<i64: 1, 256>}, {pipeline_mode = #tpu.pipeline_mode<synchronous>, transform_indices = @transform_5, window_bounds = array<i64: 1, 256>}, {transform_indices = @transform_6, window_bounds = array<i64: 64, 256>}]} {
    %c0 = arith.constant 0 : index
    %c0_0 = arith.constant 0 : index
    %0 = vector.load %arg1[%c0, %c0_0] : memref<64x512xbf16, #tpu.memory_space<vmem>>, vector<64x512xbf16>
    %1 = arith.extf %0 : vector<64x512xbf16> to vector<64x512xf32>
    %c0_1 = arith.constant 0 : index
    %c0_2 = arith.constant 0 : index
    %2 = vector.load %arg3[%c0_1, %c0_2] : memref<1x512xf32, #tpu.memory_space<vmem>>, vector<1x512xf32>
    %3 = vector.broadcast %2 : vector<1x512xf32> to vector<64x512xf32>
    %4 = arith.mulf %1, %3 : vector<64x512xf32>
    %c0_3 = arith.constant 0 : index
    %c0_4 = arith.constant 0 : index
    %5 = vector.load %arg4[%c0_3, %c0_4] : memref<1x512xf32, #tpu.memory_space<vmem>>, vector<1x512xf32>
    %6 = vector.broadcast %5 : vector<1x512xf32> to vector<64x512xf32>
    %7 = arith.addf %4, %6 : vector<64x512xf32>
    %cst = arith.constant 0.000000e+00 : f32
    %8 = vector.broadcast %cst : f32 to vector<64x512xf32>
    %9 = arith.maximumf %7, %8 : vector<64x512xf32>
    %10 = arith.truncf %9 : vector<64x512xf32> to vector<64x512xbf16>
    %c0_5 = arith.constant 0 : index
    %c0_6 = arith.constant 0 : index
    %11 = vector.load %arg2[%c0_5, %c0_6] : memref<512x256xbf16, #tpu.memory_space<vmem>>, vector<512x256xbf16>
    %cst_7 = arith.constant dense<0.000000e+00> : vector<64x256xf32>
    %12 = tpu.matmul %10, %11, %cst_7 {dimension_numbers = #tpu.dot_dimension_numbers<[1], [0], [0], [1], [0, 0, 1, 1], [], []>} : vector<64x512xbf16>, vector<512x256xbf16>, vector<64x256xf32> -> vector<64x256xf32>
    %c0_8 = arith.constant 0 : index
    %c0_9 = arith.constant 0 : index
    %13 = vector.load %arg5[%c0_8, %c0_9] : memref<1x256xf32, #tpu.memory_space<vmem>>, vector<1x256xf32>
    %14 = vector.broadcast %13 : vector<1x256xf32> to vector<64x256xf32>
    %15 = arith.mulf %12, %14 : vector<64x256xf32>
    %c0_10 = arith.constant 0 : index
    %c0_11 = arith.constant 0 : index
    %16 = vector.load %arg6[%c0_10, %c0_11] : memref<1x256xf32, #tpu.memory_space<vmem>>, vector<1x256xf32>
    %17 = vector.broadcast %16 : vector<1x256xf32> to vector<64x256xf32>
    %18 = arith.addf %15, %17 : vector<64x256xf32>
    %c0_12 = arith.constant 0 : index
    %c0_13 = arith.constant 0 : index
    %19 = vector.load %arg7[%c0_12, %c0_13] : memref<64x256xf32, #tpu.memory_space<vmem>>, vector<64x256xf32>
    tpu.vector_store %arg7[%c0_12, %c0_13], %18 {strides = array<i32>} : memref<64x256xf32, #tpu.memory_space<vmem>>, vector<64x256xf32>,
    return
  }
  func.func @transform_0(%arg0: i32) -> (i32, i32) {
    %c0_i32 = arith.constant 0 : i32
    %c0_i32_0 = arith.constant 0 : i32
    return %arg0, %c0_i32 : i32, i32
  }
  func.func @transform_1(%arg0: i32) -> (i32, i32) {
    %c0_i32 = arith.constant 0 : i32
    %c0_i32_0 = arith.constant 0 : i32
    %c0_i32_1 = arith.constant 0 : i32
    return %c0_i32, %c0_i32_0 : i32, i32
  }
  func.func @transform_2(%arg0: i32) -> (i32, i32) {
    %c0_i32 = arith.constant 0 : i32
    %c0_i32_0 = arith.constant 0 : i32
    %c0_i32_1 = arith.constant 0 : i32
    return %c0_i32, %c0_i32_0 : i32, i32
  }
  func.func @transform_3(%arg0: i32) -> (i32, i32) {
    %c0_i32 = arith.constant 0 : i32
    %c0_i32_0 = arith.constant 0 : i32
    %c0_i32_1 = arith.constant 0 : i32
    return %c0_i32, %c0_i32_0 : i32, i32
  }
  func.func @transform_4(%arg0: i32) -> (i32, i32) {
    %c0_i32 = arith.constant 0 : i32
    %c0_i32_0 = arith.constant 0 : i32
    %c0_i32_1 = arith.constant 0 : i32
    return %c0_i32, %c0_i32_0 : i32, i32
  }
  func.func @transform_5(%arg0: i32) -> (i32, i32) {
    %c0_i32 = arith.constant 0 : i32
    %c0_i32_0 = arith.constant 0 : i32
    %c0_i32_1 = arith.constant 0 : i32
    return %c0_i32, %c0_i32_0 : i32, i32
  }
  func.func @transform_6(%arg0: i32) -> (i32, i32) {
    %c0_i32 = arith.constant 0 : i32
    %c0_i32_0 = arith.constant 0 : i32
    return %arg0, %c0_i32 : i32, i32
  }
}

module attributes {stable_mosaic.version = 11 : i64} {
  func.func @_mm_kernel(%arg0: i32, %arg1: memref<32x256xbf16, #tpu.memory_space<vmem>>, %arg2: memref<256x128xbf16, #tpu.memory_space<vmem>>, %arg3: memref<1x256xf32, #tpu.memory_space<vmem>>, %arg4: memref<1x256xf32, #tpu.memory_space<vmem>>, %arg5: memref<1x128xf32, #tpu.memory_space<vmem>>, %arg6: memref<1x128xf32, #tpu.memory_space<vmem>>, %arg7: memref<32x128xf32, #tpu.memory_space<vmem>>) attributes {dimension_semantics = [#tpu.dimension_semantics<parallel>], iteration_bounds = array<i64: 1>, scalar_prefetch = 0 : i64, scratch_operands = 0 : i64, tpu.core_type = #tpu.core_type<tc>, window_params = [{transform_indices = @transform_0, window_bounds = array<i64: 32, 256>}, {pipeline_mode = #tpu.pipeline_mode<synchronous>, transform_indices = @transform_1, window_bounds = array<i64: 256, 128>}, {pipeline_mode = #tpu.pipeline_mode<synchronous>, transform_indices = @transform_2, window_bounds = array<i64: 1, 256>}, {pipeline_mode = #tpu.pipeline_mode<synchronous>, transform_indices = @transform_3, window_bounds = array<i64: 1, 256>}, {pipeline_mode = #tpu.pipeline_mode<synchronous>, transform_indices = @transform_4, window_bounds = array<i64: 1, 128>}, {pipeline_mode = #tpu.pipeline_mode<synchronous>, transform_indices = @transform_5, window_bounds = array<i64: 1, 128>}, {transform_indices = @transform_6, window_bounds = array<i64: 32, 128>}]} {
    %c0 = arith.constant 0 : index
    %c0_0 = arith.constant 0 : index
    %0 = vector.load %arg1[%c0, %c0_0] : memref<32x256xbf16, #tpu.memory_space<vmem>>, vector<32x256xbf16>
    %1 = arith.extf %0 : vector<32x256xbf16> to vector<32x256xf32>
    %c0_1 = arith.constant 0 : index
    %c0_2 = arith.constant 0 : index
    %2 = vector.load %arg3[%c0_1, %c0_2] : memref<1x256xf32, #tpu.memory_space<vmem>>, vector<1x256xf32>
    %3 = vector.broadcast %2 : vector<1x256xf32> to vector<32x256xf32>
    %4 = arith.mulf %1, %3 : vector<32x256xf32>
    %c0_3 = arith.constant 0 : index
    %c0_4 = arith.constant 0 : index
    %5 = vector.load %arg4[%c0_3, %c0_4] : memref<1x256xf32, #tpu.memory_space<vmem>>, vector<1x256xf32>
    %6 = vector.broadcast %5 : vector<1x256xf32> to vector<32x256xf32>
    %7 = arith.addf %4, %6 : vector<32x256xf32>
    %cst = arith.constant 0.000000e+00 : f32
    %8 = vector.broadcast %cst : f32 to vector<32x256xf32>
    %9 = arith.maximumf %7, %8 : vector<32x256xf32>
    %10 = arith.truncf %9 : vector<32x256xf32> to vector<32x256xbf16>
    %c0_5 = arith.constant 0 : index
    %c0_6 = arith.constant 0 : index
    %11 = vector.load %arg2[%c0_5, %c0_6] : memref<256x128xbf16, #tpu.memory_space<vmem>>, vector<256x128xbf16>
    %cst_7 = arith.constant dense<0.000000e+00> : vector<32x128xf32>
    %12 = tpu.matmul %10, %11, %cst_7 {dimension_numbers = #tpu.dot_dimension_numbers<[1], [0], [0], [1], [0, 0, 1, 1], [], []>} : vector<32x256xbf16>, vector<256x128xbf16>, vector<32x128xf32> -> vector<32x128xf32>
    %c0_8 = arith.constant 0 : index
    %c0_9 = arith.constant 0 : index
    %13 = vector.load %arg5[%c0_8, %c0_9] : memref<1x128xf32, #tpu.memory_space<vmem>>, vector<1x128xf32>
    %14 = vector.broadcast %13 : vector<1x128xf32> to vector<32x128xf32>
    %15 = arith.mulf %12, %14 : vector<32x128xf32>
    %c0_10 = arith.constant 0 : index
    %c0_11 = arith.constant 0 : index
    %16 = vector.load %arg6[%c0_10, %c0_11] : memref<1x128xf32, #tpu.memory_space<vmem>>, vector<1x128xf32>
    %17 = vector.broadcast %16 : vector<1x128xf32> to vector<32x128xf32>
    %18 = arith.addf %15, %17 : vector<32x128xf32>
    %cst_12 = arith.constant 0.000000e+00 : f32
    %19 = vector.broadcast %cst_12 : f32 to vector<32x128xf32>
    %20 = arith.maximumf %18, %19 : vector<32x128xf32>
    %c0_13 = arith.constant 0 : index
    %c0_14 = arith.constant 0 : index
    %21 = vector.load %arg7[%c0_13, %c0_14] : memref<32x128xf32, #tpu.memory_space<vmem>>, vector<32x128xf32>
    tpu.vector_store %arg7[%c0_13, %c0_14], %20 {strides = array<i32>} : memref<32x128xf32, #tpu.memory_space<vmem>>, vector<32x128xf32>,
    return
  }
  func.func @transform_0(%arg0: i32) -> (i32, i32) {
    %c0_i32 = arith.constant 0 : i32
    %c0_i32_0 = arith.constant 0 : i32
    return %arg0, %c0_i32 : i32, i32
  }
  func.func @transform_1(%arg0: i32) -> (i32, i32) {
    %c0_i32 = arith.constant 0 : i32
    %c0_i32_0 = arith.constant 0 : i32
    %c0_i32_1 = arith.constant 0 : i32
    return %c0_i32, %c0_i32_0 : i32, i32
  }
  func.func @transform_2(%arg0: i32) -> (i32, i32) {
    %c0_i32 = arith.constant 0 : i32
    %c0_i32_0 = arith.constant 0 : i32
    %c0_i32_1 = arith.constant 0 : i32
    return %c0_i32, %c0_i32_0 : i32, i32
  }
  func.func @transform_3(%arg0: i32) -> (i32, i32) {
    %c0_i32 = arith.constant 0 : i32
    %c0_i32_0 = arith.constant 0 : i32
    %c0_i32_1 = arith.constant 0 : i32
    return %c0_i32, %c0_i32_0 : i32, i32
  }
  func.func @transform_4(%arg0: i32) -> (i32, i32) {
    %c0_i32 = arith.constant 0 : i32
    %c0_i32_0 = arith.constant 0 : i32
    %c0_i32_1 = arith.constant 0 : i32
    return %c0_i32, %c0_i32_0 : i32, i32
  }
  func.func @transform_5(%arg0: i32) -> (i32, i32) {
    %c0_i32 = arith.constant 0 : i32
    %c0_i32_0 = arith.constant 0 : i32
    %c0_i32_1 = arith.constant 0 : i32
    return %c0_i32, %c0_i32_0 : i32, i32
  }
  func.func @transform_6(%arg0: i32) -> (i32, i32) {
    %c0_i32 = arith.constant 0 : i32
    %c0_i32_0 = arith.constant 0 : i32
    return %arg0, %c0_i32 : i32, i32
  }
}

module attributes {stable_mosaic.version = 11 : i64} {
  func.func @_mm_kernel(%arg0: i32, %arg1: memref<32x896xbf16, #tpu.memory_space<vmem>>, %arg2: memref<896x128xbf16, #tpu.memory_space<vmem>>, %arg3: memref<1x128xf32, #tpu.memory_space<vmem>>, %arg4: memref<1x128xf32, #tpu.memory_space<vmem>>, %arg5: memref<32x128xf32, #tpu.memory_space<vmem>>) attributes {dimension_semantics = [#tpu.dimension_semantics<parallel>], iteration_bounds = array<i64: 1>, scalar_prefetch = 0 : i64, scratch_operands = 0 : i64, tpu.core_type = #tpu.core_type<tc>, window_params = [{transform_indices = @transform_0, window_bounds = array<i64: 32, 896>}, {pipeline_mode = #tpu.pipeline_mode<synchronous>, transform_indices = @transform_1, window_bounds = array<i64: 896, 128>}, {pipeline_mode = #tpu.pipeline_mode<synchronous>, transform_indices = @transform_2, window_bounds = array<i64: 1, 128>}, {pipeline_mode = #tpu.pipeline_mode<synchronous>, transform_indices = @transform_3, window_bounds = array<i64: 1, 128>}, {transform_indices = @transform_4, window_bounds = array<i64: 32, 128>}]} {
    %c0 = arith.constant 0 : index
    %c0_0 = arith.constant 0 : index
    %0 = vector.load %arg1[%c0, %c0_0] : memref<32x896xbf16, #tpu.memory_space<vmem>>, vector<32x896xbf16>
    %c0_1 = arith.constant 0 : index
    %c0_2 = arith.constant 0 : index
    %1 = vector.load %arg2[%c0_1, %c0_2] : memref<896x128xbf16, #tpu.memory_space<vmem>>, vector<896x128xbf16>
    %cst = arith.constant dense<0.000000e+00> : vector<32x128xf32>
    %2 = tpu.matmul %0, %1, %cst {dimension_numbers = #tpu.dot_dimension_numbers<[1], [0], [0], [1], [0, 0, 1, 1], [], []>} : vector<32x896xbf16>, vector<896x128xbf16>, vector<32x128xf32> -> vector<32x128xf32>
    %c0_3 = arith.constant 0 : index
    %c0_4 = arith.constant 0 : index
    %3 = vector.load %arg3[%c0_3, %c0_4] : memref<1x128xf32, #tpu.memory_space<vmem>>, vector<1x128xf32>
    %4 = vector.broadcast %3 : vector<1x128xf32> to vector<32x128xf32>
    %5 = arith.mulf %2, %4 : vector<32x128xf32>
    %c0_5 = arith.constant 0 : index
    %c0_6 = arith.constant 0 : index
    %6 = vector.load %arg4[%c0_5, %c0_6] : memref<1x128xf32, #tpu.memory_space<vmem>>, vector<1x128xf32>
    %7 = vector.broadcast %6 : vector<1x128xf32> to vector<32x128xf32>
    %8 = arith.addf %5, %7 : vector<32x128xf32>
    %c0_7 = arith.constant 0 : index
    %c0_8 = arith.constant 0 : index
    %9 = vector.load %arg5[%c0_7, %c0_8] : memref<32x128xf32, #tpu.memory_space<vmem>>, vector<32x128xf32>
    tpu.vector_store %arg5[%c0_7, %c0_8], %8 {strides = array<i32>} : memref<32x128xf32, #tpu.memory_space<vmem>>, vector<32x128xf32>,
    return
  }
  func.func @transform_0(%arg0: i32) -> (i32, i32) {
    %c0_i32 = arith.constant 0 : i32
    %c0_i32_0 = arith.constant 0 : i32
    return %arg0, %c0_i32 : i32, i32
  }
  func.func @transform_1(%arg0: i32) -> (i32, i32) {
    %c0_i32 = arith.constant 0 : i32
    %c0_i32_0 = arith.constant 0 : i32
    %c0_i32_1 = arith.constant 0 : i32
    return %c0_i32, %c0_i32_0 : i32, i32
  }
  func.func @transform_2(%arg0: i32) -> (i32, i32) {
    %c0_i32 = arith.constant 0 : i32
    %c0_i32_0 = arith.constant 0 : i32
    %c0_i32_1 = arith.constant 0 : i32
    return %c0_i32, %c0_i32_0 : i32, i32
  }
  func.func @transform_3(%arg0: i32) -> (i32, i32) {
    %c0_i32 = arith.constant 0 : i32
    %c0_i32_0 = arith.constant 0 : i32
    %c0_i32_1 = arith.constant 0 : i32
    return %c0_i32, %c0_i32_0 : i32, i32
  }
  func.func @transform_4(%arg0: i32) -> (i32, i32) {
    %c0_i32 = arith.constant 0 : i32
    %c0_i32_0 = arith.constant 0 : i32
    return %arg0, %c0_i32 : i32, i32
  }
}

module attributes {stable_mosaic.version = 11 : i64} {
  func.func @_mm_kernel(%arg0: i32, %arg1: memref<32x384xbf16, #tpu.memory_space<vmem>>, %arg2: memref<384x128xbf16, #tpu.memory_space<vmem>>, %arg3: memref<1x384xf32, #tpu.memory_space<vmem>>, %arg4: memref<1x384xf32, #tpu.memory_space<vmem>>, %arg5: memref<1x128xf32, #tpu.memory_space<vmem>>, %arg6: memref<1x128xf32, #tpu.memory_space<vmem>>, %arg7: memref<32x128xf32, #tpu.memory_space<vmem>>) attributes {dimension_semantics = [#tpu.dimension_semantics<parallel>], iteration_bounds = array<i64: 1>, scalar_prefetch = 0 : i64, scratch_operands = 0 : i64, tpu.core_type = #tpu.core_type<tc>, window_params = [{transform_indices = @transform_0, window_bounds = array<i64: 32, 384>}, {pipeline_mode = #tpu.pipeline_mode<synchronous>, transform_indices = @transform_1, window_bounds = array<i64: 384, 128>}, {pipeline_mode = #tpu.pipeline_mode<synchronous>, transform_indices = @transform_2, window_bounds = array<i64: 1, 384>}, {pipeline_mode = #tpu.pipeline_mode<synchronous>, transform_indices = @transform_3, window_bounds = array<i64: 1, 384>}, {pipeline_mode = #tpu.pipeline_mode<synchronous>, transform_indices = @transform_4, window_bounds = array<i64: 1, 128>}, {pipeline_mode = #tpu.pipeline_mode<synchronous>, transform_indices = @transform_5, window_bounds = array<i64: 1, 128>}, {transform_indices = @transform_6, window_bounds = array<i64: 32, 128>}]} {
    %c0 = arith.constant 0 : index
    %c0_0 = arith.constant 0 : index
    %0 = vector.load %arg1[%c0, %c0_0] : memref<32x384xbf16, #tpu.memory_space<vmem>>, vector<32x384xbf16>
    %1 = arith.extf %0 : vector<32x384xbf16> to vector<32x384xf32>
    %c0_1 = arith.constant 0 : index
    %c0_2 = arith.constant 0 : index
    %2 = vector.load %arg3[%c0_1, %c0_2] : memref<1x384xf32, #tpu.memory_space<vmem>>, vector<1x384xf32>
    %3 = vector.broadcast %2 : vector<1x384xf32> to vector<32x384xf32>
    %4 = arith.mulf %1, %3 : vector<32x384xf32>
    %c0_3 = arith.constant 0 : index
    %c0_4 = arith.constant 0 : index
    %5 = vector.load %arg4[%c0_3, %c0_4] : memref<1x384xf32, #tpu.memory_space<vmem>>, vector<1x384xf32>
    %6 = vector.broadcast %5 : vector<1x384xf32> to vector<32x384xf32>
    %7 = arith.addf %4, %6 : vector<32x384xf32>
    %cst = arith.constant 0.000000e+00 : f32
    %8 = vector.broadcast %cst : f32 to vector<32x384xf32>
    %9 = arith.maximumf %7, %8 : vector<32x384xf32>
    %10 = arith.truncf %9 : vector<32x384xf32> to vector<32x384xbf16>
    %c0_5 = arith.constant 0 : index
    %c0_6 = arith.constant 0 : index
    %11 = vector.load %arg2[%c0_5, %c0_6] : memref<384x128xbf16, #tpu.memory_space<vmem>>, vector<384x128xbf16>
    %cst_7 = arith.constant dense<0.000000e+00> : vector<32x128xf32>
    %12 = tpu.matmul %10, %11, %cst_7 {dimension_numbers = #tpu.dot_dimension_numbers<[1], [0], [0], [1], [0, 0, 1, 1], [], []>} : vector<32x384xbf16>, vector<384x128xbf16>, vector<32x128xf32> -> vector<32x128xf32>
    %c0_8 = arith.constant 0 : index
    %c0_9 = arith.constant 0 : index
    %13 = vector.load %arg5[%c0_8, %c0_9] : memref<1x128xf32, #tpu.memory_space<vmem>>, vector<1x128xf32>
    %14 = vector.broadcast %13 : vector<1x128xf32> to vector<32x128xf32>
    %15 = arith.mulf %12, %14 : vector<32x128xf32>
    %c0_10 = arith.constant 0 : index
    %c0_11 = arith.constant 0 : index
    %16 = vector.load %arg6[%c0_10, %c0_11] : memref<1x128xf32, #tpu.memory_space<vmem>>, vector<1x128xf32>
    %17 = vector.broadcast %16 : vector<1x128xf32> to vector<32x128xf32>
    %18 = arith.addf %15, %17 : vector<32x128xf32>
    %cst_12 = arith.constant 0.000000e+00 : f32
    %19 = vector.broadcast %cst_12 : f32 to vector<32x128xf32>
    %20 = arith.maximumf %18, %19 : vector<32x128xf32>
    %c0_13 = arith.constant 0 : index
    %c0_14 = arith.constant 0 : index
    %21 = vector.load %arg7[%c0_13, %c0_14] : memref<32x128xf32, #tpu.memory_space<vmem>>, vector<32x128xf32>
    tpu.vector_store %arg7[%c0_13, %c0_14], %20 {strides = array<i32>} : memref<32x128xf32, #tpu.memory_space<vmem>>, vector<32x128xf32>,
    return
  }
  func.func @transform_0(%arg0: i32) -> (i32, i32) {
    %c0_i32 = arith.constant 0 : i32
    %c0_i32_0 = arith.constant 0 : i32
    return %arg0, %c0_i32 : i32, i32
  }
  func.func @transform_1(%arg0: i32) -> (i32, i32) {
    %c0_i32 = arith.constant 0 : i32
    %c0_i32_0 = arith.constant 0 : i32
    %c0_i32_1 = arith.constant 0 : i32
    return %c0_i32, %c0_i32_0 : i32, i32
  }
  func.func @transform_2(%arg0: i32) -> (i32, i32) {
    %c0_i32 = arith.constant 0 : i32
    %c0_i32_0 = arith.constant 0 : i32
    %c0_i32_1 = arith.constant 0 : i32
    return %c0_i32, %c0_i32_0 : i32, i32
  }
  func.func @transform_3(%arg0: i32) -> (i32, i32) {
    %c0_i32 = arith.constant 0 : i32
    %c0_i32_0 = arith.constant 0 : i32
    %c0_i32_1 = arith.constant 0 : i32
    return %c0_i32, %c0_i32_0 : i32, i32
  }
  func.func @transform_4(%arg0: i32) -> (i32, i32) {
    %c0_i32 = arith.constant 0 : i32
    %c0_i32_0 = arith.constant 0 : i32
    %c0_i32_1 = arith.constant 0 : i32
    return %c0_i32, %c0_i32_0 : i32, i32
  }
  func.func @transform_5(%arg0: i32) -> (i32, i32) {
    %c0_i32 = arith.constant 0 : i32
    %c0_i32_0 = arith.constant 0 : i32
    %c0_i32_1 = arith.constant 0 : i32
    return %c0_i32, %c0_i32_0 : i32, i32
  }
  func.func @transform_6(%arg0: i32) -> (i32, i32) {
    %c0_i32 = arith.constant 0 : i32
    %c0_i32_0 = arith.constant 0 : i32
    return %arg0, %c0_i32 : i32, i32
  }
}

module attributes {stable_mosaic.version = 11 : i64} {
  func.func @_mm_kernel(%arg0: i32, %arg1: memref<32x512xbf16, #tpu.memory_space<vmem>>, %arg2: memref<512x128xbf16, #tpu.memory_space<vmem>>, %arg3: memref<1x512xf32, #tpu.memory_space<vmem>>, %arg4: memref<1x512xf32, #tpu.memory_space<vmem>>, %arg5: memref<1x128xf32, #tpu.memory_space<vmem>>, %arg6: memref<1x128xf32, #tpu.memory_space<vmem>>, %arg7: memref<32x128xf32, #tpu.memory_space<vmem>>) attributes {dimension_semantics = [#tpu.dimension_semantics<parallel>], iteration_bounds = array<i64: 1>, scalar_prefetch = 0 : i64, scratch_operands = 0 : i64, tpu.core_type = #tpu.core_type<tc>, window_params = [{transform_indices = @transform_0, window_bounds = array<i64: 32, 512>}, {pipeline_mode = #tpu.pipeline_mode<synchronous>, transform_indices = @transform_1, window_bounds = array<i64: 512, 128>}, {pipeline_mode = #tpu.pipeline_mode<synchronous>, transform_indices = @transform_2, window_bounds = array<i64: 1, 512>}, {pipeline_mode = #tpu.pipeline_mode<synchronous>, transform_indices = @transform_3, window_bounds = array<i64: 1, 512>}, {pipeline_mode = #tpu.pipeline_mode<synchronous>, transform_indices = @transform_4, window_bounds = array<i64: 1, 128>}, {pipeline_mode = #tpu.pipeline_mode<synchronous>, transform_indices = @transform_5, window_bounds = array<i64: 1, 128>}, {transform_indices = @transform_6, window_bounds = array<i64: 32, 128>}]} {
    %c0 = arith.constant 0 : index
    %c0_0 = arith.constant 0 : index
    %0 = vector.load %arg1[%c0, %c0_0] : memref<32x512xbf16, #tpu.memory_space<vmem>>, vector<32x512xbf16>
    %1 = arith.extf %0 : vector<32x512xbf16> to vector<32x512xf32>
    %c0_1 = arith.constant 0 : index
    %c0_2 = arith.constant 0 : index
    %2 = vector.load %arg3[%c0_1, %c0_2] : memref<1x512xf32, #tpu.memory_space<vmem>>, vector<1x512xf32>
    %3 = vector.broadcast %2 : vector<1x512xf32> to vector<32x512xf32>
    %4 = arith.mulf %1, %3 : vector<32x512xf32>
    %c0_3 = arith.constant 0 : index
    %c0_4 = arith.constant 0 : index
    %5 = vector.load %arg4[%c0_3, %c0_4] : memref<1x512xf32, #tpu.memory_space<vmem>>, vector<1x512xf32>
    %6 = vector.broadcast %5 : vector<1x512xf32> to vector<32x512xf32>
    %7 = arith.addf %4, %6 : vector<32x512xf32>
    %cst = arith.constant 0.000000e+00 : f32
    %8 = vector.broadcast %cst : f32 to vector<32x512xf32>
    %9 = arith.maximumf %7, %8 : vector<32x512xf32>
    %10 = arith.truncf %9 : vector<32x512xf32> to vector<32x512xbf16>
    %c0_5 = arith.constant 0 : index
    %c0_6 = arith.constant 0 : index
    %11 = vector.load %arg2[%c0_5, %c0_6] : memref<512x128xbf16, #tpu.memory_space<vmem>>, vector<512x128xbf16>
    %cst_7 = arith.constant dense<0.000000e+00> : vector<32x128xf32>
    %12 = tpu.matmul %10, %11, %cst_7 {dimension_numbers = #tpu.dot_dimension_numbers<[1], [0], [0], [1], [0, 0, 1, 1], [], []>} : vector<32x512xbf16>, vector<512x128xbf16>, vector<32x128xf32> -> vector<32x128xf32>
    %c0_8 = arith.constant 0 : index
    %c0_9 = arith.constant 0 : index
    %13 = vector.load %arg5[%c0_8, %c0_9] : memref<1x128xf32, #tpu.memory_space<vmem>>, vector<1x128xf32>
    %14 = vector.broadcast %13 : vector<1x128xf32> to vector<32x128xf32>
    %15 = arith.mulf %12, %14 : vector<32x128xf32>
    %c0_10 = arith.constant 0 : index
    %c0_11 = arith.constant 0 : index
    %16 = vector.load %arg6[%c0_10, %c0_11] : memref<1x128xf32, #tpu.memory_space<vmem>>, vector<1x128xf32>
    %17 = vector.broadcast %16 : vector<1x128xf32> to vector<32x128xf32>
    %18 = arith.addf %15, %17 : vector<32x128xf32>
    %cst_12 = arith.constant 0.000000e+00 : f32
    %19 = vector.broadcast %cst_12 : f32 to vector<32x128xf32>
    %20 = arith.maximumf %18, %19 : vector<32x128xf32>
    %c0_13 = arith.constant 0 : index
    %c0_14 = arith.constant 0 : index
    %21 = vector.load %arg7[%c0_13, %c0_14] : memref<32x128xf32, #tpu.memory_space<vmem>>, vector<32x128xf32>
    tpu.vector_store %arg7[%c0_13, %c0_14], %20 {strides = array<i32>} : memref<32x128xf32, #tpu.memory_space<vmem>>, vector<32x128xf32>,
    return
  }
  func.func @transform_0(%arg0: i32) -> (i32, i32) {
    %c0_i32 = arith.constant 0 : i32
    %c0_i32_0 = arith.constant 0 : i32
    return %arg0, %c0_i32 : i32, i32
  }
  func.func @transform_1(%arg0: i32) -> (i32, i32) {
    %c0_i32 = arith.constant 0 : i32
    %c0_i32_0 = arith.constant 0 : i32
    %c0_i32_1 = arith.constant 0 : i32
    return %c0_i32, %c0_i32_0 : i32, i32
  }
  func.func @transform_2(%arg0: i32) -> (i32, i32) {
    %c0_i32 = arith.constant 0 : i32
    %c0_i32_0 = arith.constant 0 : i32
    %c0_i32_1 = arith.constant 0 : i32
    return %c0_i32, %c0_i32_0 : i32, i32
  }
  func.func @transform_3(%arg0: i32) -> (i32, i32) {
    %c0_i32 = arith.constant 0 : i32
    %c0_i32_0 = arith.constant 0 : i32
    %c0_i32_1 = arith.constant 0 : i32
    return %c0_i32, %c0_i32_0 : i32, i32
  }
  func.func @transform_4(%arg0: i32) -> (i32, i32) {
    %c0_i32 = arith.constant 0 : i32
    %c0_i32_0 = arith.constant 0 : i32
    %c0_i32_1 = arith.constant 0 : i32
    return %c0_i32, %c0_i32_0 : i32, i32
  }
  func.func @transform_5(%arg0: i32) -> (i32, i32) {
    %c0_i32 = arith.constant 0 : i32
    %c0_i32_0 = arith.constant 0 : i32
    %c0_i32_1 = arith.constant 0 : i32
    return %c0_i32, %c0_i32_0 : i32, i32
  }
  func.func @transform_6(%arg0: i32) -> (i32, i32) {
    %c0_i32 = arith.constant 0 : i32
    %c0_i32_0 = arith.constant 0 : i32
    return %arg0, %c0_i32 : i32, i32
  }
}

module attributes {stable_mosaic.version = 11 : i64} {
  func.func @_mm_kernel(%arg0: i32, %arg1: memref<32x640xbf16, #tpu.memory_space<vmem>>, %arg2: memref<640x128xbf16, #tpu.memory_space<vmem>>, %arg3: memref<1x640xf32, #tpu.memory_space<vmem>>, %arg4: memref<1x640xf32, #tpu.memory_space<vmem>>, %arg5: memref<1x128xf32, #tpu.memory_space<vmem>>, %arg6: memref<1x128xf32, #tpu.memory_space<vmem>>, %arg7: memref<32x128xf32, #tpu.memory_space<vmem>>) attributes {dimension_semantics = [#tpu.dimension_semantics<parallel>], iteration_bounds = array<i64: 1>, scalar_prefetch = 0 : i64, scratch_operands = 0 : i64, tpu.core_type = #tpu.core_type<tc>, window_params = [{transform_indices = @transform_0, window_bounds = array<i64: 32, 640>}, {pipeline_mode = #tpu.pipeline_mode<synchronous>, transform_indices = @transform_1, window_bounds = array<i64: 640, 128>}, {pipeline_mode = #tpu.pipeline_mode<synchronous>, transform_indices = @transform_2, window_bounds = array<i64: 1, 640>}, {pipeline_mode = #tpu.pipeline_mode<synchronous>, transform_indices = @transform_3, window_bounds = array<i64: 1, 640>}, {pipeline_mode = #tpu.pipeline_mode<synchronous>, transform_indices = @transform_4, window_bounds = array<i64: 1, 128>}, {pipeline_mode = #tpu.pipeline_mode<synchronous>, transform_indices = @transform_5, window_bounds = array<i64: 1, 128>}, {transform_indices = @transform_6, window_bounds = array<i64: 32, 128>}]} {
    %c0 = arith.constant 0 : index
    %c0_0 = arith.constant 0 : index
    %0 = vector.load %arg1[%c0, %c0_0] : memref<32x640xbf16, #tpu.memory_space<vmem>>, vector<32x640xbf16>
    %1 = arith.extf %0 : vector<32x640xbf16> to vector<32x640xf32>
    %c0_1 = arith.constant 0 : index
    %c0_2 = arith.constant 0 : index
    %2 = vector.load %arg3[%c0_1, %c0_2] : memref<1x640xf32, #tpu.memory_space<vmem>>, vector<1x640xf32>
    %3 = vector.broadcast %2 : vector<1x640xf32> to vector<32x640xf32>
    %4 = arith.mulf %1, %3 : vector<32x640xf32>
    %c0_3 = arith.constant 0 : index
    %c0_4 = arith.constant 0 : index
    %5 = vector.load %arg4[%c0_3, %c0_4] : memref<1x640xf32, #tpu.memory_space<vmem>>, vector<1x640xf32>
    %6 = vector.broadcast %5 : vector<1x640xf32> to vector<32x640xf32>
    %7 = arith.addf %4, %6 : vector<32x640xf32>
    %cst = arith.constant 0.000000e+00 : f32
    %8 = vector.broadcast %cst : f32 to vector<32x640xf32>
    %9 = arith.maximumf %7, %8 : vector<32x640xf32>
    %10 = arith.truncf %9 : vector<32x640xf32> to vector<32x640xbf16>
    %c0_5 = arith.constant 0 : index
    %c0_6 = arith.constant 0 : index
    %11 = vector.load %arg2[%c0_5, %c0_6] : memref<640x128xbf16, #tpu.memory_space<vmem>>, vector<640x128xbf16>
    %cst_7 = arith.constant dense<0.000000e+00> : vector<32x128xf32>
    %12 = tpu.matmul %10, %11, %cst_7 {dimension_numbers = #tpu.dot_dimension_numbers<[1], [0], [0], [1], [0, 0, 1, 1], [], []>} : vector<32x640xbf16>, vector<640x128xbf16>, vector<32x128xf32> -> vector<32x128xf32>
    %c0_8 = arith.constant 0 : index
    %c0_9 = arith.constant 0 : index
    %13 = vector.load %arg5[%c0_8, %c0_9] : memref<1x128xf32, #tpu.memory_space<vmem>>, vector<1x128xf32>
    %14 = vector.broadcast %13 : vector<1x128xf32> to vector<32x128xf32>
    %15 = arith.mulf %12, %14 : vector<32x128xf32>
    %c0_10 = arith.constant 0 : index
    %c0_11 = arith.constant 0 : index
    %16 = vector.load %arg6[%c0_10, %c0_11] : memref<1x128xf32, #tpu.memory_space<vmem>>, vector<1x128xf32>
    %17 = vector.broadcast %16 : vector<1x128xf32> to vector<32x128xf32>
    %18 = arith.addf %15, %17 : vector<32x128xf32>
    %cst_12 = arith.constant 0.000000e+00 : f32
    %19 = vector.broadcast %cst_12 : f32 to vector<32x128xf32>
    %20 = arith.maximumf %18, %19 : vector<32x128xf32>
    %c0_13 = arith.constant 0 : index
    %c0_14 = arith.constant 0 : index
    %21 = vector.load %arg7[%c0_13, %c0_14] : memref<32x128xf32, #tpu.memory_space<vmem>>, vector<32x128xf32>
    tpu.vector_store %arg7[%c0_13, %c0_14], %20 {strides = array<i32>} : memref<32x128xf32, #tpu.memory_space<vmem>>, vector<32x128xf32>,
    return
  }
  func.func @transform_0(%arg0: i32) -> (i32, i32) {
    %c0_i32 = arith.constant 0 : i32
    %c0_i32_0 = arith.constant 0 : i32
    return %arg0, %c0_i32 : i32, i32
  }
  func.func @transform_1(%arg0: i32) -> (i32, i32) {
    %c0_i32 = arith.constant 0 : i32
    %c0_i32_0 = arith.constant 0 : i32
    %c0_i32_1 = arith.constant 0 : i32
    return %c0_i32, %c0_i32_0 : i32, i32
  }
  func.func @transform_2(%arg0: i32) -> (i32, i32) {
    %c0_i32 = arith.constant 0 : i32
    %c0_i32_0 = arith.constant 0 : i32
    %c0_i32_1 = arith.constant 0 : i32
    return %c0_i32, %c0_i32_0 : i32, i32
  }
  func.func @transform_3(%arg0: i32) -> (i32, i32) {
    %c0_i32 = arith.constant 0 : i32
    %c0_i32_0 = arith.constant 0 : i32
    %c0_i32_1 = arith.constant 0 : i32
    return %c0_i32, %c0_i32_0 : i32, i32
  }
  func.func @transform_4(%arg0: i32) -> (i32, i32) {
    %c0_i32 = arith.constant 0 : i32
    %c0_i32_0 = arith.constant 0 : i32
    %c0_i32_1 = arith.constant 0 : i32
    return %c0_i32, %c0_i32_0 : i32, i32
  }
  func.func @transform_5(%arg0: i32) -> (i32, i32) {
    %c0_i32 = arith.constant 0 : i32
    %c0_i32_0 = arith.constant 0 : i32
    %c0_i32_1 = arith.constant 0 : i32
    return %c0_i32, %c0_i32_0 : i32, i32
  }
  func.func @transform_6(%arg0: i32) -> (i32, i32) {
    %c0_i32 = arith.constant 0 : i32
    %c0_i32_0 = arith.constant 0 : i32
    return %arg0, %c0_i32 : i32, i32
  }
}

module attributes {stable_mosaic.version = 11 : i64} {
  func.func @_mm_kernel(%arg0: i32, %arg1: memref<32x640xbf16, #tpu.memory_space<vmem>>, %arg2: memref<640x384xbf16, #tpu.memory_space<vmem>>, %arg3: memref<1x640xf32, #tpu.memory_space<vmem>>, %arg4: memref<1x640xf32, #tpu.memory_space<vmem>>, %arg5: memref<1x384xf32, #tpu.memory_space<vmem>>, %arg6: memref<1x384xf32, #tpu.memory_space<vmem>>, %arg7: memref<32x384xf32, #tpu.memory_space<vmem>>) attributes {dimension_semantics = [#tpu.dimension_semantics<parallel>], iteration_bounds = array<i64: 1>, scalar_prefetch = 0 : i64, scratch_operands = 0 : i64, tpu.core_type = #tpu.core_type<tc>, window_params = [{transform_indices = @transform_0, window_bounds = array<i64: 32, 640>}, {pipeline_mode = #tpu.pipeline_mode<synchronous>, transform_indices = @transform_1, window_bounds = array<i64: 640, 384>}, {pipeline_mode = #tpu.pipeline_mode<synchronous>, transform_indices = @transform_2, window_bounds = array<i64: 1, 640>}, {pipeline_mode = #tpu.pipeline_mode<synchronous>, transform_indices = @transform_3, window_bounds = array<i64: 1, 640>}, {pipeline_mode = #tpu.pipeline_mode<synchronous>, transform_indices = @transform_4, window_bounds = array<i64: 1, 384>}, {pipeline_mode = #tpu.pipeline_mode<synchronous>, transform_indices = @transform_5, window_bounds = array<i64: 1, 384>}, {transform_indices = @transform_6, window_bounds = array<i64: 32, 384>}]} {
    %c0 = arith.constant 0 : index
    %c0_0 = arith.constant 0 : index
    %0 = vector.load %arg1[%c0, %c0_0] : memref<32x640xbf16, #tpu.memory_space<vmem>>, vector<32x640xbf16>
    %1 = arith.extf %0 : vector<32x640xbf16> to vector<32x640xf32>
    %c0_1 = arith.constant 0 : index
    %c0_2 = arith.constant 0 : index
    %2 = vector.load %arg3[%c0_1, %c0_2] : memref<1x640xf32, #tpu.memory_space<vmem>>, vector<1x640xf32>
    %3 = vector.broadcast %2 : vector<1x640xf32> to vector<32x640xf32>
    %4 = arith.mulf %1, %3 : vector<32x640xf32>
    %c0_3 = arith.constant 0 : index
    %c0_4 = arith.constant 0 : index
    %5 = vector.load %arg4[%c0_3, %c0_4] : memref<1x640xf32, #tpu.memory_space<vmem>>, vector<1x640xf32>
    %6 = vector.broadcast %5 : vector<1x640xf32> to vector<32x640xf32>
    %7 = arith.addf %4, %6 : vector<32x640xf32>
    %cst = arith.constant 0.000000e+00 : f32
    %8 = vector.broadcast %cst : f32 to vector<32x640xf32>
    %9 = arith.maximumf %7, %8 : vector<32x640xf32>
    %10 = arith.truncf %9 : vector<32x640xf32> to vector<32x640xbf16>
    %c0_5 = arith.constant 0 : index
    %c0_6 = arith.constant 0 : index
    %11 = vector.load %arg2[%c0_5, %c0_6] : memref<640x384xbf16, #tpu.memory_space<vmem>>, vector<640x384xbf16>
    %cst_7 = arith.constant dense<0.000000e+00> : vector<32x384xf32>
    %12 = tpu.matmul %10, %11, %cst_7 {dimension_numbers = #tpu.dot_dimension_numbers<[1], [0], [0], [1], [0, 0, 1, 1], [], []>} : vector<32x640xbf16>, vector<640x384xbf16>, vector<32x384xf32> -> vector<32x384xf32>
    %c0_8 = arith.constant 0 : index
    %c0_9 = arith.constant 0 : index
    %13 = vector.load %arg5[%c0_8, %c0_9] : memref<1x384xf32, #tpu.memory_space<vmem>>, vector<1x384xf32>
    %14 = vector.broadcast %13 : vector<1x384xf32> to vector<32x384xf32>
    %15 = arith.mulf %12, %14 : vector<32x384xf32>
    %c0_10 = arith.constant 0 : index
    %c0_11 = arith.constant 0 : index
    %16 = vector.load %arg6[%c0_10, %c0_11] : memref<1x384xf32, #tpu.memory_space<vmem>>, vector<1x384xf32>
    %17 = vector.broadcast %16 : vector<1x384xf32> to vector<32x384xf32>
    %18 = arith.addf %15, %17 : vector<32x384xf32>
    %c0_12 = arith.constant 0 : index
    %c0_13 = arith.constant 0 : index
    %19 = vector.load %arg7[%c0_12, %c0_13] : memref<32x384xf32, #tpu.memory_space<vmem>>, vector<32x384xf32>
    tpu.vector_store %arg7[%c0_12, %c0_13], %18 {strides = array<i32>} : memref<32x384xf32, #tpu.memory_space<vmem>>, vector<32x384xf32>,
    return
  }
  func.func @transform_0(%arg0: i32) -> (i32, i32) {
    %c0_i32 = arith.constant 0 : i32
    %c0_i32_0 = arith.constant 0 : i32
    return %arg0, %c0_i32 : i32, i32
  }
  func.func @transform_1(%arg0: i32) -> (i32, i32) {
    %c0_i32 = arith.constant 0 : i32
    %c0_i32_0 = arith.constant 0 : i32
    %c0_i32_1 = arith.constant 0 : i32
    return %c0_i32, %c0_i32_0 : i32, i32
  }
  func.func @transform_2(%arg0: i32) -> (i32, i32) {
    %c0_i32 = arith.constant 0 : i32
    %c0_i32_0 = arith.constant 0 : i32
    %c0_i32_1 = arith.constant 0 : i32
    return %c0_i32, %c0_i32_0 : i32, i32
  }
  func.func @transform_3(%arg0: i32) -> (i32, i32) {
    %c0_i32 = arith.constant 0 : i32
    %c0_i32_0 = arith.constant 0 : i32
    %c0_i32_1 = arith.constant 0 : i32
    return %c0_i32, %c0_i32_0 : i32, i32
  }
  func.func @transform_4(%arg0: i32) -> (i32, i32) {
    %c0_i32 = arith.constant 0 : i32
    %c0_i32_0 = arith.constant 0 : i32
    %c0_i32_1 = arith.constant 0 : i32
    return %c0_i32, %c0_i32_0 : i32, i32
  }
  func.func @transform_5(%arg0: i32) -> (i32, i32) {
    %c0_i32 = arith.constant 0 : i32
    %c0_i32_0 = arith.constant 0 : i32
    %c0_i32_1 = arith.constant 0 : i32
    return %c0_i32, %c0_i32_0 : i32, i32
  }
  func.func @transform_6(%arg0: i32) -> (i32, i32) {
    %c0_i32 = arith.constant 0 : i32
    %c0_i32_0 = arith.constant 0 : i32
    return %arg0, %c0_i32 : i32, i32
  }
}

module attributes {stable_mosaic.version = 11 : i64} {
  func.func @_mm_kernel(%arg0: i32, %arg1: memref<32x384xbf16, #tpu.memory_space<vmem>>, %arg2: memref<384x128xbf16, #tpu.memory_space<vmem>>, %arg3: memref<1x128xf32, #tpu.memory_space<vmem>>, %arg4: memref<1x128xf32, #tpu.memory_space<vmem>>, %arg5: memref<32x128xf32, #tpu.memory_space<vmem>>) attributes {dimension_semantics = [#tpu.dimension_semantics<parallel>], iteration_bounds = array<i64: 1>, scalar_prefetch = 0 : i64, scratch_operands = 0 : i64, tpu.core_type = #tpu.core_type<tc>, window_params = [{transform_indices = @transform_0, window_bounds = array<i64: 32, 384>}, {pipeline_mode = #tpu.pipeline_mode<synchronous>, transform_indices = @transform_1, window_bounds = array<i64: 384, 128>}, {pipeline_mode = #tpu.pipeline_mode<synchronous>, transform_indices = @transform_2, window_bounds = array<i64: 1, 128>}, {pipeline_mode = #tpu.pipeline_mode<synchronous>, transform_indices = @transform_3, window_bounds = array<i64: 1, 128>}, {transform_indices = @transform_4, window_bounds = array<i64: 32, 128>}]} {
    %c0 = arith.constant 0 : index
    %c0_0 = arith.constant 0 : index
    %0 = vector.load %arg1[%c0, %c0_0] : memref<32x384xbf16, #tpu.memory_space<vmem>>, vector<32x384xbf16>
    %c0_1 = arith.constant 0 : index
    %c0_2 = arith.constant 0 : index
    %1 = vector.load %arg2[%c0_1, %c0_2] : memref<384x128xbf16, #tpu.memory_space<vmem>>, vector<384x128xbf16>
    %cst = arith.constant dense<0.000000e+00> : vector<32x128xf32>
    %2 = tpu.matmul %0, %1, %cst {dimension_numbers = #tpu.dot_dimension_numbers<[1], [0], [0], [1], [0, 0, 1, 1], [], []>} : vector<32x384xbf16>, vector<384x128xbf16>, vector<32x128xf32> -> vector<32x128xf32>
    %c0_3 = arith.constant 0 : index
    %c0_4 = arith.constant 0 : index
    %3 = vector.load %arg3[%c0_3, %c0_4] : memref<1x128xf32, #tpu.memory_space<vmem>>, vector<1x128xf32>
    %4 = vector.broadcast %3 : vector<1x128xf32> to vector<32x128xf32>
    %5 = arith.mulf %2, %4 : vector<32x128xf32>
    %c0_5 = arith.constant 0 : index
    %c0_6 = arith.constant 0 : index
    %6 = vector.load %arg4[%c0_5, %c0_6] : memref<1x128xf32, #tpu.memory_space<vmem>>, vector<1x128xf32>
    %7 = vector.broadcast %6 : vector<1x128xf32> to vector<32x128xf32>
    %8 = arith.addf %5, %7 : vector<32x128xf32>
    %cst_7 = arith.constant 0.000000e+00 : f32
    %9 = vector.broadcast %cst_7 : f32 to vector<32x128xf32>
    %10 = arith.maximumf %8, %9 : vector<32x128xf32>
    %c0_8 = arith.constant 0 : index
    %c0_9 = arith.constant 0 : index
    %11 = vector.load %arg5[%c0_8, %c0_9] : memref<32x128xf32, #tpu.memory_space<vmem>>, vector<32x128xf32>
    tpu.vector_store %arg5[%c0_8, %c0_9], %10 {strides = array<i32>} : memref<32x128xf32, #tpu.memory_space<vmem>>, vector<32x128xf32>,
    return
  }
  func.func @transform_0(%arg0: i32) -> (i32, i32) {
    %c0_i32 = arith.constant 0 : i32
    %c0_i32_0 = arith.constant 0 : i32
    return %arg0, %c0_i32 : i32, i32
  }
  func.func @transform_1(%arg0: i32) -> (i32, i32) {
    %c0_i32 = arith.constant 0 : i32
    %c0_i32_0 = arith.constant 0 : i32
    %c0_i32_1 = arith.constant 0 : i32
    return %c0_i32, %c0_i32_0 : i32, i32
  }
  func.func @transform_2(%arg0: i32) -> (i32, i32) {
    %c0_i32 = arith.constant 0 : i32
    %c0_i32_0 = arith.constant 0 : i32
    %c0_i32_1 = arith.constant 0 : i32
    return %c0_i32, %c0_i32_0 : i32, i32
  }
  func.func @transform_3(%arg0: i32) -> (i32, i32) {
    %c0_i32 = arith.constant 0 : i32
    %c0_i32_0 = arith.constant 0 : i32
    %c0_i32_1 = arith.constant 0 : i32
    return %c0_i32, %c0_i32_0 : i32, i32
  }
  func.func @transform_4(%arg0: i32) -> (i32, i32) {
    %c0_i32 = arith.constant 0 : i32
    %c0_i32_0 = arith.constant 0 : i32
    return %arg0, %c0_i32 : i32, i32
  }
}

module attributes {stable_mosaic.version = 11 : i64} {
  func.func @_mm_kernel(%arg0: i32, %arg1: memref<16x256xbf16, #tpu.memory_space<vmem>>, %arg2: memref<256x128xbf16, #tpu.memory_space<vmem>>, %arg3: memref<1x128xf32, #tpu.memory_space<vmem>>, %arg4: memref<1x128xf32, #tpu.memory_space<vmem>>, %arg5: memref<16x128xf32, #tpu.memory_space<vmem>>) attributes {dimension_semantics = [#tpu.dimension_semantics<parallel>], iteration_bounds = array<i64: 1>, scalar_prefetch = 0 : i64, scratch_operands = 0 : i64, tpu.core_type = #tpu.core_type<tc>, window_params = [{transform_indices = @transform_0, window_bounds = array<i64: 16, 256>}, {pipeline_mode = #tpu.pipeline_mode<synchronous>, transform_indices = @transform_1, window_bounds = array<i64: 256, 128>}, {pipeline_mode = #tpu.pipeline_mode<synchronous>, transform_indices = @transform_2, window_bounds = array<i64: 1, 128>}, {pipeline_mode = #tpu.pipeline_mode<synchronous>, transform_indices = @transform_3, window_bounds = array<i64: 1, 128>}, {transform_indices = @transform_4, window_bounds = array<i64: 16, 128>}]} {
    %c0 = arith.constant 0 : index
    %c0_0 = arith.constant 0 : index
    %0 = vector.load %arg1[%c0, %c0_0] : memref<16x256xbf16, #tpu.memory_space<vmem>>, vector<16x256xbf16>
    %c0_1 = arith.constant 0 : index
    %c0_2 = arith.constant 0 : index
    %1 = vector.load %arg2[%c0_1, %c0_2] : memref<256x128xbf16, #tpu.memory_space<vmem>>, vector<256x128xbf16>
    %cst = arith.constant dense<0.000000e+00> : vector<16x128xf32>
    %2 = tpu.matmul %0, %1, %cst {dimension_numbers = #tpu.dot_dimension_numbers<[1], [0], [0], [1], [0, 0, 1, 1], [], []>} : vector<16x256xbf16>, vector<256x128xbf16>, vector<16x128xf32> -> vector<16x128xf32>
    %c0_3 = arith.constant 0 : index
    %c0_4 = arith.constant 0 : index
    %3 = vector.load %arg3[%c0_3, %c0_4] : memref<1x128xf32, #tpu.memory_space<vmem>>, vector<1x128xf32>
    %4 = vector.broadcast %3 : vector<1x128xf32> to vector<16x128xf32>
    %5 = arith.mulf %2, %4 : vector<16x128xf32>
    %c0_5 = arith.constant 0 : index
    %c0_6 = arith.constant 0 : index
    %6 = vector.load %arg4[%c0_5, %c0_6] : memref<1x128xf32, #tpu.memory_space<vmem>>, vector<1x128xf32>
    %7 = vector.broadcast %6 : vector<1x128xf32> to vector<16x128xf32>
    %8 = arith.addf %5, %7 : vector<16x128xf32>
    %c0_7 = arith.constant 0 : index
    %c0_8 = arith.constant 0 : index
    %9 = vector.load %arg5[%c0_7, %c0_8] : memref<16x128xf32, #tpu.memory_space<vmem>>, vector<16x128xf32>
    tpu.vector_store %arg5[%c0_7, %c0_8], %8 {strides = array<i32>} : memref<16x128xf32, #tpu.memory_space<vmem>>, vector<16x128xf32>,
    return
  }
  func.func @transform_0(%arg0: i32) -> (i32, i32) {
    %c0_i32 = arith.constant 0 : i32
    %c0_i32_0 = arith.constant 0 : i32
    return %arg0, %c0_i32 : i32, i32
  }
  func.func @transform_1(%arg0: i32) -> (i32, i32) {
    %c0_i32 = arith.constant 0 : i32
    %c0_i32_0 = arith.constant 0 : i32
    %c0_i32_1 = arith.constant 0 : i32
    return %c0_i32, %c0_i32_0 : i32, i32
  }
  func.func @transform_2(%arg0: i32) -> (i32, i32) {
    %c0_i32 = arith.constant 0 : i32
    %c0_i32_0 = arith.constant 0 : i32
    %c0_i32_1 = arith.constant 0 : i32
    return %c0_i32, %c0_i32_0 : i32, i32
  }
  func.func @transform_3(%arg0: i32) -> (i32, i32) {
    %c0_i32 = arith.constant 0 : i32
    %c0_i32_0 = arith.constant 0 : i32
    %c0_i32_1 = arith.constant 0 : i32
    return %c0_i32, %c0_i32_0 : i32, i32
  }
  func.func @transform_4(%arg0: i32) -> (i32, i32) {
    %c0_i32 = arith.constant 0 : i32
    %c0_i32_0 = arith.constant 0 : i32
    return %arg0, %c0_i32 : i32, i32
  }
}

</mosaic_0001>

<bundles_post_ra>
// kernel: rot_prediction_forward.69
= control target key start
LH: loop header
LB: loop body
LE: loop exit
PB: predicated region body
PF: predicated region fallthrough
CT: control target
= control target key end

     0   :  { %s872_s15 = smov 0   ;;  %s1043_s0 = inlined_call_operand.vmem [shape: bf16[512,128], index: 0, kind: input, shape index: {}]   ;;  %s1044_s1 = inlined_call_operand.vmem [shape: bf16[128,128], index: 1, kind: input, shape index: {}]   ;;  %s1045_s2 = inlined_call_operand.vmem [shape: f32[1,128], index: 2, kind: input, shape index: {}]   ;;  %s1046_s3 = inlined_call_operand.vmem [shape: f32[1,128], index: 3, kind: input, shape index: {}]   ;;  %s1047_s4 = inlined_call_operand.vmem [shape: f32[512,128], index: 4, kind: output, shape index: {}]  }
   0x1 LB: > { %s674_s16 = sadd.s32 4294967295, %s845_s15   ;;  %p678_p0 = scmp.ge.s32.totalorder %s845_s15, 1  ;;  %s845_s15 = sphi %s872_s15, %s14_s15  }
   0x2   : > { %p163_p1 = scmp.lt.s32.totalorder %s845_s15, 3 }
   0x4   : > { %p164_p2 = pnand %p678_p0, %p163_p1 }
   0x5   : > { %s679_s25 = sshll.u32 (!%p164_p2), %s674_s16, 5 }
   0x6   : > { %167 = sbr.rel (%p164_p2) target bundleno = 240 (0xf0), region = 36  ;;  %p190_p3 = scmp.lt.s32.totalorder (!%p164_p2), %s679_s25, 63 }
   0xb   : > { %v804_v0 = vld [vmem:[%s1044_s1 + $0x38] sm:$0xff]  ;;  %v803_v1 = vld [vmem:[%s1044_s1 + $0x30] sm:$0xff]  ;;  %v802_v2 = vld [vmem:[%s1044_s1 + $0x28] sm:$0xff]  ;;  %s1049_s25 = smov (!%p190_p3, %s679_s25), 63 }
   0xc   : > { %393 = vmatpush.bf16.msra.mxu0 %v804_v0  ;;  %805 = vmatpush.bf16.msra.mxu1 %v804_v0  ;;  %v801_v3 = vld [vmem:[%s1044_s1 + $0x20] sm:$0xff]  ;;  %v800_v4 = vld [vmem:[%s1044_s1 + $0x18] sm:$0xff]  ;;  %v799_v5 = vld [vmem:[%s1044_s1 + $0x10] sm:$0xff]  ;;  %s680_s6 = sshll.u32 %s1049_s25, 2  ;;  %s682_s17 = sshll.u32 %s1049_s25, 3 }
   0xd   : > { %806 = vmatpush.bf16.msra.mxu2 %v804_v0  ;;  %807 = vmatpush.bf16.msra.mxu3 %v804_v0  ;;  %v798_v6 = vld [vmem:[%s1044_s1 + $0x8] sm:$0xff]  ;;  %v797_v7 = vld [vmem:[%s1044_s1] sm:$0xff]  ;;  %s910_s11 = scalar_lea.vmem %s1043_s0, %s680_s6  ;;  %s946_s20 = scalar_lea.vmem %s1047_s4, %s682_s17 }
   0xe   : > { %v781_v8 = vld [vmem:[%s910_s11] sm:$0xff]  ;;  %v782_v12 = vld [vmem:[%s910_s11 + $0x8] sm:$0xff]  ;;  %v783_v16 = vld [vmem:[%s910_s11 + $0x10] sm:$0xff] }
   0xf   : > { %v785_v9 = vld [vmem:[%s910_s11 + $0x20] sm:$0xff]  ;;  %v786_v13 = vld [vmem:[%s910_s11 + $0x28] sm:$0xff]  ;;  %v787_v17 = vld [vmem:[%s910_s11 + $0x30] sm:$0xff] }
  0x10   : > { %394 = vmatpush.bf16.msra.mxu0 %v803_v1  ;;  %808 = vmatpush.bf16.msra.mxu1 %v803_v1  ;;  %v789_v10 = vld [vmem:[%s910_s11 + $0x40] sm:$0xff]  ;;  %v790_v14 = vld [vmem:[%s910_s11 + $0x48] sm:$0xff]  ;;  %v791_v18 = vld [vmem:[%s910_s11 + $0x50] sm:$0xff] }
  0x11   : > { %809 = vmatpush.bf16.msra.mxu2 %v803_v1  ;;  %810 = vmatpush.bf16.msra.mxu3 %v803_v1  ;;  %v793_v11 = vld [vmem:[%s910_s11 + $0x60] sm:$0xff]  ;;  %v794_v15 = vld [vmem:[%s910_s11 + $0x68] sm:$0xff]  ;;  %v795_v19 = vld [vmem:[%s910_s11 + $0x70] sm:$0xff] }
  0x12   : > { %v784_v20 = vld [vmem:[%s910_s11 + $0x18] sm:$0xff]  ;;  %v931_v24 = vld [vmem:[%s1045_s2] ss:$0 sm:$0xff] }
  0x13   : > { %v788_v21 = vld [vmem:[%s910_s11 + $0x38] sm:$0xff]  ;;  %v936_v25 = vld [vmem:[%s1046_s3] ss:$0 sm:$0xff] }
  0x14   : > { %395 = vmatpush.bf16.msra.mxu0 %v802_v2  ;;  %811 = vmatpush.bf16.msra.mxu1 %v802_v2  ;;  %v792_v22 = vld [vmem:[%s910_s11 + $0x58] sm:$0xff] }
  0x15   : > { %812 = vmatpush.bf16.msra.mxu2 %v802_v2  ;;  %813 = vmatpush.bf16.msra.mxu3 %v802_v2  ;;  %v796_v23 = vld [vmem:[%s910_s11 + $0x78] sm:$0xff] }
  0x18   : > { %396 = vmatpush.bf16.msra.mxu0 %v801_v3  ;;  %814 = vmatpush.bf16.msra.mxu1 %v801_v3 }
  0x19   : > { %815 = vmatpush.bf16.msra.mxu2 %v801_v3  ;;  %816 = vmatpush.bf16.msra.mxu3 %v801_v3 }
  0x1c   : > { %397 = vmatpush.bf16.msra.mxu0 %v800_v4  ;;  %817 = vmatpush.bf16.msra.mxu1 %v800_v4 }
  0x1d   : > { %818 = vmatpush.bf16.msra.mxu2 %v800_v4  ;;  %819 = vmatpush.bf16.msra.mxu3 %v800_v4 }
  0x20   : > { %398 = vmatpush.bf16.msra.mxu0 %v799_v5  ;;  %820 = vmatpush.bf16.msra.mxu1 %v799_v5 }
  0x21   : > { %821 = vmatpush.bf16.msra.mxu2 %v799_v5  ;;  %822 = vmatpush.bf16.msra.mxu3 %v799_v5 }
  0x24   : > { %399 = vmatpush.bf16.msra.mxu0 %v798_v6  ;;  %823 = vmatpush.bf16.msra.mxu1 %v798_v6 }
  0x25   : > { %824 = vmatpush.bf16.msra.mxu2 %v798_v6  ;;  %825 = vmatpush.bf16.msra.mxu3 %v798_v6 }
  0x28   : > { %400 = vmatpush.bf16.msra.mxu0 %v797_v7  ;;  %826 = vmatpush.bf16.msra.mxu1 %v797_v7 }
  0x29   : > { %827 = vmatpush.bf16.msra.mxu2 %v797_v7  ;;  %828 = vmatpush.bf16.msra.mxu3 %v797_v7 }
  0x2b   : > { %401 = vmatmul.bf16.vlgmr.msra.gmra.mxu0 %v781_v8  ;;  %421 = vmatmul.bf16.vlgmr.msra.gmra.mxu1 %v785_v9 }
  0x2c   : > { %441 = vmatmul.bf16.vlgmr.msra.gmra.mxu2 %v789_v10  ;;  %461 = vmatmul.bf16.vlgmr.msra.gmra.mxu3 %v793_v11 }
  0x3b   : > { %406 = vmatmul.bf16.gmra.mxu0 %v782_v12  ;;  %426 = vmatmul.bf16.gmra.mxu1 %v786_v13 }
  0x3c   : > { %446 = vmatmul.bf16.gmra.mxu2 %v790_v14  ;;  %466 = vmatmul.bf16.gmra.mxu3 %v794_v15 }
  0x4b   : > { %411 = vmatmul.bf16.gmra.mxu0 %v783_v16  ;;  %431 = vmatmul.bf16.gmra.mxu1 %v787_v17 }
  0x4c   : > { %451 = vmatmul.bf16.gmra.mxu2 %v791_v18  ;;  %471 = vmatmul.bf16.gmra.mxu3 %v795_v19 }
  0x5b   : > { %416 = vmatmul.bf16.gmra.mxu0 %v784_v20  ;;  %436 = vmatmul.bf16.gmra.mxu1 %v788_v21 }
  0x5c   : > { %456 = vmatmul.bf16.gmra.mxu2 %v792_v22  ;;  %476 = vmatmul.bf16.gmra.mxu3 %v796_v23 }
  0xa8   : > { %v402_v26 = vpop.f32.mrf.mxu0  ;;  %v422_v27 = vpop.f32.mrf.mxu1 }
  0xa9   : > { %v486_v28 = vmul.f32 %v931_v24, %v402_v26  ;;  %v494_v29 = vmul.f32 %v931_v24, %v422_v27 }
  0xab   : > { %v522_v30 = vadd.f32 %v936_v25, %v486_v28  ;;  %v530_v31 = vadd.f32 %v936_v25, %v494_v29 }
  0xad   : > { %v554_v32 = vmax.f32 %v522_v30, 0.0  ;;  %v562_v33 = vmax.f32 %v530_v31, 0.0 }
  0xaf   : > { %586 = vst [vmem:[%s946_s20] sm:$0xff] %v554_v32  ;;  %v442_v34 = vpop.f32.mrf.mxu2  ;;  %v462_v35 = vpop.f32.mrf.mxu3 }
  0xb0   : > { %594 = vst [vmem:[%s946_s20 + $0x40] sm:$0xff] %v562_v33  ;;  %v502_v36 = vmul.f32 %v931_v24, %v442_v34  ;;  %v510_v37 = vmul.f32 %v931_v24, %v462_v35  ;;  %v404_v38 = vpop.f32.mrf.mxu0  ;;  %v424_v39 = vpop.f32.mrf.mxu1 }
  0xb1   : > { %v487_v40 = vmul.f32 %v931_v24, %v404_v38  ;;  %v495_v41 = vmul.f32 %v931_v24, %v424_v39 }
  0xb2   : > { %v538_v42 = vadd.f32 %v936_v25, %v502_v36  ;;  %v546_v43 = vadd.f32 %v936_v25, %v510_v37 }
  0xb3   : > { %v523_v44 = vadd.f32 %v936_v25, %v487_v40  ;;  %v531_v45 = vadd.f32 %v936_v25, %v495_v41 }
  0xb4   : > { %v570_v46 = vmax.f32 %v538_v42, 0.0  ;;  %v578_v47 = vmax.f32 %v546_v43, 0.0 }
  0xb5   : > { %v555_v48 = vmax.f32 %v523_v44, 0.0  ;;  %v563_v49 = vmax.f32 %v531_v45, 0.0 }
  0xb6   : > { %602 = vst [vmem:[%s946_s20 + $0x80] sm:$0xff] %v570_v46 }
  0xb7   : > { %610 = vst [vmem:[%s946_s20 + $0xc0] sm:$0xff] %v578_v47  ;;  %v444_v50 = vpop.f32.mrf.mxu2  ;;  %v464_v51 = vpop.f32.mrf.mxu3 }
  0xb8   : > { %587 = vst [vmem:[%s946_s20 + $0x8] sm:$0xff] %v555_v48  ;;  %v503_v52 = vmul.f32 %v931_v24, %v444_v50  ;;  %v511_v53 = vmul.f32 %v931_v24, %v464_v51  ;;  %v407_v54 = vpop.f32.mrf.mxu0  ;;  %v427_v55 = vpop.f32.mrf.mxu1 }
  0xb9   : > { %595 = vst [vmem:[%s946_s20 + $0x48] sm:$0xff] %v563_v49  ;;  %v488_v56 = vmul.f32 %v931_v24, %v407_v54  ;;  %v496_v57 = vmul.f32 %v931_v24, %v427_v55 }
  0xba   : > { %v539_v58 = vadd.f32 %v936_v25, %v503_v52  ;;  %v547_v59 = vadd.f32 %v936_v25, %v511_v53 }
  0xbb   : > { %v524_v60 = vadd.f32 %v936_v25, %v488_v56  ;;  %v532_v61 = vadd.f32 %v936_v25, %v496_v57 }
  0xbc   : > { %v571_v62 = vmax.f32 %v539_v58, 0.0  ;;  %v579_v63 = vmax.f32 %v547_v59, 0.0 }
  0xbd   : > { %v556_v0 = vmax.f32 %v524_v60, 0.0  ;;  %v564_v1 = vmax.f32 %v532_v61, 0.0 }
  0xbe   : > { %603 = vst [vmem:[%s946_s20 + $0x88] sm:$0xff] %v571_v62 }
  0xbf   : > { %611 = vst [vmem:[%s946_s20 + $0xc8] sm:$0xff] %v579_v63  ;;  %v447_v2 = vpop.f32.mrf.mxu2  ;;  %v467_v3 = vpop.f32.mrf.mxu3 }
  0xc0   : > { %588 = vst [vmem:[%s946_s20 + $0x10] sm:$0xff] %v556_v0  ;;  %v504_v4 = vmul.f32 %v931_v24, %v447_v2  ;;  %v512_v5 = vmul.f32 %v931_v24, %v467_v3  ;;  %v409_v6 = vpop.f32.mrf.mxu0  ;;  %v429_v7 = vpop.f32.mrf.mxu1 }
  0xc1   : > { %596 = vst [vmem:[%s946_s20 + $0x50] sm:$0xff] %v564_v1  ;;  %v489_v8 = vmul.f32 %v931_v24, %v409_v6  ;;  %v497_v9 = vmul.f32 %v931_v24, %v429_v7 }
  0xc2   : > { %v540_v10 = vadd.f32 %v936_v25, %v504_v4  ;;  %v548_v11 = vadd.f32 %v936_v25, %v512_v5 }
  0xc3   : > { %v525_v12 = vadd.f32 %v936_v25, %v489_v8  ;;  %v533_v13 = vadd.f32 %v936_v25, %v497_v9 }
  0xc4   : > { %v572_v14 = vmax.f32 %v540_v10, 0.0  ;;  %v580_v15 = vmax.f32 %v548_v11, 0.0 }
  0xc5   : > { %v557_v16 = vmax.f32 %v525_v12, 0.0  ;;  %v565_v17 = vmax.f32 %v533_v13, 0.0 }
  0xc6   : > { %604 = vst [vmem:[%s946_s20 + $0x90] sm:$0xff] %v572_v14 }
  0xc7   : > { %612 = vst [vmem:[%s946_s20 + $0xd0] sm:$0xff] %v580_v15  ;;  %v449_v18 = vpop.f32.mrf.mxu2  ;;  %v469_v19 = vpop.f32.mrf.mxu3 }
  0xc8   : > { %589 = vst [vmem:[%s946_s20 + $0x18] sm:$0xff] %v557_v16  ;;  %v505_v20 = vmul.f32 %v931_v24, %v449_v18  ;;  %v513_v21 = vmul.f32 %v931_v24, %v469_v19  ;;  %v412_v22 = vpop.f32.mrf.mxu0  ;;  %v432_v23 = vpop.f32.mrf.mxu1 }
  0xc9   : > { %597 = vst [vmem:[%s946_s20 + $0x58] sm:$0xff] %v565_v17  ;;  %v490_v26 = vmul.f32 %v931_v24, %v412_v22  ;;  %v498_v27 = vmul.f32 %v931_v24, %v432_v23 }
  0xca   : > { %v541_v28 = vadd.f32 %v936_v25, %v505_v20  ;;  %v549_v29 = vadd.f32 %v936_v25, %v513_v21 }
  0xcb   : > { %v526_v30 = vadd.f32 %v936_v25, %v490_v26  ;;  %v534_v31 = vadd.f32 %v936_v25, %v498_v27 }
  0xcc   : > { %v573_v32 = vmax.f32 %v541_v28, 0.0  ;;  %v581_v33 = vmax.f32 %v549_v29, 0.0 }
  0xcd   : > { %v558_v34 = vmax.f32 %v526_v30, 0.0  ;;  %v566_v35 = vmax.f32 %v534_v31, 0.0 }
  0xce   : > { %605 = vst [vmem:[%s946_s20 + $0x98] sm:$0xff] %v573_v32 }
  0xcf   : > { %613 = vst [vmem:[%s946_s20 + $0xd8] sm:$0xff] %v581_v33  ;;  %v452_v36 = vpop.f32.mrf.mxu2  ;;  %v472_v37 = vpop.f32.mrf.mxu3 }
  0xd0   : > { %590 = vst [vmem:[%s946_s20 + $0x20] sm:$0xff] %v558_v34  ;;  %v506_v38 = vmul.f32 %v931_v24, %v452_v36  ;;  %v514_v39 = vmul.f32 %v931_v24, %v472_v37  ;;  %v414_v40 = vpop.f32.mrf.mxu0  ;;  %v434_v41 = vpop.f32.mrf.mxu1 }
  0xd1   : > { %598 = vst [vmem:[%s946_s20 + $0x60] sm:$0xff] %v566_v35  ;;  %v491_v42 = vmul.f32 %v931_v24, %v414_v40  ;;  %v499_v43 = vmul.f32 %v931_v24, %v434_v41 }
  0xd2   : > { %v542_v44 = vadd.f32 %v936_v25, %v506_v38  ;;  %v550_v45 = vadd.f32 %v936_v25, %v514_v39 }
  0xd3   : > { %v527_v46 = vadd.f32 %v936_v25, %v491_v42  ;;  %v535_v47 = vadd.f32 %v936_v25, %v499_v43 }
  0xd4   : > { %v574_v48 = vmax.f32 %v542_v44, 0.0  ;;  %v582_v49 = vmax.f32 %v550_v45, 0.0 }
  0xd5   : > { %v559_v50 = vmax.f32 %v527_v46, 0.0  ;;  %v567_v51 = vmax.f32 %v535_v47, 0.0 }
  0xd6   : > { %606 = vst [vmem:[%s946_s20 + $0xa0] sm:$0xff] %v574_v48 }
  0xd7   : > { %614 = vst [vmem:[%s946_s20 + $0xe0] sm:$0xff] %v582_v49  ;;  %v454_v52 = vpop.f32.mrf.mxu2  ;;  %v474_v53 = vpop.f32.mrf.mxu3 }
  0xd8   : > { %591 = vst [vmem:[%s946_s20 + $0x28] sm:$0xff] %v559_v50  ;;  %v507_v54 = vmul.f32 %v931_v24, %v454_v52  ;;  %v515_v55 = vmul.f32 %v931_v24, %v474_v53  ;;  %v417_v56 = vpop.f32.mrf.mxu0  ;;  %v437_v57 = vpop.f32.mrf.mxu1 }
  0xd9   : > { %599 = vst [vmem:[%s946_s20 + $0x68] sm:$0xff] %v567_v51  ;;  %v492_v58 = vmul.f32 %v931_v24, %v417_v56  ;;  %v500_v59 = vmul.f32 %v931_v24, %v437_v57 }
  0xda   : > { %v543_v60 = vadd.f32 %v936_v25, %v507_v54  ;;  %v551_v61 = vadd.f32 %v936_v25, %v515_v55 }
  0xdb   : > { %v528_v62 = vadd.f32 %v936_v25, %v492_v58  ;;  %v536_v63 = vadd.f32 %v936_v25, %v500_v59 }
  0xdc   : > { %v575_v0 = vmax.f32 %v543_v60, 0.0  ;;  %v583_v1 = vmax.f32 %v551_v61, 0.0 }
  0xdd   : > { %v560_v2 = vmax.f32 %v528_v62, 0.0  ;;  %v568_v3 = vmax.f32 %v536_v63, 0.0 }
  0xde   : > { %607 = vst [vmem:[%s946_s20 + $0xa8] sm:$0xff] %v575_v0 }
  0xdf   : > { %615 = vst [vmem:[%s946_s20 + $0xe8] sm:$0xff] %v583_v1  ;;  %v457_v4 = vpop.f32.mrf.mxu2  ;;  %v477_v5 = vpop.f32.mrf.mxu3 }
  0xe0   : > { %592 = vst [vmem:[%s946_s20 + $0x30] sm:$0xff] %v560_v2  ;;  %v508_v6 = vmul.f32 %v931_v24, %v457_v4  ;;  %v516_v7 = vmul.f32 %v931_v24, %v477_v5  ;;  %v419_v8 = vpop.f32.mrf.mxu0  ;;  %v439_v9 = vpop.f32.mrf.mxu1 }
  0xe1   : > { %600 = vst [vmem:[%s946_s20 + $0x70] sm:$0xff] %v568_v3  ;;  %v493_v10 = vmul.f32 %v931_v24, %v419_v8  ;;  %v501_v11 = vmul.f32 %v931_v24, %v439_v9 }
  0xe2   : > { %v544_v12 = vadd.f32 %v936_v25, %v508_v6  ;;  %v552_v13 = vadd.f32 %v936_v25, %v516_v7 }
  0xe3   : > { %v529_v14 = vadd.f32 %v936_v25, %v493_v10  ;;  %v537_v15 = vadd.f32 %v936_v25, %v501_v11 }
  0xe4   : > { %v576_v16 = vmax.f32 %v544_v12, 0.0  ;;  %v584_v17 = vmax.f32 %v552_v13, 0.0 }
  0xe5   : > { %v561_v18 = vmax.f32 %v529_v14, 0.0  ;;  %v569_v19 = vmax.f32 %v537_v15, 0.0 }
  0xe6   : > { %608 = vst [vmem:[%s946_s20 + $0xb0] sm:$0xff] %v576_v16 }
  0xe7   : > { %616 = vst [vmem:[%s946_s20 + $0xf0] sm:$0xff] %v584_v17  ;;  %v459_v20 = vpop.f32.mrf.mxu2  ;;  %v479_v21 = vpop.f32.mrf.mxu3 }
  0xe8   : > { %593 = vst [vmem:[%s946_s20 + $0x38] sm:$0xff] %v561_v18  ;;  %v509_v22 = vmul.f32 %v931_v24, %v459_v20  ;;  %v517_v23 = vmul.f32 %v931_v24, %v479_v21 }
  0xe9   : > { %601 = vst [vmem:[%s946_s20 + $0x78] sm:$0xff] %v569_v19 }
  0xea   : > { %v545_v26 = vadd.f32 %v936_v25, %v509_v22  ;;  %v553_v27 = vadd.f32 %v936_v25, %v517_v23 }
  0xec   : > { %v577_v28 = vmax.f32 %v545_v26, 0.0  ;;  %v585_v29 = vmax.f32 %v553_v27, 0.0 }
  0xee   : > { %609 = vst [vmem:[%s946_s20 + $0xb8] sm:$0xff] %v577_v28 }
  0xef   : > { %617 = vst [vmem:[%s946_s20 + $0xf8] sm:$0xff] %v585_v29 }
  0xf0 PF: > { %s14_s15 = sadd.s32 1, %s845_s15  }
  0xf1   : > { %p11_p4 = scmp.ge.s32.totalorder %s14_s15, 4  }
  0xf3   :  { %13 = sbr.rel (!%p11_p4) target bundleno = 1 (0x1), region = 66 }

// kernel: rot_prediction_forward.70
= control target key start
LH: loop header
LB: loop body
LE: loop exit
PB: predicated region body
PF: predicated region fallthrough
CT: control target
= control target key end

     0   :  { %s645_s21 = smov 0   ;;  %s712_s0 = inlined_call_operand.vmem [shape: bf16[128,128], index: 0, kind: input, shape index: {}]   ;;  %s713_s1 = inlined_call_operand.vmem [shape: bf16[128,128], index: 1, kind: input, shape index: {}]   ;;  %s714_s2 = inlined_call_operand.vmem [shape: f32[1,128], index: 2, kind: input, shape index: {}]   ;;  %s715_s3 = inlined_call_operand.vmem [shape: f32[1,128], index: 3, kind: input, shape index: {}]   ;;  %s716_s4 = inlined_call_operand.vmem [shape: f32[1,128], index: 4, kind: input, shape index: {}]   ;;  %s717_s5 = inlined_call_operand.vmem [shape: f32[1,128], index: 5, kind: input, shape index: {}]   ;;  %s718_s6 = inlined_call_operand.vmem [shape: f32[128,128], index: 6, kind: output, shape index: {}]  }
   0x1 LB: > { %s496_s22 = sadd.s32 4294967295, %s608_s21   ;;  %p500_p0 = scmp.ge.s32.totalorder %s608_s21, 1  ;;  %s608_s21 = sphi %s645_s21, %s16_s21  }
   0x2   : > { %p213_p1 = scmp.lt.s32.totalorder %s608_s21, 3 }
   0x4   : > { %p214_p2 = pnand %p500_p0, %p213_p1 }
   0x5   : > { %s501_s25 = sshll.u32 (!%p214_p2), %s496_s22, 3 }
   0x6   : > { %217 = sbr.rel (%p214_p2) target bundleno = 192 (0xc0), region = 44  ;;  %p244_p3 = scmp.lt.s32.totalorder (!%p214_p2), %s501_s25, 15 }
   0xb   : > { %v546_v0 = vld [vmem:[%s713_s1 + $0x38] sm:$0xff]  ;;  %v545_v1 = vld [vmem:[%s713_s1 + $0x30] sm:$0xff]  ;;  %s720_s25 = smov (!%p244_p3, %s501_s25), 15  ;;  %v544_v2 = vld [vmem:[%s713_s1 + $0x28] sm:$0xff] }
   0xc   : > { %371 = vmatpush.bf16.msra.mxu0 %v546_v0  ;;  %566 = vmatpush.bf16.msra.mxu1 %v546_v0  ;;  %s502_s28 = sshll.u32 %s720_s25, 2  ;;  %v543_v4 = vld [vmem:[%s713_s1 + $0x20] sm:$0xff]  ;;  %v542_v14 = vld [vmem:[%s713_s1 + $0x18] sm:$0xff]  ;;  %v541_v24 = vld [vmem:[%s713_s1 + $0x10] sm:$0xff]  ;;  %s504_s30 = sshll.u32 %s720_s25, 3 }
   0xd   : > { %567 = vmatpush.bf16.msra.mxu2 %v546_v0  ;;  %568 = vmatpush.bf16.msra.mxu3 %v546_v0  ;;  %s247_s9 = scalar_lea.vmem %s712_s0, %s502_s28  ;;  %v598_v9 = vld [vmem:[%s714_s2] ss:$0 sm:$0xff]  ;;  %v540_v33 = vld [vmem:[%s713_s1 + $0x8] sm:$0xff] }
   0xe   : > { %v548_v3 = vld [vmem:[%s247_s9] sm:$0xff]   ;;  %v563_v5 = vld [vmem:[%s247_s9 + $0x8] sm:$0xff]   ;;  %v564_v6 = vld [vmem:[%s247_s9 + $0x10] sm:$0xff]  }
   0xf   : > { %v565_v7 = vld [vmem:[%s247_s9 + $0x18] sm:$0xff]   ;;  %v549_v8 = vunpack.c.l.bf16 %v548_v3  ;;  %v550_v10 = vunpack.c.h.bf16 %v548_v3  ;;  %v553_v11 = vunpack.c.l.bf16 %v563_v5  ;;  %v554_v12 = vunpack.c.h.bf16 %v563_v5  ;;  %v599_v19 = vld [vmem:[%s715_s3] ss:$0 sm:$0xff]  ;;  %s699_s9 = scalar_lea.vmem %s718_s6, %s504_s30 }
  0x10   : > { %372 = vmatpush.bf16.msra.mxu0 %v545_v1  ;;  %569 = vmatpush.bf16.msra.mxu1 %v545_v1  ;;  %v557_v13 = vunpack.c.l.bf16 %v564_v6  ;;  %v558_v15 = vunpack.c.h.bf16 %v564_v6  ;;  %v561_v16 = vunpack.c.l.bf16 %v565_v7  ;;  %v562_v17 = vunpack.c.h.bf16 %v565_v7  ;;  %v539_v41 = vld [vmem:[%s713_s1] sm:$0xff] }
  0x11   : > { %570 = vmatpush.bf16.msra.mxu2 %v545_v1  ;;  %571 = vmatpush.bf16.msra.mxu3 %v545_v1  ;;  %v275_v18 = vmul.f32 %v598_v9, %v549_v8  ;;  %v276_v20 = vmul.f32 %v598_v9, %v550_v10  ;;  %v277_v21 = vmul.f32 %v598_v9, %v553_v11  ;;  %v600_v50 = vld [vmem:[%s716_s4] ss:$0 sm:$0xff] }
  0x12   : > { %v278_v22 = vmul.f32 %v598_v9, %v554_v12  ;;  %v279_v23 = vmul.f32 %v598_v9, %v557_v13  ;;  %v280_v25 = vmul.f32 %v598_v9, %v558_v15  ;;  %v281_v26 = vmul.f32 %v598_v9, %v561_v16  ;;  %v601_v51 = vld [vmem:[%s717_s5] ss:$0 sm:$0xff] }
  0x13   : > { %v282_v27 = vmul.f32 %v598_v9, %v562_v17  ;;  %v287_v28 = vadd.f32 %v599_v19, %v275_v18  ;;  %v288_v29 = vadd.f32 %v599_v19, %v276_v20  ;;  %v289_v30 = vadd.f32 %v599_v19, %v277_v21 }
  0x14   : > { %373 = vmatpush.bf16.msra.mxu0 %v544_v2  ;;  %572 = vmatpush.bf16.msra.mxu1 %v544_v2  ;;  %v290_v31 = vadd.f32 %v599_v19, %v278_v22  ;;  %v291_v32 = vadd.f32 %v599_v19, %v279_v23  ;;  %v292_v34 = vadd.f32 %v599_v19, %v280_v25 }
  0x15   : > { %573 = vmatpush.bf16.msra.mxu2 %v544_v2  ;;  %574 = vmatpush.bf16.msra.mxu3 %v544_v2  ;;  %v293_v35 = vadd.f32 %v599_v19, %v281_v26  ;;  %v294_v36 = vadd.f32 %v599_v19, %v282_v27  ;;  %v295_v37 = vmax.f32 %v287_v28, 0.0  ;;  %v296_v38 = vmax.f32 %v288_v29, 0.0 }
  0x16   : > { %v297_v39 = vmax.f32 %v289_v30, 0.0  ;;  %v298_v40 = vmax.f32 %v290_v31, 0.0  ;;  %v299_v42 = vmax.f32 %v291_v32, 0.0  ;;  %v300_v43 = vmax.f32 %v292_v34, 0.0 }
  0x17   : > { %v301_v44 = vmax.f32 %v293_v35, 0.0  ;;  %v302_v45 = vmax.f32 %v294_v36, 0.0  ;;  %v303_v46 = vpack.c.bf16 %v296_v38, %v295_v37 }
  0x18   : > { %374 = vmatpush.bf16.msra.mxu0 %v543_v4  ;;  %575 = vmatpush.bf16.msra.mxu1 %v543_v4  ;;  %v304_v47 = vpack.c.bf16 %v298_v40, %v297_v39  ;;  %v305_v48 = vpack.c.bf16 %v300_v43, %v299_v42 }
  0x19   : > { %576 = vmatpush.bf16.msra.mxu2 %v543_v4  ;;  %577 = vmatpush.bf16.msra.mxu3 %v543_v4  ;;  %v306_v49 = vpack.c.bf16 %v302_v45, %v301_v44 }
  0x1c   : > { %375 = vmatpush.bf16.msra.mxu0 %v542_v14  ;;  %578 = vmatpush.bf16.msra.mxu1 %v542_v14 }
  0x1d   : > { %579 = vmatpush.bf16.msra.mxu2 %v542_v14  ;;  %580 = vmatpush.bf16.msra.mxu3 %v542_v14 }
  0x20   : > { %376 = vmatpush.bf16.msra.mxu0 %v541_v24  ;;  %581 = vmatpush.bf16.msra.mxu1 %v541_v24 }
  0x21   : > { %582 = vmatpush.bf16.msra.mxu2 %v541_v24  ;;  %583 = vmatpush.bf16.msra.mxu3 %v541_v24 }
  0x24   : > { %377 = vmatpush.bf16.msra.mxu0 %v540_v33  ;;  %584 = vmatpush.bf16.msra.mxu1 %v540_v33 }
  0x25   : > { %585 = vmatpush.bf16.msra.mxu2 %v540_v33  ;;  %586 = vmatpush.bf16.msra.mxu3 %v540_v33 }
  0x28   : > { %378 = vmatpush.bf16.msra.mxu0 %v539_v41  ;;  %587 = vmatpush.bf16.msra.mxu1 %v539_v41 }
  0x29   : > { %588 = vmatpush.bf16.msra.mxu2 %v539_v41  ;;  %589 = vmatpush.bf16.msra.mxu3 %v539_v41 }
  0x2b   : > { %379 = vmatmul.bf16.vlgmr.msra.gmra.mxu0 %v303_v46  ;;  %384 = vmatmul.bf16.vlgmr.msra.gmra.mxu1 %v304_v47 }
  0x2c   : > { %389 = vmatmul.bf16.vlgmr.msra.gmra.mxu2 %v305_v48  ;;  %394 = vmatmul.bf16.vlgmr.msra.gmra.mxu3 %v306_v49 }
  0xa8   : > { %v380_v52 = vpop.f32.mrf.mxu0  ;;  %v385_v53 = vpop.f32.mrf.mxu1 }
  0xa9   : > { %v404_v54 = vmul.f32 %v600_v50, %v380_v52  ;;  %v406_v55 = vmul.f32 %v600_v50, %v385_v53 }
  0xab   : > { %v416_v56 = vadd.f32 %v601_v51, %v404_v54  ;;  %v418_v57 = vadd.f32 %v601_v51, %v406_v55 }
  0xad   : > { %v424_v58 = vmax.f32 %v416_v56, 0.0  ;;  %v426_v59 = vmax.f32 %v418_v57, 0.0 }
  0xaf   : > { %432 = vst [vmem:[%s699_s9] sm:$0xff] %v424_v58  ;;  %v390_v60 = vpop.f32.mrf.mxu2  ;;  %v395_v61 = vpop.f32.mrf.mxu3 }
  0xb0   : > { %434 = vst [vmem:[%s699_s9 + $0x10] sm:$0xff] %v426_v59  ;;  %v408_v62 = vmul.f32 %v600_v50, %v390_v60  ;;  %v410_v63 = vmul.f32 %v600_v50, %v395_v61  ;;  %v382_v0 = vpop.f32.mrf.mxu0  ;;  %v387_v1 = vpop.f32.mrf.mxu1 }
  0xb1   : > { %v405_v2 = vmul.f32 %v600_v50, %v382_v0  ;;  %v407_v3 = vmul.f32 %v600_v50, %v387_v1 }
  0xb2   : > { %v420_v4 = vadd.f32 %v601_v51, %v408_v62  ;;  %v422_v5 = vadd.f32 %v601_v51, %v410_v63 }
  0xb3   : > { %v417_v6 = vadd.f32 %v601_v51, %v405_v2  ;;  %v419_v7 = vadd.f32 %v601_v51, %v407_v3 }
  0xb4   : > { %v428_v8 = vmax.f32 %v420_v4, 0.0  ;;  %v430_v9 = vmax.f32 %v422_v5, 0.0 }
  0xb5   : > { %v425_v10 = vmax.f32 %v417_v6, 0.0  ;;  %v427_v11 = vmax.f32 %v419_v7, 0.0 }
  0xb6   : > { %436 = vst [vmem:[%s699_s9 + $0x20] sm:$0xff] %v428_v8 }
  0xb7   : > { %438 = vst [vmem:[%s699_s9 + $0x30] sm:$0xff] %v430_v9  ;;  %v392_v12 = vpop.f32.mrf.mxu2  ;;  %v397_v13 = vpop.f32.mrf.mxu3 }
  0xb8   : > { %433 = vst [vmem:[%s699_s9 + $0x8] sm:$0xff] %v425_v10  ;;  %v409_v14 = vmul.f32 %v600_v50, %v392_v12  ;;  %v411_v15 = vmul.f32 %v600_v50, %v397_v13 }
  0xb9   : > { %435 = vst [vmem:[%s699_s9 + $0x18] sm:$0xff] %v427_v11 }
  0xba   : > { %v421_v16 = vadd.f32 %v601_v51, %v409_v14  ;;  %v423_v17 = vadd.f32 %v601_v51, %v411_v15 }
  0xbc   : > { %v429_v18 = vmax.f32 %v421_v16, 0.0  ;;  %v431_v19 = vmax.f32 %v423_v17, 0.0 }
  0xbe   : > { %437 = vst [vmem:[%s699_s9 + $0x28] sm:$0xff] %v429_v18 }
  0xbf   : > { %439 = vst [vmem:[%s699_s9 + $0x38] sm:$0xff] %v431_v19 }
  0xc0 PF: > { %s16_s21 = sadd.s32 1, %s608_s21  }
  0xc1   : > { %p13_p4 = scmp.ge.s32.totalorder %s16_s21, 4  }
  0xc3   :  { %15 = sbr.rel (!%p13_p4) target bundleno = 1 (0x1), region = 74 }

// kernel: rot_prediction_forward.71
= control target key start
LH: loop header
LB: loop body
LE: loop exit
PB: predicated region body
PF: predicated region fallthrough
CT: control target
= control target key end

     0   :  { %s1618_s15 = smov 0   ;;  %s1973_s0 = inlined_call_operand.vmem [shape: bf16[128,896], index: 0, kind: input, shape index: {}]   ;;  %s1974_s1 = inlined_call_operand.vmem [shape: bf16[896,128], index: 1, kind: input, shape index: {}]   ;;  %s1975_s2 = inlined_call_operand.vmem [shape: f32[1,128], index: 2, kind: input, shape index: {}]   ;;  %s1976_s3 = inlined_call_operand.vmem [shape: f32[1,128], index: 3, kind: input, shape index: {}]   ;;  %s1977_s4 = inlined_call_operand.vmem [shape: f32[128,128], index: 4, kind: output, shape index: {}]  }
   0x1 LB: > { %s1119_s16 = sadd.s32 4294967295, %s1591_s15   ;;  %p1123_p0 = scmp.ge.s32.totalorder %s1591_s15, 1  ;;  %s1591_s15 = sphi %s1618_s15, %s14_s15  }
   0x2   : > { %p164_p1 = scmp.lt.s32.totalorder %s1591_s15, 3 }
   0x4   : > { %p165_p2 = pnand %p1123_p0, %p164_p1 }
   0x5   : > { %s1124_s9 = sshll.u32 (!%p165_p2), %s1119_s16, 3 }
   0x6   : > { %168 = sbr.rel (%p165_p2) target bundleno = 288 (0x120), region = 36  ;;  %p192_p3 = scmp.lt.s32.totalorder (!%p165_p2), %s1124_s9, 15 }
   0xb   : > { %v1501_v0 = vld [vmem:[%s1974_s1 + $0x38] sm:$0xff]  ;;  %v1500_v3 = vld [vmem:[%s1974_s1 + $0x30] sm:$0xff]  ;;  %v1499_v6 = vld [vmem:[%s1974_s1 + $0x28] sm:$0xff]  ;;  %s1979_s9 = smov (!%p192_p3, %s1124_s9), 15 }
   0xc   : > { %v1509_v1 = vld [vmem:[%s1974_s1 + $0x78] sm:$0xff]  ;;  %828 = vmatpush.bf16.msra.mxu0 %v1501_v0  ;;  %1550 = vmatpush.bf16.msra.mxu3 %v1501_v0  ;;  %v1508_v4 = vld [vmem:[%s1974_s1 + $0x70] sm:$0xff]  ;;  %v1507_v7 = vld [vmem:[%s1974_s1 + $0x68] sm:$0xff]  ;;  %s1574_s25 = smul.u32 28, %s1979_s9  ;;  %s1127_s16 = sshll.u32 %s1979_s9, 3 }
   0xd   : > { %v1517_v2 = vld [vmem:[%s1974_s1 + $0xb8] sm:$0xff]  ;;  %857 = vmatpush.bf16.msra.mxu1 %v1509_v1  ;;  %v1516_v5 = vld [vmem:[%s1974_s1 + $0xb0] sm:$0xff]  ;;  %v1515_v8 = vld [vmem:[%s1974_s1 + $0xa8] sm:$0xff]  ;;  %s1937_s22 = scalar_lea.vmem %s1977_s4, %s1127_s16 }
   0xe   : > { %886 = vmatpush.bf16.msra.mxu2 %v1517_v2  ;;  %v1498_v9 = vld [vmem:[%s1974_s1 + $0x20] sm:$0xff]  ;;  %v1497_v12 = vld [vmem:[%s1974_s1 + $0x18] sm:$0xff]  ;;  %v1496_v15 = vld [vmem:[%s1974_s1 + $0x10] sm:$0xff]  ;;  %s1689_s8 = scalar_lea.vmem %s1973_s0, %s1574_s25 }
   0xf   : > { %v1506_v10 = vld [vmem:[%s1974_s1 + $0x60] sm:$0xff]  ;;  %v1505_v13 = vld [vmem:[%s1974_s1 + $0x58] sm:$0xff]  ;;  %v1504_v16 = vld [vmem:[%s1974_s1 + $0x50] sm:$0xff] }
  0x10   : > { %829 = vmatpush.bf16.msra.mxu0 %v1500_v3  ;;  %1551 = vmatpush.bf16.msra.mxu3 %v1500_v3  ;;  %v1514_v11 = vld [vmem:[%s1974_s1 + $0xa0] sm:$0xff]  ;;  %v1513_v14 = vld [vmem:[%s1974_s1 + $0x98] sm:$0xff]  ;;  %v1512_v17 = vld [vmem:[%s1974_s1 + $0x90] sm:$0xff] }
  0x11   : > { %858 = vmatpush.bf16.msra.mxu1 %v1508_v4  ;;  %v1495_v18 = vld [vmem:[%s1974_s1 + $0x8] sm:$0xff]  ;;  %v1494_v21 = vld [vmem:[%s1974_s1] sm:$0xff]  ;;  %v1469_v25 = vld [vmem:[%s1689_s8 + $0x18] sm:$0xf0] }
  0x12   : > { %887 = vmatpush.bf16.msra.mxu2 %v1516_v5  ;;  %v1503_v19 = vld [vmem:[%s1974_s1 + $0x48] sm:$0xff]  ;;  %v1502_v22 = vld [vmem:[%s1974_s1 + $0x40] sm:$0xff]  ;;  %v1186_v26 = vld [vmem:[%s1689_s8 + $0x70] sm:$0xf] }
  0x13   : > { %v1511_v20 = vld [vmem:[%s1974_s1 + $0x88] sm:$0xff]  ;;  %v1510_v23 = vld [vmem:[%s1974_s1 + $0x80] sm:$0xff]  ;;  %v1525_v32 = vld [vmem:[%s1974_s1 + $0xf8] sm:$0xff] }
  0x14   : > { %830 = vmatpush.bf16.msra.mxu0 %v1499_v6  ;;  %1552 = vmatpush.bf16.msra.mxu3 %v1499_v6  ;;  %v1130_v24 = vld [vmem:[%s1689_s8] sm:$0xf]  ;;  %v1483_v27 = vld [vmem:[%s1689_s8 + $0x88] sm:$0xf0]  ;;  %v1466_v28 = vld [vmem:[%s1689_s8 + $0x4] sm:$0xf] }
  0x15   : > { %859 = vmatpush.bf16.msra.mxu1 %v1507_v7  ;;  %v1132_v29 = vld [vmem:[%s1689_s8 + $0x1c] sm:$0xf0]  ;;  %v1138_v30 = vld [vmem:[%s1689_s8 + $0x8] sm:$0xf]  ;;  %v1470_v31 = vld [vmem:[%s1689_s8 + $0x20] sm:$0xf0]  ;;  %v1131_v34 = vor.u32 %v1469_v25, %v1130_v24  ;;  %v1187_v35 = vor.u32 %v1483_v27, %v1186_v26 }
  0x16   : > { %888 = vmatpush.bf16.msra.mxu2 %v1515_v8  ;;  %v1720_v33 = vld [vmem:[%s1974_s1 + $0x1b8] sm:$0xff]  ;;  %v1135_v36 = vor.u32 %v1466_v28, %v1132_v29  ;;  %v1139_v37 = vor.u32 %v1470_v31, %v1138_v30  ;;  %v1524_v40 = vld [vmem:[%s1974_s1 + $0xf0] sm:$0xff]  ;;  %v1523_v44 = vld [vmem:[%s1974_s1 + $0xe8] sm:$0xff] }
  0x17   : > { %v1533_v38 = vld [vmem:[%s1974_s1 + $0x138] sm:$0xff]  ;;  %v1737_v41 = vld [vmem:[%s1974_s1 + $0x1b0] sm:$0xff]  ;;  %v1755_v45 = vld [vmem:[%s1974_s1 + $0x1a8] sm:$0xff] }
  0x18   : > { %831 = vmatpush.bf16.msra.mxu0 %v1498_v9  ;;  %1553 = vmatpush.bf16.msra.mxu3 %v1498_v9  ;;  %v1728_v39 = vld [vmem:[%s1974_s1 + $0x178] sm:$0xff]  ;;  %v1532_v42 = vld [vmem:[%s1974_s1 + $0x130] sm:$0xff]  ;;  %v1531_v46 = vld [vmem:[%s1974_s1 + $0x128] sm:$0xff] }
  0x19   : > { %860 = vmatpush.bf16.msra.mxu1 %v1506_v10  ;;  %v1746_v43 = vld [vmem:[%s1974_s1 + $0x170] sm:$0xff]  ;;  %v1764_v47 = vld [vmem:[%s1974_s1 + $0x168] sm:$0xff]  ;;  %v1522_v48 = vld [vmem:[%s1974_s1 + $0xe0] sm:$0xff] }
  0x1a   : > { %889 = vmatpush.bf16.msra.mxu2 %v1514_v11  ;;  %v1773_v49 = vld [vmem:[%s1974_s1 + $0x1a0] sm:$0xff]  ;;  %v1158_v51 = vld [vmem:[%s1689_s8 + $0x38] sm:$0xf]  ;;  %v1476_v52 = vld [vmem:[%s1689_s8 + $0x50] sm:$0xf0] }
  0x1b   : > { %v1530_v50 = vld [vmem:[%s1974_s1 + $0x120] sm:$0xff]  ;;  %v1214_v53 = vld [vmem:[%s1689_s8 + $0xa8] sm:$0xf]  ;;  %v1473_v55 = vld [vmem:[%s1689_s8 + $0x3c] sm:$0xf]  ;;  %v1159_v62 = vor.u32 %v1476_v52, %v1158_v51 }
  0x1c   : > { %832 = vmatpush.bf16.msra.mxu0 %v1497_v12  ;;  %1554 = vmatpush.bf16.msra.mxu3 %v1497_v12  ;;  %v1490_v54 = vld [vmem:[%s1689_s8 + $0xc0] sm:$0xf0]  ;;  %v1160_v56 = vld [vmem:[%s1689_s8 + $0x54] sm:$0xf0]  ;;  %v1166_v57 = vld [vmem:[%s1689_s8 + $0x40] sm:$0xf] }
  0x1d   : > { %861 = vmatpush.bf16.msra.mxu1 %v1505_v13  ;;  %v1477_v58 = vld [vmem:[%s1689_s8 + $0x58] sm:$0xf0]  ;;  %v1790_v59 = vld [vmem:[%s1974_s1 + $0x160] sm:$0xff]  ;;  %v1215_v63 = vor.u32 %v1490_v54, %v1214_v53  ;;  %v1163_v0 = vor.u32 %v1473_v55, %v1160_v56  ;;  %v1520_v4 = vld [vmem:[%s1974_s1 + $0xd0] sm:$0xff] }
  0x1e   : > { %890 = vmatpush.bf16.msra.mxu2 %v1513_v14  ;;  %v1521_v60 = vld [vmem:[%s1974_s1 + $0xd8] sm:$0xff]  ;;  %v1167_v1 = vor.u32 %v1477_v58, %v1166_v57  ;;  %v1817_v5 = vld [vmem:[%s1974_s1 + $0x190] sm:$0xff]  ;;  %v1519_v8 = vld [vmem:[%s1974_s1 + $0xc8] sm:$0xff] }
  0x1f   : > { %v1799_v61 = vld [vmem:[%s1974_s1 + $0x198] sm:$0xff]  ;;  %v1528_v6 = vld [vmem:[%s1974_s1 + $0x110] sm:$0xff]  ;;  %v1543_v9 = vld [vmem:[%s1974_s1 + $0x188] sm:$0xff] }
  0x20   : > { %833 = vmatpush.bf16.msra.mxu0 %v1496_v15  ;;  %1555 = vmatpush.bf16.msra.mxu3 %v1496_v15  ;;  %v1529_v2 = vld [vmem:[%s1974_s1 + $0x118] sm:$0xff]  ;;  %v1826_v7 = vld [vmem:[%s1974_s1 + $0x150] sm:$0xff]  ;;  %v1527_v10 = vld [vmem:[%s1974_s1 + $0x108] sm:$0xff] }
  0x21   : > { %862 = vmatpush.bf16.msra.mxu1 %v1504_v16  ;;  %v1808_v3 = vld [vmem:[%s1974_s1 + $0x158] sm:$0xff]  ;;  %v1535_v11 = vld [vmem:[%s1974_s1 + $0x148] sm:$0xff]  ;;  %v1518_v12 = vld [vmem:[%s1974_s1 + $0xc0] sm:$0xff] }
  0x22   : > { %891 = vmatpush.bf16.msra.mxu2 %v1512_v17  ;;  %v1542_v13 = vld [vmem:[%s1974_s1 + $0x180] sm:$0xff]  ;;  %v1480_v15 = vld [vmem:[%s1689_s8 + $0x74] sm:$0xf]  ;;  %v1188_v16 = vld [vmem:[%s1689_s8 + $0x8c] sm:$0xf0] }
  0x23   : > { %v1526_v14 = vld [vmem:[%s1974_s1 + $0x100] sm:$0xff]  ;;  %v1467_v17 = vld [vmem:[%s1689_s8 + $0xc] sm:$0xf]  ;;  %v1191_v25 = vor.u32 %v1480_v15, %v1188_v16  ;;  %v1216_v31 = vld [vmem:[%s1689_s8 + $0xc4] sm:$0xf0] }
  0x24   : > { %834 = vmatpush.bf16.msra.mxu0 %v1495_v18  ;;  %1556 = vmatpush.bf16.msra.mxu3 %v1495_v18  ;;  %v1140_v18 = vld [vmem:[%s1689_s8 + $0x24] sm:$0xf0]  ;;  %v1487_v28 = vld [vmem:[%s1689_s8 + $0xac] sm:$0xf]  ;;  %v1474_v29 = vld [vmem:[%s1689_s8 + $0x44] sm:$0xf] }
  0x25   : > { %863 = vmatpush.bf16.msra.mxu1 %v1503_v19  ;;  %v1194_v19 = vld [vmem:[%s1689_s8 + $0x78] sm:$0xf]  ;;  %v1143_v24 = vor.u32 %v1467_v17, %v1140_v18  ;;  %v1168_v30 = vld [vmem:[%s1689_s8 + $0x5c] sm:$0xf0]  ;;  %v1488_v52 = vld [vmem:[%s1689_s8 + $0xb4] sm:$0xf] }
  0x26   : > { %892 = vmatpush.bf16.msra.mxu2 %v1511_v20  ;;  %v1484_v20 = vld [vmem:[%s1689_s8 + $0x90] sm:$0xf0]  ;;  %v1224_v53 = vld [vmem:[%s1689_s8 + $0xcc] sm:$0xf0]  ;;  %v1482_v54 = vld [vmem:[%s1689_s8 + $0x84] sm:$0xf] }
  0x27   : > { %v1195_v26 = vor.u32 %v1484_v20, %v1194_v19  ;;  %v1204_v55 = vld [vmem:[%s1689_s8 + $0x9c] sm:$0xf0]  ;;  %v1182_v56 = vld [vmem:[%s1689_s8 + $0x50] sm:$0xf]  ;;  %v1479_v57 = vld [vmem:[%s1689_s8 + $0x68] sm:$0xf0] }
  0x28   : > { %835 = vmatpush.bf16.msra.mxu0 %v1494_v21  ;;  %1557 = vmatpush.bf16.msra.mxu3 %v1494_v21  ;;  %v1534_v21 = vld [vmem:[%s1974_s1 + $0x140] sm:$0xff]  ;;  %v1230_v58 = vld [vmem:[%s1689_s8 + $0xb8] sm:$0xf] }
  0x29   : > { %864 = vmatpush.bf16.msra.mxu1 %v1502_v22  ;;  %v1146_v22 = vld [vmem:[%s1689_s8 + $0x10] sm:$0xf] }
  0x2a   : > { %893 = vmatpush.bf16.msra.mxu2 %v1510_v23  ;;  %v1471_v23 = vld [vmem:[%s1689_s8 + $0x28] sm:$0xf0] }
  0x2b   : > { %836 = vmatmul.bf16.vlgmr.msra.gmra.mxu0 %v1131_v34  ;;  %846 = vmatmul.bf16.vlgmr.msra.gmra.mxu3 %v1187_v35  ;;  %v1147_v27 = vor.u32 %v1471_v23, %v1146_v22  ;;  %v1174_v34 = vld [vmem:[%s1689_s8 + $0x48] sm:$0xf]  ;;  %v1478_v35 = vld [vmem:[%s1689_s8 + $0x60] sm:$0xf0] }
  0x2c   : > { %915 = vmatpush.bf16.msrb.mxu3 %v1525_v32  ;;  %865 = vmatmul.bf16.vlgmr.msra.gmra.mxu1 %v1135_v36  ;;  %v1222_v32 = vld [vmem:[%s1689_s8 + $0xb0] sm:$0xf]  ;;  %v1171_v36 = vor.u32 %v1474_v29, %v1168_v30 }
  0x2d   : > { %894 = vmatmul.bf16.vlgmr.msra.gmra.mxu2 %v1139_v37  ;;  %944 = vmatpush.bf16.msrb.mxu0 %v1533_v38  ;;  %v1219_v37 = vor.u32 %v1487_v28, %v1216_v31 }
  0x2e   : > { %1002 = vmatpush.bf16.msrb.mxu2 %v1720_v33  ;;  %1558 = vmatpush.bf16.msrb.mxu1 %v1728_v39 }
  0x30   : > { %916 = vmatpush.bf16.msrb.mxu3 %v1524_v40  ;;  %v1481_v40 = vld [vmem:[%s1689_s8 + $0x7c] sm:$0xf] }
  0x31   : > { %945 = vmatpush.bf16.msrb.mxu0 %v1532_v42  ;;  %v1475_v42 = vld [vmem:[%s1689_s8 + $0x4c] sm:$0xf] }
  0x32   : > { %1003 = vmatpush.bf16.msrb.mxu2 %v1737_v41  ;;  %1559 = vmatpush.bf16.msrb.mxu1 %v1746_v43 }
  0x34   : > { %917 = vmatpush.bf16.msrb.mxu3 %v1523_v44  ;;  %v1154_v44 = vld [vmem:[%s1689_s8 + $0x18] sm:$0xf] }
  0x35   : > { %946 = vmatpush.bf16.msrb.mxu0 %v1531_v46  ;;  %v1202_v46 = vld [vmem:[%s1689_s8 + $0x80] sm:$0xf] }
  0x36   : > { %1004 = vmatpush.bf16.msrb.mxu2 %v1755_v45  ;;  %1560 = vmatpush.bf16.msrb.mxu1 %v1764_v47 }
  0x38   : > { %918 = vmatpush.bf16.msrb.mxu3 %v1522_v48 }
  0x39   : > { %947 = vmatpush.bf16.msrb.mxu0 %v1530_v50 }
  0x3a   : > { %1005 = vmatpush.bf16.msrb.mxu2 %v1773_v49  ;;  %1561 = vmatpush.bf16.msrb.mxu1 %v1790_v59 }
  0x3b   : > { %841 = vmatmul.bf16.gmra.mxu0 %v1159_v62  ;;  %851 = vmatmul.bf16.gmra.mxu3 %v1215_v63  ;;  %v1183_v62 = vor.u32 %v1479_v57, %v1182_v56 }
  0x3c   : > { %919 = vmatpush.bf16.msrb.mxu3 %v1521_v60  ;;  %870 = vmatmul.bf16.gmra.mxu1 %v1163_v0  ;;  %v1227_v60 = vor.u32 %v1488_v52, %v1224_v53  ;;  %v1489_v0 = vld [vmem:[%s1689_s8 + $0xbc] sm:$0xf] }
  0x3d   : > { %899 = vmatmul.bf16.gmra.mxu2 %v1167_v1  ;;  %948 = vmatpush.bf16.msrb.mxu0 %v1529_v2  ;;  %v1238_v1 = vld [vmem:[%s1689_s8 + $0xc0] sm:$0xf]  ;;  %v1493_v2 = vld [vmem:[%s1689_s8 + $0xd8] sm:$0xf0] }
  0x3e   : > { %1006 = vmatpush.bf16.msrb.mxu2 %v1799_v61  ;;  %1562 = vmatpush.bf16.msrb.mxu1 %v1808_v3 }
  0x40   : > { %920 = vmatpush.bf16.msrb.mxu3 %v1520_v4  ;;  %v1210_v4 = vld [vmem:[%s1689_s8 + $0x88] sm:$0xf] }
  0x41   : > { %949 = vmatpush.bf16.msrb.mxu0 %v1528_v6  ;;  %v1468_v6 = vld [vmem:[%s1689_s8 + $0x14] sm:$0xf] }
  0x42   : > { %1007 = vmatpush.bf16.msrb.mxu2 %v1817_v5  ;;  %1563 = vmatpush.bf16.msrb.mxu1 %v1826_v7 }
  0x44   : > { %921 = vmatpush.bf16.msrb.mxu3 %v1519_v8  ;;  %v1239_v8 = vor.u32 %v1493_v2, %v1238_v1  ;;  %v1925_v2 = vld [vmem:[%s1975_s2] ss:$0 sm:$0xff] }
  0x45   : > { %950 = vmatpush.bf16.msrb.mxu0 %v1527_v10 }
  0x46   : > { %1008 = vmatpush.bf16.msrb.mxu2 %v1543_v9  ;;  %1564 = vmatpush.bf16.msrb.mxu1 %v1535_v11 }
  0x48   : > { %922 = vmatpush.bf16.msrb.mxu3 %v1518_v12 }
  0x49   : > { %951 = vmatpush.bf16.msrb.mxu0 %v1526_v14 }
  0x4a   : > { %1009 = vmatpush.bf16.msrb.mxu2 %v1542_v13  ;;  %1565 = vmatpush.bf16.msrb.mxu1 %v1534_v21 }
  0x4b   : > { %923 = vmatmul.bf16.vlgmr.msrb.gmra.mxu3 %v1143_v24 }
  0x4c   : > { %1566 = vmatpush.bf16.msra.mxu3 %v1720_v33  ;;  %875 = vmatmul.bf16.gmra.mxu1 %v1191_v25  ;;  %v1491_v33 = vld [vmem:[%s1689_s8 + $0xc8] sm:$0xf0] }
  0x4d   : > { %973 = vmatpush.bf16.msra.mxu0 %v1728_v39  ;;  %904 = vmatmul.bf16.gmra.mxu2 %v1195_v26  ;;  %v1223_v38 = vor.u32 %v1491_v33, %v1222_v32  ;;  %v1175_v39 = vor.u32 %v1478_v35, %v1174_v34 }
  0x4e   : > { %952 = vmatmul.bf16.vlgmr.msrb.gmra.mxu0 %v1147_v27 }
  0x50   : > { %1567 = vmatpush.bf16.msra.mxu3 %v1737_v41  ;;  %v1196_v41 = vld [vmem:[%s1689_s8 + $0x94] sm:$0xf0] }
  0x51   : > { %974 = vmatpush.bf16.msra.mxu0 %v1746_v43  ;;  %v1176_v43 = vld [vmem:[%s1689_s8 + $0x64] sm:$0xf0]  ;;  %v1199_v48 = vor.u32 %v1481_v40, %v1196_v41 }
  0x54   : > { %1568 = vmatpush.bf16.msra.mxu3 %v1755_v45  ;;  %v1472_v45 = vld [vmem:[%s1689_s8 + $0x30] sm:$0xf0] }
  0x55   : > { %975 = vmatpush.bf16.msra.mxu0 %v1764_v47  ;;  %v1485_v47 = vld [vmem:[%s1689_s8 + $0x98] sm:$0xf0]  ;;  %v1155_v50 = vor.u32 %v1472_v45, %v1154_v44 }
  0x56   : > { %v1203_v51 = vor.u32 %v1485_v47, %v1202_v46 }
  0x58   : > { %1569 = vmatpush.bf16.msra.mxu3 %v1773_v49  ;;  %v1179_v49 = vor.u32 %v1475_v42, %v1176_v43 }
  0x59   : > { %976 = vmatpush.bf16.msra.mxu0 %v1790_v59  ;;  %v1492_v59 = vld [vmem:[%s1689_s8 + $0xd0] sm:$0xf0] }
  0x5a   : > { %v1231_v63 = vor.u32 %v1492_v59, %v1230_v58 }
  0x5b   : > { %928 = vmatmul.bf16.gmra.mxu3 %v1171_v36 }
  0x5c   : > { %1570 = vmatpush.bf16.msra.mxu3 %v1799_v61  ;;  %880 = vmatmul.bf16.gmra.mxu1 %v1219_v37  ;;  %v1207_v61 = vor.u32 %v1482_v54, %v1204_v55 }
  0x5d   : > { %977 = vmatpush.bf16.msra.mxu0 %v1808_v3  ;;  %909 = vmatmul.bf16.gmra.mxu2 %v1223_v38  ;;  %v1232_v3 = vld [vmem:[%s1689_s8 + $0xd4] sm:$0xf0] }
  0x5e   : > { %957 = vmatmul.bf16.gmra.mxu0 %v1175_v39 }
  0x60   : > { %1571 = vmatpush.bf16.msra.mxu3 %v1817_v5  ;;  %v1486_v5 = vld [vmem:[%s1689_s8 + $0xa0] sm:$0xf0] }
  0x61   : > { %978 = vmatpush.bf16.msra.mxu0 %v1826_v7  ;;  %v1148_v7 = vld [vmem:[%s1689_s8 + $0x2c] sm:$0xf0]  ;;  %v1211_v10 = vor.u32 %v1486_v5, %v1210_v4 }
  0x64   : > { %1572 = vmatpush.bf16.msra.mxu3 %v1543_v9  ;;  %v1235_v9 = vor.u32 %v1489_v0, %v1232_v3 }
  0x65   : > { %979 = vmatpush.bf16.msra.mxu0 %v1535_v11  ;;  %v1151_v11 = vor.u32 %v1468_v6, %v1148_v7  ;;  %v1931_v6 = vld [vmem:[%s1976_s3] ss:$0 sm:$0xff] }
  0x68   : > { %1573 = vmatpush.bf16.msra.mxu3 %v1542_v13 }
  0x69   : > { %980 = vmatpush.bf16.msra.mxu0 %v1534_v21 }
  0x6b   : > { %933 = vmatmul.bf16.gmra.mxu3 %v1199_v48 }
  0x6c   : > { %986 = vmatmul.bf16.vlgmr.msrb.gmra.mxu1 %v1179_v49 }
  0x6d   : > { %1010 = vmatmul.bf16.vlgmr.msrb.gmra.mxu2 %v1155_v50 }
  0x6e   : > { %962 = vmatmul.bf16.gmra.mxu0 %v1203_v51 }
  0x7b   : > { %938 = vmatmul.bf16.gmra.mxu3 %v1227_v60 }
  0x7c   : > { %991 = vmatmul.bf16.gmra.mxu1 %v1207_v61 }
  0x7d   : > { %1015 = vmatmul.bf16.gmra.mxu2 %v1183_v62 }
  0x7e   : > { %967 = vmatmul.bf16.gmra.mxu0 %v1231_v63 }
  0x8b   : > { %1025 = vmatmul.bf16.vlgmr.msra.gmra.mxu3 %v1239_v8 }
  0x8c   : > { %996 = vmatmul.bf16.gmra.mxu1 %v1235_v9 }
  0x8d   : > { %1020 = vmatmul.bf16.gmra.mxu2 %v1211_v10 }
  0x8e   : > { %981 = vmatmul.bf16.vlgmr.msra.gmra.mxu0 %v1151_v11 }
  0xa8   : > { %v837_v12 = vpop.f32.mrf.mxu0 }
  0xa9   : > { %v866_v13 = vpop.f32.mrf.mxu1 }
  0xaa   : > { %v867_v14 = vadd.f32 %v866_v13, %v837_v12 }
  0xae   : > { %v847_v15 = vpop.f32.mrf.mxu3 }
  0xb0   : > { %v895_v16 = vpop.f32.mrf.mxu2  ;;  %v839_v18 = vpop.f32.mrf.mxu0 }
  0xb1   : > { %v1906_v17 = vadd.f32 %v895_v16, %v867_v14  ;;  %v868_v19 = vpop.f32.mrf.mxu1 }
  0xb2   : > { %v869_v20 = vadd.f32 %v868_v19, %v839_v18 }
  0xb6   : > { %v1908_v21 = vpop.f32.mrf.mxu3 }
  0xb8   : > { %v897_v22 = vpop.f32.mrf.mxu2  ;;  %v842_v24 = vpop.f32.mrf.mxu0 }
  0xb9   : > { %v1910_v23 = vadd.f32 %v897_v22, %v869_v20  ;;  %v871_v25 = vpop.f32.mrf.mxu1 }
  0xba   : > { %v872_v53 = vadd.f32 %v871_v25, %v842_v24 }
  0xbe   : > { %v852_v26 = vpop.f32.mrf.mxu3 }
  0xc0   : > { %v900_v27 = vpop.f32.mrf.mxu2  ;;  %v844_v28 = vpop.f32.mrf.mxu0 }
  0xc1   : > { %v873_v29 = vpop.f32.mrf.mxu1  ;;  %v901_v55 = vadd.f32 %v900_v27, %v872_v53 }
  0xc2   : > { %v874_v61 = vadd.f32 %v873_v29, %v844_v28 }
  0xc6   : > { %v1912_v30 = vpop.f32.mrf.mxu3 }
  0xc8   : > { %v902_v31 = vpop.f32.mrf.mxu2 }
  0xc9   : > { %v876_v32 = vpop.f32.mrf.mxu1  ;;  %v903_v63 = vadd.f32 %v902_v31, %v874_v61 }
  0xca   : > { %v877_v11 = vadd.f32 %v876_v32, %v847_v15 }
  0xcb   : > { %v953_v33 = vpop.f32.mrf.mxu0 }
  0xce   : > { %v924_v34 = vpop.f32.mrf.mxu3 }
  0xcf   : > { %v925_v14 = vadd.f32 %v924_v34, %v1906_v17 }
  0xd0   : > { %v905_v35 = vpop.f32.mrf.mxu2 }
  0xd1   : > { %v878_v36 = vpop.f32.mrf.mxu1  ;;  %v906_v18 = vadd.f32 %v905_v35, %v877_v11  ;;  %v954_v27 = vadd.f32 %v953_v33, %v925_v14 }
  0xd2   : > { %v879_v17 = vadd.f32 %v878_v36, %v1908_v21 }
  0xd3   : > { %v1914_v37 = vpop.f32.mrf.mxu0 }
  0xd6   : > { %v926_v38 = vpop.f32.mrf.mxu3 }
  0xd8   : > { %v1916_v39 = vpop.f32.mrf.mxu2 }
  0xd9   : > { %v881_v40 = vpop.f32.mrf.mxu1  ;;  %v908_v33 = vadd.f32 %v1916_v39, %v879_v17 }
  0xda   : > { %v882_v10 = vadd.f32 %v881_v40, %v852_v26 }
  0xdb   : > { %v958_v41 = vpop.f32.mrf.mxu0 }
  0xde   : > { %v929_v42 = vpop.f32.mrf.mxu3 }
  0xdf   : > { %v930_v58 = vadd.f32 %v929_v42, %v901_v55 }
  0xe0   : > { %v910_v43 = vpop.f32.mrf.mxu2 }
  0xe1   : > { %v883_v44 = vpop.f32.mrf.mxu1  ;;  %v959_v62 = vadd.f32 %v958_v41, %v930_v58  ;;  %v911_v16 = vadd.f32 %v910_v43, %v882_v10  ;;  %v927_v41 = vadd.f32 %v926_v38, %v1910_v23 }
  0xe2   : > { %v884_v31 = vadd.f32 %v883_v44, %v1912_v30 }
  0xe3   : > { %v960_v45 = vpop.f32.mrf.mxu0  ;;  %v956_v38 = vadd.f32 %v1914_v37, %v927_v41 }
  0xe6   : > { %v931_v46 = vpop.f32.mrf.mxu3 }
  0xe7   : > { %v932_v4 = vadd.f32 %v931_v46, %v903_v63 }
  0xe8   : > { %v912_v47 = vpop.f32.mrf.mxu2 }
  0xe9   : > { %v987_v48 = vpop.f32.mrf.mxu1  ;;  %v961_v12 = vadd.f32 %v960_v45, %v932_v4  ;;  %v913_v42 = vadd.f32 %v912_v47, %v884_v31 }
  0xea   : > { %v988_v0 = vadd.f32 %v987_v48, %v959_v62 }
  0xeb   : > { %v963_v49 = vpop.f32.mrf.mxu0 }
  0xee   : > { %v934_v50 = vpop.f32.mrf.mxu3 }
  0xef   : > { %v935_v25 = vadd.f32 %v934_v50, %v906_v18 }
  0xf0   : > { %v1011_v51 = vpop.f32.mrf.mxu2 }
  0xf1   : > { %v989_v52 = vpop.f32.mrf.mxu1  ;;  %v964_v34 = vadd.f32 %v963_v49, %v935_v25 }
  0xf2   : > { %v990_v19 = vadd.f32 %v989_v52, %v961_v12 }
  0xf3   : > { %v1918_v54 = vpop.f32.mrf.mxu0 }
  0xf6   : > { %v936_v56 = vpop.f32.mrf.mxu3 }
  0xf7   : > { %v937_v36 = vadd.f32 %v936_v56, %v908_v33 }
  0xf8   : > { %v1920_v57 = vpop.f32.mrf.mxu2 }
  0xf9   : > { %v992_v59 = vpop.f32.mrf.mxu1  ;;  %v966_v56 = vadd.f32 %v1918_v54, %v937_v36 }
  0xfa   : > { %v993_v46 = vadd.f32 %v992_v59, %v964_v34 }
  0xfb   : > { %v968_v60 = vpop.f32.mrf.mxu0 }
  0xfe   : > { %v939_v1 = vpop.f32.mrf.mxu3 }
  0xff   : > { %v940_v22 = vadd.f32 %v939_v1, %v911_v16 }
 0x100   : > { %v1016_v3 = vpop.f32.mrf.mxu2 }
 0x101   : > { %v1017_v5 = vadd.f32 %v1016_v3, %v988_v0  ;;  %v994_v7 = vpop.f32.mrf.mxu1  ;;  %v969_v40 = vadd.f32 %v968_v60, %v940_v22 }
 0x102   : > { %v995_v61 = vadd.f32 %v994_v7, %v966_v56 }
 0x103   : > { %v1037_v8 = vmul.f32 %v1925_v2, %v1017_v5  ;;  %v970_v9 = vpop.f32.mrf.mxu0 }
 0x105   : > { %v1049_v13 = vadd.f32 %v1931_v6, %v1037_v8 }
 0x106   : > { %v941_v20 = vpop.f32.mrf.mxu3 }
 0x107   : > { %1057 = vst [vmem:[%s1937_s22 + $0x10] sm:$0xff] %v1049_v13  ;;  %v942_v50 = vadd.f32 %v941_v20, %v913_v42 }
 0x108   : > { %v1018_v24 = vpop.f32.mrf.mxu2 }
 0x109   : > { %v1019_v26 = vadd.f32 %v1018_v24, %v990_v19  ;;  %v997_v28 = vpop.f32.mrf.mxu1  ;;  %v971_v58 = vadd.f32 %v970_v9, %v942_v50 }
 0x10a   : > { %v998_v45 = vadd.f32 %v997_v28, %v969_v40 }
 0x10b   : > { %v1038_v29 = vmul.f32 %v1925_v2, %v1019_v26  ;;  %v982_v15 = vpop.f32.mrf.mxu0 }
 0x10c   : > { %v983_v32 = vadd.f32 %v982_v15, %v954_v27 }
 0x10d   : > { %v1050_v35 = vadd.f32 %v1931_v6, %v1038_v29 }
 0x10e   : > { %v1012_v43 = vadd.f32 %v1011_v51, %v983_v32  ;;  %v1026_v48 = vpop.f32.mrf.mxu3 }
 0x10f   : > { %1058 = vst [vmem:[%s1937_s22 + $0x18] sm:$0xff] %v1050_v35  ;;  %v1027_v21 = vadd.f32 %v1026_v48, %v998_v45 }
 0x110   : > { %v1035_v30 = vmul.f32 %v1925_v2, %v1012_v43  ;;  %v1021_v44 = vpop.f32.mrf.mxu2 }
 0x111   : > { %v1022_v49 = vadd.f32 %v1021_v44, %v993_v46  ;;  %v1041_v23 = vmul.f32 %v1925_v2, %v1027_v21  ;;  %v999_v51 = vpop.f32.mrf.mxu1 }
 0x112   : > { %v1047_v52 = vadd.f32 %v1931_v6, %v1035_v30  ;;  %v1000_v37 = vadd.f32 %v999_v51, %v971_v58 }
 0x113   : > { %v1039_v39 = vmul.f32 %v1925_v2, %v1022_v49  ;;  %v984_v47 = vpop.f32.mrf.mxu0  ;;  %v1053_v53 = vadd.f32 %v1931_v6, %v1041_v23 }
 0x114   : > { %1055 = vst [vmem:[%s1937_s22] sm:$0xff] %v1047_v52  ;;  %v985_v55 = vadd.f32 %v984_v47, %v956_v38 }
 0x115   : > { %v1051_v59 = vadd.f32 %v1931_v6, %v1039_v39  ;;  %1061 = vst [vmem:[%s1937_s22 + $0x30] sm:$0xff] %v1053_v53 }
 0x116   : > { %v1014_v60 = vadd.f32 %v1920_v57, %v985_v55  ;;  %v1028_v62 = vpop.f32.mrf.mxu3 }
 0x117   : > { %1059 = vst [vmem:[%s1937_s22 + $0x20] sm:$0xff] %v1051_v59  ;;  %v1029_v1 = vadd.f32 %v1028_v62, %v1000_v37 }
 0x118   : > { %v1036_v63 = vmul.f32 %v1925_v2, %v1014_v60  ;;  %v1023_v0 = vpop.f32.mrf.mxu2 }
 0x119   : > { %v1024_v3 = vadd.f32 %v1023_v0, %v995_v61  ;;  %v1042_v54 = vmul.f32 %v1925_v2, %v1029_v1 }
 0x11a   : > { %v1048_v4 = vadd.f32 %v1931_v6, %v1036_v63 }
 0x11b   : > { %v1040_v5 = vmul.f32 %v1925_v2, %v1024_v3  ;;  %v1054_v8 = vadd.f32 %v1931_v6, %v1042_v54 }
 0x11c   : > { %1056 = vst [vmem:[%s1937_s22 + $0x8] sm:$0xff] %v1048_v4 }
 0x11d   : > { %v1052_v57 = vadd.f32 %v1931_v6, %v1040_v5  ;;  %1062 = vst [vmem:[%s1937_s22 + $0x38] sm:$0xff] %v1054_v8 }
 0x11f   : > { %1060 = vst [vmem:[%s1937_s22 + $0x28] sm:$0xff] %v1052_v57 }
 0x120 PF: > { %s14_s15 = sadd.s32 1, %s1591_s15  }
 0x121   : > { %p11_p4 = scmp.ge.s32.totalorder %s14_s15, 4  }
 0x123   :  { %13 = sbr.rel (!%p11_p4) target bundleno = 1 (0x1), region = 66 }

// kernel: rot_prediction_forward.78
= control target key start
LH: loop header
LB: loop body
LE: loop exit
PB: predicated region body
PF: predicated region fallthrough
CT: control target
= control target key end

     0   :  { %s794_s21 = smov 0   ;;  %s938_s0 = inlined_call_operand.vmem [shape: bf16[128,256], index: 0, kind: input, shape index: {}]   ;;  %s939_s1 = inlined_call_operand.vmem [shape: bf16[256,128], index: 1, kind: input, shape index: {}]   ;;  %s940_s2 = inlined_call_operand.vmem [shape: f32[1,256], index: 2, kind: input, shape index: {}]   ;;  %s941_s3 = inlined_call_operand.vmem [shape: f32[1,256], index: 3, kind: input, shape index: {}]   ;;  %s942_s4 = inlined_call_operand.vmem [shape: f32[1,128], index: 4, kind: input, shape index: {}]   ;;  %s943_s5 = inlined_call_operand.vmem [shape: f32[1,128], index: 5, kind: input, shape index: {}]   ;;  %s944_s6 = inlined_call_operand.vmem [shape: f32[128,128], index: 6, kind: output, shape index: {}]  }
   0x1 LB: > { %s632_s22 = sadd.s32 4294967295, %s757_s21   ;;  %p636_p0 = scmp.ge.s32.totalorder %s757_s21, 1  ;;  %s757_s21 = sphi %s794_s21, %s16_s21  }
   0x2   : > { %p214_p1 = scmp.lt.s32.totalorder %s757_s21, 3 }
   0x4   : > { %p215_p2 = pnand %p636_p0, %p214_p1 }
   0x5   : > { %s637_s27 = sshll.u32 (!%p215_p2), %s632_s22, 3 }
   0x6   : > { %218 = sbr.rel (%p215_p2) target bundleno = 209 (0xd1), region = 44  ;;  %p246_p3 = scmp.lt.s32.totalorder (!%p215_p2), %s637_s27, 15 }
   0xb   : > { %v716_v0 = vld [vmem:[%s939_s1 + $0x38] sm:$0xff]  ;;  %v715_v2 = vld [vmem:[%s939_s1 + $0x30] sm:$0xff]  ;;  %s946_s27 = smov (!%p246_p3, %s637_s27), 15  ;;  %v714_v4 = vld [vmem:[%s939_s1 + $0x28] sm:$0xff] }
   0xc   : > { %v724_v1 = vld [vmem:[%s939_s1 + $0x78] sm:$0xff]  ;;  %478 = vmatpush.bf16.msra.mxu0 %v716_v0  ;;  %725 = vmatpush.bf16.msra.mxu2 %v716_v0  ;;  %v723_v3 = vld [vmem:[%s939_s1 + $0x70] sm:$0xff]  ;;  %s708_s8 = sshll.u32 %s946_s27, 3  ;;  %v722_v5 = vld [vmem:[%s939_s1 + $0x68] sm:$0xff] }
   0xd   : > { %507 = vmatpush.bf16.msra.mxu1 %v724_v1  ;;  %733 = vmatpush.bf16.msra.mxu3 %v724_v1  ;;  %s825_s13 = scalar_lea.vmem %s938_s0, %s708_s8  ;;  %v282_v8 = vld [vmem:[%s940_s2] sm:$0x3]  ;;  %v712_v22 = vld [vmem:[%s939_s1 + $0x18] sm:$0xff]  ;;  %v711_v34 = vld [vmem:[%s939_s1 + $0x10] sm:$0xff]  ;;  %s925_s26 = scalar_lea.vmem %s944_s6, %s708_s8 }
   0xe   : > { %v258_v6 = vld [vmem:[%s825_s13] sm:$0xff]  ;;  %v259_v7 = vld [vmem:[%s825_s13 + $0x8] sm:$0xff]  ;;  %v843_v13 = vperm.slane %v282_v8, 0  ;;  %v848_v21 = vperm.slane %v282_v8, 1  ;;  %v720_v25 = vld [vmem:[%s939_s1 + $0x58] sm:$0xff] }
   0xf   : > { %v262_v9 = vld [vmem:[%s825_s13 + $0x20] sm:$0xff]  ;;  %v263_v10 = vld [vmem:[%s825_s13 + $0x28] sm:$0xff]  ;;  %v266_v14 = vunpack.c.l.bf16 %v258_v6  ;;  %v268_v15 = vunpack.c.l.bf16 %v259_v7  ;;  %v267_v19 = vunpack.c.h.bf16 %v258_v6  ;;  %v269_v20 = vunpack.c.h.bf16 %v259_v7  ;;  %v719_v37 = vld [vmem:[%s939_s1 + $0x50] sm:$0xff] }
  0x10   : > { %479 = vmatpush.bf16.msra.mxu0 %v715_v2  ;;  %726 = vmatpush.bf16.msra.mxu2 %v715_v2  ;;  %v713_v11 = vld [vmem:[%s939_s1 + $0x20] sm:$0xff]  ;;  %v274_v17 = vunpack.c.l.bf16 %v262_v9  ;;  %v276_v18 = vunpack.c.l.bf16 %v263_v10  ;;  %v275_v23 = vunpack.c.h.bf16 %v262_v9  ;;  %v277_v24 = vunpack.c.h.bf16 %v263_v10  ;;  %v710_v44 = vld [vmem:[%s939_s1 + $0x8] sm:$0xff]  ;;  %v260_v54 = vld [vmem:[%s825_s13 + $0x10] sm:$0xff] }
  0x11   : > { %508 = vmatpush.bf16.msra.mxu1 %v723_v3  ;;  %734 = vmatpush.bf16.msra.mxu3 %v723_v3  ;;  %v721_v12 = vld [vmem:[%s939_s1 + $0x60] sm:$0xff]  ;;  %v288_v27 = vmul.f32 %v843_v13, %v266_v14  ;;  %v290_v28 = vmul.f32 %v843_v13, %v268_v15  ;;  %v289_v31 = vmul.f32 %v848_v21, %v267_v19  ;;  %v718_v47 = vld [vmem:[%s939_s1 + $0x48] sm:$0xff]  ;;  %v261_v55 = vld [vmem:[%s825_s13 + $0x18] sm:$0xff]  ;;  %v270_v0 = vunpack.c.l.bf16 %v260_v54 }
  0x12   : > { %v304_v16 = vld [vmem:[%s941_s3] sm:$0x3]  ;;  %v296_v29 = vmul.f32 %v843_v13, %v274_v17  ;;  %v298_v30 = vmul.f32 %v843_v13, %v276_v18  ;;  %v291_v32 = vmul.f32 %v848_v21, %v269_v20  ;;  %v297_v35 = vmul.f32 %v848_v21, %v275_v23  ;;  %v264_v59 = vld [vmem:[%s825_s13 + $0x30] sm:$0xff]  ;;  %v265_v60 = vld [vmem:[%s825_s13 + $0x38] sm:$0xff] }
  0x13   : > { %v856_v26 = vperm.slane %v304_v16, 0  ;;  %v864_v33 = vperm.slane %v304_v16, 1  ;;  %v299_v36 = vmul.f32 %v848_v21, %v277_v24  ;;  %v709_v56 = vld [vmem:[%s939_s1] sm:$0xff]  ;;  %v272_v1 = vunpack.c.l.bf16 %v261_v55 }
  0x14   : > { %480 = vmatpush.bf16.msra.mxu0 %v714_v4  ;;  %727 = vmatpush.bf16.msra.mxu2 %v714_v4  ;;  %v717_v61 = vld [vmem:[%s939_s1 + $0x40] sm:$0xff]  ;;  %v278_v3 = vunpack.c.l.bf16 %v264_v59  ;;  %v280_v4 = vunpack.c.l.bf16 %v265_v60  ;;  %v273_v7 = vunpack.c.h.bf16 %v261_v55  ;;  %v279_v8 = vunpack.c.h.bf16 %v264_v59 }
  0x15   : > { %509 = vmatpush.bf16.msra.mxu1 %v722_v5  ;;  %735 = vmatpush.bf16.msra.mxu3 %v722_v5  ;;  %v310_v38 = vadd.f32 %v856_v26, %v288_v27  ;;  %v312_v39 = vadd.f32 %v856_v26, %v290_v28  ;;  %v318_v40 = vadd.f32 %v856_v26, %v296_v29  ;;  %v271_v5 = vunpack.c.h.bf16 %v260_v54 }
  0x16   : > { %v320_v41 = vadd.f32 %v856_v26, %v298_v30  ;;  %v311_v42 = vadd.f32 %v864_v33, %v289_v31  ;;  %v313_v43 = vadd.f32 %v864_v33, %v291_v32  ;;  %v319_v45 = vadd.f32 %v864_v33, %v297_v35 }
  0x17   : > { %v321_v46 = vadd.f32 %v864_v33, %v299_v36  ;;  %v326_v48 = vmax.f32 %v310_v38, 0.0  ;;  %v328_v49 = vmax.f32 %v312_v39, 0.0  ;;  %v334_v50 = vmax.f32 %v318_v40, 0.0 }
  0x18   : > { %481 = vmatpush.bf16.msra.mxu0 %v713_v11  ;;  %728 = vmatpush.bf16.msra.mxu2 %v713_v11  ;;  %v336_v51 = vmax.f32 %v320_v41, 0.0  ;;  %v327_v52 = vmax.f32 %v311_v42, 0.0  ;;  %v329_v53 = vmax.f32 %v313_v43, 0.0  ;;  %v335_v57 = vmax.f32 %v319_v45, 0.0  ;;  %v750_v42 = vld [vmem:[%s943_s5] ss:$0 sm:$0xff] }
  0x19   : > { %510 = vmatpush.bf16.msra.mxu1 %v721_v12  ;;  %736 = vmatpush.bf16.msra.mxu3 %v721_v12  ;;  %v337_v58 = vmax.f32 %v321_v46, 0.0  ;;  %v342_v62 = vpack.c.bf16 %v328_v49, %v326_v48  ;;  %v281_v9 = vunpack.c.h.bf16 %v265_v60  ;;  %v292_v10 = vmul.f32 %v843_v13, %v270_v0 }
  0x1a   : > { %v346_v63 = vpack.c.bf16 %v336_v51, %v334_v50  ;;  %v343_v2 = vpack.c.bf16 %v329_v53, %v327_v52  ;;  %v294_v11 = vmul.f32 %v843_v13, %v272_v1  ;;  %v300_v12 = vmul.f32 %v843_v13, %v278_v3 }
  0x1b   : > { %v347_v6 = vpack.c.bf16 %v337_v58, %v335_v57  ;;  %v302_v14 = vmul.f32 %v843_v13, %v280_v4  ;;  %v293_v15 = vmul.f32 %v848_v21, %v271_v5  ;;  %v295_v16 = vmul.f32 %v848_v21, %v273_v7 }
  0x1c   : > { %482 = vmatpush.bf16.msra.mxu0 %v712_v22  ;;  %729 = vmatpush.bf16.msra.mxu2 %v712_v22  ;;  %v301_v17 = vmul.f32 %v848_v21, %v279_v8  ;;  %v303_v18 = vmul.f32 %v848_v21, %v281_v9  ;;  %v314_v19 = vadd.f32 %v856_v26, %v292_v10 }
  0x1d   : > { %511 = vmatpush.bf16.msra.mxu1 %v720_v25  ;;  %737 = vmatpush.bf16.msra.mxu3 %v720_v25  ;;  %v316_v20 = vadd.f32 %v856_v26, %v294_v11  ;;  %v322_v22 = vadd.f32 %v856_v26, %v300_v12  ;;  %v324_v23 = vadd.f32 %v856_v26, %v302_v14 }
  0x1e   : > { %v315_v13 = vadd.f32 %v864_v33, %v293_v15  ;;  %v317_v24 = vadd.f32 %v864_v33, %v295_v16  ;;  %v323_v25 = vadd.f32 %v864_v33, %v301_v17  ;;  %v325_v27 = vadd.f32 %v864_v33, %v303_v18  ;;  %v749_v33 = vld [vmem:[%s942_s4] ss:$0 sm:$0xff] }
  0x1f   : > { %v330_v28 = vmax.f32 %v314_v19, 0.0  ;;  %v332_v29 = vmax.f32 %v316_v20, 0.0  ;;  %v338_v30 = vmax.f32 %v322_v22, 0.0  ;;  %v340_v21 = vmax.f32 %v324_v23, 0.0 }
  0x20   : > { %483 = vmatpush.bf16.msra.mxu0 %v711_v34  ;;  %730 = vmatpush.bf16.msra.mxu2 %v711_v34  ;;  %v331_v31 = vmax.f32 %v315_v13, 0.0  ;;  %v333_v32 = vmax.f32 %v317_v24, 0.0  ;;  %v339_v34 = vmax.f32 %v323_v25, 0.0  ;;  %v341_v35 = vmax.f32 %v325_v27, 0.0 }
  0x21   : > { %512 = vmatpush.bf16.msra.mxu1 %v719_v37  ;;  %738 = vmatpush.bf16.msra.mxu3 %v719_v37  ;;  %v344_v36 = vpack.c.bf16 %v332_v29, %v330_v28  ;;  %v348_v37 = vpack.c.bf16 %v340_v21, %v338_v30 }
  0x22   : > { %v345_v26 = vpack.c.bf16 %v333_v32, %v331_v31  ;;  %v349_v38 = vpack.c.bf16 %v341_v35, %v339_v34 }
  0x24   : > { %484 = vmatpush.bf16.msra.mxu0 %v710_v44  ;;  %731 = vmatpush.bf16.msra.mxu2 %v710_v44 }
  0x25   : > { %513 = vmatpush.bf16.msra.mxu1 %v718_v47  ;;  %739 = vmatpush.bf16.msra.mxu3 %v718_v47 }
  0x28   : > { %485 = vmatpush.bf16.msra.mxu0 %v709_v56  ;;  %732 = vmatpush.bf16.msra.mxu2 %v709_v56 }
  0x29   : > { %514 = vmatpush.bf16.msra.mxu1 %v717_v61  ;;  %740 = vmatpush.bf16.msra.mxu3 %v717_v61 }
  0x2b   : > { %486 = vmatmul.bf16.vlgmr.msra.gmra.mxu0 %v342_v62  ;;  %496 = vmatmul.bf16.vlgmr.msra.gmra.mxu2 %v346_v63 }
  0x2c   : > { %515 = vmatmul.bf16.vlgmr.msra.gmra.mxu1 %v343_v2  ;;  %525 = vmatmul.bf16.vlgmr.msra.gmra.mxu3 %v347_v6 }
  0x3b   : > { %491 = vmatmul.bf16.gmra.mxu0 %v344_v36  ;;  %501 = vmatmul.bf16.gmra.mxu2 %v348_v37 }
  0x3c   : > { %520 = vmatmul.bf16.gmra.mxu1 %v345_v26  ;;  %530 = vmatmul.bf16.gmra.mxu3 %v349_v38 }
  0xa8   : > { %v487_v39 = vpop.f32.mrf.mxu0 }
  0xa9   : > { %v516_v40 = vpop.f32.mrf.mxu1 }
  0xaa   : > { %v517_v41 = vadd.f32 %v516_v40, %v487_v39 }
  0xac   : > { %v540_v43 = vmul.f32 %v749_v33, %v517_v41 }
  0xae   : > { %v552_v44 = vadd.f32 %v750_v42, %v540_v43  ;;  %v497_v45 = vpop.f32.mrf.mxu2 }
  0xaf   : > { %v526_v46 = vpop.f32.mrf.mxu3 }
  0xb0   : > { %v560_v47 = vmax.f32 %v552_v44, 0.0  ;;  %v527_v48 = vadd.f32 %v526_v46, %v497_v45  ;;  %v489_v49 = vpop.f32.mrf.mxu0 }
  0xb1   : > { %v518_v50 = vpop.f32.mrf.mxu1 }
  0xb2   : > { %568 = vst [vmem:[%s925_s26] sm:$0xff] %v560_v47  ;;  %v544_v51 = vmul.f32 %v749_v33, %v527_v48  ;;  %v519_v52 = vadd.f32 %v518_v50, %v489_v49 }
  0xb4   : > { %v556_v53 = vadd.f32 %v750_v42, %v544_v51  ;;  %v541_v54 = vmul.f32 %v749_v33, %v519_v52 }
  0xb6   : > { %v564_v55 = vmax.f32 %v556_v53, 0.0  ;;  %v553_v56 = vadd.f32 %v750_v42, %v541_v54  ;;  %v499_v57 = vpop.f32.mrf.mxu2 }
  0xb7   : > { %v528_v58 = vpop.f32.mrf.mxu3 }
  0xb8   : > { %572 = vst [vmem:[%s925_s26 + $0x20] sm:$0xff] %v564_v55  ;;  %v561_v59 = vmax.f32 %v553_v56, 0.0  ;;  %v529_v60 = vadd.f32 %v528_v58, %v499_v57  ;;  %v492_v61 = vpop.f32.mrf.mxu0 }
  0xb9   : > { %v521_v62 = vpop.f32.mrf.mxu1 }
  0xba   : > { %569 = vst [vmem:[%s925_s26 + $0x8] sm:$0xff] %v561_v59  ;;  %v545_v63 = vmul.f32 %v749_v33, %v529_v60  ;;  %v522_v0 = vadd.f32 %v521_v62, %v492_v61 }
  0xbc   : > { %v557_v1 = vadd.f32 %v750_v42, %v545_v63  ;;  %v542_v2 = vmul.f32 %v749_v33, %v522_v0 }
  0xbe   : > { %v565_v3 = vmax.f32 %v557_v1, 0.0  ;;  %v554_v4 = vadd.f32 %v750_v42, %v542_v2  ;;  %v502_v5 = vpop.f32.mrf.mxu2 }
  0xbf   : > { %v531_v6 = vpop.f32.mrf.mxu3 }
  0xc0   : > { %573 = vst [vmem:[%s925_s26 + $0x28] sm:$0xff] %v565_v3  ;;  %v562_v7 = vmax.f32 %v554_v4, 0.0  ;;  %v532_v8 = vadd.f32 %v531_v6, %v502_v5  ;;  %v494_v9 = vpop.f32.mrf.mxu0 }
  0xc1   : > { %v523_v10 = vpop.f32.mrf.mxu1 }
  0xc2   : > { %570 = vst [vmem:[%s925_s26 + $0x10] sm:$0xff] %v562_v7  ;;  %v546_v11 = vmul.f32 %v749_v33, %v532_v8  ;;  %v524_v12 = vadd.f32 %v523_v10, %v494_v9 }
  0xc4   : > { %v558_v14 = vadd.f32 %v750_v42, %v546_v11  ;;  %v543_v15 = vmul.f32 %v749_v33, %v524_v12 }
  0xc6   : > { %v566_v16 = vmax.f32 %v558_v14, 0.0  ;;  %v555_v17 = vadd.f32 %v750_v42, %v543_v15  ;;  %v504_v18 = vpop.f32.mrf.mxu2 }
  0xc7   : > { %v533_v19 = vpop.f32.mrf.mxu3 }
  0xc8   : > { %574 = vst [vmem:[%s925_s26 + $0x30] sm:$0xff] %v566_v16  ;;  %v563_v20 = vmax.f32 %v555_v17, 0.0  ;;  %v534_v22 = vadd.f32 %v533_v19, %v504_v18 }
  0xca   : > { %571 = vst [vmem:[%s925_s26 + $0x18] sm:$0xff] %v563_v20  ;;  %v547_v23 = vmul.f32 %v749_v33, %v534_v22 }
  0xcc   : > { %v559_v13 = vadd.f32 %v750_v42, %v547_v23 }
  0xce   : > { %v567_v24 = vmax.f32 %v559_v13, 0.0 }
  0xd0   : > { %575 = vst [vmem:[%s925_s26 + $0x38] sm:$0xff] %v567_v24 }
  0xd1 PF: > { %s16_s21 = sadd.s32 1, %s757_s21  }
  0xd2   : > { %p13_p4 = scmp.ge.s32.totalorder %s16_s21, 4  }
  0xd4   :  { %15 = sbr.rel (!%p13_p4) target bundleno = 1 (0x1), region = 74 }

// kernel: rot_prediction_forward.88
= control target key start
LH: loop header
LB: loop body
LE: loop exit
PB: predicated region body
PF: predicated region fallthrough
CT: control target
= control target key end

     0   :  { %s966_s21 = smov 0   ;;  %s1187_s0 = inlined_call_operand.vmem [shape: bf16[128,384], index: 0, kind: input, shape index: {}]   ;;  %s1188_s1 = inlined_call_operand.vmem [shape: bf16[384,128], index: 1, kind: input, shape index: {}]   ;;  %s1189_s2 = inlined_call_operand.vmem [shape: f32[1,384], index: 2, kind: input, shape index: {}]   ;;  %s1190_s3 = inlined_call_operand.vmem [shape: f32[1,384], index: 3, kind: input, shape index: {}]   ;;  %s1191_s4 = inlined_call_operand.vmem [shape: f32[1,128], index: 4, kind: input, shape index: {}]   ;;  %s1192_s5 = inlined_call_operand.vmem [shape: f32[1,128], index: 5, kind: input, shape index: {}]   ;;  %s1193_s6 = inlined_call_operand.vmem [shape: f32[128,128], index: 6, kind: output, shape index: {}]  }
   0x1 LB: > { %s773_s22 = sadd.s32 4294967295, %s929_s21   ;;  %p777_p0 = scmp.ge.s32.totalorder %s929_s21, 1  ;;  %s929_s21 = sphi %s966_s21, %s16_s21  }
   0x2   : > { %p214_p1 = scmp.lt.s32.totalorder %s929_s21, 3 }
   0x4   : > { %p215_p2 = pnand %p777_p0, %p214_p1 }
   0x5   : > { %s778_s29 = sshll.u32 (!%p215_p2), %s773_s22, 3 }
   0x6   : > { %218 = sbr.rel (%p215_p2) target bundleno = 242 (0xf2), region = 44  ;;  %p246_p3 = scmp.lt.s32.totalorder (!%p215_p2), %s778_s29, 15 }
   0xb   : > { %v887_v0 = vld [vmem:[%s1188_s1 + $0x38] sm:$0xff]  ;;  %v886_v3 = vld [vmem:[%s1188_s1 + $0x30] sm:$0xff]  ;;  %s1195_s29 = smov (!%p246_p3, %s778_s29), 15  ;;  %v885_v6 = vld [vmem:[%s1188_s1 + $0x28] sm:$0xff] }
   0xc   : > { %v895_v1 = vld [vmem:[%s1188_s1 + $0x78] sm:$0xff]  ;;  %590 = vmatpush.bf16.msra.mxu0 %v887_v0  ;;  %v894_v4 = vld [vmem:[%s1188_s1 + $0x70] sm:$0xff]  ;;  %904 = vmatpush.bf16.msra.mxu3 %v887_v0  ;;  %s912_s12 = smul.u32 12, %s1195_s29  ;;  %v893_v7 = vld [vmem:[%s1188_s1 + $0x68] sm:$0xff]  ;;  %s781_s16 = sshll.u32 %s1195_s29, 3 }
   0xd   : > { %v903_v2 = vld [vmem:[%s1188_s1 + $0xb8] sm:$0xff]  ;;  %619 = vmatpush.bf16.msra.mxu1 %v895_v1  ;;  %v902_v5 = vld [vmem:[%s1188_s1 + $0xb0] sm:$0xff]  ;;  %v901_v8 = vld [vmem:[%s1188_s1 + $0xa8] sm:$0xff]  ;;  %s1160_s19 = scalar_lea.vmem %s1193_s6, %s781_s16 }
   0xe   : > { %648 = vmatpush.bf16.msra.mxu2 %v903_v2  ;;  %s1007_s22 = scalar_lea.vmem %s1187_s0, %s912_s12  ;;  %v884_v9 = vld [vmem:[%s1188_s1 + $0x20] sm:$0xff]  ;;  %v883_v28 = vld [vmem:[%s1188_s1 + $0x18] sm:$0xff]  ;;  %v882_v42 = vld [vmem:[%s1188_s1 + $0x10] sm:$0xff] }
   0xf   : > { %v892_v10 = vld [vmem:[%s1188_s1 + $0x60] sm:$0xff]  ;;  %v260_v12 = vld [vmem:[%s1007_s22 + $0xc] sm:$0xff]  ;;  %v259_v15 = vld [vmem:[%s1007_s22 + $0x8] sm:$0xf] }
  0x10   : > { %591 = vmatpush.bf16.msra.mxu0 %v886_v3  ;;  %905 = vmatpush.bf16.msra.mxu3 %v886_v3  ;;  %v258_v11 = vld [vmem:[%s1007_s22] sm:$0xff]  ;;  %v1025_v16 = vld [vmem:[%s1007_s22 + $0x18] sm:$0xff]  ;;  %v261_v17 = vld [vmem:[%s1007_s22 + $0x14] sm:$0xf]  ;;  %v277_v20 = vunpack.c.l.bf16 %v260_v12  ;;  %v278_v24 = vunpack.c.h.bf16 %v260_v12  ;;  %v276_v26 = vunpack.c.l.bf16 %v259_v15 }
  0x11   : > { %620 = vmatpush.bf16.msra.mxu1 %v894_v4  ;;  %v298_v13 = vld [vmem:[%s1189_s2] sm:$0x7]  ;;  %v1029_v18 = vld [vmem:[%s1007_s22 + $0x24] sm:$0xff]  ;;  %v274_v19 = vunpack.c.l.bf16 %v258_v11  ;;  %v275_v22 = vunpack.c.h.bf16 %v258_v11  ;;  %v891_v29 = vld [vmem:[%s1188_s1 + $0x58] sm:$0xff]  ;;  %v279_v30 = vunpack.c.l.bf16 %v261_v17  ;;  %v280_v31 = vunpack.c.l.bf16 %v1025_v16 }
  0x12   : > { %649 = vmatpush.bf16.msra.mxu2 %v902_v5  ;;  %v900_v14 = vld [vmem:[%s1188_s1 + $0xa0] sm:$0xff]  ;;  %v1031_v21 = vperm.slane %v298_v13, 0  ;;  %v1036_v25 = vperm.slane %v298_v13, 1  ;;  %v1038_v27 = vperm.slane %v298_v13, 2  ;;  %v283_v32 = vunpack.c.l.bf16 %v1029_v18  ;;  %v899_v33 = vld [vmem:[%s1188_s1 + $0x98] sm:$0xff]  ;;  %v890_v43 = vld [vmem:[%s1188_s1 + $0x50] sm:$0xff] }
  0x13   : > { %v330_v23 = vld [vmem:[%s1190_s3] sm:$0x7]  ;;  %v898_v47 = vld [vmem:[%s1188_s1 + $0x90] sm:$0xff]  ;;  %v881_v53 = vld [vmem:[%s1188_s1 + $0x8] sm:$0xff]  ;;  %v281_v11 = vunpack.c.h.bf16 %v1025_v16  ;;  %v284_v13 = vunpack.c.h.bf16 %v1029_v18 }
  0x14   : > { %592 = vmatpush.bf16.msra.mxu0 %v885_v6  ;;  %906 = vmatpush.bf16.msra.mxu3 %v885_v6  ;;  %v306_v34 = vmul.f32 %v1031_v21, %v274_v19  ;;  %v309_v35 = vmul.f32 %v1031_v21, %v277_v20  ;;  %v1053_v36 = vperm.slane %v330_v23, 0  ;;  %v1055_v37 = vperm.slane %v330_v23, 1  ;;  %v889_v54 = vld [vmem:[%s1188_s1 + $0x48] sm:$0xff]  ;;  %v880_v61 = vld [vmem:[%s1188_s1] sm:$0xff] }
  0x15   : > { %621 = vmatpush.bf16.msra.mxu1 %v893_v7  ;;  %v307_v38 = vmul.f32 %v1036_v25, %v275_v22  ;;  %v310_v39 = vmul.f32 %v1036_v25, %v278_v24  ;;  %v308_v40 = vmul.f32 %v1038_v27, %v276_v26  ;;  %v1060_v41 = vperm.slane %v330_v23, 2  ;;  %v897_v58 = vld [vmem:[%s1188_s1 + $0x88] sm:$0xff]  ;;  %v888_v62 = vld [vmem:[%s1188_s1 + $0x40] sm:$0xff] }
  0x16   : > { %650 = vmatpush.bf16.msra.mxu2 %v901_v8  ;;  %v311_v44 = vmul.f32 %v1038_v27, %v279_v30  ;;  %v312_v45 = vmul.f32 %v1031_v21, %v280_v31  ;;  %v315_v46 = vmul.f32 %v1031_v21, %v283_v32  ;;  %v338_v48 = vadd.f32 %v1053_v36, %v306_v34  ;;  %v263_v1 = vld [vmem:[%s1007_s22 + $0x20] sm:$0xf]  ;;  %v265_v6 = vld [vmem:[%s1007_s22 + $0x2c] sm:$0xf]  ;;  %v266_v8 = vld [vmem:[%s1007_s22 + $0x30] sm:$0xff] }
  0x17   : > { %v341_v49 = vadd.f32 %v1053_v36, %v309_v35  ;;  %v339_v50 = vadd.f32 %v1055_v37, %v307_v38  ;;  %v342_v51 = vadd.f32 %v1055_v37, %v310_v39  ;;  %v340_v52 = vadd.f32 %v1060_v41, %v308_v40  ;;  %v896_v7 = vld [vmem:[%s1188_s1 + $0x80] sm:$0xff]  ;;  %v267_v39 = vld [vmem:[%s1007_s22 + $0x38] sm:$0xf] }
  0x18   : > { %593 = vmatpush.bf16.msra.mxu0 %v884_v9  ;;  %907 = vmatpush.bf16.msra.mxu3 %v884_v9  ;;  %v343_v55 = vadd.f32 %v1060_v41, %v311_v44  ;;  %v344_v56 = vadd.f32 %v1053_v36, %v312_v45  ;;  %v347_v57 = vadd.f32 %v1053_v36, %v315_v46  ;;  %v362_v59 = vmax.f32 %v338_v48, 0.0  ;;  %v268_v9 = vld [vmem:[%s1007_s22 + $0x3c] sm:$0xff]  ;;  %v269_v45 = vld [vmem:[%s1007_s22 + $0x44] sm:$0xf]  ;;  %v270_v46 = vld [vmem:[%s1007_s22 + $0x48] sm:$0xff] }
  0x19   : > { %622 = vmatpush.bf16.msra.mxu1 %v892_v10  ;;  %v365_v60 = vmax.f32 %v341_v49, 0.0  ;;  %v363_v63 = vmax.f32 %v339_v50, 0.0  ;;  %v366_v0 = vmax.f32 %v342_v51, 0.0  ;;  %v364_v2 = vmax.f32 %v340_v52, 0.0 }
  0x1a   : > { %651 = vmatpush.bf16.msra.mxu2 %v900_v14  ;;  %v367_v3 = vmax.f32 %v343_v55, 0.0  ;;  %v368_v4 = vmax.f32 %v344_v56, 0.0  ;;  %v371_v5 = vmax.f32 %v347_v57, 0.0  ;;  %v282_v14 = vunpack.c.l.bf16 %v263_v1 }
  0x1b   : > { %v386_v10 = vpack.c.bf16 %v365_v60, %v362_v59  ;;  %v387_v12 = vpack.c.bf16 %v366_v0, %v363_v63  ;;  %v285_v15 = vunpack.c.l.bf16 %v265_v6  ;;  %v286_v20 = vunpack.c.l.bf16 %v266_v8 }
  0x1c   : > { %594 = vmatpush.bf16.msra.mxu0 %v883_v28  ;;  %908 = vmatpush.bf16.msra.mxu3 %v883_v28  ;;  %v388_v17 = vpack.c.bf16 %v367_v3, %v364_v2  ;;  %v389_v19 = vpack.c.bf16 %v371_v5, %v368_v4  ;;  %v289_v22 = vunpack.c.l.bf16 %v268_v9  ;;  %v313_v23 = vmul.f32 %v1036_v25, %v281_v11  ;;  %v271_v11 = vld [vmem:[%s1007_s22 + $0x50] sm:$0xf] }
  0x1d   : > { %623 = vmatpush.bf16.msra.mxu1 %v891_v29  ;;  %v316_v16 = vmul.f32 %v1036_v25, %v284_v13  ;;  %v314_v24 = vmul.f32 %v1038_v27, %v282_v14  ;;  %v317_v18 = vmul.f32 %v1038_v27, %v285_v15  ;;  %v318_v26 = vmul.f32 %v1031_v21, %v286_v20 }
  0x1e   : > { %652 = vmatpush.bf16.msra.mxu2 %v899_v33  ;;  %v321_v28 = vmul.f32 %v1031_v21, %v289_v22  ;;  %v345_v29 = vadd.f32 %v1055_v37, %v313_v23  ;;  %v287_v48 = vunpack.c.h.bf16 %v266_v8  ;;  %v290_v50 = vunpack.c.h.bf16 %v268_v9 }
  0x1f   : > { %v348_v30 = vadd.f32 %v1055_v37, %v316_v16  ;;  %v346_v31 = vadd.f32 %v1060_v41, %v314_v24  ;;  %v349_v32 = vadd.f32 %v1060_v41, %v317_v18  ;;  %v350_v33 = vadd.f32 %v1053_v36, %v318_v26 }
  0x20   : > { %595 = vmatpush.bf16.msra.mxu0 %v882_v42  ;;  %909 = vmatpush.bf16.msra.mxu3 %v882_v42  ;;  %v353_v34 = vadd.f32 %v1053_v36, %v321_v28  ;;  %v369_v35 = vmax.f32 %v345_v29, 0.0  ;;  %v288_v51 = vunpack.c.l.bf16 %v267_v39  ;;  %v291_v52 = vunpack.c.l.bf16 %v269_v45 }
  0x21   : > { %624 = vmatpush.bf16.msra.mxu1 %v890_v43  ;;  %v372_v38 = vmax.f32 %v348_v30, 0.0  ;;  %v370_v40 = vmax.f32 %v346_v31, 0.0  ;;  %v373_v42 = vmax.f32 %v349_v32, 0.0  ;;  %v374_v43 = vmax.f32 %v350_v33, 0.0 }
  0x22   : > { %653 = vmatpush.bf16.msra.mxu2 %v898_v47  ;;  %v377_v44 = vmax.f32 %v353_v34, 0.0  ;;  %v272_v47 = vld [vmem:[%s1007_s22 + $0x54] sm:$0xff]  ;;  %v292_v55 = vunpack.c.l.bf16 %v270_v46  ;;  %v319_v57 = vmul.f32 %v1036_v25, %v287_v48  ;;  %v320_v59 = vmul.f32 %v1038_v27, %v288_v51 }
  0x23   : > { %v390_v49 = vpack.c.bf16 %v372_v38, %v369_v35  ;;  %v295_v56 = vunpack.c.l.bf16 %v272_v47  ;;  %v323_v60 = vmul.f32 %v1038_v27, %v291_v52  ;;  %v293_v13 = vunpack.c.h.bf16 %v270_v46 }
  0x24   : > { %596 = vmatpush.bf16.msra.mxu0 %v881_v53  ;;  %910 = vmatpush.bf16.msra.mxu3 %v881_v53  ;;  %v391_v53 = vpack.c.bf16 %v373_v42, %v370_v40  ;;  %v351_v63 = vadd.f32 %v1055_v37, %v319_v57  ;;  %v352_v1 = vadd.f32 %v1060_v41, %v320_v59  ;;  %v296_v14 = vunpack.c.h.bf16 %v272_v47 }
  0x25   : > { %625 = vmatpush.bf16.msra.mxu1 %v889_v54  ;;  %v392_v54 = vpack.c.bf16 %v377_v44, %v374_v43  ;;  %v355_v2 = vadd.f32 %v1060_v41, %v323_v60  ;;  %v325_v22 = vmul.f32 %v1036_v25, %v293_v13 }
  0x26   : > { %654 = vmatpush.bf16.msra.mxu2 %v897_v58  ;;  %v322_v58 = vmul.f32 %v1036_v25, %v290_v50  ;;  %v375_v5 = vmax.f32 %v351_v63, 0.0 }
  0x27   : > { %v379_v8 = vmax.f32 %v355_v2, 0.0  ;;  %v357_v24 = vadd.f32 %v1055_v37, %v325_v22 }
  0x28   : > { %597 = vmatpush.bf16.msra.mxu0 %v880_v61  ;;  %911 = vmatpush.bf16.msra.mxu3 %v880_v61  ;;  %v324_v61 = vmul.f32 %v1031_v21, %v292_v55  ;;  %v354_v0 = vadd.f32 %v1055_v37, %v322_v58 }
  0x29   : > { %626 = vmatpush.bf16.msra.mxu1 %v888_v62  ;;  %v327_v62 = vmul.f32 %v1031_v21, %v295_v56  ;;  %v273_v21 = vld [vmem:[%s1007_s22 + $0x5c] sm:$0xf]  ;;  %v381_v29 = vmax.f32 %v357_v24, 0.0 }
  0x2a   : > { %655 = vmatpush.bf16.msra.mxu2 %v896_v7  ;;  %v356_v3 = vadd.f32 %v1053_v36, %v324_v61  ;;  %v378_v6 = vmax.f32 %v354_v0, 0.0  ;;  %v376_v7 = vmax.f32 %v352_v1, 0.0  ;;  %v297_v20 = vunpack.c.l.bf16 %v273_v21 }
  0x2b   : > { %598 = vmatmul.bf16.vlgmr.msra.gmra.mxu0 %v386_v10  ;;  %603 = vmatmul.bf16.vlgmr.msra.gmra.mxu3 %v389_v19  ;;  %v359_v4 = vadd.f32 %v1053_v36, %v327_v62  ;;  %v294_v19 = vunpack.c.l.bf16 %v271_v11  ;;  %v328_v36 = vmul.f32 %v1036_v25, %v296_v14 }
  0x2c   : > { %627 = vmatmul.bf16.vlgmr.msra.gmra.mxu1 %v387_v12  ;;  %v380_v9 = vmax.f32 %v356_v3, 0.0  ;;  %v393_v12 = vpack.c.bf16 %v378_v6, %v375_v5  ;;  %v394_v15 = vpack.c.bf16 %v379_v8, %v376_v7  ;;  %v329_v16 = vmul.f32 %v1038_v27, %v297_v20 }
  0x2d   : > { %656 = vmatmul.bf16.vlgmr.msra.gmra.mxu2 %v388_v17  ;;  %v383_v10 = vmax.f32 %v359_v4, 0.0  ;;  %v326_v23 = vmul.f32 %v1038_v27, %v294_v19  ;;  %v360_v18 = vadd.f32 %v1055_v37, %v328_v36  ;;  %v1147_v37 = vld [vmem:[%s1191_s4] ss:$0 sm:$0xff] }
  0x2e   : > { %v361_v28 = vadd.f32 %v1060_v41, %v329_v16 }
  0x2f   : > { %v395_v17 = vpack.c.bf16 %v383_v10, %v380_v9  ;;  %v358_v26 = vadd.f32 %v1060_v41, %v326_v23  ;;  %v384_v30 = vmax.f32 %v360_v18, 0.0  ;;  %v1152_v41 = vld [vmem:[%s1192_s5] ss:$0 sm:$0xff] }
  0x30   : > { %v385_v32 = vmax.f32 %v361_v28, 0.0 }
  0x31   : > { %v382_v31 = vmax.f32 %v358_v26, 0.0  ;;  %v396_v25 = vpack.c.bf16 %v384_v30, %v381_v29 }
  0x33   : > { %v397_v33 = vpack.c.bf16 %v385_v32, %v382_v31 }
  0x3b   : > { %608 = vmatmul.bf16.gmra.mxu3 %v392_v54 }
  0x3c   : > { %632 = vmatmul.bf16.gmra.mxu1 %v390_v49 }
  0x3d   : > { %661 = vmatmul.bf16.gmra.mxu2 %v391_v53 }
  0x4b   : > { %613 = vmatmul.bf16.gmra.mxu3 %v395_v17 }
  0x4c   : > { %637 = vmatmul.bf16.gmra.mxu1 %v393_v12 }
  0x4d   : > { %666 = vmatmul.bf16.gmra.mxu2 %v394_v15 }
  0x5c   : > { %642 = vmatmul.bf16.gmra.mxu1 %v396_v25 }
  0x5d   : > { %671 = vmatmul.bf16.gmra.mxu2 %v397_v33 }
  0xa8   : > { %v599_v35 = vpop.f32.mrf.mxu0 }
  0xa9   : > { %v628_v34 = vpop.f32.mrf.mxu1 }
  0xaa   : > { %v629_v27 = vadd.f32 %v628_v34, %v599_v35 }
  0xae   : > { %v604_v44 = vpop.f32.mrf.mxu3 }
  0xb0   : > { %v657_v38 = vpop.f32.mrf.mxu2  ;;  %v601_v43 = vpop.f32.mrf.mxu0 }
  0xb1   : > { %v658_v39 = vadd.f32 %v657_v38, %v629_v27  ;;  %v630_v40 = vpop.f32.mrf.mxu1 }
  0xb2   : > { %v631_v47 = vadd.f32 %v630_v40, %v601_v43 }
  0xb3   : > { %v681_v42 = vmul.f32 %v1147_v37, %v658_v39 }
  0xb5   : > { %v693_v45 = vadd.f32 %v1152_v41, %v681_v42 }
  0xb6   : > { %v606_v54 = vpop.f32.mrf.mxu3 }
  0xb7   : > { %v701_v46 = vmax.f32 %v693_v45, 0.0 }
  0xb8   : > { %v659_v48 = vpop.f32.mrf.mxu2 }
  0xb9   : > { %709 = vst [vmem:[%s1160_s19] sm:$0xff] %v701_v46  ;;  %v660_v49 = vadd.f32 %v659_v48, %v631_v47  ;;  %v633_v50 = vpop.f32.mrf.mxu1 }
  0xba   : > { %v634_v53 = vadd.f32 %v633_v50, %v604_v44 }
  0xbb   : > { %v682_v51 = vmul.f32 %v1147_v37, %v660_v49 }
  0xbd   : > { %v694_v52 = vadd.f32 %v1152_v41, %v682_v51 }
  0xbe   : > { %v609_v63 = vpop.f32.mrf.mxu3 }
  0xbf   : > { %v702_v55 = vmax.f32 %v694_v52, 0.0 }
  0xc0   : > { %v662_v56 = vpop.f32.mrf.mxu2 }
  0xc1   : > { %710 = vst [vmem:[%s1160_s19 + $0x8] sm:$0xff] %v702_v55  ;;  %v663_v57 = vadd.f32 %v662_v56, %v634_v53  ;;  %v635_v58 = vpop.f32.mrf.mxu1 }
  0xc2   : > { %v636_v62 = vadd.f32 %v635_v58, %v606_v54 }
  0xc3   : > { %v683_v59 = vmul.f32 %v1147_v37, %v663_v57 }
  0xc5   : > { %v695_v60 = vadd.f32 %v1152_v41, %v683_v59 }
  0xc6   : > { %v611_v10 = vpop.f32.mrf.mxu3 }
  0xc7   : > { %v703_v61 = vmax.f32 %v695_v60, 0.0 }
  0xc8   : > { %v664_v0 = vpop.f32.mrf.mxu2 }
  0xc9   : > { %711 = vst [vmem:[%s1160_s19 + $0x10] sm:$0xff] %v703_v61  ;;  %v665_v1 = vadd.f32 %v664_v0, %v636_v62  ;;  %v638_v2 = vpop.f32.mrf.mxu1 }
  0xca   : > { %v639_v5 = vadd.f32 %v638_v2, %v609_v63 }
  0xcb   : > { %v684_v3 = vmul.f32 %v1147_v37, %v665_v1 }
  0xcd   : > { %v696_v4 = vadd.f32 %v1152_v41, %v684_v3 }
  0xce   : > { %v614_v20 = vpop.f32.mrf.mxu3 }
  0xcf   : > { %v704_v6 = vmax.f32 %v696_v4, 0.0 }
  0xd0   : > { %v667_v7 = vpop.f32.mrf.mxu2 }
  0xd1   : > { %712 = vst [vmem:[%s1160_s19 + $0x18] sm:$0xff] %v704_v6  ;;  %v668_v8 = vadd.f32 %v667_v7, %v639_v5  ;;  %v640_v9 = vpop.f32.mrf.mxu1 }
  0xd2   : > { %v641_v13 = vadd.f32 %v640_v9, %v611_v10 }
  0xd3   : > { %v685_v11 = vmul.f32 %v1147_v37, %v668_v8 }
  0xd5   : > { %v697_v21 = vadd.f32 %v1152_v41, %v685_v11 }
  0xd6   : > { %v616_v29 = vpop.f32.mrf.mxu3 }
  0xd7   : > { %v705_v12 = vmax.f32 %v697_v21, 0.0 }
  0xd8   : > { %v669_v14 = vpop.f32.mrf.mxu2 }
  0xd9   : > { %713 = vst [vmem:[%s1160_s19 + $0x20] sm:$0xff] %v705_v12  ;;  %v670_v15 = vadd.f32 %v669_v14, %v641_v13  ;;  %v643_v17 = vpop.f32.mrf.mxu1 }
  0xda   : > { %v644_v36 = vadd.f32 %v643_v17, %v614_v20 }
  0xdb   : > { %v686_v19 = vmul.f32 %v1147_v37, %v670_v15 }
  0xdd   : > { %v698_v22 = vadd.f32 %v1152_v41, %v686_v19 }
  0xdf   : > { %v706_v23 = vmax.f32 %v698_v22, 0.0 }
  0xe0   : > { %v672_v16 = vpop.f32.mrf.mxu2 }
  0xe1   : > { %714 = vst [vmem:[%s1160_s19 + $0x28] sm:$0xff] %v706_v23  ;;  %v673_v24 = vadd.f32 %v672_v16, %v644_v36  ;;  %v645_v26 = vpop.f32.mrf.mxu1 }
  0xe2   : > { %v646_v31 = vadd.f32 %v645_v26, %v616_v29 }
  0xe3   : > { %v687_v18 = vmul.f32 %v1147_v37, %v673_v24 }
  0xe5   : > { %v699_v28 = vadd.f32 %v1152_v41, %v687_v18 }
  0xe7   : > { %v707_v30 = vmax.f32 %v699_v28, 0.0 }
  0xe8   : > { %v674_v32 = vpop.f32.mrf.mxu2 }
  0xe9   : > { %715 = vst [vmem:[%s1160_s19 + $0x30] sm:$0xff] %v707_v30  ;;  %v675_v25 = vadd.f32 %v674_v32, %v646_v31 }
  0xeb   : > { %v688_v33 = vmul.f32 %v1147_v37, %v675_v25 }
  0xed   : > { %v700_v34 = vadd.f32 %v1152_v41, %v688_v33 }
  0xef   : > { %v708_v35 = vmax.f32 %v700_v34, 0.0 }
  0xf1   : > { %716 = vst [vmem:[%s1160_s19 + $0x38] sm:$0xff] %v708_v35 }
  0xf2 PF: > { %s16_s21 = sadd.s32 1, %s929_s21  }
  0xf3   : > { %p13_p4 = scmp.ge.s32.totalorder %s16_s21, 4  }
  0xf5   :  { %15 = sbr.rel (!%p13_p4) target bundleno = 1 (0x1), region = 74 }

// kernel: rot_prediction_forward.100
= control target key start
LH: loop header
LB: loop body
LE: loop exit
PB: predicated region body
PF: predicated region fallthrough
CT: control target
= control target key end

     0   :  { %s1132_s21 = smov 0   ;;  %s1389_s0 = inlined_call_operand.vmem [shape: bf16[128,512], index: 0, kind: input, shape index: {}]   ;;  %s1390_s1 = inlined_call_operand.vmem [shape: bf16[512,128], index: 1, kind: input, shape index: {}]   ;;  %s1391_s2 = inlined_call_operand.vmem [shape: f32[1,512], index: 2, kind: input, shape index: {}]   ;;  %s1392_s3 = inlined_call_operand.vmem [shape: f32[1,512], index: 3, kind: input, shape index: {}]   ;;  %s1393_s4 = inlined_call_operand.vmem [shape: f32[1,128], index: 4, kind: input, shape index: {}]   ;;  %s1394_s5 = inlined_call_operand.vmem [shape: f32[1,128], index: 5, kind: input, shape index: {}]   ;;  %s1395_s6 = inlined_call_operand.vmem [shape: f32[128,128], index: 6, kind: output, shape index: {}]  }
   0x1 LB: > { %s906_s22 = sadd.s32 4294967295, %s1095_s21   ;;  %p910_p0 = scmp.ge.s32.totalorder %s1095_s21, 1  ;;  %s1095_s21 = sphi %s1132_s21, %s16_s21  }
   0x2   : > { %p214_p1 = scmp.lt.s32.totalorder %s1095_s21, 3 }
   0x4   : > { %p215_p2 = pnand %p910_p0, %p214_p1 }
   0x5   : > { %s911_s29 = sshll.u32 (!%p215_p2), %s906_s22, 3 }
   0x6   : > { %218 = sbr.rel (%p215_p2) target bundleno = 244 (0xf4), region = 44  ;;  %p246_p3 = scmp.lt.s32.totalorder (!%p215_p2), %s911_s29, 15 }
   0xb   : > { %v1054_v0 = vld [vmem:[%s1390_s1 + $0x38] sm:$0xff]  ;;  %v1053_v4 = vld [vmem:[%s1390_s1 + $0x30] sm:$0xff]  ;;  %s1397_s29 = smov (!%p246_p3, %s911_s29), 15  ;;  %v1052_v8 = vld [vmem:[%s1390_s1 + $0x28] sm:$0xff] }
   0xc   : > { %v1062_v1 = vld [vmem:[%s1390_s1 + $0x78] sm:$0xff]  ;;  %694 = vmatpush.bf16.msra.mxu0 %v1054_v0  ;;  %v1061_v5 = vld [vmem:[%s1390_s1 + $0x70] sm:$0xff]  ;;  %s1046_s16 = sshll.u32 %s1397_s29, 4  ;;  %v1060_v9 = vld [vmem:[%s1390_s1 + $0x68] sm:$0xff]  ;;  %s915_s11 = sshll.u32 %s1397_s29, 3 }
   0xd   : > { %v1070_v2 = vld [vmem:[%s1390_s1 + $0xb8] sm:$0xff]  ;;  %723 = vmatpush.bf16.msra.mxu1 %v1062_v1  ;;  %v1069_v6 = vld [vmem:[%s1390_s1 + $0xb0] sm:$0xff]  ;;  %v1068_v10 = vld [vmem:[%s1390_s1 + $0xa8] sm:$0xff]  ;;  %s1182_s28 = scalar_lea.vmem %s1389_s0, %s1046_s16  ;;  %s1362_s14 = scalar_lea.vmem %s1395_s6, %s915_s11 }
   0xe   : > { %v1078_v3 = vld [vmem:[%s1390_s1 + $0xf8] sm:$0xff]  ;;  %752 = vmatpush.bf16.msra.mxu2 %v1070_v2  ;;  %v1077_v7 = vld [vmem:[%s1390_s1 + $0xf0] sm:$0xff]  ;;  %v1076_v11 = vld [vmem:[%s1390_s1 + $0xe8] sm:$0xff] }
   0xf   : > { %781 = vmatpush.bf16.msra.mxu3 %v1078_v3  ;;  %v1051_v12 = vld [vmem:[%s1390_s1 + $0x20] sm:$0xff]  ;;  %v260_v17 = vld [vmem:[%s1182_s28 + $0x10] sm:$0xff]  ;;  %v259_v25 = vld [vmem:[%s1182_s28 + $0x8] sm:$0xff] }
  0x10   : > { %695 = vmatpush.bf16.msra.mxu0 %v1053_v4  ;;  %v1059_v13 = vld [vmem:[%s1390_s1 + $0x60] sm:$0xff]  ;;  %v278_v20 = vunpack.c.l.bf16 %v260_v17  ;;  %v279_v24 = vunpack.c.h.bf16 %v260_v17  ;;  %v261_v26 = vld [vmem:[%s1182_s28 + $0x18] sm:$0xff]  ;;  %v276_v29 = vunpack.c.l.bf16 %v259_v25  ;;  %v277_v37 = vunpack.c.h.bf16 %v259_v25  ;;  %v1049_v47 = vld [vmem:[%s1390_s1 + $0x10] sm:$0xff] }
  0x11   : > { %724 = vmatpush.bf16.msra.mxu1 %v1061_v5  ;;  %v1067_v14 = vld [vmem:[%s1390_s1 + $0xa0] sm:$0xff]  ;;  %v1050_v27 = vld [vmem:[%s1390_s1 + $0x18] sm:$0xff]  ;;  %v280_v30 = vunpack.c.l.bf16 %v261_v26  ;;  %v281_v38 = vunpack.c.h.bf16 %v261_v26  ;;  %v1057_v48 = vld [vmem:[%s1390_s1 + $0x50] sm:$0xff] }
  0x12   : > { %753 = vmatpush.bf16.msra.mxu2 %v1069_v6  ;;  %v258_v15 = vld [vmem:[%s1182_s28] sm:$0xff]  ;;  %v1058_v31 = vld [vmem:[%s1390_s1 + $0x58] sm:$0xff]  ;;  %v1065_v50 = vld [vmem:[%s1390_s1 + $0x90] sm:$0xff] }
  0x13   : > { %782 = vmatpush.bf16.msra.mxu3 %v1077_v7  ;;  %v1075_v16 = vld [vmem:[%s1390_s1 + $0xe0] sm:$0xff]  ;;  %v274_v18 = vunpack.c.l.bf16 %v258_v15  ;;  %v275_v23 = vunpack.c.h.bf16 %v258_v15  ;;  %v1066_v33 = vld [vmem:[%s1390_s1 + $0x98] sm:$0xff]  ;;  %v1073_v51 = vld [vmem:[%s1390_s1 + $0xd0] sm:$0xff] }
  0x14   : > { %696 = vmatpush.bf16.msra.mxu0 %v1052_v8  ;;  %v306_v19 = vld [vmem:[%s1391_s2] sm:$0xf]  ;;  %v1074_v34 = vld [vmem:[%s1390_s1 + $0xd8] sm:$0xff]  ;;  %v1048_v60 = vld [vmem:[%s1390_s1 + $0x8] sm:$0xff] }
  0x15   : > { %725 = vmatpush.bf16.msra.mxu1 %v1060_v9  ;;  %v1201_v21 = vperm.slane %v306_v19, 0  ;;  %v348_v22 = vld [vmem:[%s1392_s3] sm:$0xf]  ;;  %v1211_v28 = vperm.slane %v306_v19, 1  ;;  %v1216_v32 = vperm.slane %v306_v19, 2  ;;  %v1236_v46 = vperm.slane %v306_v19, 3 }
  0x16   : > { %754 = vmatpush.bf16.msra.mxu2 %v1068_v10  ;;  %v1224_v35 = vperm.slane %v348_v22, 0  ;;  %v1226_v36 = vperm.slane %v348_v22, 1  ;;  %v1234_v45 = vperm.slane %v348_v22, 2  ;;  %v1244_v49 = vperm.slane %v348_v22, 3  ;;  %v1056_v61 = vld [vmem:[%s1390_s1 + $0x48] sm:$0xff]  ;;  %v262_v8 = vld [vmem:[%s1182_s28 + $0x20] sm:$0xff] }
  0x17   : > { %783 = vmatpush.bf16.msra.mxu3 %v1076_v11  ;;  %v316_v39 = vmul.f32 %v1201_v21, %v274_v18  ;;  %v320_v40 = vmul.f32 %v1201_v21, %v278_v20  ;;  %v317_v41 = vmul.f32 %v1211_v28, %v275_v23  ;;  %v321_v42 = vmul.f32 %v1211_v28, %v279_v24  ;;  %v1064_v0 = vld [vmem:[%s1390_s1 + $0x88] sm:$0xff]  ;;  %v264_v9 = vld [vmem:[%s1182_s28 + $0x30] sm:$0xff]  ;;  %v1047_v10 = vld [vmem:[%s1390_s1] sm:$0xff] }
  0x18   : > { %697 = vmatpush.bf16.msra.mxu0 %v1051_v12  ;;  %v318_v43 = vmul.f32 %v1216_v32, %v276_v29  ;;  %v322_v44 = vmul.f32 %v1216_v32, %v280_v30  ;;  %v319_v52 = vmul.f32 %v1236_v46, %v277_v37  ;;  %v323_v53 = vmul.f32 %v1236_v46, %v281_v38  ;;  %v1072_v1 = vld [vmem:[%s1390_s1 + $0xc8] sm:$0xff]  ;;  %v1055_v11 = vld [vmem:[%s1390_s1 + $0x40] sm:$0xff]  ;;  %v265_v17 = vld [vmem:[%s1182_s28 + $0x38] sm:$0xff] }
  0x19   : > { %726 = vmatpush.bf16.msra.mxu1 %v1059_v13  ;;  %v358_v54 = vadd.f32 %v1224_v35, %v316_v39  ;;  %v362_v55 = vadd.f32 %v1224_v35, %v320_v40  ;;  %v359_v56 = vadd.f32 %v1226_v36, %v317_v41  ;;  %v363_v57 = vadd.f32 %v1226_v36, %v321_v42  ;;  %v1063_v15 = vld [vmem:[%s1390_s1 + $0x80] sm:$0xff] }
  0x1a   : > { %755 = vmatpush.bf16.msra.mxu2 %v1067_v14  ;;  %v360_v58 = vadd.f32 %v1234_v45, %v318_v43  ;;  %v364_v59 = vadd.f32 %v1234_v45, %v322_v44  ;;  %v361_v62 = vadd.f32 %v1244_v49, %v319_v52  ;;  %v365_v63 = vadd.f32 %v1244_v49, %v323_v53  ;;  %v263_v14 = vld [vmem:[%s1182_s28 + $0x28] sm:$0xff] }
  0x1b   : > { %784 = vmatpush.bf16.msra.mxu3 %v1075_v16  ;;  %v390_v2 = vmax.f32 %v358_v54, 0.0  ;;  %v394_v3 = vmax.f32 %v362_v55, 0.0  ;;  %v391_v4 = vmax.f32 %v359_v56, 0.0  ;;  %v395_v5 = vmax.f32 %v363_v57, 0.0  ;;  %v1071_v16 = vld [vmem:[%s1390_s1 + $0xc0] sm:$0xff] }
  0x1c   : > { %698 = vmatpush.bf16.msra.mxu0 %v1050_v27  ;;  %v392_v6 = vmax.f32 %v360_v58, 0.0  ;;  %v396_v7 = vmax.f32 %v364_v59, 0.0  ;;  %v393_v12 = vmax.f32 %v361_v62, 0.0  ;;  %v397_v13 = vmax.f32 %v365_v63, 0.0  ;;  %v266_v58 = vld [vmem:[%s1182_s28 + $0x40] sm:$0xff]  ;;  %v268_v59 = vld [vmem:[%s1182_s28 + $0x50] sm:$0xff] }
  0x1d   : > { %727 = vmatpush.bf16.msra.mxu1 %v1058_v31  ;;  %v422_v18 = vpack.c.bf16 %v394_v3, %v390_v2  ;;  %v423_v19 = vpack.c.bf16 %v395_v5, %v391_v4  ;;  %v282_v20 = vunpack.c.l.bf16 %v262_v8  ;;  %v286_v22 = vunpack.c.l.bf16 %v264_v9 }
  0x1e   : > { %756 = vmatpush.bf16.msra.mxu2 %v1066_v33  ;;  %v424_v23 = vpack.c.bf16 %v396_v7, %v392_v6  ;;  %v283_v24 = vunpack.c.h.bf16 %v262_v8  ;;  %v287_v25 = vunpack.c.h.bf16 %v264_v9  ;;  %v284_v26 = vunpack.c.l.bf16 %v263_v14 }
  0x1f   : > { %785 = vmatpush.bf16.msra.mxu3 %v1074_v34  ;;  %v425_v27 = vpack.c.bf16 %v397_v13, %v393_v12  ;;  %v288_v29 = vunpack.c.l.bf16 %v265_v17  ;;  %v285_v30 = vunpack.c.h.bf16 %v263_v14  ;;  %v289_v31 = vunpack.c.h.bf16 %v265_v17 }
  0x20   : > { %699 = vmatpush.bf16.msra.mxu0 %v1049_v47  ;;  %v324_v33 = vmul.f32 %v1201_v21, %v282_v20  ;;  %v328_v34 = vmul.f32 %v1201_v21, %v286_v22  ;;  %v325_v37 = vmul.f32 %v1211_v28, %v283_v24  ;;  %v329_v38 = vmul.f32 %v1211_v28, %v287_v25 }
  0x21   : > { %728 = vmatpush.bf16.msra.mxu1 %v1057_v48  ;;  %v326_v39 = vmul.f32 %v1216_v32, %v284_v26  ;;  %v330_v40 = vmul.f32 %v1216_v32, %v288_v29  ;;  %v327_v41 = vmul.f32 %v1236_v46, %v285_v30  ;;  %v331_v42 = vmul.f32 %v1236_v46, %v289_v31 }
  0x22   : > { %757 = vmatpush.bf16.msra.mxu2 %v1065_v50  ;;  %v366_v43 = vadd.f32 %v1224_v35, %v324_v33  ;;  %v370_v44 = vadd.f32 %v1224_v35, %v328_v34  ;;  %v367_v47 = vadd.f32 %v1226_v36, %v325_v37  ;;  %v371_v48 = vadd.f32 %v1226_v36, %v329_v38 }
  0x23   : > { %786 = vmatpush.bf16.msra.mxu3 %v1073_v51  ;;  %v368_v50 = vadd.f32 %v1234_v45, %v326_v39  ;;  %v372_v51 = vadd.f32 %v1234_v45, %v330_v40  ;;  %v369_v52 = vadd.f32 %v1244_v49, %v327_v41  ;;  %v373_v53 = vadd.f32 %v1244_v49, %v331_v42  ;;  %v270_v41 = vld [vmem:[%s1182_s28 + $0x60] sm:$0xff]  ;;  %v272_v42 = vld [vmem:[%s1182_s28 + $0x70] sm:$0xff] }
  0x24   : > { %700 = vmatpush.bf16.msra.mxu0 %v1048_v60  ;;  %v398_v54 = vmax.f32 %v366_v43, 0.0  ;;  %v402_v55 = vmax.f32 %v370_v44, 0.0  ;;  %v399_v56 = vmax.f32 %v367_v47, 0.0  ;;  %v403_v57 = vmax.f32 %v371_v48, 0.0  ;;  %v271_v47 = vld [vmem:[%s1182_s28 + $0x68] sm:$0xff]  ;;  %v273_v48 = vld [vmem:[%s1182_s28 + $0x78] sm:$0xff] }
  0x25   : > { %729 = vmatpush.bf16.msra.mxu1 %v1056_v61  ;;  %v400_v60 = vmax.f32 %v368_v50, 0.0  ;;  %v404_v61 = vmax.f32 %v372_v51, 0.0  ;;  %v401_v62 = vmax.f32 %v369_v52, 0.0  ;;  %v405_v63 = vmax.f32 %v373_v53, 0.0 }
  0x26   : > { %758 = vmatpush.bf16.msra.mxu2 %v1064_v0  ;;  %v267_v0 = vld [vmem:[%s1182_s28 + $0x48] sm:$0xff]  ;;  %v290_v2 = vunpack.c.l.bf16 %v266_v58  ;;  %v294_v3 = vunpack.c.l.bf16 %v268_v59  ;;  %v291_v4 = vunpack.c.h.bf16 %v266_v58  ;;  %v295_v5 = vunpack.c.h.bf16 %v268_v59 }
  0x27   : > { %787 = vmatpush.bf16.msra.mxu3 %v1072_v1  ;;  %v269_v1 = vld [vmem:[%s1182_s28 + $0x58] sm:$0xff]  ;;  %v426_v6 = vpack.c.bf16 %v402_v55, %v398_v54  ;;  %v427_v7 = vpack.c.bf16 %v403_v57, %v399_v56  ;;  %v292_v8 = vunpack.c.l.bf16 %v267_v0  ;;  %v293_v12 = vunpack.c.h.bf16 %v267_v0 }
  0x28   : > { %701 = vmatpush.bf16.msra.mxu0 %v1047_v10  ;;  %v296_v9 = vunpack.c.l.bf16 %v269_v1  ;;  %v428_v10 = vpack.c.bf16 %v404_v61, %v400_v60  ;;  %v297_v13 = vunpack.c.h.bf16 %v269_v1  ;;  %v332_v14 = vmul.f32 %v1201_v21, %v290_v2 }
  0x29   : > { %730 = vmatpush.bf16.msra.mxu1 %v1055_v11  ;;  %v429_v11 = vpack.c.bf16 %v405_v63, %v401_v62  ;;  %v337_v17 = vmul.f32 %v1211_v28, %v295_v5  ;;  %v335_v20 = vmul.f32 %v1236_v46, %v293_v12  ;;  %v298_v52 = vunpack.c.l.bf16 %v270_v41 }
  0x2a   : > { %759 = vmatpush.bf16.msra.mxu2 %v1063_v15  ;;  %v336_v15 = vmul.f32 %v1201_v21, %v294_v3  ;;  %v339_v22 = vmul.f32 %v1236_v46, %v297_v13  ;;  %v302_v53 = vunpack.c.l.bf16 %v272_v42  ;;  %v299_v55 = vunpack.c.h.bf16 %v270_v41 }
  0x2b   : > { %788 = vmatpush.bf16.msra.mxu3 %v1071_v16  ;;  %702 = vmatmul.bf16.vlgmr.msra.gmra.mxu0 %v422_v18  ;;  %v333_v16 = vmul.f32 %v1211_v28, %v291_v4  ;;  %v334_v18 = vmul.f32 %v1216_v32, %v292_v8  ;;  %v379_v26 = vadd.f32 %v1226_v36, %v337_v17  ;;  %v303_v56 = vunpack.c.h.bf16 %v272_v42 }
  0x2c   : > { %731 = vmatmul.bf16.vlgmr.msra.gmra.mxu1 %v423_v19  ;;  %v338_v19 = vmul.f32 %v1216_v32, %v296_v9  ;;  %v378_v24 = vadd.f32 %v1224_v35, %v336_v15  ;;  %v377_v30 = vadd.f32 %v1244_v49, %v335_v20  ;;  %v381_v31 = vadd.f32 %v1244_v49, %v339_v22 }
  0x2d   : > { %760 = vmatmul.bf16.vlgmr.msra.gmra.mxu2 %v424_v23  ;;  %v374_v23 = vadd.f32 %v1224_v35, %v332_v14  ;;  %v375_v25 = vadd.f32 %v1226_v36, %v333_v16  ;;  %v411_v38 = vmax.f32 %v379_v26, 0.0  ;;  %v300_v57 = vunpack.c.l.bf16 %v271_v47 }
  0x2e   : > { %789 = vmatmul.bf16.vlgmr.msra.gmra.mxu3 %v425_v27  ;;  %v376_v27 = vadd.f32 %v1234_v45, %v334_v18  ;;  %v380_v29 = vadd.f32 %v1234_v45, %v338_v19  ;;  %v410_v34 = vmax.f32 %v378_v24, 0.0  ;;  %v409_v43 = vmax.f32 %v377_v30, 0.0  ;;  %v1354_v30 = vld [vmem:[%s1394_s5] ss:$0 sm:$0xff] }
  0x2f   : > { %v406_v33 = vmax.f32 %v374_v23, 0.0  ;;  %v407_v37 = vmax.f32 %v375_v25, 0.0  ;;  %v413_v44 = vmax.f32 %v381_v31, 0.0  ;;  %v304_v59 = vunpack.c.l.bf16 %v273_v48  ;;  %v1349_v25 = vld [vmem:[%s1393_s4] ss:$0 sm:$0xff] }
  0x30   : > { %v408_v39 = vmax.f32 %v376_v27, 0.0  ;;  %v412_v40 = vmax.f32 %v380_v29, 0.0  ;;  %v301_v60 = vunpack.c.h.bf16 %v271_v47  ;;  %v305_v61 = vunpack.c.h.bf16 %v273_v48 }
  0x31   : > { %v430_v50 = vpack.c.bf16 %v410_v34, %v406_v33  ;;  %v431_v51 = vpack.c.bf16 %v411_v38, %v407_v37  ;;  %v433_v58 = vpack.c.bf16 %v413_v44, %v409_v43  ;;  %v340_v62 = vmul.f32 %v1201_v21, %v298_v52 }
  0x32   : > { %v432_v54 = vpack.c.bf16 %v412_v40, %v408_v39  ;;  %v344_v63 = vmul.f32 %v1201_v21, %v302_v53  ;;  %v341_v0 = vmul.f32 %v1211_v28, %v299_v55  ;;  %v345_v1 = vmul.f32 %v1211_v28, %v303_v56 }
  0x33   : > { %v342_v2 = vmul.f32 %v1216_v32, %v300_v57  ;;  %v346_v3 = vmul.f32 %v1216_v32, %v304_v59  ;;  %v343_v4 = vmul.f32 %v1236_v46, %v301_v60  ;;  %v347_v5 = vmul.f32 %v1236_v46, %v305_v61 }
  0x34   : > { %v386_v21 = vadd.f32 %v1224_v35, %v344_v63  ;;  %v387_v8 = vadd.f32 %v1226_v36, %v345_v1 }
  0x35   : > { %v384_v28 = vadd.f32 %v1234_v45, %v342_v2  ;;  %v388_v9 = vadd.f32 %v1234_v45, %v346_v3  ;;  %v389_v32 = vadd.f32 %v1244_v49, %v347_v5 }
  0x36   : > { %v418_v12 = vmax.f32 %v386_v21, 0.0  ;;  %v419_v46 = vmax.f32 %v387_v8, 0.0 }
  0x37   : > { %v416_v14 = vmax.f32 %v384_v28, 0.0  ;;  %v420_v15 = vmax.f32 %v388_v9, 0.0 }
  0x39   : > { %v436_v19 = vpack.c.bf16 %v420_v15, %v416_v14 }
  0x3b   : > { %707 = vmatmul.bf16.gmra.mxu0 %v426_v6  ;;  %v382_v6 = vadd.f32 %v1224_v35, %v340_v62  ;;  %v421_v35 = vmax.f32 %v389_v32, 0.0 }
  0x3c   : > { %736 = vmatmul.bf16.gmra.mxu1 %v427_v7  ;;  %v383_v7 = vadd.f32 %v1226_v36, %v341_v0 }
  0x3d   : > { %765 = vmatmul.bf16.gmra.mxu2 %v428_v10  ;;  %v385_v10 = vadd.f32 %v1244_v49, %v343_v4 }
  0x3e   : > { %794 = vmatmul.bf16.gmra.mxu3 %v429_v11  ;;  %v414_v11 = vmax.f32 %v382_v6, 0.0  ;;  %v415_v13 = vmax.f32 %v383_v7, 0.0 }
  0x3f   : > { %v417_v16 = vmax.f32 %v385_v10, 0.0 }
  0x40   : > { %v434_v17 = vpack.c.bf16 %v418_v12, %v414_v11  ;;  %v435_v18 = vpack.c.bf16 %v419_v46, %v415_v13 }
  0x41   : > { %v437_v36 = vpack.c.bf16 %v421_v35, %v417_v16 }
  0x4b   : > { %712 = vmatmul.bf16.gmra.mxu0 %v430_v50 }
  0x4c   : > { %741 = vmatmul.bf16.gmra.mxu1 %v431_v51 }
  0x4d   : > { %770 = vmatmul.bf16.gmra.mxu2 %v432_v54 }
  0x4e   : > { %799 = vmatmul.bf16.gmra.mxu3 %v433_v58 }
  0x5b   : > { %717 = vmatmul.bf16.gmra.mxu0 %v434_v17 }
  0x5c   : > { %746 = vmatmul.bf16.gmra.mxu1 %v435_v18 }
  0x5d   : > { %775 = vmatmul.bf16.gmra.mxu2 %v436_v19 }
  0x5e   : > { %804 = vmatmul.bf16.gmra.mxu3 %v437_v36 }
  0xa8   : > { %v703_v45 = vpop.f32.mrf.mxu0 }
  0xa9   : > { %v732_v20 = vpop.f32.mrf.mxu1 }
  0xaa   : > { %v733_v49 = vadd.f32 %v732_v20, %v703_v45 }
  0xb0   : > { %v761_v22 = vpop.f32.mrf.mxu2  ;;  %v705_v26 = vpop.f32.mrf.mxu0 }
  0xb1   : > { %v790_v23 = vpop.f32.mrf.mxu3  ;;  %v762_v24 = vadd.f32 %v761_v22, %v733_v49  ;;  %v734_v27 = vpop.f32.mrf.mxu1 }
  0xb2   : > { %v735_v34 = vadd.f32 %v734_v27, %v705_v26 }
  0xb3   : > { %v791_v29 = vadd.f32 %v790_v23, %v762_v24 }
  0xb5   : > { %v814_v31 = vmul.f32 %v1349_v25, %v791_v29 }
  0xb7   : > { %v826_v33 = vadd.f32 %v1354_v30, %v814_v31 }
  0xb8   : > { %v763_v37 = vpop.f32.mrf.mxu2  ;;  %v708_v41 = vpop.f32.mrf.mxu0 }
  0xb9   : > { %v792_v38 = vpop.f32.mrf.mxu3  ;;  %v834_v39 = vmax.f32 %v826_v33, 0.0  ;;  %v764_v40 = vadd.f32 %v763_v37, %v735_v34  ;;  %v737_v42 = vpop.f32.mrf.mxu1 }
  0xba   : > { %v738_v47 = vadd.f32 %v737_v42, %v708_v41 }
  0xbb   : > { %842 = vst [vmem:[%s1362_s14] sm:$0xff] %v834_v39  ;;  %v793_v43 = vadd.f32 %v792_v38, %v764_v40 }
  0xbd   : > { %v815_v44 = vmul.f32 %v1349_v25, %v793_v43 }
  0xbf   : > { %v827_v48 = vadd.f32 %v1354_v30, %v815_v44 }
  0xc0   : > { %v766_v50 = vpop.f32.mrf.mxu2  ;;  %v710_v54 = vpop.f32.mrf.mxu0 }
  0xc1   : > { %v795_v51 = vpop.f32.mrf.mxu3  ;;  %v835_v52 = vmax.f32 %v827_v48, 0.0  ;;  %v767_v53 = vadd.f32 %v766_v50, %v738_v47  ;;  %v739_v55 = vpop.f32.mrf.mxu1 }
  0xc2   : > { %v740_v59 = vadd.f32 %v739_v55, %v710_v54 }
  0xc3   : > { %843 = vst [vmem:[%s1362_s14 + $0x8] sm:$0xff] %v835_v52  ;;  %v796_v56 = vadd.f32 %v795_v51, %v767_v53 }
  0xc5   : > { %v816_v57 = vmul.f32 %v1349_v25, %v796_v56 }
  0xc7   : > { %v828_v58 = vadd.f32 %v1354_v30, %v816_v57 }
  0xc8   : > { %v768_v60 = vpop.f32.mrf.mxu2  ;;  %v713_v0 = vpop.f32.mrf.mxu0 }
  0xc9   : > { %v797_v61 = vpop.f32.mrf.mxu3  ;;  %v836_v62 = vmax.f32 %v828_v58, 0.0  ;;  %v769_v63 = vadd.f32 %v768_v60, %v740_v59  ;;  %v742_v1 = vpop.f32.mrf.mxu1 }
  0xca   : > { %v743_v4 = vadd.f32 %v742_v1, %v713_v0 }
  0xcb   : > { %844 = vst [vmem:[%s1362_s14 + $0x10] sm:$0xff] %v836_v62  ;;  %v798_v2 = vadd.f32 %v797_v61, %v769_v63 }
  0xcd   : > { %v817_v3 = vmul.f32 %v1349_v25, %v798_v2 }
  0xcf   : > { %v829_v5 = vadd.f32 %v1354_v30, %v817_v3 }
  0xd0   : > { %v771_v6 = vpop.f32.mrf.mxu2  ;;  %v715_v28 = vpop.f32.mrf.mxu0 }
  0xd1   : > { %v800_v21 = vpop.f32.mrf.mxu3  ;;  %v837_v7 = vmax.f32 %v829_v5, 0.0  ;;  %v772_v8 = vadd.f32 %v771_v6, %v743_v4  ;;  %v744_v9 = vpop.f32.mrf.mxu1 }
  0xd2   : > { %v745_v12 = vadd.f32 %v744_v9, %v715_v28 }
  0xd3   : > { %845 = vst [vmem:[%s1362_s14 + $0x18] sm:$0xff] %v837_v7  ;;  %v801_v10 = vadd.f32 %v800_v21, %v772_v8 }
  0xd5   : > { %v818_v32 = vmul.f32 %v1349_v25, %v801_v10 }
  0xd7   : > { %v830_v11 = vadd.f32 %v1354_v30, %v818_v32 }
  0xd8   : > { %v773_v13 = vpop.f32.mrf.mxu2  ;;  %v718_v16 = vpop.f32.mrf.mxu0 }
  0xd9   : > { %v802_v46 = vpop.f32.mrf.mxu3  ;;  %v838_v14 = vmax.f32 %v830_v11, 0.0  ;;  %v774_v15 = vadd.f32 %v773_v13, %v745_v12  ;;  %v747_v35 = vpop.f32.mrf.mxu1 }
  0xda   : > { %v748_v19 = vadd.f32 %v747_v35, %v718_v16 }
  0xdb   : > { %846 = vst [vmem:[%s1362_s14 + $0x20] sm:$0xff] %v838_v14  ;;  %v803_v17 = vadd.f32 %v802_v46, %v774_v15 }
  0xdd   : > { %v819_v18 = vmul.f32 %v1349_v25, %v803_v17 }
  0xdf   : > { %v831_v36 = vadd.f32 %v1354_v30, %v819_v18 }
  0xe0   : > { %v776_v45 = vpop.f32.mrf.mxu2  ;;  %v720_v24 = vpop.f32.mrf.mxu0 }
  0xe1   : > { %v805_v20 = vpop.f32.mrf.mxu3  ;;  %v839_v49 = vmax.f32 %v831_v36, 0.0  ;;  %v777_v22 = vadd.f32 %v776_v45, %v748_v19  ;;  %v749_v26 = vpop.f32.mrf.mxu1 }
  0xe2   : > { %v750_v31 = vadd.f32 %v749_v26, %v720_v24 }
  0xe3   : > { %847 = vst [vmem:[%s1362_s14 + $0x28] sm:$0xff] %v839_v49  ;;  %v806_v23 = vadd.f32 %v805_v20, %v777_v22 }
  0xe5   : > { %v820_v27 = vmul.f32 %v1349_v25, %v806_v23 }
  0xe7   : > { %v832_v29 = vadd.f32 %v1354_v30, %v820_v27 }
  0xe8   : > { %v778_v33 = vpop.f32.mrf.mxu2 }
  0xe9   : > { %v840_v34 = vmax.f32 %v832_v29, 0.0  ;;  %v779_v37 = vadd.f32 %v778_v33, %v750_v31  ;;  %v807_v38 = vpop.f32.mrf.mxu3 }
  0xeb   : > { %848 = vst [vmem:[%s1362_s14 + $0x30] sm:$0xff] %v840_v34  ;;  %v808_v39 = vadd.f32 %v807_v38, %v779_v37 }
  0xed   : > { %v821_v40 = vmul.f32 %v1349_v25, %v808_v39 }
  0xef   : > { %v833_v41 = vadd.f32 %v1354_v30, %v821_v40 }
  0xf1   : > { %v841_v42 = vmax.f32 %v833_v41, 0.0 }
  0xf3   : > { %849 = vst [vmem:[%s1362_s14 + $0x38] sm:$0xff] %v841_v42 }
  0xf4 PF: > { %s16_s21 = sadd.s32 1, %s1095_s21  }
  0xf5   : > { %p13_p4 = scmp.ge.s32.totalorder %s16_s21, 4  }
  0xf7   :  { %15 = sbr.rel (!%p13_p4) target bundleno = 1 (0x1), region = 74 }

// kernel: rot_prediction_forward.102
= control target key start
LH: loop header
LB: loop body
LE: loop exit
PB: predicated region body
PF: predicated region fallthrough
CT: control target
= control target key end

     0   :  { %s1560_s21 = smov 0   ;;  %s2248_s0 = inlined_call_operand.vmem [shape: bf16[128,512], index: 0, kind: input, shape index: {}]   ;;  %s2249_s1 = inlined_call_operand.vmem [shape: bf16[512,256], index: 1, kind: input, shape index: {}]   ;;  %s2250_s2 = inlined_call_operand.vmem [shape: f32[1,512], index: 2, kind: input, shape index: {}]   ;;  %s2251_s3 = inlined_call_operand.vmem [shape: f32[1,512], index: 3, kind: input, shape index: {}]   ;;  %s2252_s4 = inlined_call_operand.vmem [shape: f32[1,256], index: 4, kind: input, shape index: {}]   ;;  %s2253_s5 = inlined_call_operand.vmem [shape: f32[1,256], index: 5, kind: input, shape index: {}]   ;;  %s2254_s6 = inlined_call_operand.vmem [shape: f32[128,256], index: 6, kind: output, shape index: {}]  }
   0x1 LB: > { %s1174_s22 = sadd.s32 4294967295, %s1523_s21   ;;  %p1178_p0 = scmp.ge.s32.totalorder %s1523_s21, 1  ;;  %s1523_s21 = sphi %s1560_s21, %s16_s21  }
   0x2   : > { %p214_p1 = scmp.lt.s32.totalorder %s1523_s21, 3 }
   0x4   : > { %p215_p2 = pnand %p1178_p0, %p214_p1 }
   0x5   : > { %s1179_s15 = sshll.u32 (!%p215_p2), %s1174_s22, 3 }
   0x6   : > { %218 = sbr.rel (%p215_p2) target bundleno = 311 (0x137), region = 44  ;;  %p247_p3 = scmp.lt.s32.totalorder (!%p215_p2), %s1179_s15, 15 }
   0xb   : > { %v1243_v0 = vld [vmem:[%s2249_s1 + $0x70] sm:$0xf]  ;;  %v1460_v1 = vld [vmem:[%s2249_s1 + $0x74] sm:$0xf0]  ;;  %v1235_v11 = vld [vmem:[%s2249_s1 + $0x60] sm:$0xf] }
   0xc   : > { %v1307_v2 = vld [vmem:[%s2249_s1 + $0xf0] sm:$0xf]  ;;  %v1244_v3 = vor.u32 %v1460_v1, %v1243_v0  ;;  %v1476_v4 = vld [vmem:[%s2249_s1 + $0xf4] sm:$0xf0]  ;;  %v1458_v13 = vld [vmem:[%s2249_s1 + $0x64] sm:$0xf0] }
   0xd   : > { %v1371_v5 = vld [vmem:[%s2249_s1 + $0x170] sm:$0xf]  ;;  %v1492_v6 = vld [vmem:[%s2249_s1 + $0x174] sm:$0xf0]  ;;  %v1308_v7 = vor.u32 %v1476_v4, %v1307_v2  ;;  %v1299_v14 = vld [vmem:[%s2249_s1 + $0xe0] sm:$0xf]  ;;  %v1236_v16 = vor.u32 %v1458_v13, %v1235_v11 }
   0xe   : > { %v1372_v8 = vor.u32 %v1492_v6, %v1371_v5  ;;  %v1435_v9 = vld [vmem:[%s2249_s1 + $0x1f0] sm:$0xf]  ;;  %v1508_v10 = vld [vmem:[%s2249_s1 + $0x1f4] sm:$0xf0]  ;;  %824 = vmatpush.bf16.msra.mxu0 %v1244_v3  ;;  %v1474_v15 = vld [vmem:[%s2249_s1 + $0xe4] sm:$0xf0] }
   0xf   : > { %v1436_v12 = vor.u32 %v1508_v10, %v1435_v9  ;;  %853 = vmatpush.bf16.msra.mxu1 %v1308_v7  ;;  %v1300_v17 = vor.u32 %v1474_v15, %v1299_v14  ;;  %v1363_v18 = vld [vmem:[%s2249_s1 + $0x160] sm:$0xf]  ;;  %v1490_v19 = vld [vmem:[%s2249_s1 + $0x164] sm:$0xf0]  ;;  %v1227_v23 = vld [vmem:[%s2249_s1 + $0x50] sm:$0xf] }
  0x10   : > { %882 = vmatpush.bf16.msra.mxu2 %v1372_v8  ;;  %v1427_v20 = vld [vmem:[%s2249_s1 + $0x1e0] sm:$0xf]  ;;  %v1364_v21 = vor.u32 %v1490_v19, %v1363_v18  ;;  %v1506_v22 = vld [vmem:[%s2249_s1 + $0x1e4] sm:$0xf0]  ;;  %v1456_v24 = vld [vmem:[%s2249_s1 + $0x54] sm:$0xf0] }
  0x11   : > { %911 = vmatpush.bf16.msra.mxu3 %v1436_v12  ;;  %v1428_v25 = vor.u32 %v1506_v22, %v1427_v20  ;;  %v1291_v26 = vld [vmem:[%s2249_s1 + $0xd0] sm:$0xf]  ;;  %v1472_v27 = vld [vmem:[%s2249_s1 + $0xd4] sm:$0xf0]  ;;  %v1228_v29 = vor.u32 %v1456_v24, %v1227_v23  ;;  %v1219_v35 = vld [vmem:[%s2249_s1 + $0x40] sm:$0xf] }
  0x12   : > { %v1355_v28 = vld [vmem:[%s2249_s1 + $0x150] sm:$0xf]  ;;  %825 = vmatpush.bf16.msra.mxu0 %v1236_v16  ;;  %v1488_v30 = vld [vmem:[%s2249_s1 + $0x154] sm:$0xf0]  ;;  %v1292_v33 = vor.u32 %v1472_v27, %v1291_v26  ;;  %v1454_v36 = vld [vmem:[%s2249_s1 + $0x44] sm:$0xf0] }
  0x13   : > { %v1419_v31 = vld [vmem:[%s2249_s1 + $0x1d0] sm:$0xf]  ;;  %v1504_v32 = vld [vmem:[%s2249_s1 + $0x1d4] sm:$0xf0]  ;;  %854 = vmatpush.bf16.msra.mxu1 %v1300_v17  ;;  %v1356_v34 = vor.u32 %v1488_v30, %v1355_v28  ;;  %v1283_v37 = vld [vmem:[%s2249_s1 + $0xc0] sm:$0xf]  ;;  %v1220_v44 = vor.u32 %v1454_v36, %v1219_v35 }
  0x14   : > { %883 = vmatpush.bf16.msra.mxu2 %v1364_v21  ;;  %v1420_v38 = vor.u32 %v1504_v32, %v1419_v31  ;;  %v1470_v39 = vld [vmem:[%s2249_s1 + $0xc4] sm:$0xf0]  ;;  %v1347_v40 = vld [vmem:[%s2249_s1 + $0x140] sm:$0xf]  ;;  %v1211_v47 = vld [vmem:[%s2249_s1 + $0x30] sm:$0xf] }
  0x15   : > { %912 = vmatpush.bf16.msra.mxu3 %v1428_v25  ;;  %v1486_v41 = vld [vmem:[%s2249_s1 + $0x144] sm:$0xf0]  ;;  %v1411_v42 = vld [vmem:[%s2249_s1 + $0x1c0] sm:$0xf]  ;;  %v1284_v45 = vor.u32 %v1470_v39, %v1283_v37  ;;  %v1452_v48 = vld [vmem:[%s2249_s1 + $0x34] sm:$0xf0] }
  0x16   : > { %v1502_v43 = vld [vmem:[%s2249_s1 + $0x1c4] sm:$0xf0]  ;;  %826 = vmatpush.bf16.msra.mxu0 %v1228_v29  ;;  %v1348_v46 = vor.u32 %v1486_v41, %v1347_v40  ;;  %v1275_v49 = vld [vmem:[%s2249_s1 + $0xb0] sm:$0xf]  ;;  %v1468_v51 = vld [vmem:[%s2249_s1 + $0xb4] sm:$0xf0]  ;;  %v1212_v56 = vor.u32 %v1452_v48, %v1211_v47 }
  0x17   : > { %855 = vmatpush.bf16.msra.mxu1 %v1292_v33  ;;  %v1412_v50 = vor.u32 %v1502_v43, %v1411_v42  ;;  %v1339_v52 = vld [vmem:[%s2249_s1 + $0x130] sm:$0xf]  ;;  %v1484_v53 = vld [vmem:[%s2249_s1 + $0x134] sm:$0xf0]  ;;  %v1203_v57 = vld [vmem:[%s2249_s1 + $0x20] sm:$0xf]  ;;  %v1276_v58 = vor.u32 %v1468_v51, %v1275_v49 }
  0x18   : > { %884 = vmatpush.bf16.msra.mxu2 %v1356_v34  ;;  %v1403_v54 = vld [vmem:[%s2249_s1 + $0x1b0] sm:$0xf]  ;;  %v1500_v55 = vld [vmem:[%s2249_s1 + $0x1b4] sm:$0xf0]  ;;  %v1340_v59 = vor.u32 %v1484_v53, %v1339_v52  ;;  %v1450_v60 = vld [vmem:[%s2249_s1 + $0x24] sm:$0xf0] }
  0x19   : > { %913 = vmatpush.bf16.msra.mxu3 %v1420_v38  ;;  %v1267_v61 = vld [vmem:[%s2249_s1 + $0xa0] sm:$0xf]  ;;  %v1466_v62 = vld [vmem:[%s2249_s1 + $0xa4] sm:$0xf0]  ;;  %v1404_v63 = vor.u32 %v1500_v55, %v1403_v54  ;;  %v1195_v4 = vld [vmem:[%s2249_s1 + $0x10] sm:$0xf]  ;;  %v1204_v6 = vor.u32 %v1450_v60, %v1203_v57 }
  0x1a   : > { %827 = vmatpush.bf16.msra.mxu0 %v1220_v44  ;;  %v1331_v0 = vld [vmem:[%s2249_s1 + $0x120] sm:$0xf]  ;;  %v1482_v1 = vld [vmem:[%s2249_s1 + $0x124] sm:$0xf0]  ;;  %v1448_v5 = vld [vmem:[%s2249_s1 + $0x14] sm:$0xf0]  ;;  %v1268_v11 = vor.u32 %v1466_v62, %v1267_v61 }
  0x1b   : > { %856 = vmatpush.bf16.msra.mxu1 %v1284_v45  ;;  %v1395_v2 = vld [vmem:[%s2249_s1 + $0x1a0] sm:$0xf]  ;;  %v1498_v3 = vld [vmem:[%s2249_s1 + $0x1a4] sm:$0xf0]  ;;  %v1259_v7 = vld [vmem:[%s2249_s1 + $0x90] sm:$0xf]  ;;  %v1332_v12 = vor.u32 %v1482_v1, %v1331_v0  ;;  %v1196_v26 = vor.u32 %v1448_v5, %v1195_v4 }
  0x1c   : > { %885 = vmatpush.bf16.msra.mxu2 %v1348_v46  ;;  %v1464_v8 = vld [vmem:[%s2249_s1 + $0x94] sm:$0xf0]  ;;  %v1323_v9 = vld [vmem:[%s2249_s1 + $0x110] sm:$0xf]  ;;  %v1739_v15 = vld [vmem:[%s2249_s1] sm:$0xf]  ;;  %v1396_v17 = vor.u32 %v1498_v3, %v1395_v2 }
  0x1d   : > { %914 = vmatpush.bf16.msra.mxu3 %v1412_v50  ;;  %v1480_v10 = vld [vmem:[%s2249_s1 + $0x114] sm:$0xf0]  ;;  %v1387_v13 = vld [vmem:[%s2249_s1 + $0x190] sm:$0xf]  ;;  %v1744_v16 = vld [vmem:[%s2249_s1 + $0x4] sm:$0xf0]  ;;  %v1260_v31 = vor.u32 %v1464_v8, %v1259_v7 }
  0x1e   : > { %828 = vmatpush.bf16.msra.mxu0 %v1212_v56  ;;  %v1496_v14 = vld [vmem:[%s2249_s1 + $0x194] sm:$0xf0]  ;;  %v1749_v18 = vld [vmem:[%s2249_s1 + $0x80] sm:$0xf]  ;;  %v1754_v19 = vld [vmem:[%s2249_s1 + $0x84] sm:$0xf0]  ;;  %v1324_v32 = vor.u32 %v1480_v10, %v1323_v9  ;;  %v1188_v37 = vor.u32 %v1744_v16, %v1739_v15 }
  0x1f   : > { %857 = vmatpush.bf16.msra.mxu1 %v1276_v58  ;;  %v1759_v20 = vld [vmem:[%s2249_s1 + $0x100] sm:$0xf]  ;;  %v1764_v21 = vld [vmem:[%s2249_s1 + $0x104] sm:$0xf0]  ;;  %v1793_v30 = vld [vmem:[%s2249_s1 + $0x174] sm:$0xf]  ;;  %v1388_v36 = vor.u32 %v1496_v14, %v1387_v13  ;;  %v1252_v41 = vor.u32 %v1754_v19, %v1749_v18 }
  0x20   : > { %886 = vmatpush.bf16.msra.mxu2 %v1340_v59  ;;  %v1769_v22 = vld [vmem:[%s2249_s1 + $0x180] sm:$0xf]  ;;  %v1779_v24 = vld [vmem:[%s2249_s1 + $0x184] sm:$0xf0]  ;;  %s2256_s15 = smov (!%p247_p3, %s1179_s15), 15  ;;  %v1316_v42 = vor.u32 %v1764_v21, %v1759_v20 }
  0x21   : > { %915 = vmatpush.bf16.msra.mxu3 %v1404_v63  ;;  %v308_v23 = vld [vmem:[%s2250_s2] sm:$0xf]  ;;  %v1802_v34 = vld [vmem:[%s2249_s1 + $0x178] sm:$0xf0]  ;;  %v1807_v35 = vld [vmem:[%s2249_s1 + $0x1f4] sm:$0xf]  ;;  %v1380_v43 = vor.u32 %v1779_v24, %v1769_v22 }
  0x22   : > { %v350_v25 = vld [vmem:[%s2251_s3] sm:$0xf]  ;;  %829 = vmatpush.bf16.msra.mxu0 %v1204_v6  ;;  %v1784_v27 = vperm.slane %v308_v23, 0  ;;  %v1786_v28 = vperm.slane %v308_v23, 1  ;;  %v1788_v29 = vperm.slane %v308_v23, 2  ;;  %s1443_s11 = sshll.u32 %s2256_s15, 4  ;;  %v1376_v49 = vor.u32 %v1793_v30, %v1802_v34 }
  0x23   : > { %858 = vmatpush.bf16.msra.mxu1 %v1268_v11  ;;  %v1797_v33 = vperm.slane %v350_v25, 0  ;;  %v1814_v38 = vld [vmem:[%s2249_s1 + $0x1f8] sm:$0xf0]  ;;  %v1819_v39 = vld [vmem:[%s2249_s1 + $0x74] sm:$0xf]  ;;  %v1833_v44 = vperm.slane %v350_v25, 1  ;;  %s1850_s19 = scalar_lea.vmem %s2248_s0, %s1443_s11  ;;  %s2190_s14 = scalar_lea.vmem %s2254_s6, %s1443_s11 }
  0x24   : > { %887 = vmatpush.bf16.msra.mxu2 %v1332_v12  ;;  %v1824_v40 = vld [vmem:[%s2249_s1 + $0x78] sm:$0xf0]  ;;  %v1838_v45 = vld [vmem:[%s2249_s1 + $0xf4] sm:$0xf]  ;;  %v1852_v47 = vperm.slane %v350_v25, 2  ;;  %v1854_v48 = vperm.slane %v308_v23, 3  ;;  %v1440_v50 = vor.u32 %v1807_v35, %v1814_v38 }
  0x25   : > { %916 = vmatpush.bf16.msra.mxu3 %v1396_v17  ;;  %v1843_v46 = vld [vmem:[%s2249_s1 + $0xf8] sm:$0xf0]  ;;  %v1863_v51 = vld [vmem:[%s2249_s1 + $0x164] sm:$0xf]  ;;  %v1868_v52 = vld [vmem:[%s2249_s1 + $0x168] sm:$0xf0]  ;;  %v1248_v57 = vor.u32 %v1819_v39, %v1824_v40 }
  0x26   : > { %830 = vmatpush.bf16.msra.mxu0 %v1196_v26  ;;  %v260_v53 = vld [vmem:[%s1850_s19] sm:$0xff]  ;;  %v262_v54 = vld [vmem:[%s1850_s19 + $0x10] sm:$0xff]  ;;  %v261_v55 = vld [vmem:[%s1850_s19 + $0x8] sm:$0xff]  ;;  %v1873_v56 = vperm.slane %v350_v25, 3  ;;  %v1312_v58 = vor.u32 %v1838_v45, %v1843_v46  ;;  %v1368_v59 = vor.u32 %v1863_v51, %v1868_v52 }
  0x27   : > { %859 = vmatpush.bf16.msra.mxu1 %v1260_v31  ;;  %v276_v60 = vunpack.c.l.bf16 %v260_v53  ;;  %v280_v61 = vunpack.c.l.bf16 %v262_v54  ;;  %v277_v62 = vunpack.c.h.bf16 %v260_v53  ;;  %v281_v63 = vunpack.c.h.bf16 %v262_v54  ;;  %v263_v0 = vld [vmem:[%s1850_s19 + $0x18] sm:$0xff]  ;;  %v264_v9 = vld [vmem:[%s1850_s19 + $0x20] sm:$0xff]  ;;  %v1429_v19 = vld [vmem:[%s2249_s1 + $0x1e8] sm:$0xf0] }
  0x28   : > { %888 = vmatpush.bf16.msra.mxu2 %v1324_v32  ;;  %v278_v1 = vunpack.c.l.bf16 %v261_v55  ;;  %v282_v2 = vunpack.c.l.bf16 %v263_v0  ;;  %v279_v3 = vunpack.c.h.bf16 %v261_v55  ;;  %v283_v4 = vunpack.c.h.bf16 %v263_v0  ;;  %v1505_v18 = vld [vmem:[%s2249_s1 + $0x1e4] sm:$0xf]  ;;  %v1237_v25 = vld [vmem:[%s2249_s1 + $0x68] sm:$0xf0] }
  0x29   : > { %917 = vmatpush.bf16.msra.mxu3 %v1388_v36  ;;  %v318_v5 = vmul.f32 %v1784_v27, %v276_v60  ;;  %v322_v6 = vmul.f32 %v1784_v27, %v280_v61  ;;  %v319_v7 = vmul.f32 %v1786_v28, %v277_v62  ;;  %v323_v8 = vmul.f32 %v1786_v28, %v281_v63  ;;  %v1457_v20 = vld [vmem:[%s2249_s1 + $0x64] sm:$0xf]  ;;  %v1301_v30 = vld [vmem:[%s2249_s1 + $0xe8] sm:$0xf0]  ;;  %v266_v36 = vld [vmem:[%s1850_s19 + $0x30] sm:$0xff] }
  0x2a   : > { %831 = vmatpush.bf16.msra.mxu0 %v1188_v37  ;;  %v320_v10 = vmul.f32 %v1788_v29, %v278_v1  ;;  %v324_v11 = vmul.f32 %v1788_v29, %v282_v2  ;;  %v321_v12 = vmul.f32 %v1854_v48, %v279_v3  ;;  %v284_v13 = vunpack.c.l.bf16 %v264_v9  ;;  %v1473_v26 = vld [vmem:[%s2249_s1 + $0xe4] sm:$0xf]  ;;  %v1487_v3 = vld [vmem:[%s2249_s1 + $0x154] sm:$0xf] }
  0x2b   : > { %860 = vmatpush.bf16.msra.mxu1 %v1252_v41  ;;  %v360_v14 = vadd.f32 %v1797_v33, %v318_v5  ;;  %v364_v15 = vadd.f32 %v1797_v33, %v322_v6  ;;  %v361_v16 = vadd.f32 %v1833_v44, %v319_v7  ;;  %v365_v17 = vadd.f32 %v1833_v44, %v323_v8  ;;  %v265_v41 = vld [vmem:[%s1850_s19 + $0x28] sm:$0xff] }
  0x2c   : > { %889 = vmatpush.bf16.msra.mxu2 %v1316_v42  ;;  %v362_v21 = vadd.f32 %v1852_v47, %v320_v10  ;;  %v366_v22 = vadd.f32 %v1852_v47, %v324_v11  ;;  %v325_v23 = vmul.f32 %v1854_v48, %v283_v4  ;;  %v363_v24 = vadd.f32 %v1873_v56, %v321_v12  ;;  %v1357_v4 = vld [vmem:[%s2249_s1 + $0x158] sm:$0xf0]  ;;  %v1455_v11 = vld [vmem:[%s2249_s1 + $0x54] sm:$0xf] }
  0x2d   : > { %918 = vmatpush.bf16.msra.mxu3 %v1380_v43  ;;  %v392_v31 = vmax.f32 %v360_v14, 0.0  ;;  %v396_v32 = vmax.f32 %v364_v15, 0.0  ;;  %v393_v34 = vmax.f32 %v361_v16, 0.0  ;;  %v397_v35 = vmax.f32 %v365_v17, 0.0  ;;  %v1421_v10 = vld [vmem:[%s2249_s1 + $0x1d8] sm:$0xf0] }
  0x2e   : > { %940 = vmatpush.bf16.msrb.mxu0 %v1248_v57  ;;  %v394_v37 = vmax.f32 %v362_v21, 0.0  ;;  %v398_v38 = vmax.f32 %v366_v22, 0.0  ;;  %v367_v39 = vadd.f32 %v1873_v56, %v325_v23  ;;  %v395_v40 = vmax.f32 %v363_v24, 0.0  ;;  %v1229_v15 = vld [vmem:[%s2249_s1 + $0x58] sm:$0xf0] }
  0x2f   : > { %969 = vmatpush.bf16.msrb.mxu1 %v1312_v58  ;;  %v1919_v42 = vpack.c.bf16 %v396_v32, %v392_v31  ;;  %v1921_v43 = vpack.c.bf16 %v397_v35, %v393_v34  ;;  %v1432_v45 = vor.u32 %v1505_v18, %v1429_v19  ;;  %v1240_v46 = vor.u32 %v1457_v20, %v1237_v25  ;;  %v1471_v16 = vld [vmem:[%s2249_s1 + $0xd4] sm:$0xf]  ;;  %v1293_v17 = vld [vmem:[%s2249_s1 + $0xd8] sm:$0xf0]  ;;  %v1485_v21 = vld [vmem:[%s2249_s1 + $0x144] sm:$0xf] }
  0x30   : > { %998 = vmatpush.bf16.msrb.mxu2 %v1376_v49  ;;  %v267_v49 = vld [vmem:[%s1850_s19 + $0x38] sm:$0xff]  ;;  %v1924_v51 = vpack.c.bf16 %v398_v38, %v394_v37  ;;  %v399_v52 = vmax.f32 %v367_v39, 0.0  ;;  %v288_v53 = vunpack.c.l.bf16 %v266_v36  ;;  %v326_v54 = vmul.f32 %v1784_v27, %v284_v13  ;;  %v1349_v22 = vld [vmem:[%s2249_s1 + $0x148] sm:$0xf0]  ;;  %v1501_v23 = vld [vmem:[%s2249_s1 + $0x1c4] sm:$0xf] }
  0x31   : > { %1027 = vmatpush.bf16.msrb.mxu3 %v1440_v50  ;;  %v1304_v50 = vor.u32 %v1473_v26, %v1301_v30  ;;  %832 = vmatmul.bf16.vlgmr.msra.gmra.mxu0 %v1919_v42  ;;  %v285_v55 = vunpack.c.h.bf16 %v264_v9  ;;  %v289_v57 = vunpack.c.h.bf16 %v266_v36  ;;  %v286_v58 = vunpack.c.l.bf16 %v265_v41  ;;  %v1503_v9 = vld [vmem:[%s2249_s1 + $0x1d4] sm:$0xf]  ;;  %v1413_v26 = vld [vmem:[%s2249_s1 + $0x1c8] sm:$0xf0]  ;;  %v1453_v30 = vld [vmem:[%s2249_s1 + $0x44] sm:$0xf] }
  0x32   : > { %861 = vmatmul.bf16.vlgmr.msra.gmra.mxu1 %v1921_v43  ;;  %890 = vmatmul.bf16.vlgmr.msra.gmra.mxu2 %v1924_v51  ;;  %v1930_v60 = vpack.c.bf16 %v399_v52, %v395_v40  ;;  %v330_v61 = vmul.f32 %v1784_v27, %v288_v53  ;;  %v290_v62 = vunpack.c.l.bf16 %v267_v49  ;;  %v368_v63 = vadd.f32 %v1797_v33, %v326_v54  ;;  %v1221_v31 = vld [vmem:[%s2249_s1 + $0x48] sm:$0xf0]  ;;  %v1469_v36 = vld [vmem:[%s2249_s1 + $0xc4] sm:$0xf] }
  0x33   : > { %941 = vmatpush.bf16.msrb.mxu0 %v1240_v46  ;;  %970 = vmatpush.bf16.msrb.mxu1 %v1304_v50  ;;  %v327_v0 = vmul.f32 %v1786_v28, %v285_v55  ;;  %v331_v1 = vmul.f32 %v1786_v28, %v289_v57  ;;  %v291_v2 = vunpack.c.h.bf16 %v267_v49  ;;  %v328_v6 = vmul.f32 %v1788_v29, %v286_v58  ;;  %v268_v37 = vld [vmem:[%s1850_s19 + $0x40] sm:$0xff]  ;;  %v270_v46 = vld [vmem:[%s1850_s19 + $0x50] sm:$0xff]  ;;  %v269_v54 = vld [vmem:[%s1850_s19 + $0x48] sm:$0xff] }
  0x34   : > { %999 = vmatpush.bf16.msrb.mxu2 %v1368_v59  ;;  %v287_v59 = vunpack.c.h.bf16 %v265_v41  ;;  %919 = vmatmul.bf16.vlgmr.msra.gmra.mxu3 %v1930_v60  ;;  %v372_v5 = vadd.f32 %v1797_v33, %v330_v61  ;;  %v332_v7 = vmul.f32 %v1788_v29, %v290_v62  ;;  %v1360_v25 = vor.u32 %v1487_v3, %v1357_v4  ;;  %v271_v62 = vld [vmem:[%s1850_s19 + $0x58] sm:$0xff] }
  0x35   : > { %1028 = vmatpush.bf16.msrb.mxu3 %v1432_v45  ;;  %v369_v12 = vadd.f32 %v1833_v44, %v327_v0  ;;  %v373_v13 = vadd.f32 %v1833_v44, %v331_v1  ;;  %v333_v14 = vmul.f32 %v1854_v48, %v291_v2  ;;  %v370_v18 = vadd.f32 %v1852_v47, %v328_v6  ;;  %v1285_v45 = vld [vmem:[%s2249_s1 + $0xc8] sm:$0xf0] }
  0x36   : > { %v329_v8 = vmul.f32 %v1854_v48, %v287_v59  ;;  %v374_v19 = vadd.f32 %v1852_v47, %v332_v7  ;;  %v400_v32 = vmax.f32 %v368_v63, 0.0  ;;  %v404_v34 = vmax.f32 %v372_v5, 0.0 }
  0x37   : > { %v375_v24 = vadd.f32 %v1873_v56, %v333_v14  ;;  %v401_v35 = vmax.f32 %v369_v12, 0.0  ;;  %v405_v38 = vmax.f32 %v373_v13, 0.0  ;;  %v402_v39 = vmax.f32 %v370_v18, 0.0  ;;  %v1341_v12 = vld [vmem:[%s2249_s1 + $0x138] sm:$0xf0] }
  0x38   : > { %v371_v20 = vadd.f32 %v1873_v56, %v329_v8  ;;  %1000 = vmatpush.bf16.msrb.mxu2 %v1360_v25  ;;  %v1424_v40 = vor.u32 %v1503_v9, %v1421_v10  ;;  %v1232_v41 = vor.u32 %v1455_v11, %v1229_v15  ;;  %v406_v49 = vmax.f32 %v374_v19, 0.0  ;;  %v1483_v11 = vld [vmem:[%s2249_s1 + $0x134] sm:$0xf]  ;;  %v1481_v25 = vld [vmem:[%s2249_s1 + $0x124] sm:$0xf] }
  0x39   : > { %v1296_v50 = vor.u32 %v1471_v16, %v1293_v17  ;;  %v1352_v53 = vor.u32 %v1485_v21, %v1349_v22  ;;  %v407_v55 = vmax.f32 %v375_v24, 0.0  ;;  %v1416_v57 = vor.u32 %v1501_v23, %v1413_v26  ;;  %v1499_v16 = vld [vmem:[%s2249_s1 + $0x1b4] sm:$0xf]  ;;  %v1405_v17 = vld [vmem:[%s2249_s1 + $0x1b8] sm:$0xf0] }
  0x3a   : > { %v403_v52 = vmax.f32 %v371_v20, 0.0  ;;  %1029 = vmatpush.bf16.msrb.mxu3 %v1424_v40  ;;  %942 = vmatpush.bf16.msrb.mxu0 %v1232_v41  ;;  %v1224_v58 = vor.u32 %v1453_v30, %v1221_v31  ;;  %v292_v61 = vunpack.c.l.bf16 %v268_v37  ;;  %v1288_v59 = vor.u32 %v1469_v36, %v1285_v45  ;;  %v1451_v18 = vld [vmem:[%s2249_s1 + $0x34] sm:$0xf]  ;;  %v1213_v20 = vld [vmem:[%s2249_s1 + $0x38] sm:$0xf0] }
  0x3b   : > { %971 = vmatpush.bf16.msrb.mxu1 %v1296_v50  ;;  %v296_v63 = vunpack.c.l.bf16 %v270_v46  ;;  %v293_v0 = vunpack.c.h.bf16 %v268_v37  ;;  %v297_v1 = vunpack.c.h.bf16 %v270_v46  ;;  %v2000_v2 = vpack.c.bf16 %v404_v34, %v400_v32  ;;  %v1467_v21 = vld [vmem:[%s2249_s1 + $0xb4] sm:$0xf]  ;;  %v1277_v22 = vld [vmem:[%s2249_s1 + $0xb8] sm:$0xf0]  ;;  %v1333_v26 = vld [vmem:[%s2249_s1 + $0x128] sm:$0xf0] }
  0x3c   : > { %v2002_v3 = vpack.c.bf16 %v405_v38, %v401_v35  ;;  %1001 = vmatpush.bf16.msrb.mxu2 %v1352_v53  ;;  %v294_v4 = vunpack.c.l.bf16 %v269_v54  ;;  %v2004_v5 = vpack.c.bf16 %v406_v49, %v402_v39  ;;  %v334_v6 = vmul.f32 %v1784_v27, %v292_v61  ;;  %v1497_v30 = vld [vmem:[%s2249_s1 + $0x1a4] sm:$0xf]  ;;  %v1397_v36 = vld [vmem:[%s2249_s1 + $0x1a8] sm:$0xf0] }
  0x3d   : > { %v298_v7 = vunpack.c.l.bf16 %v271_v62  ;;  %v338_v8 = vmul.f32 %v1784_v27, %v296_v63  ;;  %v295_v9 = vunpack.c.h.bf16 %v269_v54  ;;  %v299_v10 = vunpack.c.h.bf16 %v271_v62  ;;  %v1449_v37 = vld [vmem:[%s2249_s1 + $0x24] sm:$0xf]  ;;  %v1205_v38 = vld [vmem:[%s2249_s1 + $0x28] sm:$0xf0] }
  0x3e   : > { %1030 = vmatpush.bf16.msrb.mxu3 %v1416_v57  ;;  %943 = vmatpush.bf16.msrb.mxu0 %v1224_v58  ;;  %v2014_v13 = vpack.c.bf16 %v407_v55, %v403_v52  ;;  %v335_v14 = vmul.f32 %v1786_v28, %v293_v0  ;;  %v339_v15 = vmul.f32 %v1786_v28, %v297_v1  ;;  %v1465_v46 = vld [vmem:[%s2249_s1 + $0xa4] sm:$0xf]  ;;  %v1269_v49 = vld [vmem:[%s2249_s1 + $0xa8] sm:$0xf0] }
  0x3f   : > { %972 = vmatpush.bf16.msrb.mxu1 %v1288_v59  ;;  %v336_v19 = vmul.f32 %v1788_v29, %v294_v4  ;;  %v376_v23 = vadd.f32 %v1797_v33, %v334_v6  ;;  %v340_v24 = vmul.f32 %v1788_v29, %v298_v7  ;;  %v380_v31 = vadd.f32 %v1797_v33, %v338_v8  ;;  %v272_v4 = vld [vmem:[%s1850_s19 + $0x60] sm:$0xff]  ;;  %v274_v6 = vld [vmem:[%s1850_s19 + $0x70] sm:$0xff]  ;;  %v273_v7 = vld [vmem:[%s1850_s19 + $0x68] sm:$0xff] }
  0x40   : > { %v337_v32 = vmul.f32 %v1854_v48, %v295_v9  ;;  %v341_v34 = vmul.f32 %v1854_v48, %v299_v10  ;;  %v1344_v35 = vor.u32 %v1483_v11, %v1341_v12  ;;  %v377_v39 = vadd.f32 %v1833_v44, %v335_v14  ;;  %v275_v8 = vld [vmem:[%s1850_s19 + $0x78] sm:$0xff]  ;;  %v1479_v11 = vld [vmem:[%s2249_s1 + $0x114] sm:$0xf] }
  0x41   : > { %837 = vmatmul.bf16.gmra.mxu0 %v2000_v2  ;;  %v381_v40 = vadd.f32 %v1833_v44, %v339_v15  ;;  %v1408_v41 = vor.u32 %v1499_v16, %v1405_v17  ;;  %v1216_v45 = vor.u32 %v1451_v18, %v1213_v20  ;;  %v378_v52 = vadd.f32 %v1852_v47, %v336_v19  ;;  %v1325_v12 = vld [vmem:[%s2249_s1 + $0x118] sm:$0xf0]  ;;  %v1495_v17 = vld [vmem:[%s2249_s1 + $0x194] sm:$0xf] }
  0x42   : > { %866 = vmatmul.bf16.gmra.mxu1 %v2002_v3  ;;  %895 = vmatmul.bf16.gmra.mxu2 %v2004_v5  ;;  %v1280_v50 = vor.u32 %v1467_v21, %v1277_v22  ;;  %v1336_v53 = vor.u32 %v1481_v25, %v1333_v26  ;;  %v382_v54 = vadd.f32 %v1852_v47, %v340_v24  ;;  %v408_v59 = vmax.f32 %v376_v23, 0.0  ;;  %v1389_v18 = vld [vmem:[%s2249_s1 + $0x198] sm:$0xf0]  ;;  %v1447_v21 = vld [vmem:[%s2249_s1 + $0x14] sm:$0xf] }
  0x43   : > { %1002 = vmatpush.bf16.msrb.mxu2 %v1344_v35  ;;  %1031 = vmatpush.bf16.msrb.mxu3 %v1408_v41  ;;  %v1400_v55 = vor.u32 %v1497_v30, %v1397_v36  ;;  %v1208_v57 = vor.u32 %v1449_v37, %v1205_v38  ;;  %v379_v58 = vadd.f32 %v1873_v56, %v337_v32  ;;  %v412_v63 = vmax.f32 %v380_v31, 0.0  ;;  %v1197_v22 = vld [vmem:[%s2249_s1 + $0x18] sm:$0xf0]  ;;  %v1463_v23 = vld [vmem:[%s2249_s1 + $0x94] sm:$0xf] }
  0x44   : > { %924 = vmatmul.bf16.gmra.mxu3 %v2014_v13  ;;  %944 = vmatpush.bf16.msrb.mxu0 %v1216_v45  ;;  %v383_v61 = vadd.f32 %v1873_v56, %v341_v34  ;;  %v1272_v62 = vor.u32 %v1465_v46, %v1269_v49  ;;  %v409_v0 = vmax.f32 %v377_v39, 0.0  ;;  %v413_v1 = vmax.f32 %v381_v40, 0.0  ;;  %v1261_v31 = vld [vmem:[%s2249_s1 + $0x98] sm:$0xf0]  ;;  %v1477_v32 = vld [vmem:[%s2249_s1 + $0x104] sm:$0xf] }
  0x45   : > { %973 = vmatpush.bf16.msrb.mxu1 %v1280_v50  ;;  %v410_v9 = vmax.f32 %v378_v52, 0.0  ;;  %v414_v10 = vmax.f32 %v382_v54, 0.0  ;;  %v411_v14 = vmax.f32 %v379_v58, 0.0  ;;  %v300_v16 = vunpack.c.l.bf16 %v272_v4  ;;  %v1317_v34 = vld [vmem:[%s2249_s1 + $0x108] sm:$0xf0] }
  0x46   : > { %v415_v15 = vmax.f32 %v383_v61, 0.0  ;;  %v2092_v19 = vpack.c.bf16 %v412_v63, %v408_v59  ;;  %v2094_v20 = vpack.c.bf16 %v413_v1, %v409_v0  ;;  %v304_v24 = vunpack.c.l.bf16 %v274_v6  ;;  %v1493_v45 = vld [vmem:[%s2249_s1 + $0x184] sm:$0xf]  ;;  %v1381_v46 = vld [vmem:[%s2249_s1 + $0x188] sm:$0xf0] }
  0x47   : > { %1003 = vmatpush.bf16.msrb.mxu2 %v1336_v53  ;;  %1032 = vmatpush.bf16.msrb.mxu3 %v1400_v55  ;;  %v301_v25 = vunpack.c.h.bf16 %v272_v4  ;;  %v305_v26 = vunpack.c.h.bf16 %v274_v6  ;;  %v1328_v30 = vor.u32 %v1479_v11, %v1325_v12  ;;  %v2114_v35 = vpack.c.bf16 %v414_v10, %v410_v9  ;;  %v1445_v49 = vld [vmem:[%s2249_s1 + $0x4] sm:$0xf]  ;;  %v1189_v55 = vld [vmem:[%s2249_s1 + $0x8] sm:$0xf0] }
  0x48   : > { %945 = vmatpush.bf16.msrb.mxu0 %v1208_v57  ;;  %v302_v36 = vunpack.c.l.bf16 %v273_v7  ;;  %v306_v37 = vunpack.c.l.bf16 %v275_v8  ;;  %v2116_v38 = vpack.c.bf16 %v415_v15, %v411_v14  ;;  %v342_v39 = vmul.f32 %v1784_v27, %v300_v16  ;;  %v1461_v57 = vld [vmem:[%s2249_s1 + $0x84] sm:$0xf]  ;;  %v1253_v58 = vld [vmem:[%s2249_s1 + $0x88] sm:$0xf0] }
  0x49   : > { %974 = vmatpush.bf16.msrb.mxu1 %v1272_v62  ;;  %v1392_v40 = vor.u32 %v1495_v17, %v1389_v18  ;;  %v1200_v41 = vor.u32 %v1447_v21, %v1197_v22  ;;  %v303_v52 = vunpack.c.h.bf16 %v273_v7  ;;  %v307_v50 = vunpack.c.h.bf16 %v275_v8 }
  0x4a   : > { %v1264_v53 = vor.u32 %v1463_v23, %v1261_v31  ;;  %v1320_v54 = vor.u32 %v1477_v32, %v1317_v34  ;;  %v346_v61 = vmul.f32 %v1784_v27, %v304_v24  ;;  %v343_v62 = vmul.f32 %v1786_v28, %v301_v25 }
  0x4b   : > { %1004 = vmatpush.bf16.msrb.mxu2 %v1328_v30  ;;  %v347_v59 = vmul.f32 %v1786_v28, %v305_v26  ;;  %v344_v63 = vmul.f32 %v1788_v29, %v302_v36  ;;  %v348_v0 = vmul.f32 %v1788_v29, %v306_v37  ;;  %1033 = vmatpush.bf16.msrb.mxu3 %v1392_v40 }
  0x4c   : > { %v1384_v1 = vor.u32 %v1493_v45, %v1381_v46  ;;  %946 = vmatpush.bf16.msrb.mxu0 %v1200_v41  ;;  %v1192_v4 = vor.u32 %v1445_v49, %v1189_v55  ;;  %v1256_v6 = vor.u32 %v1461_v57, %v1253_v58  ;;  %v345_v27 = vmul.f32 %v1854_v48, %v303_v52 }
  0x4d   : > { %975 = vmatpush.bf16.msrb.mxu1 %v1264_v53  ;;  %v349_v7 = vmul.f32 %v1854_v48, %v307_v50  ;;  %v384_v28 = vadd.f32 %v1797_v33, %v342_v39  ;;  %v388_v8 = vadd.f32 %v1797_v33, %v346_v61  ;;  %v385_v9 = vadd.f32 %v1833_v44, %v343_v62 }
  0x4e   : > { %v389_v29 = vadd.f32 %v1833_v44, %v347_v59  ;;  %v386_v10 = vadd.f32 %v1852_v47, %v344_v63  ;;  %v390_v11 = vadd.f32 %v1852_v47, %v348_v0  ;;  %v387_v12 = vadd.f32 %v1873_v56, %v345_v27 }
  0x4f   : > { %1005 = vmatpush.bf16.msrb.mxu2 %v1320_v54  ;;  %1034 = vmatpush.bf16.msrb.mxu3 %v1384_v1  ;;  %v391_v48 = vadd.f32 %v1873_v56, %v349_v7  ;;  %v416_v14 = vmax.f32 %v384_v28, 0.0  ;;  %v420_v15 = vmax.f32 %v388_v8, 0.0  ;;  %v417_v16 = vmax.f32 %v385_v9, 0.0 }
  0x50   : > { %947 = vmatpush.bf16.msrb.mxu0 %v1192_v4  ;;  %v421_v17 = vmax.f32 %v389_v29, 0.0  ;;  %v418_v33 = vmax.f32 %v386_v10, 0.0  ;;  %v422_v18 = vmax.f32 %v390_v11, 0.0  ;;  %v419_v21 = vmax.f32 %v387_v12, 0.0 }
  0x51   : > { %842 = vmatmul.bf16.gmra.mxu0 %v2092_v19  ;;  %976 = vmatpush.bf16.msrb.mxu1 %v1256_v6  ;;  %v423_v22 = vmax.f32 %v391_v48, 0.0  ;;  %v436_v44 = vpack.c.bf16 %v420_v15, %v416_v14 }
  0x52   : > { %871 = vmatmul.bf16.gmra.mxu1 %v2094_v20  ;;  %900 = vmatmul.bf16.gmra.mxu2 %v2114_v35  ;;  %v437_v23 = vpack.c.bf16 %v421_v17, %v417_v16  ;;  %v438_v24 = vpack.c.bf16 %v422_v18, %v418_v33 }
  0x53   : > { %v439_v25 = vpack.c.bf16 %v423_v22, %v419_v21 }
  0x54   : > { %929 = vmatmul.bf16.gmra.mxu3 %v2116_v38 }
  0x61   : > { %847 = vmatmul.bf16.gmra.mxu0 %v436_v44 }
  0x62   : > { %876 = vmatmul.bf16.gmra.mxu1 %v437_v23  ;;  %905 = vmatmul.bf16.gmra.mxu2 %v438_v24 }
  0x64   : > { %934 = vmatmul.bf16.gmra.mxu3 %v439_v25 }
  0x71   : > { %948 = vmatmul.bf16.vlgmr.msrb.gmra.mxu0 %v1919_v42 }
  0x72   : > { %977 = vmatmul.bf16.vlgmr.msrb.gmra.mxu1 %v1921_v43  ;;  %1006 = vmatmul.bf16.vlgmr.msrb.gmra.mxu2 %v1924_v51  ;;  %v2171_v43 = vld [vmem:[%s2252_s4] sm:$0x3] }
  0x74   : > { %1035 = vmatmul.bf16.vlgmr.msrb.gmra.mxu3 %v1930_v60  ;;  %v2176_v60 = vld [vmem:[%s2253_s5] sm:$0x3] }
  0x75   : > { %v2182_v26 = vperm.slane %v2176_v60, 0 }
  0x81   : > { %953 = vmatmul.bf16.gmra.mxu0 %v2000_v2 }
  0x82   : > { %982 = vmatmul.bf16.gmra.mxu1 %v2002_v3  ;;  %1011 = vmatmul.bf16.gmra.mxu2 %v2004_v5  ;;  %v2179_v3 = vperm.slane %v2171_v43, 0 }
  0x84   : > { %1040 = vmatmul.bf16.gmra.mxu3 %v2014_v13 }
  0x91   : > { %958 = vmatmul.bf16.gmra.mxu0 %v2092_v19 }
  0x92   : > { %987 = vmatmul.bf16.gmra.mxu1 %v2094_v20  ;;  %1016 = vmatmul.bf16.gmra.mxu2 %v2114_v35 }
  0x94   : > { %1045 = vmatmul.bf16.gmra.mxu3 %v2116_v38 }
  0xa1   : > { %963 = vmatmul.bf16.gmra.mxu0 %v436_v44 }
  0xa2   : > { %992 = vmatmul.bf16.gmra.mxu1 %v437_v23  ;;  %1021 = vmatmul.bf16.gmra.mxu2 %v438_v24 }
  0xa4   : > { %1050 = vmatmul.bf16.gmra.mxu3 %v439_v25 }
  0xae   : > { %v833_v47 = vpop.f32.mrf.mxu0 }
  0xaf   : > { %v862_v56 = vpop.f32.mrf.mxu1 }
  0xb0   : > { %v863_v42 = vadd.f32 %v862_v56, %v833_v47 }
  0xb5   : > { %v891_v51 = vpop.f32.mrf.mxu2 }
  0xb6   : > { %v892_v2 = vadd.f32 %v891_v51, %v863_v42  ;;  %v835_v5 = vpop.f32.mrf.mxu0 }
  0xb7   : > { %v864_v13 = vpop.f32.mrf.mxu1  ;;  %v920_v19 = vpop.f32.mrf.mxu3 }
  0xb8   : > { %v921_v20 = vadd.f32 %v920_v19, %v892_v2  ;;  %v865_v32 = vadd.f32 %v864_v13, %v835_v5 }
  0xba   : > { %v1062_v30 = vmul.f32 %v2179_v3, %v921_v20 }
  0xbc   : > { %v1084_v31 = vadd.f32 %v2182_v26, %v1062_v30 }
  0xbd   : > { %v893_v34 = vpop.f32.mrf.mxu2 }
  0xbe   : > { %1100 = vst [vmem:[%s2190_s14] sm:$0xff] %v1084_v31  ;;  %v894_v35 = vadd.f32 %v893_v34, %v865_v32  ;;  %v838_v36 = vpop.f32.mrf.mxu0 }
  0xbf   : > { %v867_v37 = vpop.f32.mrf.mxu1  ;;  %v922_v38 = vpop.f32.mrf.mxu3 }
  0xc0   : > { %v923_v39 = vadd.f32 %v922_v38, %v894_v35  ;;  %v868_v41 = vadd.f32 %v867_v37, %v838_v36 }
  0xc2   : > { %v1064_v40 = vmul.f32 %v2179_v3, %v923_v39  ;;  %v2216_v39 = vperm.slane %v2171_v43, 1 }
  0xc4   : > { %v1086_v45 = vadd.f32 %v2182_v26, %v1064_v40 }
  0xc5   : > { %v896_v46 = vpop.f32.mrf.mxu2 }
  0xc6   : > { %1102 = vst [vmem:[%s2190_s14 + $0x10] sm:$0xff] %v1086_v45  ;;  %v897_v49 = vadd.f32 %v896_v46, %v868_v41  ;;  %v840_v52 = vpop.f32.mrf.mxu0 }
  0xc7   : > { %v869_v50 = vpop.f32.mrf.mxu1  ;;  %v925_v53 = vpop.f32.mrf.mxu3 }
  0xc8   : > { %v926_v54 = vadd.f32 %v925_v53, %v897_v49  ;;  %v870_v58 = vadd.f32 %v869_v50, %v840_v52  ;;  %v2219_v49 = vperm.slane %v2176_v60, 1 }
  0xca   : > { %v1066_v55 = vmul.f32 %v2179_v3, %v926_v54 }
  0xcc   : > { %v1088_v57 = vadd.f32 %v2182_v26, %v1066_v55 }
  0xcd   : > { %v898_v61 = vpop.f32.mrf.mxu2 }
  0xce   : > { %1104 = vst [vmem:[%s2190_s14 + $0x20] sm:$0xff] %v1088_v57  ;;  %v899_v62 = vadd.f32 %v898_v61, %v870_v58  ;;  %v843_v59 = vpop.f32.mrf.mxu0 }
  0xcf   : > { %v872_v63 = vpop.f32.mrf.mxu1  ;;  %v927_v0 = vpop.f32.mrf.mxu3 }
  0xd0   : > { %v928_v1 = vadd.f32 %v927_v0, %v899_v62  ;;  %v873_v6 = vadd.f32 %v872_v63, %v843_v59 }
  0xd2   : > { %v1068_v4 = vmul.f32 %v2179_v3, %v928_v1 }
  0xd4   : > { %v1090_v27 = vadd.f32 %v2182_v26, %v1068_v4 }
  0xd5   : > { %v901_v7 = vpop.f32.mrf.mxu2 }
  0xd6   : > { %1106 = vst [vmem:[%s2190_s14 + $0x30] sm:$0xff] %v1090_v27  ;;  %v902_v28 = vadd.f32 %v901_v7, %v873_v6  ;;  %v845_v8 = vpop.f32.mrf.mxu0 }
  0xd7   : > { %v874_v9 = vpop.f32.mrf.mxu1  ;;  %v930_v29 = vpop.f32.mrf.mxu3 }
  0xd8   : > { %v931_v10 = vadd.f32 %v930_v29, %v902_v28  ;;  %v875_v48 = vadd.f32 %v874_v9, %v845_v8 }
  0xda   : > { %v1070_v11 = vmul.f32 %v2179_v3, %v931_v10 }
  0xdc   : > { %v1092_v12 = vadd.f32 %v2182_v26, %v1070_v11 }
  0xdd   : > { %v903_v14 = vpop.f32.mrf.mxu2 }
  0xde   : > { %1108 = vst [vmem:[%s2190_s14 + $0x40] sm:$0xff] %v1092_v12  ;;  %v904_v15 = vadd.f32 %v903_v14, %v875_v48  ;;  %v848_v16 = vpop.f32.mrf.mxu0 }
  0xdf   : > { %v877_v17 = vpop.f32.mrf.mxu1  ;;  %v932_v33 = vpop.f32.mrf.mxu3 }
  0xe0   : > { %v933_v18 = vadd.f32 %v932_v33, %v904_v15  ;;  %v878_v22 = vadd.f32 %v877_v17, %v848_v16 }
  0xe2   : > { %v1072_v21 = vmul.f32 %v2179_v3, %v933_v18 }
  0xe4   : > { %v1094_v44 = vadd.f32 %v2182_v26, %v1072_v21 }
  0xe5   : > { %v906_v23 = vpop.f32.mrf.mxu2 }
  0xe6   : > { %1110 = vst [vmem:[%s2190_s14 + $0x50] sm:$0xff] %v1094_v44  ;;  %v907_v24 = vadd.f32 %v906_v23, %v878_v22  ;;  %v850_v25 = vpop.f32.mrf.mxu0 }
  0xe7   : > { %v879_v47 = vpop.f32.mrf.mxu1  ;;  %v935_v56 = vpop.f32.mrf.mxu3 }
  0xe8   : > { %v936_v42 = vadd.f32 %v935_v56, %v907_v24  ;;  %v880_v5 = vadd.f32 %v879_v47, %v850_v25 }
  0xea   : > { %v1074_v51 = vmul.f32 %v2179_v3, %v936_v42 }
  0xec   : > { %v1096_v2 = vadd.f32 %v2182_v26, %v1074_v51 }
  0xed   : > { %v908_v13 = vpop.f32.mrf.mxu2 }
  0xee   : > { %1112 = vst [vmem:[%s2190_s14 + $0x60] sm:$0xff] %v1096_v2  ;;  %v909_v19 = vadd.f32 %v908_v13, %v880_v5  ;;  %v949_v20 = vpop.f32.mrf.mxu0 }
  0xef   : > { %v978_v30 = vpop.f32.mrf.mxu1  ;;  %v937_v31 = vpop.f32.mrf.mxu3 }
  0xf0   : > { %v938_v32 = vadd.f32 %v937_v31, %v909_v19  ;;  %v979_v35 = vadd.f32 %v978_v30, %v949_v20 }
  0xf2   : > { %v1076_v34 = vmul.f32 %v2179_v3, %v938_v32 }
  0xf4   : > { %v1098_v36 = vadd.f32 %v2182_v26, %v1076_v34 }
  0xf5   : > { %v1007_v37 = vpop.f32.mrf.mxu2 }
  0xf6   : > { %1114 = vst [vmem:[%s2190_s14 + $0x70] sm:$0xff] %v1098_v36  ;;  %v1008_v38 = vadd.f32 %v1007_v37, %v979_v35  ;;  %v951_v40 = vpop.f32.mrf.mxu0 }
  0xf7   : > { %v980_v41 = vpop.f32.mrf.mxu1  ;;  %v1036_v45 = vpop.f32.mrf.mxu3 }
  0xf8   : > { %v1037_v46 = vadd.f32 %v1036_v45, %v1008_v38  ;;  %v981_v50 = vadd.f32 %v980_v41, %v951_v40 }
  0xfa   : > { %v1063_v3 = vmul.f32 %v2216_v39, %v1037_v46 }
  0xfc   : > { %v1085_v52 = vadd.f32 %v2219_v49, %v1063_v3 }
  0xfd   : > { %v1009_v26 = vpop.f32.mrf.mxu2 }
  0xfe   : > { %1101 = vst [vmem:[%s2190_s14 + $0x8] sm:$0xff] %v1085_v52  ;;  %v1010_v53 = vadd.f32 %v1009_v26, %v981_v50  ;;  %v954_v54 = vpop.f32.mrf.mxu0 }
  0xff   : > { %v983_v55 = vpop.f32.mrf.mxu1  ;;  %v1038_v43 = vpop.f32.mrf.mxu3 }
 0x100   : > { %v1039_v57 = vadd.f32 %v1038_v43, %v1010_v53  ;;  %v984_v61 = vadd.f32 %v983_v55, %v954_v54 }
 0x102   : > { %v1065_v58 = vmul.f32 %v2216_v39, %v1039_v57 }
 0x104   : > { %v1087_v62 = vadd.f32 %v2219_v49, %v1065_v58 }
 0x105   : > { %v1012_v60 = vpop.f32.mrf.mxu2 }
 0x106   : > { %1103 = vst [vmem:[%s2190_s14 + $0x18] sm:$0xff] %v1087_v62  ;;  %v1013_v59 = vadd.f32 %v1012_v60, %v984_v61  ;;  %v956_v63 = vpop.f32.mrf.mxu0 }
 0x107   : > { %v985_v0 = vpop.f32.mrf.mxu1  ;;  %v1041_v1 = vpop.f32.mrf.mxu3 }
 0x108   : > { %v1042_v4 = vadd.f32 %v1041_v1, %v1013_v59  ;;  %v986_v7 = vadd.f32 %v985_v0, %v956_v63 }
 0x10a   : > { %v1067_v6 = vmul.f32 %v2216_v39, %v1042_v4 }
 0x10c   : > { %v1089_v27 = vadd.f32 %v2219_v49, %v1067_v6 }
 0x10d   : > { %v1014_v28 = vpop.f32.mrf.mxu2 }
 0x10e   : > { %1105 = vst [vmem:[%s2190_s14 + $0x28] sm:$0xff] %v1089_v27  ;;  %v1015_v8 = vadd.f32 %v1014_v28, %v986_v7  ;;  %v959_v9 = vpop.f32.mrf.mxu0 }
 0x10f   : > { %v988_v29 = vpop.f32.mrf.mxu1  ;;  %v1043_v10 = vpop.f32.mrf.mxu3 }
 0x110   : > { %v1044_v11 = vadd.f32 %v1043_v10, %v1015_v8  ;;  %v989_v48 = vadd.f32 %v988_v29, %v959_v9 }
 0x112   : > { %v1069_v12 = vmul.f32 %v2216_v39, %v1044_v11 }
 0x114   : > { %v1091_v14 = vadd.f32 %v2219_v49, %v1069_v12 }
 0x115   : > { %v1017_v15 = vpop.f32.mrf.mxu2 }
 0x116   : > { %1107 = vst [vmem:[%s2190_s14 + $0x38] sm:$0xff] %v1091_v14  ;;  %v1018_v16 = vadd.f32 %v1017_v15, %v989_v48  ;;  %v961_v17 = vpop.f32.mrf.mxu0 }
 0x117   : > { %v990_v33 = vpop.f32.mrf.mxu1  ;;  %v1046_v18 = vpop.f32.mrf.mxu3 }
 0x118   : > { %v1047_v21 = vadd.f32 %v1046_v18, %v1018_v16  ;;  %v991_v23 = vadd.f32 %v990_v33, %v961_v17 }
 0x11a   : > { %v1071_v22 = vmul.f32 %v2216_v39, %v1047_v21 }
 0x11c   : > { %v1093_v44 = vadd.f32 %v2219_v49, %v1071_v22 }
 0x11d   : > { %v1019_v24 = vpop.f32.mrf.mxu2 }
 0x11e   : > { %1109 = vst [vmem:[%s2190_s14 + $0x48] sm:$0xff] %v1093_v44  ;;  %v1020_v25 = vadd.f32 %v1019_v24, %v991_v23  ;;  %v964_v47 = vpop.f32.mrf.mxu0 }
 0x11f   : > { %v1048_v56 = vpop.f32.mrf.mxu3  ;;  %v993_v42 = vpop.f32.mrf.mxu1 }
 0x120   : > { %v1049_v51 = vadd.f32 %v1048_v56, %v1020_v25  ;;  %v994_v5 = vadd.f32 %v993_v42, %v964_v47 }
 0x122   : > { %v1073_v2 = vmul.f32 %v2216_v39, %v1049_v51 }
 0x124   : > { %v1095_v13 = vadd.f32 %v2219_v49, %v1073_v2 }
 0x125   : > { %v1022_v19 = vpop.f32.mrf.mxu2 }
 0x126   : > { %1111 = vst [vmem:[%s2190_s14 + $0x58] sm:$0xff] %v1095_v13  ;;  %v1023_v20 = vadd.f32 %v1022_v19, %v994_v5  ;;  %v966_v32 = vpop.f32.mrf.mxu0 }
 0x127   : > { %v1051_v30 = vpop.f32.mrf.mxu3  ;;  %v995_v34 = vpop.f32.mrf.mxu1 }
 0x128   : > { %v1052_v31 = vadd.f32 %v1051_v30, %v1023_v20  ;;  %v996_v37 = vadd.f32 %v995_v34, %v966_v32 }
 0x12a   : > { %v1075_v35 = vmul.f32 %v2216_v39, %v1052_v31 }
 0x12c   : > { %v1097_v36 = vadd.f32 %v2219_v49, %v1075_v35 }
 0x12d   : > { %v1024_v38 = vpop.f32.mrf.mxu2 }
 0x12e   : > { %1113 = vst [vmem:[%s2190_s14 + $0x68] sm:$0xff] %v1097_v36  ;;  %v1025_v40 = vadd.f32 %v1024_v38, %v996_v37 }
 0x12f   : > { %v1053_v41 = vpop.f32.mrf.mxu3 }
 0x130   : > { %v1054_v45 = vadd.f32 %v1053_v41, %v1025_v40 }
 0x132   : > { %v1077_v46 = vmul.f32 %v2216_v39, %v1054_v45 }
 0x134   : > { %v1099_v3 = vadd.f32 %v2219_v49, %v1077_v46 }
 0x136   : > { %1115 = vst [vmem:[%s2190_s14 + $0x78] sm:$0xff] %v1099_v3 }
 0x137 PF: > { %s16_s21 = sadd.s32 1, %s1523_s21  }
 0x138   : > { %p13_p4 = scmp.ge.s32.totalorder %s16_s21, 4  }
 0x13a   :  { %15 = sbr.rel (!%p13_p4) target bundleno = 1 (0x1), region = 74 }

// kernel: rot_prediction_forward.103
= control target key start
LH: loop header
LB: loop body
LE: loop exit
PB: predicated region body
PF: predicated region fallthrough
CT: control target
= control target key end

     0   :  { %s486_s1 = inlined_call_operand.vmem [shape: bf16[256,128], index: 1, kind: input, shape index: {}]   ;;  %s487_s0 = inlined_call_operand.vmem [shape: bf16[32,256], index: 0, kind: input, shape index: {}]   ;;  %s488_s2 = inlined_call_operand.vmem [shape: f32[1,256], index: 2, kind: input, shape index: {}]   ;;  %s489_s3 = inlined_call_operand.vmem [shape: f32[1,256], index: 3, kind: input, shape index: {}]   ;;  %s490_s4 = inlined_call_operand.vmem [shape: f32[1,128], index: 4, kind: input, shape index: {}]   ;;  %s491_s5 = inlined_call_operand.vmem [shape: f32[1,128], index: 5, kind: input, shape index: {}]   ;;  %s492_s6 = inlined_call_operand.vmem [shape: f32[32,128], index: 6, kind: output, shape index: {}]  }
   0x1   :  { %v340_v0 = vld [vmem:[%s486_s1 + $0x38] sm:$0xff]  ;;  %v339_v2 = vld [vmem:[%s486_s1 + $0x30] sm:$0xff]  ;;  %v338_v4 = vld [vmem:[%s486_s1 + $0x28] sm:$0xff] }
   0x2   :  { %v348_v1 = vld [vmem:[%s486_s1 + $0x78] sm:$0xff]  ;;  %203 = vmatpush.bf16.msra.mxu0 %v340_v0  ;;  %349 = vmatpush.bf16.msra.mxu2 %v340_v0  ;;  %v347_v3 = vld [vmem:[%s486_s1 + $0x70] sm:$0xff]  ;;  %v346_v5 = vld [vmem:[%s486_s1 + $0x68] sm:$0xff] }
   0x3   :  { %222 = vmatpush.bf16.msra.mxu1 %v348_v1  ;;  %357 = vmatpush.bf16.msra.mxu3 %v348_v1  ;;  %v23_v6 = vld [vmem:[%s487_s0] sm:$0xff]  ;;  %v24_v7 = vld [vmem:[%s487_s0 + $0x8] sm:$0xff]  ;;  %v25_v10 = vld [vmem:[%s487_s0 + $0x10] sm:$0xff] }
   0x4   :  { %v35_v8 = vld [vmem:[%s488_s2] sm:$0x3]  ;;  %v26_v11 = vld [vmem:[%s487_s0 + $0x18] sm:$0xff]  ;;  %v27_v13 = vunpack.c.l.bf16 %v23_v6  ;;  %v29_v14 = vunpack.c.l.bf16 %v24_v7  ;;  %v31_v17 = vunpack.c.l.bf16 %v25_v10  ;;  %v28_v19 = vunpack.c.h.bf16 %v23_v6  ;;  %v335_v33 = vld [vmem:[%s486_s1 + $0x10] sm:$0xff] }
   0x5   :  { %v337_v9 = vld [vmem:[%s486_s1 + $0x20] sm:$0xff]  ;;  %v37_v15 = vperm.slane %v35_v8, 0  ;;  %v33_v18 = vunpack.c.l.bf16 %v26_v11  ;;  %v38_v20 = vperm.slane %v35_v8, 1  ;;  %v336_v21 = vld [vmem:[%s486_s1 + $0x18] sm:$0xff]  ;;  %v30_v22 = vunpack.c.h.bf16 %v24_v7  ;;  %v343_v37 = vld [vmem:[%s486_s1 + $0x50] sm:$0xff] }
   0x6   :  { %204 = vmatpush.bf16.msra.mxu0 %v339_v2  ;;  %350 = vmatpush.bf16.msra.mxu2 %v339_v2  ;;  %v345_v12 = vld [vmem:[%s486_s1 + $0x60] sm:$0xff]  ;;  %v32_v23 = vunpack.c.h.bf16 %v25_v10  ;;  %v34_v24 = vunpack.c.h.bf16 %v26_v11  ;;  %v344_v25 = vld [vmem:[%s486_s1 + $0x58] sm:$0xff]  ;;  %v334_v43 = vld [vmem:[%s486_s1 + $0x8] sm:$0xff] }
   0x7   :  { %223 = vmatpush.bf16.msra.mxu1 %v347_v3  ;;  %358 = vmatpush.bf16.msra.mxu3 %v347_v3  ;;  %v49_v16 = vld [vmem:[%s489_s3] sm:$0x3]  ;;  %v41_v26 = vmul.f32 %v37_v15, %v27_v13  ;;  %v43_v29 = vmul.f32 %v37_v15, %v29_v14  ;;  %v45_v30 = vmul.f32 %v37_v15, %v31_v17  ;;  %v342_v47 = vld [vmem:[%s486_s1 + $0x48] sm:$0xff] }
   0x8   :  { %v51_v27 = vperm.slane %v49_v16, 0  ;;  %v52_v28 = vperm.slane %v49_v16, 1  ;;  %v47_v31 = vmul.f32 %v37_v15, %v33_v18  ;;  %v42_v32 = vmul.f32 %v38_v20, %v28_v19  ;;  %v333_v52 = vld [vmem:[%s486_s1] sm:$0xff] }
   0x9   :  { %v44_v34 = vmul.f32 %v38_v20, %v30_v22  ;;  %v46_v35 = vmul.f32 %v38_v20, %v32_v23  ;;  %v48_v36 = vmul.f32 %v38_v20, %v34_v24  ;;  %v341_v57 = vld [vmem:[%s486_s1 + $0x40] sm:$0xff] }
   0xa   :  { %205 = vmatpush.bf16.msra.mxu0 %v338_v4  ;;  %351 = vmatpush.bf16.msra.mxu2 %v338_v4  ;;  %v55_v38 = vadd.f32 %v51_v27, %v41_v26  ;;  %v57_v39 = vadd.f32 %v51_v27, %v43_v29  ;;  %v59_v40 = vadd.f32 %v51_v27, %v45_v30  ;;  %v365_v63 = vld [vmem:[%s490_s4] ss:$0 sm:$0xff] }
   0xb   :  { %224 = vmatpush.bf16.msra.mxu1 %v346_v5  ;;  %359 = vmatpush.bf16.msra.mxu3 %v346_v5  ;;  %v61_v41 = vadd.f32 %v51_v27, %v47_v31  ;;  %v56_v42 = vadd.f32 %v52_v28, %v42_v32  ;;  %v58_v44 = vadd.f32 %v52_v28, %v44_v34  ;;  %v366_v2 = vld [vmem:[%s491_s5] ss:$0 sm:$0xff] }
   0xc   :  { %v60_v45 = vadd.f32 %v52_v28, %v46_v35  ;;  %v62_v46 = vadd.f32 %v52_v28, %v48_v36  ;;  %v63_v48 = vmax.f32 %v55_v38, 0.0  ;;  %v65_v49 = vmax.f32 %v57_v39, 0.0 }
   0xd   :  { %v67_v50 = vmax.f32 %v59_v40, 0.0  ;;  %v69_v51 = vmax.f32 %v61_v41, 0.0  ;;  %v64_v53 = vmax.f32 %v56_v42, 0.0  ;;  %v66_v54 = vmax.f32 %v58_v44, 0.0 }
   0xe   :  { %206 = vmatpush.bf16.msra.mxu0 %v337_v9  ;;  %352 = vmatpush.bf16.msra.mxu2 %v337_v9  ;;  %v68_v55 = vmax.f32 %v60_v45, 0.0  ;;  %v70_v56 = vmax.f32 %v62_v46, 0.0  ;;  %v71_v58 = vpack.c.bf16 %v65_v49, %v63_v48 }
   0xf   :  { %225 = vmatpush.bf16.msra.mxu1 %v345_v12  ;;  %360 = vmatpush.bf16.msra.mxu3 %v345_v12  ;;  %v73_v59 = vpack.c.bf16 %v69_v51, %v67_v50  ;;  %v72_v60 = vpack.c.bf16 %v66_v54, %v64_v53 }
  0x10   :  { %v74_v61 = vpack.c.bf16 %v70_v56, %v68_v55 }
  0x12   :  { %207 = vmatpush.bf16.msra.mxu0 %v336_v21  ;;  %353 = vmatpush.bf16.msra.mxu2 %v336_v21 }
  0x13   :  { %226 = vmatpush.bf16.msra.mxu1 %v344_v25  ;;  %361 = vmatpush.bf16.msra.mxu3 %v344_v25 }
  0x16   :  { %208 = vmatpush.bf16.msra.mxu0 %v335_v33  ;;  %354 = vmatpush.bf16.msra.mxu2 %v335_v33 }
  0x17   :  { %227 = vmatpush.bf16.msra.mxu1 %v343_v37  ;;  %362 = vmatpush.bf16.msra.mxu3 %v343_v37 }
  0x1a   :  { %209 = vmatpush.bf16.msra.mxu0 %v334_v43  ;;  %355 = vmatpush.bf16.msra.mxu2 %v334_v43 }
  0x1b   :  { %228 = vmatpush.bf16.msra.mxu1 %v342_v47  ;;  %363 = vmatpush.bf16.msra.mxu3 %v342_v47 }
  0x1e   :  { %210 = vmatpush.bf16.msra.mxu0 %v333_v52  ;;  %356 = vmatpush.bf16.msra.mxu2 %v333_v52 }
  0x1f   :  { %229 = vmatpush.bf16.msra.mxu1 %v341_v57  ;;  %364 = vmatpush.bf16.msra.mxu3 %v341_v57 }
  0x21   :  { %211 = vmatmul.bf16.vlgmr.msra.gmra.mxu0 %v71_v58  ;;  %216 = vmatmul.bf16.vlgmr.msra.gmra.mxu2 %v73_v59 }
  0x22   :  { %230 = vmatmul.bf16.vlgmr.msra.gmra.mxu1 %v72_v60  ;;  %235 = vmatmul.bf16.vlgmr.msra.gmra.mxu3 %v74_v61 }
  0x9e   :  { %v212_v62 = vpop.f32.mrf.mxu0 }
  0x9f   :  { %v231_v0 = vpop.f32.mrf.mxu1 }
  0xa0   :  { %v232_v1 = vadd.f32 %v231_v0, %v212_v62 }
  0xa2   :  { %v245_v3 = vmul.f32 %v365_v63, %v232_v1 }
  0xa4   :  { %v253_v4 = vadd.f32 %v366_v2, %v245_v3  ;;  %v217_v5 = vpop.f32.mrf.mxu2 }
  0xa5   :  { %v236_v6 = vpop.f32.mrf.mxu3 }
  0xa6   :  { %v257_v7 = vmax.f32 %v253_v4, 0.0  ;;  %v237_v8 = vadd.f32 %v236_v6, %v217_v5  ;;  %v214_v9 = vpop.f32.mrf.mxu0 }
  0xa7   :  { %v233_v10 = vpop.f32.mrf.mxu1 }
  0xa8   :  { %261 = vst [vmem:[%s492_s6] sm:$0xff] %v257_v7  ;;  %v247_v11 = vmul.f32 %v365_v63, %v237_v8  ;;  %v234_v12 = vadd.f32 %v233_v10, %v214_v9 }
  0xaa   :  { %v255_v13 = vadd.f32 %v366_v2, %v247_v11  ;;  %v246_v14 = vmul.f32 %v365_v63, %v234_v12 }
  0xac   :  { %v259_v15 = vmax.f32 %v255_v13, 0.0  ;;  %v254_v16 = vadd.f32 %v366_v2, %v246_v14  ;;  %v219_v17 = vpop.f32.mrf.mxu2 }
  0xad   :  { %v238_v18 = vpop.f32.mrf.mxu3 }
  0xae   :  { %263 = vst [vmem:[%s492_s6 + $0x10] sm:$0xff] %v259_v15  ;;  %v258_v19 = vmax.f32 %v254_v16, 0.0  ;;  %v239_v20 = vadd.f32 %v238_v18, %v219_v17 }
  0xb0   :  { %262 = vst [vmem:[%s492_s6 + $0x8] sm:$0xff] %v258_v19  ;;  %v248_v21 = vmul.f32 %v365_v63, %v239_v20 }
  0xb2   :  { %v256_v22 = vadd.f32 %v366_v2, %v248_v21 }
  0xb4   :  { %v260_v23 = vmax.f32 %v256_v22, 0.0 }
  0xb6   :  { %264 = vst [vmem:[%s492_s6 + $0x18] sm:$0xff] %v260_v23 }

// kernel: rot_prediction_forward.107
= control target key start
LH: loop header
LB: loop body
LE: loop exit
PB: predicated region body
PF: predicated region fallthrough
CT: control target
= control target key end

     0   :  { %s695_s1 = inlined_call_operand.vmem [shape: bf16[384,128], index: 1, kind: input, shape index: {}]   ;;  %s696_s0 = inlined_call_operand.vmem [shape: bf16[32,384], index: 0, kind: input, shape index: {}]   ;;  %s697_s2 = inlined_call_operand.vmem [shape: f32[1,384], index: 2, kind: input, shape index: {}]   ;;  %s698_s3 = inlined_call_operand.vmem [shape: f32[1,384], index: 3, kind: input, shape index: {}]   ;;  %s699_s4 = inlined_call_operand.vmem [shape: f32[1,128], index: 4, kind: input, shape index: {}]   ;;  %s700_s5 = inlined_call_operand.vmem [shape: f32[1,128], index: 5, kind: input, shape index: {}]   ;;  %s701_s6 = inlined_call_operand.vmem [shape: f32[32,128], index: 6, kind: output, shape index: {}]  }
   0x1   :  { %v481_v0 = vld [vmem:[%s695_s1 + $0x38] sm:$0xff]  ;;  %v480_v3 = vld [vmem:[%s695_s1 + $0x30] sm:$0xff]  ;;  %v479_v6 = vld [vmem:[%s695_s1 + $0x28] sm:$0xff] }
   0x2   :  { %v489_v1 = vld [vmem:[%s695_s1 + $0x78] sm:$0xff]  ;;  %293 = vmatpush.bf16.msra.mxu0 %v481_v0  ;;  %v488_v4 = vld [vmem:[%s695_s1 + $0x70] sm:$0xff]  ;;  %498 = vmatpush.bf16.msra.mxu3 %v481_v0  ;;  %v487_v7 = vld [vmem:[%s695_s1 + $0x68] sm:$0xff] }
   0x3   :  { %v497_v2 = vld [vmem:[%s695_s1 + $0xb8] sm:$0xff]  ;;  %312 = vmatpush.bf16.msra.mxu1 %v489_v1  ;;  %v496_v5 = vld [vmem:[%s695_s1 + $0xb0] sm:$0xff]  ;;  %v495_v8 = vld [vmem:[%s695_s1 + $0xa8] sm:$0xff] }
   0x4   :  { %331 = vmatpush.bf16.msra.mxu2 %v497_v2  ;;  %v478_v9 = vld [vmem:[%s695_s1 + $0x20] sm:$0xff]  ;;  %v25_v11 = vld [vmem:[%s696_s0 + $0xc] sm:$0xff]  ;;  %v24_v15 = vld [vmem:[%s696_s0 + $0x8] sm:$0xf] }
   0x5   :  { %v23_v10 = vld [vmem:[%s696_s0] sm:$0xff]  ;;  %v26_v16 = vld [vmem:[%s696_s0 + $0x14] sm:$0xf]  ;;  %v597_v17 = vld [vmem:[%s696_s0 + $0x18] sm:$0xff]  ;;  %v34_v20 = vunpack.c.l.bf16 %v25_v11  ;;  %v35_v24 = vunpack.c.h.bf16 %v25_v11  ;;  %v33_v26 = vunpack.c.l.bf16 %v24_v15 }
   0x6   :  { %294 = vmatpush.bf16.msra.mxu0 %v480_v3  ;;  %499 = vmatpush.bf16.msra.mxu3 %v480_v3  ;;  %v43_v12 = vld [vmem:[%s697_s2] sm:$0x7]  ;;  %v602_v18 = vld [vmem:[%s696_s0 + $0x24] sm:$0xff]  ;;  %v31_v19 = vunpack.c.l.bf16 %v23_v10  ;;  %v32_v22 = vunpack.c.h.bf16 %v23_v10  ;;  %v477_v28 = vld [vmem:[%s695_s1 + $0x18] sm:$0xff]  ;;  %v36_v30 = vunpack.c.l.bf16 %v26_v16  ;;  %v37_v31 = vunpack.c.l.bf16 %v597_v17 }
   0x7   :  { %313 = vmatpush.bf16.msra.mxu1 %v488_v4  ;;  %v486_v13 = vld [vmem:[%s695_s1 + $0x60] sm:$0xff]  ;;  %v45_v21 = vperm.slane %v43_v12, 0  ;;  %v607_v25 = vperm.slane %v43_v12, 1  ;;  %v609_v27 = vperm.slane %v43_v12, 2  ;;  %v485_v29 = vld [vmem:[%s695_s1 + $0x58] sm:$0xff]  ;;  %v40_v32 = vunpack.c.l.bf16 %v602_v18  ;;  %v476_v42 = vld [vmem:[%s695_s1 + $0x10] sm:$0xff] }
   0x8   :  { %332 = vmatpush.bf16.msra.mxu2 %v496_v5  ;;  %v494_v14 = vld [vmem:[%s695_s1 + $0xa0] sm:$0xff]  ;;  %v493_v33 = vld [vmem:[%s695_s1 + $0x98] sm:$0xff]  ;;  %v484_v43 = vld [vmem:[%s695_s1 + $0x50] sm:$0xff]  ;;  %v38_v10 = vunpack.c.h.bf16 %v597_v17  ;;  %v41_v11 = vunpack.c.h.bf16 %v602_v18 }
   0x9   :  { %v63_v23 = vld [vmem:[%s698_s3] sm:$0x7]  ;;  %v51_v34 = vmul.f32 %v45_v21, %v31_v19  ;;  %v54_v35 = vmul.f32 %v45_v21, %v34_v20  ;;  %v52_v38 = vmul.f32 %v607_v25, %v32_v22  ;;  %v55_v39 = vmul.f32 %v607_v25, %v35_v24  ;;  %v492_v47 = vld [vmem:[%s695_s1 + $0x90] sm:$0xff]  ;;  %v475_v53 = vld [vmem:[%s695_s1 + $0x8] sm:$0xff] }
   0xa   :  { %295 = vmatpush.bf16.msra.mxu0 %v479_v6  ;;  %500 = vmatpush.bf16.msra.mxu3 %v479_v6  ;;  %v65_v36 = vperm.slane %v63_v23, 0  ;;  %v622_v37 = vperm.slane %v63_v23, 1  ;;  %v53_v40 = vmul.f32 %v609_v27, %v33_v26  ;;  %v627_v41 = vperm.slane %v63_v23, 2  ;;  %v483_v54 = vld [vmem:[%s695_s1 + $0x48] sm:$0xff]  ;;  %v474_v63 = vld [vmem:[%s695_s1] sm:$0xff] }
   0xb   :  { %314 = vmatpush.bf16.msra.mxu1 %v487_v7  ;;  %v56_v44 = vmul.f32 %v609_v27, %v36_v30  ;;  %v57_v45 = vmul.f32 %v45_v21, %v37_v31  ;;  %v60_v46 = vmul.f32 %v45_v21, %v40_v32  ;;  %v491_v58 = vld [vmem:[%s695_s1 + $0x88] sm:$0xff]  ;;  %v482_v0 = vld [vmem:[%s695_s1 + $0x40] sm:$0xff]  ;;  %v58_v16 = vmul.f32 %v607_v25, %v38_v10 }
   0xc   :  { %333 = vmatpush.bf16.msra.mxu2 %v495_v8  ;;  %v71_v48 = vadd.f32 %v65_v36, %v51_v34  ;;  %v74_v49 = vadd.f32 %v65_v36, %v54_v35  ;;  %v72_v50 = vadd.f32 %v622_v37, %v52_v38  ;;  %v75_v51 = vadd.f32 %v622_v37, %v55_v39  ;;  %v490_v5 = vld [vmem:[%s695_s1 + $0x80] sm:$0xff]  ;;  %v30_v7 = vld [vmem:[%s696_s0 + $0x2c] sm:$0xf] }
   0xd   :  { %v73_v52 = vadd.f32 %v627_v41, %v53_v40  ;;  %v76_v55 = vadd.f32 %v627_v41, %v56_v44  ;;  %v77_v56 = vadd.f32 %v65_v36, %v57_v45  ;;  %v80_v57 = vadd.f32 %v65_v36, %v60_v46  ;;  %v28_v6 = vld [vmem:[%s696_s0 + $0x20] sm:$0xf] }
   0xe   :  { %296 = vmatpush.bf16.msra.mxu0 %v478_v9  ;;  %501 = vmatpush.bf16.msra.mxu3 %v478_v9  ;;  %v83_v59 = vmax.f32 %v71_v48, 0.0  ;;  %v86_v60 = vmax.f32 %v74_v49, 0.0  ;;  %v84_v61 = vmax.f32 %v72_v50, 0.0  ;;  %v87_v62 = vmax.f32 %v75_v51, 0.0  ;;  %v507_v36 = vld [vmem:[%s700_s5] ss:$0 sm:$0xff] }
   0xf   :  { %315 = vmatpush.bf16.msra.mxu1 %v486_v13  ;;  %v85_v1 = vmax.f32 %v73_v52, 0.0  ;;  %v88_v2 = vmax.f32 %v76_v55, 0.0  ;;  %v89_v3 = vmax.f32 %v77_v56, 0.0  ;;  %v92_v4 = vmax.f32 %v80_v57, 0.0 }
  0x10   :  { %334 = vmatpush.bf16.msra.mxu2 %v494_v14  ;;  %v95_v8 = vpack.c.bf16 %v86_v60, %v83_v59  ;;  %v96_v9 = vpack.c.bf16 %v87_v62, %v84_v61  ;;  %v39_v14 = vunpack.c.l.bf16 %v28_v6  ;;  %v42_v15 = vunpack.c.l.bf16 %v30_v7 }
  0x11   :  { %v97_v12 = vpack.c.bf16 %v88_v2, %v85_v1  ;;  %v98_v13 = vpack.c.bf16 %v92_v4, %v89_v3  ;;  %v61_v19 = vmul.f32 %v607_v25, %v41_v11  ;;  %v78_v20 = vadd.f32 %v622_v37, %v58_v16 }
  0x12   :  { %297 = vmatpush.bf16.msra.mxu0 %v477_v28  ;;  %502 = vmatpush.bf16.msra.mxu3 %v477_v28  ;;  %v59_v17 = vmul.f32 %v609_v27, %v39_v14  ;;  %v62_v18 = vmul.f32 %v609_v27, %v42_v15  ;;  %v506_v27 = vld [vmem:[%s699_s4] ss:$0 sm:$0xff] }
  0x13   :  { %316 = vmatpush.bf16.msra.mxu1 %v485_v29  ;;  %v81_v21 = vadd.f32 %v622_v37, %v61_v19  ;;  %v90_v24 = vmax.f32 %v78_v20, 0.0 }
  0x14   :  { %335 = vmatpush.bf16.msra.mxu2 %v493_v33  ;;  %v79_v22 = vadd.f32 %v627_v41, %v59_v17  ;;  %v82_v23 = vadd.f32 %v627_v41, %v62_v18 }
  0x15   :  { %v93_v26 = vmax.f32 %v81_v21, 0.0 }
  0x16   :  { %298 = vmatpush.bf16.msra.mxu0 %v476_v42  ;;  %503 = vmatpush.bf16.msra.mxu3 %v476_v42  ;;  %v91_v28 = vmax.f32 %v79_v22, 0.0  ;;  %v94_v29 = vmax.f32 %v82_v23, 0.0 }
  0x17   :  { %317 = vmatpush.bf16.msra.mxu1 %v484_v43  ;;  %v99_v30 = vpack.c.bf16 %v93_v26, %v90_v24 }
  0x18   :  { %336 = vmatpush.bf16.msra.mxu2 %v492_v47  ;;  %v100_v25 = vpack.c.bf16 %v94_v29, %v91_v28 }
  0x1a   :  { %299 = vmatpush.bf16.msra.mxu0 %v475_v53  ;;  %504 = vmatpush.bf16.msra.mxu3 %v475_v53 }
  0x1b   :  { %318 = vmatpush.bf16.msra.mxu1 %v483_v54 }
  0x1c   :  { %337 = vmatpush.bf16.msra.mxu2 %v491_v58 }
  0x1e   :  { %300 = vmatpush.bf16.msra.mxu0 %v474_v63  ;;  %505 = vmatpush.bf16.msra.mxu3 %v474_v63 }
  0x1f   :  { %319 = vmatpush.bf16.msra.mxu1 %v482_v0 }
  0x20   :  { %338 = vmatpush.bf16.msra.mxu2 %v490_v5 }
  0x21   :  { %301 = vmatmul.bf16.vlgmr.msra.gmra.mxu0 %v95_v8  ;;  %306 = vmatmul.bf16.vlgmr.msra.gmra.mxu3 %v98_v13 }
  0x22   :  { %320 = vmatmul.bf16.vlgmr.msra.gmra.mxu1 %v96_v9 }
  0x23   :  { %339 = vmatmul.bf16.vlgmr.msra.gmra.mxu2 %v97_v12 }
  0x32   :  { %325 = vmatmul.bf16.gmra.mxu1 %v99_v30 }
  0x33   :  { %344 = vmatmul.bf16.gmra.mxu2 %v100_v25 }
  0x9e   :  { %v302_v32 = vpop.f32.mrf.mxu0 }
  0x9f   :  { %v321_v31 = vpop.f32.mrf.mxu1 }
  0xa0   :  { %v322_v33 = vadd.f32 %v321_v31, %v302_v32 }
  0xa4   :  { %v307_v47 = vpop.f32.mrf.mxu3 }
  0xa6   :  { %v340_v34 = vpop.f32.mrf.mxu2  ;;  %v304_v39 = vpop.f32.mrf.mxu0 }
  0xa7   :  { %v341_v35 = vadd.f32 %v340_v34, %v322_v33  ;;  %v323_v37 = vpop.f32.mrf.mxu1 }
  0xa8   :  { %v324_v42 = vadd.f32 %v323_v37, %v304_v39 }
  0xa9   :  { %v354_v38 = vmul.f32 %v506_v27, %v341_v35 }
  0xab   :  { %v362_v40 = vadd.f32 %v507_v36, %v354_v38 }
  0xac   :  { %v309_v56 = vpop.f32.mrf.mxu3 }
  0xad   :  { %v366_v41 = vmax.f32 %v362_v40, 0.0 }
  0xae   :  { %v342_v43 = vpop.f32.mrf.mxu2 }
  0xaf   :  { %370 = vst [vmem:[%s701_s6] sm:$0xff] %v366_v41  ;;  %v343_v44 = vadd.f32 %v342_v43, %v324_v42  ;;  %v326_v45 = vpop.f32.mrf.mxu1 }
  0xb0   :  { %v327_v49 = vadd.f32 %v326_v45, %v307_v47 }
  0xb1   :  { %v355_v46 = vmul.f32 %v506_v27, %v343_v44 }
  0xb3   :  { %v363_v48 = vadd.f32 %v507_v36, %v355_v46 }
  0xb5   :  { %v367_v50 = vmax.f32 %v363_v48, 0.0 }
  0xb6   :  { %v345_v51 = vpop.f32.mrf.mxu2 }
  0xb7   :  { %371 = vst [vmem:[%s701_s6 + $0x8] sm:$0xff] %v367_v50  ;;  %v346_v52 = vadd.f32 %v345_v51, %v327_v49  ;;  %v328_v54 = vpop.f32.mrf.mxu1 }
  0xb8   :  { %v329_v58 = vadd.f32 %v328_v54, %v309_v56 }
  0xb9   :  { %v356_v53 = vmul.f32 %v506_v27, %v346_v52 }
  0xbb   :  { %v364_v55 = vadd.f32 %v507_v36, %v356_v53 }
  0xbd   :  { %v368_v57 = vmax.f32 %v364_v55, 0.0 }
  0xbe   :  { %v347_v59 = vpop.f32.mrf.mxu2 }
  0xbf   :  { %372 = vst [vmem:[%s701_s6 + $0x10] sm:$0xff] %v368_v57  ;;  %v348_v60 = vadd.f32 %v347_v59, %v329_v58 }
  0xc1   :  { %v357_v61 = vmul.f32 %v506_v27, %v348_v60 }
  0xc3   :  { %v365_v62 = vadd.f32 %v507_v36, %v357_v61 }
  0xc5   :  { %v369_v63 = vmax.f32 %v365_v62, 0.0 }
  0xc7   :  { %373 = vst [vmem:[%s701_s6 + $0x18] sm:$0xff] %v369_v63 }

// kernel: rot_prediction_forward.104
= control target key start
LH: loop header
LB: loop body
LE: loop exit
PB: predicated region body
PF: predicated region fallthrough
CT: control target
= control target key end

     0   :  { %s1365_s1 = inlined_call_operand.vmem [shape: bf16[896,128], index: 1, kind: input, shape index: {}]   ;;  %s1366_s0 = inlined_call_operand.vmem [shape: bf16[32,896], index: 0, kind: input, shape index: {}]   ;;  %s1367_s2 = inlined_call_operand.vmem [shape: f32[1,128], index: 2, kind: input, shape index: {}]   ;;  %s1368_s3 = inlined_call_operand.vmem [shape: f32[1,128], index: 3, kind: input, shape index: {}]   ;;  %s1369_s4 = inlined_call_operand.vmem [shape: f32[32,128], index: 4, kind: output, shape index: {}]  }
   0x1   :  { %v1011_v0 = vld [vmem:[%s1365_s1 + $0x38] sm:$0xff]  ;;  %v1010_v4 = vld [vmem:[%s1365_s1 + $0x30] sm:$0xff]  ;;  %v1009_v8 = vld [vmem:[%s1365_s1 + $0x28] sm:$0xff] }
   0x2   :  { %v1019_v1 = vld [vmem:[%s1365_s1 + $0x78] sm:$0xff]  ;;  %553 = vmatpush.bf16.msra.mxu0 %v1011_v0  ;;  %v1018_v5 = vld [vmem:[%s1365_s1 + $0x70] sm:$0xff]  ;;  %v1017_v9 = vld [vmem:[%s1365_s1 + $0x68] sm:$0xff] }
   0x3   :  { %v1027_v2 = vld [vmem:[%s1365_s1 + $0xb8] sm:$0xff]  ;;  %572 = vmatpush.bf16.msra.mxu1 %v1019_v1  ;;  %v1026_v6 = vld [vmem:[%s1365_s1 + $0xb0] sm:$0xff]  ;;  %v1025_v10 = vld [vmem:[%s1365_s1 + $0xa8] sm:$0xff] }
   0x4   :  { %v1035_v3 = vld [vmem:[%s1365_s1 + $0xf8] sm:$0xff]  ;;  %591 = vmatpush.bf16.msra.mxu2 %v1027_v2  ;;  %v1034_v7 = vld [vmem:[%s1365_s1 + $0xf0] sm:$0xff]  ;;  %v1033_v11 = vld [vmem:[%s1365_s1 + $0xe8] sm:$0xff] }
   0x5   :  { %610 = vmatpush.bf16.msra.mxu3 %v1035_v3  ;;  %v1008_v12 = vld [vmem:[%s1365_s1 + $0x20] sm:$0xff]  ;;  %v1007_v16 = vld [vmem:[%s1365_s1 + $0x18] sm:$0xff]  ;;  %v1006_v20 = vld [vmem:[%s1365_s1 + $0x10] sm:$0xff] }
   0x6   :  { %554 = vmatpush.bf16.msra.mxu0 %v1010_v4  ;;  %v1016_v13 = vld [vmem:[%s1365_s1 + $0x60] sm:$0xff]  ;;  %v1015_v17 = vld [vmem:[%s1365_s1 + $0x58] sm:$0xff]  ;;  %v1014_v21 = vld [vmem:[%s1365_s1 + $0x50] sm:$0xff] }
   0x7   :  { %573 = vmatpush.bf16.msra.mxu1 %v1018_v5  ;;  %v1024_v14 = vld [vmem:[%s1365_s1 + $0xa0] sm:$0xff]  ;;  %v1023_v18 = vld [vmem:[%s1365_s1 + $0x98] sm:$0xff]  ;;  %v1022_v22 = vld [vmem:[%s1365_s1 + $0x90] sm:$0xff] }
   0x8   :  { %592 = vmatpush.bf16.msra.mxu2 %v1026_v6  ;;  %v1032_v15 = vld [vmem:[%s1365_s1 + $0xe0] sm:$0xff]  ;;  %v1031_v19 = vld [vmem:[%s1365_s1 + $0xd8] sm:$0xff]  ;;  %v1030_v23 = vld [vmem:[%s1365_s1 + $0xd0] sm:$0xff] }
   0x9   :  { %611 = vmatpush.bf16.msra.mxu3 %v1034_v7  ;;  %v1005_v24 = vld [vmem:[%s1365_s1 + $0x8] sm:$0xff]  ;;  %v1004_v28 = vld [vmem:[%s1365_s1] sm:$0xff]  ;;  %v993_v33 = vld [vmem:[%s1366_s0 + $0x18] sm:$0xf0] }
   0xa   :  { %555 = vmatpush.bf16.msra.mxu0 %v1009_v8  ;;  %v1013_v25 = vld [vmem:[%s1365_s1 + $0x48] sm:$0xff]  ;;  %v1012_v29 = vld [vmem:[%s1365_s1 + $0x40] sm:$0xff]  ;;  %v1059_v40 = vld [vmem:[%s1365_s1 + $0x1b8] sm:$0xff] }
   0xb   :  { %574 = vmatpush.bf16.msra.mxu1 %v1017_v9  ;;  %v1021_v26 = vld [vmem:[%s1365_s1 + $0x88] sm:$0xff]  ;;  %v1020_v30 = vld [vmem:[%s1365_s1 + $0x80] sm:$0xff]  ;;  %v1043_v41 = vld [vmem:[%s1365_s1 + $0x138] sm:$0xff] }
   0xc   :  { %593 = vmatpush.bf16.msra.mxu2 %v1025_v10  ;;  %v1029_v27 = vld [vmem:[%s1365_s1 + $0xc8] sm:$0xff]  ;;  %v1028_v31 = vld [vmem:[%s1365_s1 + $0xc0] sm:$0xff]  ;;  %v1051_v46 = vld [vmem:[%s1365_s1 + $0x178] sm:$0xff] }
   0xd   :  { %612 = vmatpush.bf16.msra.mxu3 %v1033_v11  ;;  %v712_v32 = vld [vmem:[%s1366_s0] sm:$0xf]  ;;  %v990_v34 = vld [vmem:[%s1366_s0 + $0x4] sm:$0xf]  ;;  %v720_v36 = vld [vmem:[%s1366_s0 + $0x8] sm:$0xf] }
   0xe   :  { %556 = vmatpush.bf16.msra.mxu0 %v1008_v12  ;;  %v714_v35 = vld [vmem:[%s1366_s0 + $0x1c] sm:$0xf0]  ;;  %v994_v37 = vld [vmem:[%s1366_s0 + $0x20] sm:$0xf0]  ;;  %v991_v38 = vld [vmem:[%s1366_s0 + $0xc] sm:$0xf]  ;;  %v713_v42 = vor.u32 %v993_v33, %v712_v32 }
   0xf   :  { %575 = vmatpush.bf16.msra.mxu1 %v1016_v13  ;;  %v722_v39 = vld [vmem:[%s1366_s0 + $0x24] sm:$0xf0]  ;;  %v717_v43 = vor.u32 %v990_v34, %v714_v35  ;;  %v721_v44 = vor.u32 %v994_v37, %v720_v36  ;;  %v1058_v47 = vld [vmem:[%s1365_s1 + $0x1b0] sm:$0xff]  ;;  %v1056_v53 = vld [vmem:[%s1365_s1 + $0x1a0] sm:$0xff] }
  0x10   :  { %594 = vmatpush.bf16.msra.mxu2 %v1024_v14  ;;  %v725_v45 = vor.u32 %v991_v38, %v722_v39  ;;  %v1042_v48 = vld [vmem:[%s1365_s1 + $0x130] sm:$0xff]  ;;  %v1057_v50 = vld [vmem:[%s1365_s1 + $0x1a8] sm:$0xff]  ;;  %v1040_v54 = vld [vmem:[%s1365_s1 + $0x120] sm:$0xff] }
  0x11   :  { %613 = vmatpush.bf16.msra.mxu3 %v1032_v15  ;;  %v1050_v49 = vld [vmem:[%s1365_s1 + $0x170] sm:$0xff]  ;;  %v1041_v51 = vld [vmem:[%s1365_s1 + $0x128] sm:$0xff]  ;;  %v1048_v55 = vld [vmem:[%s1365_s1 + $0x160] sm:$0xff] }
  0x12   :  { %557 = vmatpush.bf16.msra.mxu0 %v1007_v16  ;;  %v1049_v52 = vld [vmem:[%s1365_s1 + $0x168] sm:$0xff]  ;;  %v740_v56 = vld [vmem:[%s1366_s0 + $0x38] sm:$0xf]  ;;  %v1000_v57 = vld [vmem:[%s1366_s0 + $0x50] sm:$0xf0] }
  0x13   :  { %576 = vmatpush.bf16.msra.mxu1 %v1015_v17  ;;  %v997_v58 = vld [vmem:[%s1366_s0 + $0x3c] sm:$0xf]  ;;  %v742_v59 = vld [vmem:[%s1366_s0 + $0x54] sm:$0xf0]  ;;  %v748_v60 = vld [vmem:[%s1366_s0 + $0x40] sm:$0xf]  ;;  %v741_v2 = vor.u32 %v1000_v57, %v740_v56 }
  0x14   :  { %595 = vmatpush.bf16.msra.mxu2 %v1023_v18  ;;  %v1001_v61 = vld [vmem:[%s1366_s0 + $0x58] sm:$0xf0]  ;;  %v998_v62 = vld [vmem:[%s1366_s0 + $0x44] sm:$0xf]  ;;  %v750_v63 = vld [vmem:[%s1366_s0 + $0x5c] sm:$0xf0]  ;;  %v745_v3 = vor.u32 %v997_v58, %v742_v59 }
  0x15   :  { %614 = vmatpush.bf16.msra.mxu3 %v1031_v19  ;;  %v1055_v0 = vld [vmem:[%s1365_s1 + $0x198] sm:$0xff]  ;;  %v749_v4 = vor.u32 %v1001_v61, %v748_v60  ;;  %v753_v5 = vor.u32 %v998_v62, %v750_v63  ;;  %v1054_v7 = vld [vmem:[%s1365_s1 + $0x190] sm:$0xff]  ;;  %v1053_v10 = vld [vmem:[%s1365_s1 + $0x188] sm:$0xff] }
  0x16   :  { %558 = vmatpush.bf16.msra.mxu0 %v1006_v20  ;;  %v1039_v1 = vld [vmem:[%s1365_s1 + $0x118] sm:$0xff]  ;;  %v1038_v8 = vld [vmem:[%s1365_s1 + $0x110] sm:$0xff]  ;;  %v1037_v11 = vld [vmem:[%s1365_s1 + $0x108] sm:$0xff] }
  0x17   :  { %577 = vmatpush.bf16.msra.mxu1 %v1014_v21  ;;  %v1047_v6 = vld [vmem:[%s1365_s1 + $0x158] sm:$0xff]  ;;  %v1046_v9 = vld [vmem:[%s1365_s1 + $0x150] sm:$0xff]  ;;  %v1045_v12 = vld [vmem:[%s1365_s1 + $0x148] sm:$0xff] }
  0x18   :  { %596 = vmatpush.bf16.msra.mxu2 %v1022_v22  ;;  %v1052_v13 = vld [vmem:[%s1365_s1 + $0x180] sm:$0xff]  ;;  %v728_v16 = vld [vmem:[%s1366_s0 + $0x10] sm:$0xf]  ;;  %v995_v17 = vld [vmem:[%s1366_s0 + $0x28] sm:$0xf0] }
  0x19   :  { %615 = vmatpush.bf16.msra.mxu3 %v1030_v23  ;;  %v1036_v14 = vld [vmem:[%s1365_s1 + $0x100] sm:$0xff]  ;;  %v756_v18 = vld [vmem:[%s1366_s0 + $0x48] sm:$0xf]  ;;  %v992_v20 = vld [vmem:[%s1366_s0 + $0x14] sm:$0xf] }
  0x1a   :  { %559 = vmatpush.bf16.msra.mxu0 %v1005_v24  ;;  %v1044_v15 = vld [vmem:[%s1365_s1 + $0x140] sm:$0xff]  ;;  %v730_v21 = vld [vmem:[%s1366_s0 + $0x2c] sm:$0xf0]  ;;  %v736_v22 = vld [vmem:[%s1366_s0 + $0x18] sm:$0xf]  ;;  %v729_v24 = vor.u32 %v995_v17, %v728_v16 }
  0x1b   :  { %578 = vmatpush.bf16.msra.mxu1 %v1013_v25  ;;  %v1002_v19 = vld [vmem:[%s1366_s0 + $0x60] sm:$0xf0]  ;;  %v996_v23 = vld [vmem:[%s1366_s0 + $0x30] sm:$0xf0]  ;;  %v1068_v59 = vld [vmem:[%s1367_s2] ss:$0 sm:$0xff] }
  0x1c   :  { %597 = vmatpush.bf16.msra.mxu2 %v1021_v26  ;;  %v757_v25 = vor.u32 %v1002_v19, %v756_v18  ;;  %v733_v26 = vor.u32 %v992_v20, %v730_v21 }
  0x1d   :  { %616 = vmatpush.bf16.msra.mxu3 %v1029_v27  ;;  %v737_v27 = vor.u32 %v996_v23, %v736_v22 }
  0x1e   :  { %560 = vmatpush.bf16.msra.mxu0 %v1004_v28  ;;  %v999_v28 = vld [vmem:[%s1366_s0 + $0x4c] sm:$0xf] }
  0x1f   :  { %579 = vmatpush.bf16.msra.mxu1 %v1012_v29  ;;  %v758_v29 = vld [vmem:[%s1366_s0 + $0x64] sm:$0xf0] }
  0x20   :  { %598 = vmatpush.bf16.msra.mxu2 %v1020_v30  ;;  %v764_v30 = vld [vmem:[%s1366_s0 + $0x50] sm:$0xf]  ;;  %v761_v32 = vor.u32 %v999_v28, %v758_v29 }
  0x21   :  { %617 = vmatpush.bf16.msra.mxu3 %v1028_v31  ;;  %561 = vmatmul.bf16.vlgmr.msra.gmra.mxu0 %v713_v42  ;;  %v1003_v31 = vld [vmem:[%s1366_s0 + $0x68] sm:$0xf0] }
  0x22   :  { %629 = vmatpush.bf16.msrb.mxu0 %v1043_v41  ;;  %580 = vmatmul.bf16.vlgmr.msra.gmra.mxu1 %v717_v43  ;;  %v765_v33 = vor.u32 %v1003_v31, %v764_v30 }
  0x23   :  { %599 = vmatmul.bf16.vlgmr.msra.gmra.mxu2 %v721_v44  ;;  %648 = vmatpush.bf16.msrb.mxu1 %v1051_v46 }
  0x24   :  { %667 = vmatpush.bf16.msrb.mxu2 %v1059_v40  ;;  %618 = vmatmul.bf16.vlgmr.msra.gmra.mxu3 %v725_v45 }
  0x25   :  { %1060 = vmatpush.bf16.msrb.mxu3 %v1043_v41 }
  0x26   :  { %630 = vmatpush.bf16.msrb.mxu0 %v1042_v48 }
  0x27   :  { %649 = vmatpush.bf16.msrb.mxu1 %v1050_v49 }
  0x28   :  { %668 = vmatpush.bf16.msrb.mxu2 %v1058_v47 }
  0x29   :  { %1061 = vmatpush.bf16.msrb.mxu3 %v1042_v48 }
  0x2a   :  { %631 = vmatpush.bf16.msrb.mxu0 %v1041_v51 }
  0x2b   :  { %650 = vmatpush.bf16.msrb.mxu1 %v1049_v52 }
  0x2c   :  { %669 = vmatpush.bf16.msrb.mxu2 %v1057_v50 }
  0x2d   :  { %1062 = vmatpush.bf16.msrb.mxu3 %v1041_v51 }
  0x2e   :  { %632 = vmatpush.bf16.msrb.mxu0 %v1040_v54 }
  0x2f   :  { %651 = vmatpush.bf16.msrb.mxu1 %v1048_v55 }
  0x30   :  { %670 = vmatpush.bf16.msrb.mxu2 %v1056_v53 }
  0x31   :  { %1063 = vmatpush.bf16.msrb.mxu3 %v1040_v54  ;;  %566 = vmatmul.bf16.gmra.mxu0 %v741_v2 }
  0x32   :  { %633 = vmatpush.bf16.msrb.mxu0 %v1039_v1  ;;  %585 = vmatmul.bf16.gmra.mxu1 %v745_v3 }
  0x33   :  { %604 = vmatmul.bf16.gmra.mxu2 %v749_v4  ;;  %652 = vmatpush.bf16.msrb.mxu1 %v1047_v6 }
  0x34   :  { %671 = vmatpush.bf16.msrb.mxu2 %v1055_v0  ;;  %623 = vmatmul.bf16.gmra.mxu3 %v753_v5  ;;  %v1069_v0 = vld [vmem:[%s1368_s3] ss:$0 sm:$0xff] }
  0x35   :  { %1064 = vmatpush.bf16.msrb.mxu3 %v1039_v1 }
  0x36   :  { %634 = vmatpush.bf16.msrb.mxu0 %v1038_v8 }
  0x37   :  { %653 = vmatpush.bf16.msrb.mxu1 %v1046_v9 }
  0x38   :  { %672 = vmatpush.bf16.msrb.mxu2 %v1054_v7 }
  0x39   :  { %1065 = vmatpush.bf16.msrb.mxu3 %v1038_v8 }
  0x3a   :  { %635 = vmatpush.bf16.msrb.mxu0 %v1037_v11 }
  0x3b   :  { %654 = vmatpush.bf16.msrb.mxu1 %v1045_v12 }
  0x3c   :  { %673 = vmatpush.bf16.msrb.mxu2 %v1053_v10 }
  0x3d   :  { %1066 = vmatpush.bf16.msrb.mxu3 %v1037_v11 }
  0x3e   :  { %636 = vmatpush.bf16.msrb.mxu0 %v1036_v14 }
  0x3f   :  { %655 = vmatpush.bf16.msrb.mxu1 %v1044_v15 }
  0x40   :  { %674 = vmatpush.bf16.msrb.mxu2 %v1052_v13 }
  0x41   :  { %1067 = vmatpush.bf16.msrb.mxu3 %v1036_v14  ;;  %637 = vmatmul.bf16.vlgmr.msrb.gmra.mxu0 %v729_v24 }
  0x42   :  { %656 = vmatmul.bf16.vlgmr.msrb.gmra.mxu1 %v733_v26 }
  0x43   :  { %675 = vmatmul.bf16.vlgmr.msrb.gmra.mxu2 %v737_v27 }
  0x44   :  { %642 = vmatmul.bf16.vlgmr.msrb.gmra.mxu3 %v757_v25 }
  0x52   :  { %661 = vmatmul.bf16.gmra.mxu1 %v761_v32 }
  0x53   :  { %680 = vmatmul.bf16.gmra.mxu2 %v765_v33 }
  0x9e   :  { %v562_v34 = vpop.f32.mrf.mxu0 }
  0x9f   :  { %v581_v35 = vpop.f32.mrf.mxu1 }
  0xa0   :  { %v582_v47 = vadd.f32 %v581_v35, %v562_v34 }
  0xa6   :  { %v600_v36 = vpop.f32.mrf.mxu2  ;;  %v564_v38 = vpop.f32.mrf.mxu0 }
  0xa7   :  { %v619_v37 = vpop.f32.mrf.mxu3  ;;  %v583_v39 = vpop.f32.mrf.mxu1  ;;  %v601_v49 = vadd.f32 %v600_v36, %v582_v47 }
  0xa8   :  { %v584_v54 = vadd.f32 %v583_v39, %v564_v38 }
  0xa9   :  { %v620_v52 = vadd.f32 %v619_v37, %v601_v49 }
  0xae   :  { %v602_v40 = vpop.f32.mrf.mxu2  ;;  %v567_v41 = vpop.f32.mrf.mxu0 }
  0xaf   :  { %v586_v42 = vpop.f32.mrf.mxu1  ;;  %v621_v43 = vpop.f32.mrf.mxu3  ;;  %v603_v56 = vadd.f32 %v602_v40, %v584_v54 }
  0xb0   :  { %v587_v2 = vadd.f32 %v586_v42, %v567_v41 }
  0xb1   :  { %v622_v62 = vadd.f32 %v621_v43, %v603_v56 }
  0xb6   :  { %v605_v44 = vpop.f32.mrf.mxu2  ;;  %v569_v45 = vpop.f32.mrf.mxu0 }
  0xb7   :  { %v588_v46 = vpop.f32.mrf.mxu1  ;;  %v624_v48 = vpop.f32.mrf.mxu3  ;;  %v606_v6 = vadd.f32 %v605_v44, %v587_v2 }
  0xb8   :  { %v589_v14 = vadd.f32 %v588_v46, %v569_v45 }
  0xb9   :  { %v625_v12 = vadd.f32 %v624_v48, %v606_v6 }
  0xbe   :  { %v607_v50 = vpop.f32.mrf.mxu2  ;;  %v638_v51 = vpop.f32.mrf.mxu0 }
  0xbf   :  { %v657_v53 = vpop.f32.mrf.mxu1  ;;  %v639_v55 = vadd.f32 %v638_v51, %v620_v52  ;;  %v626_v57 = vpop.f32.mrf.mxu3  ;;  %v608_v17 = vadd.f32 %v607_v50, %v589_v14 }
  0xc1   :  { %v658_v58 = vadd.f32 %v657_v53, %v639_v55  ;;  %v627_v22 = vadd.f32 %v626_v57, %v608_v17 }
  0xc6   :  { %v676_v60 = vpop.f32.mrf.mxu2  ;;  %v640_v61 = vpop.f32.mrf.mxu0 }
  0xc7   :  { %v677_v63 = vadd.f32 %v676_v60, %v658_v58  ;;  %v659_v1 = vpop.f32.mrf.mxu1  ;;  %v641_v4 = vadd.f32 %v640_v61, %v622_v62  ;;  %v643_v8 = vpop.f32.mrf.mxu3 }
  0xc8   :  { %v644_v15 = vadd.f32 %v643_v8, %v625_v12 }
  0xc9   :  { %v690_v3 = vmul.f32 %v1068_v59, %v677_v63  ;;  %v660_v7 = vadd.f32 %v659_v1, %v641_v4 }
  0xcb   :  { %v698_v5 = vadd.f32 %v1069_v0, %v690_v3 }
  0xcd   :  { %702 = vst [vmem:[%s1369_s4] sm:$0xff] %v698_v5 }
  0xce   :  { %v678_v9 = vpop.f32.mrf.mxu2 }
  0xcf   :  { %v679_v10 = vadd.f32 %v678_v9, %v660_v7  ;;  %v662_v11 = vpop.f32.mrf.mxu1  ;;  %v645_v21 = vpop.f32.mrf.mxu3 }
  0xd0   :  { %v663_v18 = vadd.f32 %v662_v11, %v644_v15  ;;  %v646_v25 = vadd.f32 %v645_v21, %v627_v22 }
  0xd1   :  { %v691_v13 = vmul.f32 %v1068_v59, %v679_v10 }
  0xd3   :  { %v699_v16 = vadd.f32 %v1069_v0, %v691_v13 }
  0xd5   :  { %703 = vst [vmem:[%s1369_s4 + $0x8] sm:$0xff] %v699_v16 }
  0xd6   :  { %v681_v19 = vpop.f32.mrf.mxu2 }
  0xd7   :  { %v682_v20 = vadd.f32 %v681_v19, %v663_v18  ;;  %v664_v24 = vpop.f32.mrf.mxu1 }
  0xd8   :  { %v665_v27 = vadd.f32 %v664_v24, %v646_v25 }
  0xd9   :  { %v692_v23 = vmul.f32 %v1068_v59, %v682_v20 }
  0xdb   :  { %v700_v26 = vadd.f32 %v1069_v0, %v692_v23 }
  0xdd   :  { %704 = vst [vmem:[%s1369_s4 + $0x10] sm:$0xff] %v700_v26 }
  0xde   :  { %v683_v28 = vpop.f32.mrf.mxu2 }
  0xdf   :  { %v684_v29 = vadd.f32 %v683_v28, %v665_v27 }
  0xe1   :  { %v693_v30 = vmul.f32 %v1068_v59, %v684_v29 }
  0xe3   :  { %v701_v31 = vadd.f32 %v1069_v0, %v693_v30 }
  0xe5   :  { %705 = vst [vmem:[%s1369_s4 + $0x18] sm:$0xff] %v701_v31 }

// kernel: rot_prediction_forward.119
= control target key start
LH: loop header
LB: loop body
LE: loop exit
PB: predicated region body
PF: predicated region fallthrough
CT: control target
= control target key end

     0   :  { %s872_s1 = inlined_call_operand.vmem [shape: bf16[512,128], index: 1, kind: input, shape index: {}]   ;;  %s873_s0 = inlined_call_operand.vmem [shape: bf16[32,512], index: 0, kind: input, shape index: {}]   ;;  %s874_s2 = inlined_call_operand.vmem [shape: f32[1,512], index: 2, kind: input, shape index: {}]   ;;  %s875_s3 = inlined_call_operand.vmem [shape: f32[1,512], index: 3, kind: input, shape index: {}]   ;;  %s876_s4 = inlined_call_operand.vmem [shape: f32[1,128], index: 4, kind: input, shape index: {}]   ;;  %s877_s5 = inlined_call_operand.vmem [shape: f32[1,128], index: 5, kind: input, shape index: {}]   ;;  %s878_s6 = inlined_call_operand.vmem [shape: f32[32,128], index: 6, kind: output, shape index: {}]  }
   0x1   :  { %v618_v0 = vld [vmem:[%s872_s1 + $0x38] sm:$0xff]  ;;  %v617_v4 = vld [vmem:[%s872_s1 + $0x30] sm:$0xff]  ;;  %v616_v8 = vld [vmem:[%s872_s1 + $0x28] sm:$0xff] }
   0x2   :  { %v626_v1 = vld [vmem:[%s872_s1 + $0x78] sm:$0xff]  ;;  %379 = vmatpush.bf16.msra.mxu0 %v618_v0  ;;  %v625_v5 = vld [vmem:[%s872_s1 + $0x70] sm:$0xff]  ;;  %v624_v9 = vld [vmem:[%s872_s1 + $0x68] sm:$0xff] }
   0x3   :  { %v634_v2 = vld [vmem:[%s872_s1 + $0xb8] sm:$0xff]  ;;  %398 = vmatpush.bf16.msra.mxu1 %v626_v1  ;;  %v633_v6 = vld [vmem:[%s872_s1 + $0xb0] sm:$0xff]  ;;  %v632_v10 = vld [vmem:[%s872_s1 + $0xa8] sm:$0xff] }
   0x4   :  { %v642_v3 = vld [vmem:[%s872_s1 + $0xf8] sm:$0xff]  ;;  %417 = vmatpush.bf16.msra.mxu2 %v634_v2  ;;  %v641_v7 = vld [vmem:[%s872_s1 + $0xf0] sm:$0xff]  ;;  %v640_v11 = vld [vmem:[%s872_s1 + $0xe8] sm:$0xff] }
   0x5   :  { %436 = vmatpush.bf16.msra.mxu3 %v642_v3  ;;  %v615_v12 = vld [vmem:[%s872_s1 + $0x20] sm:$0xff]  ;;  %v25_v17 = vld [vmem:[%s873_s0 + $0x10] sm:$0xff]  ;;  %v24_v25 = vld [vmem:[%s873_s0 + $0x8] sm:$0xff] }
   0x6   :  { %380 = vmatpush.bf16.msra.mxu0 %v617_v4  ;;  %v623_v13 = vld [vmem:[%s872_s1 + $0x60] sm:$0xff]  ;;  %v35_v20 = vunpack.c.l.bf16 %v25_v17  ;;  %v36_v24 = vunpack.c.h.bf16 %v25_v17  ;;  %v26_v26 = vld [vmem:[%s873_s0 + $0x18] sm:$0xff]  ;;  %v33_v28 = vunpack.c.l.bf16 %v24_v25  ;;  %v34_v37 = vunpack.c.h.bf16 %v24_v25  ;;  %v613_v47 = vld [vmem:[%s872_s1 + $0x10] sm:$0xff] }
   0x7   :  { %399 = vmatpush.bf16.msra.mxu1 %v625_v5  ;;  %v631_v14 = vld [vmem:[%s872_s1 + $0xa0] sm:$0xff]  ;;  %v37_v29 = vunpack.c.l.bf16 %v26_v26  ;;  %v614_v30 = vld [vmem:[%s872_s1 + $0x18] sm:$0xff]  ;;  %v38_v38 = vunpack.c.h.bf16 %v26_v26  ;;  %v621_v48 = vld [vmem:[%s872_s1 + $0x50] sm:$0xff] }
   0x8   :  { %418 = vmatpush.bf16.msra.mxu2 %v633_v6  ;;  %v23_v15 = vld [vmem:[%s873_s0] sm:$0xff]  ;;  %v622_v31 = vld [vmem:[%s872_s1 + $0x58] sm:$0xff]  ;;  %v629_v50 = vld [vmem:[%s872_s1 + $0x90] sm:$0xff] }
   0x9   :  { %437 = vmatpush.bf16.msra.mxu3 %v641_v7  ;;  %v639_v16 = vld [vmem:[%s872_s1 + $0xe0] sm:$0xff]  ;;  %v31_v18 = vunpack.c.l.bf16 %v23_v15  ;;  %v32_v23 = vunpack.c.h.bf16 %v23_v15  ;;  %v630_v33 = vld [vmem:[%s872_s1 + $0x98] sm:$0xff]  ;;  %v637_v51 = vld [vmem:[%s872_s1 + $0xd0] sm:$0xff] }
   0xa   :  { %381 = vmatpush.bf16.msra.mxu0 %v616_v8  ;;  %v47_v19 = vld [vmem:[%s874_s2] sm:$0xf]  ;;  %v638_v34 = vld [vmem:[%s872_s1 + $0xd8] sm:$0xff]  ;;  %v612_v60 = vld [vmem:[%s872_s1 + $0x8] sm:$0xff] }
   0xb   :  { %400 = vmatpush.bf16.msra.mxu1 %v624_v9  ;;  %v737_v21 = vperm.slane %v47_v19, 0  ;;  %v73_v22 = vld [vmem:[%s875_s3] sm:$0xf]  ;;  %v748_v27 = vperm.slane %v47_v19, 1  ;;  %v756_v32 = vperm.slane %v47_v19, 2  ;;  %v776_v46 = vperm.slane %v47_v19, 3 }
   0xc   :  { %419 = vmatpush.bf16.msra.mxu2 %v632_v10  ;;  %v764_v35 = vperm.slane %v73_v22, 0  ;;  %v766_v36 = vperm.slane %v73_v22, 1  ;;  %v774_v45 = vperm.slane %v73_v22, 2  ;;  %v784_v49 = vperm.slane %v73_v22, 3  ;;  %v620_v61 = vld [vmem:[%s872_s1 + $0x48] sm:$0xff]  ;;  %v27_v8 = vld [vmem:[%s873_s0 + $0x20] sm:$0xff] }
   0xd   :  { %438 = vmatpush.bf16.msra.mxu3 %v640_v11  ;;  %v57_v39 = vmul.f32 %v737_v21, %v31_v18  ;;  %v61_v40 = vmul.f32 %v737_v21, %v35_v20  ;;  %v58_v41 = vmul.f32 %v748_v27, %v32_v23  ;;  %v62_v42 = vmul.f32 %v748_v27, %v36_v24  ;;  %v628_v0 = vld [vmem:[%s872_s1 + $0x88] sm:$0xff]  ;;  %v29_v9 = vld [vmem:[%s873_s0 + $0x30] sm:$0xff]  ;;  %v611_v10 = vld [vmem:[%s872_s1] sm:$0xff] }
   0xe   :  { %382 = vmatpush.bf16.msra.mxu0 %v615_v12  ;;  %v59_v43 = vmul.f32 %v756_v32, %v33_v28  ;;  %v63_v44 = vmul.f32 %v756_v32, %v37_v29  ;;  %v60_v52 = vmul.f32 %v776_v46, %v34_v37  ;;  %v64_v53 = vmul.f32 %v776_v46, %v38_v38  ;;  %v636_v1 = vld [vmem:[%s872_s1 + $0xc8] sm:$0xff]  ;;  %v619_v11 = vld [vmem:[%s872_s1 + $0x40] sm:$0xff]  ;;  %v30_v17 = vld [vmem:[%s873_s0 + $0x38] sm:$0xff] }
   0xf   :  { %401 = vmatpush.bf16.msra.mxu1 %v623_v13  ;;  %v83_v54 = vadd.f32 %v764_v35, %v57_v39  ;;  %v87_v55 = vadd.f32 %v764_v35, %v61_v40  ;;  %v84_v56 = vadd.f32 %v766_v36, %v58_v41  ;;  %v88_v57 = vadd.f32 %v766_v36, %v62_v42  ;;  %v627_v15 = vld [vmem:[%s872_s1 + $0x80] sm:$0xff] }
  0x10   :  { %420 = vmatpush.bf16.msra.mxu2 %v631_v14  ;;  %v85_v58 = vadd.f32 %v774_v45, %v59_v43  ;;  %v89_v59 = vadd.f32 %v774_v45, %v63_v44  ;;  %v86_v62 = vadd.f32 %v784_v49, %v60_v52  ;;  %v90_v63 = vadd.f32 %v784_v49, %v64_v53  ;;  %v28_v14 = vld [vmem:[%s873_s0 + $0x28] sm:$0xff] }
  0x11   :  { %439 = vmatpush.bf16.msra.mxu3 %v639_v16  ;;  %v99_v2 = vmax.f32 %v83_v54, 0.0  ;;  %v103_v3 = vmax.f32 %v87_v55, 0.0  ;;  %v100_v4 = vmax.f32 %v84_v56, 0.0  ;;  %v104_v5 = vmax.f32 %v88_v57, 0.0  ;;  %v635_v16 = vld [vmem:[%s872_s1 + $0xc0] sm:$0xff] }
  0x12   :  { %383 = vmatpush.bf16.msra.mxu0 %v614_v30  ;;  %v101_v6 = vmax.f32 %v85_v58, 0.0  ;;  %v105_v7 = vmax.f32 %v89_v59, 0.0  ;;  %v102_v12 = vmax.f32 %v86_v62, 0.0  ;;  %v106_v13 = vmax.f32 %v90_v63, 0.0 }
  0x13   :  { %402 = vmatpush.bf16.msra.mxu1 %v622_v31  ;;  %v115_v18 = vpack.c.bf16 %v103_v3, %v99_v2  ;;  %v116_v19 = vpack.c.bf16 %v104_v5, %v100_v4  ;;  %v39_v20 = vunpack.c.l.bf16 %v27_v8  ;;  %v43_v22 = vunpack.c.l.bf16 %v29_v9  ;;  %v644_v4 = vld [vmem:[%s877_s5] ss:$0 sm:$0xff] }
  0x14   :  { %421 = vmatpush.bf16.msra.mxu2 %v630_v33  ;;  %v117_v23 = vpack.c.bf16 %v105_v7, %v101_v6  ;;  %v40_v24 = vunpack.c.h.bf16 %v27_v8  ;;  %v44_v25 = vunpack.c.h.bf16 %v29_v9  ;;  %v41_v26 = vunpack.c.l.bf16 %v28_v14 }
  0x15   :  { %440 = vmatpush.bf16.msra.mxu3 %v638_v34  ;;  %v118_v28 = vpack.c.bf16 %v106_v13, %v102_v12  ;;  %v45_v29 = vunpack.c.l.bf16 %v30_v17  ;;  %v42_v30 = vunpack.c.h.bf16 %v28_v14  ;;  %v46_v31 = vunpack.c.h.bf16 %v30_v17 }
  0x16   :  { %384 = vmatpush.bf16.msra.mxu0 %v613_v47  ;;  %v65_v33 = vmul.f32 %v737_v21, %v39_v20  ;;  %v69_v34 = vmul.f32 %v737_v21, %v43_v22  ;;  %v66_v37 = vmul.f32 %v748_v27, %v40_v24  ;;  %v70_v38 = vmul.f32 %v748_v27, %v44_v25 }
  0x17   :  { %403 = vmatpush.bf16.msra.mxu1 %v621_v48  ;;  %v67_v39 = vmul.f32 %v756_v32, %v41_v26  ;;  %v71_v40 = vmul.f32 %v756_v32, %v45_v29  ;;  %v68_v41 = vmul.f32 %v776_v46, %v42_v30  ;;  %v72_v42 = vmul.f32 %v776_v46, %v46_v31 }
  0x18   :  { %422 = vmatpush.bf16.msra.mxu2 %v629_v50  ;;  %v91_v43 = vadd.f32 %v764_v35, %v65_v33  ;;  %v95_v21 = vadd.f32 %v764_v35, %v69_v34  ;;  %v92_v44 = vadd.f32 %v766_v36, %v66_v37  ;;  %v96_v47 = vadd.f32 %v766_v36, %v70_v38 }
  0x19   :  { %441 = vmatpush.bf16.msra.mxu3 %v637_v51  ;;  %v93_v27 = vadd.f32 %v774_v45, %v67_v39  ;;  %v97_v48 = vadd.f32 %v774_v45, %v71_v40  ;;  %v94_v50 = vadd.f32 %v784_v49, %v68_v41  ;;  %v98_v32 = vadd.f32 %v784_v49, %v72_v42 }
  0x1a   :  { %385 = vmatpush.bf16.msra.mxu0 %v612_v60  ;;  %v107_v51 = vmax.f32 %v91_v43, 0.0  ;;  %v111_v52 = vmax.f32 %v95_v21, 0.0  ;;  %v108_v53 = vmax.f32 %v92_v44, 0.0  ;;  %v112_v46 = vmax.f32 %v96_v47, 0.0 }
  0x1b   :  { %404 = vmatpush.bf16.msra.mxu1 %v620_v61  ;;  %v109_v54 = vmax.f32 %v93_v27, 0.0  ;;  %v113_v55 = vmax.f32 %v97_v48, 0.0  ;;  %v110_v56 = vmax.f32 %v94_v50, 0.0  ;;  %v114_v35 = vmax.f32 %v98_v32, 0.0 }
  0x1c   :  { %423 = vmatpush.bf16.msra.mxu2 %v628_v0  ;;  %v119_v57 = vpack.c.bf16 %v111_v52, %v107_v51  ;;  %v120_v58 = vpack.c.bf16 %v112_v46, %v108_v53  ;;  %v643_v0 = vld [vmem:[%s876_s4] ss:$0 sm:$0xff] }
  0x1d   :  { %442 = vmatpush.bf16.msra.mxu3 %v636_v1  ;;  %v121_v59 = vpack.c.bf16 %v113_v55, %v109_v54  ;;  %v122_v36 = vpack.c.bf16 %v114_v35, %v110_v56 }
  0x1e   :  { %386 = vmatpush.bf16.msra.mxu0 %v611_v10 }
  0x1f   :  { %405 = vmatpush.bf16.msra.mxu1 %v619_v11 }
  0x20   :  { %424 = vmatpush.bf16.msra.mxu2 %v627_v15 }
  0x21   :  { %443 = vmatpush.bf16.msra.mxu3 %v635_v16  ;;  %387 = vmatmul.bf16.vlgmr.msra.gmra.mxu0 %v115_v18 }
  0x22   :  { %406 = vmatmul.bf16.vlgmr.msra.gmra.mxu1 %v116_v19 }
  0x23   :  { %425 = vmatmul.bf16.vlgmr.msra.gmra.mxu2 %v117_v23 }
  0x24   :  { %444 = vmatmul.bf16.vlgmr.msra.gmra.mxu3 %v118_v28 }
  0x31   :  { %392 = vmatmul.bf16.gmra.mxu0 %v119_v57 }
  0x32   :  { %411 = vmatmul.bf16.gmra.mxu1 %v120_v58 }
  0x33   :  { %430 = vmatmul.bf16.gmra.mxu2 %v121_v59 }
  0x34   :  { %449 = vmatmul.bf16.gmra.mxu3 %v122_v36 }
  0x9e   :  { %v388_v45 = vpop.f32.mrf.mxu0 }
  0x9f   :  { %v407_v60 = vpop.f32.mrf.mxu1 }
  0xa0   :  { %v408_v61 = vadd.f32 %v407_v60, %v388_v45 }
  0xa6   :  { %v426_v49 = vpop.f32.mrf.mxu2  ;;  %v390_v1 = vpop.f32.mrf.mxu0 }
  0xa7   :  { %v445_v62 = vpop.f32.mrf.mxu3  ;;  %v427_v63 = vadd.f32 %v426_v49, %v408_v61  ;;  %v409_v2 = vpop.f32.mrf.mxu1 }
  0xa8   :  { %v410_v7 = vadd.f32 %v409_v2, %v390_v1 }
  0xa9   :  { %v446_v3 = vadd.f32 %v445_v62, %v427_v63 }
  0xab   :  { %v459_v5 = vmul.f32 %v643_v0, %v446_v3 }
  0xad   :  { %v467_v6 = vadd.f32 %v644_v4, %v459_v5 }
  0xae   :  { %v428_v8 = vpop.f32.mrf.mxu2  ;;  %v393_v12 = vpop.f32.mrf.mxu0 }
  0xaf   :  { %v447_v9 = vpop.f32.mrf.mxu3  ;;  %v471_v10 = vmax.f32 %v467_v6, 0.0  ;;  %v429_v11 = vadd.f32 %v428_v8, %v410_v7  ;;  %v412_v13 = vpop.f32.mrf.mxu1 }
  0xb0   :  { %v413_v16 = vadd.f32 %v412_v13, %v393_v12 }
  0xb1   :  { %475 = vst [vmem:[%s878_s6] sm:$0xff] %v471_v10  ;;  %v448_v14 = vadd.f32 %v447_v9, %v429_v11 }
  0xb3   :  { %v460_v15 = vmul.f32 %v643_v0, %v448_v14 }
  0xb5   :  { %v468_v17 = vadd.f32 %v644_v4, %v460_v15 }
  0xb6   :  { %v431_v18 = vpop.f32.mrf.mxu2  ;;  %v395_v24 = vpop.f32.mrf.mxu0 }
  0xb7   :  { %v450_v19 = vpop.f32.mrf.mxu3  ;;  %v472_v20 = vmax.f32 %v468_v17, 0.0  ;;  %v432_v22 = vadd.f32 %v431_v18, %v413_v16  ;;  %v414_v25 = vpop.f32.mrf.mxu1 }
  0xb8   :  { %v415_v29 = vadd.f32 %v414_v25, %v395_v24 }
  0xb9   :  { %476 = vst [vmem:[%s878_s6 + $0x8] sm:$0xff] %v472_v20  ;;  %v451_v23 = vadd.f32 %v450_v19, %v432_v22 }
  0xbb   :  { %v461_v26 = vmul.f32 %v643_v0, %v451_v23 }
  0xbd   :  { %v469_v28 = vadd.f32 %v644_v4, %v461_v26 }
  0xbe   :  { %v433_v30 = vpop.f32.mrf.mxu2 }
  0xbf   :  { %v473_v31 = vmax.f32 %v469_v28, 0.0  ;;  %v434_v33 = vadd.f32 %v433_v30, %v415_v29  ;;  %v452_v34 = vpop.f32.mrf.mxu3 }
  0xc1   :  { %477 = vst [vmem:[%s878_s6 + $0x10] sm:$0xff] %v473_v31  ;;  %v453_v37 = vadd.f32 %v452_v34, %v434_v33 }
  0xc3   :  { %v462_v38 = vmul.f32 %v643_v0, %v453_v37 }
  0xc5   :  { %v470_v39 = vadd.f32 %v644_v4, %v462_v38 }
  0xc7   :  { %v474_v40 = vmax.f32 %v470_v39, 0.0 }
  0xc9   :  { %478 = vst [vmem:[%s878_s6 + $0x18] sm:$0xff] %v474_v40 }

// kernel: rot_prediction_forward.129
= control target key start
LH: loop header
LB: loop body
LE: loop exit
PB: predicated region body
PF: predicated region fallthrough
CT: control target
= control target key end

     0   :  { %s1079_s1 = inlined_call_operand.vmem [shape: bf16[640,128], index: 1, kind: input, shape index: {}]   ;;  %s1080_s0 = inlined_call_operand.vmem [shape: bf16[32,640], index: 0, kind: input, shape index: {}]   ;;  %s1081_s2 = inlined_call_operand.vmem [shape: f32[1,640], index: 2, kind: input, shape index: {}]   ;;  %s1082_s3 = inlined_call_operand.vmem [shape: f32[1,640], index: 3, kind: input, shape index: {}]   ;;  %s1083_s4 = inlined_call_operand.vmem [shape: f32[1,128], index: 4, kind: input, shape index: {}]   ;;  %s1084_s5 = inlined_call_operand.vmem [shape: f32[1,128], index: 5, kind: input, shape index: {}]   ;;  %s1085_s6 = inlined_call_operand.vmem [shape: f32[32,128], index: 6, kind: output, shape index: {}]  }
   0x1   :  { %v759_v0 = vld [vmem:[%s1079_s1 + $0x38] sm:$0xff]  ;;  %v758_v4 = vld [vmem:[%s1079_s1 + $0x30] sm:$0xff]  ;;  %v757_v8 = vld [vmem:[%s1079_s1 + $0x28] sm:$0xff] }
   0x2   :  { %v767_v1 = vld [vmem:[%s1079_s1 + $0x78] sm:$0xff]  ;;  %469 = vmatpush.bf16.msra.mxu0 %v759_v0  ;;  %v766_v5 = vld [vmem:[%s1079_s1 + $0x70] sm:$0xff]  ;;  %v765_v9 = vld [vmem:[%s1079_s1 + $0x68] sm:$0xff] }
   0x3   :  { %v775_v2 = vld [vmem:[%s1079_s1 + $0xb8] sm:$0xff]  ;;  %488 = vmatpush.bf16.msra.mxu1 %v767_v1  ;;  %v774_v6 = vld [vmem:[%s1079_s1 + $0xb0] sm:$0xff]  ;;  %v773_v10 = vld [vmem:[%s1079_s1 + $0xa8] sm:$0xff] }
   0x4   :  { %v783_v3 = vld [vmem:[%s1079_s1 + $0xf8] sm:$0xff]  ;;  %507 = vmatpush.bf16.msra.mxu2 %v775_v2  ;;  %v782_v7 = vld [vmem:[%s1079_s1 + $0xf0] sm:$0xff]  ;;  %v781_v11 = vld [vmem:[%s1079_s1 + $0xe8] sm:$0xff] }
   0x5   :  { %526 = vmatpush.bf16.msra.mxu3 %v783_v3  ;;  %v756_v12 = vld [vmem:[%s1079_s1 + $0x20] sm:$0xff]  ;;  %v26_v17 = vld [vmem:[%s1080_s0 + $0x14] sm:$0xff]  ;;  %v24_v25 = vld [vmem:[%s1080_s0 + $0x8] sm:$0xff] }
   0x6   :  { %470 = vmatpush.bf16.msra.mxu0 %v758_v4  ;;  %v764_v13 = vld [vmem:[%s1079_s1 + $0x60] sm:$0xff]  ;;  %v40_v20 = vunpack.c.l.bf16 %v26_v17  ;;  %v41_v24 = vunpack.c.h.bf16 %v26_v17  ;;  %v37_v28 = vunpack.c.l.bf16 %v24_v25  ;;  %v755_v30 = vld [vmem:[%s1079_s1 + $0x18] sm:$0xff]  ;;  %v38_v37 = vunpack.c.h.bf16 %v24_v25  ;;  %v754_v47 = vld [vmem:[%s1079_s1 + $0x10] sm:$0xff] }
   0x7   :  { %489 = vmatpush.bf16.msra.mxu1 %v766_v5  ;;  %v772_v14 = vld [vmem:[%s1079_s1 + $0xa0] sm:$0xff]  ;;  %v763_v31 = vld [vmem:[%s1079_s1 + $0x58] sm:$0xff]  ;;  %v762_v48 = vld [vmem:[%s1079_s1 + $0x50] sm:$0xff] }
   0x8   :  { %508 = vmatpush.bf16.msra.mxu2 %v774_v6  ;;  %v23_v15 = vld [vmem:[%s1080_s0] sm:$0xff]  ;;  %v771_v33 = vld [vmem:[%s1079_s1 + $0x98] sm:$0xff]  ;;  %v770_v50 = vld [vmem:[%s1079_s1 + $0x90] sm:$0xff] }
   0x9   :  { %527 = vmatpush.bf16.msra.mxu3 %v782_v7  ;;  %v780_v16 = vld [vmem:[%s1079_s1 + $0xe0] sm:$0xff]  ;;  %v35_v18 = vunpack.c.l.bf16 %v23_v15  ;;  %v36_v23 = vunpack.c.h.bf16 %v23_v15  ;;  %v779_v34 = vld [vmem:[%s1079_s1 + $0xd8] sm:$0xff]  ;;  %v778_v51 = vld [vmem:[%s1079_s1 + $0xd0] sm:$0xff] }
   0xa   :  { %471 = vmatpush.bf16.msra.mxu0 %v757_v8  ;;  %v894_v19 = vld [vmem:[%s1081_s2] sm:$0x1f]  ;;  %v753_v60 = vld [vmem:[%s1079_s1 + $0x8] sm:$0xff] }
   0xb   :  { %490 = vmatpush.bf16.msra.mxu1 %v765_v9  ;;  %v897_v21 = vperm.slane %v894_v19, 0  ;;  %v902_v22 = vld [vmem:[%s1082_s3] sm:$0x1f]  ;;  %v911_v27 = vperm.slane %v894_v19, 1  ;;  %v920_v32 = vperm.slane %v894_v19, 2  ;;  %v944_v46 = vperm.slane %v894_v19, 3 }
   0xc   :  { %509 = vmatpush.bf16.msra.mxu2 %v773_v10  ;;  %v27_v26 = vld [vmem:[%s1080_s0 + $0x1c] sm:$0xff]  ;;  %v929_v35 = vperm.slane %v902_v22, 0  ;;  %v932_v36 = vperm.slane %v902_v22, 1  ;;  %v941_v45 = vperm.slane %v902_v22, 2  ;;  %v953_v49 = vperm.slane %v902_v22, 3  ;;  %v761_v61 = vld [vmem:[%s1079_s1 + $0x48] sm:$0xff] }
   0xd   :  { %528 = vmatpush.bf16.msra.mxu3 %v781_v11  ;;  %v42_v29 = vunpack.c.l.bf16 %v27_v26  ;;  %v43_v38 = vunpack.c.h.bf16 %v27_v26  ;;  %v67_v39 = vmul.f32 %v897_v21, %v35_v18  ;;  %v72_v40 = vmul.f32 %v897_v21, %v40_v20  ;;  %v769_v0 = vld [vmem:[%s1079_s1 + $0x88] sm:$0xff]  ;;  %v32_v9 = vld [vmem:[%s1080_s0 + $0x3c] sm:$0xff] }
   0xe   :  { %472 = vmatpush.bf16.msra.mxu0 %v756_v12  ;;  %v68_v41 = vmul.f32 %v911_v27, %v36_v23  ;;  %v73_v42 = vmul.f32 %v911_v27, %v41_v24  ;;  %v69_v43 = vmul.f32 %v920_v32, %v37_v28  ;;  %v70_v52 = vmul.f32 %v944_v46, %v38_v37  ;;  %v777_v1 = vld [vmem:[%s1079_s1 + $0xc8] sm:$0xff]  ;;  %v752_v10 = vld [vmem:[%s1079_s1] sm:$0xff]  ;;  %v791_v23 = vld [vmem:[%s1079_s1 + $0x138] sm:$0xff] }
   0xf   :  { %491 = vmatpush.bf16.msra.mxu1 %v764_v13  ;;  %v74_v44 = vmul.f32 %v920_v32, %v42_v29  ;;  %v75_v53 = vmul.f32 %v944_v46, %v43_v38  ;;  %v99_v54 = vadd.f32 %v929_v35, %v67_v39  ;;  %v104_v55 = vadd.f32 %v929_v35, %v72_v40  ;;  %v29_v8 = vld [vmem:[%s1080_s0 + $0x28] sm:$0xff]  ;;  %v760_v11 = vld [vmem:[%s1079_s1 + $0x40] sm:$0xff]  ;;  %v790_v38 = vld [vmem:[%s1079_s1 + $0x130] sm:$0xff] }
  0x10   :  { %510 = vmatpush.bf16.msra.mxu2 %v772_v14  ;;  %v100_v56 = vadd.f32 %v932_v36, %v68_v41  ;;  %v105_v57 = vadd.f32 %v932_v36, %v73_v42  ;;  %v101_v58 = vadd.f32 %v941_v45, %v69_v43  ;;  %v102_v62 = vadd.f32 %v953_v49, %v70_v52  ;;  %v30_v14 = vld [vmem:[%s1080_s0 + $0x30] sm:$0xff]  ;;  %v768_v15 = vld [vmem:[%s1079_s1 + $0x80] sm:$0xff] }
  0x11   :  { %529 = vmatpush.bf16.msra.mxu3 %v780_v16  ;;  %v106_v59 = vadd.f32 %v941_v45, %v74_v44  ;;  %v107_v63 = vadd.f32 %v953_v49, %v75_v53  ;;  %v119_v2 = vmax.f32 %v99_v54, 0.0  ;;  %v124_v3 = vmax.f32 %v104_v55, 0.0  ;;  %v776_v16 = vld [vmem:[%s1079_s1 + $0xc0] sm:$0xff] }
  0x12   :  { %473 = vmatpush.bf16.msra.mxu0 %v755_v30  ;;  %v120_v4 = vmax.f32 %v100_v56, 0.0  ;;  %v125_v5 = vmax.f32 %v105_v57, 0.0  ;;  %v121_v6 = vmax.f32 %v101_v58, 0.0  ;;  %v122_v12 = vmax.f32 %v102_v62, 0.0  ;;  %v33_v17 = vld [vmem:[%s1080_s0 + $0x44] sm:$0xff] }
  0x13   :  { %492 = vmatpush.bf16.msra.mxu1 %v763_v31  ;;  %v126_v7 = vmax.f32 %v106_v59, 0.0  ;;  %v127_v13 = vmax.f32 %v107_v63, 0.0  ;;  %v139_v18 = vpack.c.bf16 %v124_v3, %v119_v2  ;;  %v45_v24 = vunpack.c.l.bf16 %v29_v8  ;;  %v788_v55 = vld [vmem:[%s1079_s1 + $0x120] sm:$0xff]  ;;  %v34_v63 = vld [vmem:[%s1080_s0 + $0x4c] sm:$0xf] }
  0x14   :  { %511 = vmatpush.bf16.msra.mxu2 %v771_v33  ;;  %v140_v20 = vpack.c.bf16 %v125_v5, %v120_v4  ;;  %v50_v25 = vunpack.c.l.bf16 %v32_v9  ;;  %v46_v28 = vunpack.c.h.bf16 %v29_v8  ;;  %v51_v29 = vunpack.c.h.bf16 %v32_v9 }
  0x15   :  { %530 = vmatpush.bf16.msra.mxu3 %v779_v34  ;;  %v141_v26 = vpack.c.bf16 %v126_v7, %v121_v6  ;;  %v47_v30 = vunpack.c.l.bf16 %v30_v14  ;;  %v142_v31 = vpack.c.bf16 %v127_v13, %v122_v12  ;;  %v52_v33 = vunpack.c.l.bf16 %v33_v17 }
  0x16   :  { %474 = vmatpush.bf16.msra.mxu0 %v754_v47  ;;  %v48_v34 = vunpack.c.h.bf16 %v30_v14  ;;  %v53_v37 = vunpack.c.h.bf16 %v33_v17  ;;  %v77_v39 = vmul.f32 %v897_v21, %v45_v24  ;;  %v82_v40 = vmul.f32 %v897_v21, %v50_v25  ;;  %v789_v21 = vld [vmem:[%s1079_s1 + $0x128] sm:$0xff] }
  0x17   :  { %493 = vmatpush.bf16.msra.mxu1 %v762_v48  ;;  %v78_v41 = vmul.f32 %v911_v27, %v46_v28  ;;  %v83_v42 = vmul.f32 %v911_v27, %v51_v29  ;;  %v79_v43 = vmul.f32 %v920_v32, %v47_v30  ;;  %v84_v44 = vmul.f32 %v920_v32, %v52_v33 }
  0x18   :  { %512 = vmatpush.bf16.msra.mxu2 %v770_v50  ;;  %v80_v47 = vmul.f32 %v944_v46, %v48_v34  ;;  %v85_v48 = vmul.f32 %v944_v46, %v53_v37  ;;  %v109_v50 = vadd.f32 %v929_v35, %v77_v39  ;;  %v114_v27 = vadd.f32 %v929_v35, %v82_v40 }
  0x19   :  { %531 = vmatpush.bf16.msra.mxu3 %v778_v51  ;;  %v110_v51 = vadd.f32 %v932_v36, %v78_v41  ;;  %v115_v52 = vadd.f32 %v932_v36, %v83_v42  ;;  %v111_v32 = vadd.f32 %v941_v45, %v79_v43  ;;  %v116_v53 = vadd.f32 %v941_v45, %v84_v44  ;;  %v25_v36 = vld [vmem:[%s1080_s0 + $0x10] sm:$0xf]  ;;  %v28_v45 = vld [vmem:[%s1080_s0 + $0x24] sm:$0xf] }
  0x1a   :  { %475 = vmatpush.bf16.msra.mxu0 %v753_v60  ;;  %v112_v46 = vadd.f32 %v953_v49, %v80_v47  ;;  %v117_v54 = vadd.f32 %v953_v49, %v85_v48  ;;  %v129_v56 = vmax.f32 %v109_v50, 0.0  ;;  %v134_v35 = vmax.f32 %v114_v27, 0.0  ;;  %v31_v49 = vld [vmem:[%s1080_s0 + $0x38] sm:$0xf] }
  0x1b   :  { %494 = vmatpush.bf16.msra.mxu1 %v761_v61  ;;  %v130_v57 = vmax.f32 %v110_v51, 0.0  ;;  %v135_v58 = vmax.f32 %v115_v52, 0.0  ;;  %v131_v59 = vmax.f32 %v111_v32, 0.0  ;;  %v136_v60 = vmax.f32 %v116_v53, 0.0 }
  0x1c   :  { %513 = vmatpush.bf16.msra.mxu2 %v769_v0  ;;  %v132_v61 = vmax.f32 %v112_v46, 0.0  ;;  %v137_v62 = vmax.f32 %v117_v54, 0.0  ;;  %v144_v0 = vpack.c.bf16 %v134_v35, %v129_v56  ;;  %v39_v2 = vunpack.c.l.bf16 %v25_v36  ;;  %v800_v46 = vld [vmem:[%s1083_s4] ss:$0 sm:$0xff] }
  0x1d   :  { %532 = vmatpush.bf16.msra.mxu3 %v777_v1  ;;  %v787_v1 = vld [vmem:[%s1079_s1 + $0x118] sm:$0xff]  ;;  %v61_v3 = vperm.slane %v894_v19, 4  ;;  %v145_v4 = vpack.c.bf16 %v135_v58, %v130_v57  ;;  %v44_v5 = vunpack.c.l.bf16 %v28_v45  ;;  %v49_v6 = vunpack.c.l.bf16 %v31_v49  ;;  %v801_v57 = vld [vmem:[%s1084_s5] ss:$0 sm:$0xff] }
  0x1e   :  { %476 = vmatpush.bf16.msra.mxu0 %v752_v10  ;;  %v54_v7 = vunpack.c.l.bf16 %v34_v63  ;;  %v146_v8 = vpack.c.bf16 %v136_v60, %v131_v59  ;;  %v147_v9 = vpack.c.bf16 %v137_v62, %v132_v61  ;;  %v786_v10 = vld [vmem:[%s1079_s1 + $0x110] sm:$0xff]  ;;  %v93_v13 = vperm.slane %v902_v22, 4  ;;  %v784_v22 = vld [vmem:[%s1079_s1 + $0x100] sm:$0xff] }
  0x1f   :  { %495 = vmatpush.bf16.msra.mxu1 %v760_v11  ;;  %v71_v11 = vmul.f32 %v61_v3, %v39_v2  ;;  %v76_v12 = vmul.f32 %v61_v3, %v44_v5  ;;  %v81_v14 = vmul.f32 %v61_v3, %v49_v6 }
  0x20   :  { %514 = vmatpush.bf16.msra.mxu2 %v768_v15  ;;  %v86_v19 = vmul.f32 %v61_v3, %v54_v7  ;;  %v785_v15 = vld [vmem:[%s1079_s1 + $0x108] sm:$0xff] }
  0x21   :  { %533 = vmatpush.bf16.msra.mxu3 %v776_v16  ;;  %477 = vmatmul.bf16.vlgmr.msra.gmra.mxu0 %v139_v18  ;;  %v103_v16 = vadd.f32 %v93_v13, %v71_v11  ;;  %v108_v17 = vadd.f32 %v93_v13, %v76_v12  ;;  %v113_v18 = vadd.f32 %v93_v13, %v81_v14 }
  0x22   :  { %545 = vmatpush.bf16.msrb.mxu0 %v791_v23  ;;  %496 = vmatmul.bf16.vlgmr.msra.gmra.mxu1 %v140_v20  ;;  %v118_v20 = vadd.f32 %v93_v13, %v86_v19 }
  0x23   :  { %792 = vmatpush.bf16.msrb.mxu1 %v791_v23  ;;  %515 = vmatmul.bf16.vlgmr.msra.gmra.mxu2 %v141_v26  ;;  %v123_v23 = vmax.f32 %v103_v16, 0.0  ;;  %v128_v24 = vmax.f32 %v108_v17, 0.0  ;;  %v133_v25 = vmax.f32 %v113_v18, 0.0 }
  0x24   :  { %534 = vmatmul.bf16.vlgmr.msra.gmra.mxu3 %v142_v31  ;;  %v138_v26 = vmax.f32 %v118_v20, 0.0 }
  0x25   :  { %v143_v28 = vpack.c.bf16 %v128_v24, %v123_v23 }
  0x26   :  { %546 = vmatpush.bf16.msrb.mxu0 %v790_v38  ;;  %v148_v29 = vpack.c.bf16 %v138_v26, %v133_v25 }
  0x27   :  { %793 = vmatpush.bf16.msrb.mxu1 %v790_v38 }
  0x2a   :  { %547 = vmatpush.bf16.msrb.mxu0 %v789_v21 }
  0x2b   :  { %794 = vmatpush.bf16.msrb.mxu1 %v789_v21 }
  0x2e   :  { %548 = vmatpush.bf16.msrb.mxu0 %v788_v55 }
  0x2f   :  { %795 = vmatpush.bf16.msrb.mxu1 %v788_v55 }
  0x31   :  { %482 = vmatmul.bf16.gmra.mxu0 %v144_v0 }
  0x32   :  { %549 = vmatpush.bf16.msrb.mxu0 %v787_v1  ;;  %501 = vmatmul.bf16.gmra.mxu1 %v145_v4 }
  0x33   :  { %796 = vmatpush.bf16.msrb.mxu1 %v787_v1  ;;  %520 = vmatmul.bf16.gmra.mxu2 %v146_v8 }
  0x34   :  { %539 = vmatmul.bf16.gmra.mxu3 %v147_v9 }
  0x36   :  { %550 = vmatpush.bf16.msrb.mxu0 %v786_v10 }
  0x37   :  { %797 = vmatpush.bf16.msrb.mxu1 %v786_v10 }
  0x3a   :  { %551 = vmatpush.bf16.msrb.mxu0 %v785_v15 }
  0x3b   :  { %798 = vmatpush.bf16.msrb.mxu1 %v785_v15 }
  0x3e   :  { %552 = vmatpush.bf16.msrb.mxu0 %v784_v22 }
  0x3f   :  { %799 = vmatpush.bf16.msrb.mxu1 %v784_v22 }
  0x41   :  { %553 = vmatmul.bf16.vlgmr.msrb.gmra.mxu0 %v143_v28 }
  0x42   :  { %558 = vmatmul.bf16.vlgmr.msrb.gmra.mxu1 %v148_v29 }
  0x9e   :  { %v478_v30 = vpop.f32.mrf.mxu0 }
  0x9f   :  { %v497_v31 = vpop.f32.mrf.mxu1 }
  0xa0   :  { %v498_v48 = vadd.f32 %v497_v31, %v478_v30 }
  0xa6   :  { %v516_v33 = vpop.f32.mrf.mxu2  ;;  %v480_v37 = vpop.f32.mrf.mxu0 }
  0xa7   :  { %v535_v34 = vpop.f32.mrf.mxu3  ;;  %v499_v38 = vpop.f32.mrf.mxu1  ;;  %v517_v50 = vadd.f32 %v516_v33, %v498_v48 }
  0xa8   :  { %v500_v56 = vadd.f32 %v499_v38, %v480_v37 }
  0xa9   :  { %v536_v52 = vadd.f32 %v535_v34, %v517_v50 }
  0xae   :  { %v518_v39 = vpop.f32.mrf.mxu2  ;;  %v483_v40 = vpop.f32.mrf.mxu0 }
  0xaf   :  { %v502_v41 = vpop.f32.mrf.mxu1  ;;  %v537_v42 = vpop.f32.mrf.mxu3  ;;  %v519_v45 = vadd.f32 %v518_v39, %v500_v56 }
  0xb0   :  { %v503_v21 = vadd.f32 %v502_v41, %v483_v40 }
  0xb1   :  { %v538_v0 = vadd.f32 %v537_v42, %v519_v45 }
  0xb6   :  { %v521_v43 = vpop.f32.mrf.mxu2  ;;  %v485_v44 = vpop.f32.mrf.mxu0 }
  0xb7   :  { %v504_v47 = vpop.f32.mrf.mxu1  ;;  %v522_v27 = vadd.f32 %v521_v43, %v503_v21  ;;  %v540_v51 = vpop.f32.mrf.mxu3 }
  0xb8   :  { %v505_v35 = vadd.f32 %v504_v47, %v485_v44 }
  0xb9   :  { %v541_v32 = vadd.f32 %v540_v51, %v522_v27 }
  0xbe   :  { %v523_v53 = vpop.f32.mrf.mxu2  ;;  %v554_v54 = vpop.f32.mrf.mxu0 }
  0xbf   :  { %v559_v55 = vpop.f32.mrf.mxu1  ;;  %v555_v36 = vadd.f32 %v554_v54, %v536_v52  ;;  %v524_v49 = vadd.f32 %v523_v53, %v505_v35  ;;  %v542_v63 = vpop.f32.mrf.mxu3 }
  0xc0   :  { %v560_v58 = vadd.f32 %v559_v55, %v541_v32 }
  0xc1   :  { %v568_v59 = vmul.f32 %v800_v46, %v555_v36  ;;  %v543_v1 = vadd.f32 %v542_v63, %v524_v49 }
  0xc2   :  { %v570_v60 = vmul.f32 %v800_v46, %v560_v58 }
  0xc3   :  { %v576_v61 = vadd.f32 %v801_v57, %v568_v59 }
  0xc4   :  { %v578_v62 = vadd.f32 %v801_v57, %v570_v60 }
  0xc5   :  { %v580_v2 = vmax.f32 %v576_v61, 0.0 }
  0xc6   :  { %v582_v3 = vmax.f32 %v578_v62, 0.0  ;;  %v556_v4 = vpop.f32.mrf.mxu0 }
  0xc7   :  { %v561_v5 = vpop.f32.mrf.mxu1  ;;  %584 = vst [vmem:[%s1085_s6] sm:$0xff] %v580_v2  ;;  %v557_v6 = vadd.f32 %v556_v4, %v538_v0 }
  0xc8   :  { %v562_v7 = vadd.f32 %v561_v5, %v543_v1  ;;  %586 = vst [vmem:[%s1085_s6 + $0x10] sm:$0xff] %v582_v3 }
  0xc9   :  { %v569_v8 = vmul.f32 %v800_v46, %v557_v6 }
  0xca   :  { %v571_v9 = vmul.f32 %v800_v46, %v562_v7 }
  0xcb   :  { %v577_v10 = vadd.f32 %v801_v57, %v569_v8 }
  0xcc   :  { %v579_v11 = vadd.f32 %v801_v57, %v571_v9 }
  0xcd   :  { %v581_v12 = vmax.f32 %v577_v10, 0.0 }
  0xce   :  { %v583_v13 = vmax.f32 %v579_v11, 0.0 }
  0xcf   :  { %585 = vst [vmem:[%s1085_s6 + $0x8] sm:$0xff] %v581_v12 }
  0xd0   :  { %587 = vst [vmem:[%s1085_s6 + $0x18] sm:$0xff] %v583_v13 }

// kernel: rot_prediction_forward.135
= control target key start
LH: loop header
LB: loop body
LE: loop exit
PB: predicated region body
PF: predicated region fallthrough
CT: control target
= control target key end

     0   :  { %s2977_s1 = inlined_call_operand.vmem [shape: bf16[640,384], index: 1, kind: input, shape index: {}]   ;;  %s2978_s0 = inlined_call_operand.vmem [shape: bf16[32,640], index: 0, kind: input, shape index: {}]   ;;  %s2979_s2 = inlined_call_operand.vmem [shape: f32[1,640], index: 2, kind: input, shape index: {}]   ;;  %s2980_s3 = inlined_call_operand.vmem [shape: f32[1,640], index: 3, kind: input, shape index: {}]   ;;  %s2981_s4 = inlined_call_operand.vmem [shape: f32[1,384], index: 4, kind: input, shape index: {}]   ;;  %s2982_s5 = inlined_call_operand.vmem [shape: f32[1,384], index: 5, kind: input, shape index: {}]   ;;  %s2983_s6 = inlined_call_operand.vmem [shape: f32[32,384], index: 6, kind: output, shape index: {}]  }
   0x1   :  { %v1376_v0 = vld [vmem:[%s2977_s1 + $0xa8] sm:$0xf]  ;;  %v1792_v1 = vld [vmem:[%s2977_s1 + $0xb0] sm:$0xf0]  ;;  %v1364_v11 = vld [vmem:[%s2977_s1 + $0x90] sm:$0xf] }
   0x2   :  { %v1472_v2 = vld [vmem:[%s2977_s1 + $0x168] sm:$0xf]  ;;  %v1377_v3 = vor.u32 %v1792_v1, %v1376_v0  ;;  %v1816_v4 = vld [vmem:[%s2977_s1 + $0x170] sm:$0xf0]  ;;  %v1789_v13 = vld [vmem:[%s2977_s1 + $0x98] sm:$0xf0] }
   0x3   :  { %v1568_v5 = vld [vmem:[%s2977_s1 + $0x228] sm:$0xf]  ;;  %v1840_v6 = vld [vmem:[%s2977_s1 + $0x230] sm:$0xf0]  ;;  %v1473_v7 = vor.u32 %v1816_v4, %v1472_v2  ;;  %v1460_v14 = vld [vmem:[%s2977_s1 + $0x150] sm:$0xf]  ;;  %v1365_v16 = vor.u32 %v1789_v13, %v1364_v11 }
   0x4   :  { %v1569_v8 = vor.u32 %v1840_v6, %v1568_v5  ;;  %v1664_v9 = vld [vmem:[%s2977_s1 + $0x2e8] sm:$0xf]  ;;  %v1864_v10 = vld [vmem:[%s2977_s1 + $0x2f0] sm:$0xf0]  ;;  %949 = vmatpush.bf16.msra.mxu0 %v1377_v3  ;;  %v1813_v15 = vld [vmem:[%s2977_s1 + $0x158] sm:$0xf0] }
   0x5   :  { %v1665_v12 = vor.u32 %v1864_v10, %v1664_v9  ;;  %968 = vmatpush.bf16.msra.mxu1 %v1473_v7  ;;  %v1461_v17 = vor.u32 %v1813_v15, %v1460_v14  ;;  %v1556_v18 = vld [vmem:[%s2977_s1 + $0x210] sm:$0xf]  ;;  %v1837_v19 = vld [vmem:[%s2977_s1 + $0x218] sm:$0xf0]  ;;  %v1352_v23 = vld [vmem:[%s2977_s1 + $0x78] sm:$0xf] }
   0x6   :  { %987 = vmatpush.bf16.msra.mxu2 %v1569_v8  ;;  %v1652_v20 = vld [vmem:[%s2977_s1 + $0x2d0] sm:$0xf]  ;;  %v1557_v21 = vor.u32 %v1837_v19, %v1556_v18  ;;  %v1861_v22 = vld [vmem:[%s2977_s1 + $0x2d8] sm:$0xf0]  ;;  %v1786_v24 = vld [vmem:[%s2977_s1 + $0x80] sm:$0xf0] }
   0x7   :  { %1006 = vmatpush.bf16.msra.mxu3 %v1665_v12  ;;  %v1653_v25 = vor.u32 %v1861_v22, %v1652_v20  ;;  %v1448_v26 = vld [vmem:[%s2977_s1 + $0x138] sm:$0xf]  ;;  %v1810_v27 = vld [vmem:[%s2977_s1 + $0x140] sm:$0xf0]  ;;  %v1353_v29 = vor.u32 %v1786_v24, %v1352_v23  ;;  %v1340_v35 = vld [vmem:[%s2977_s1 + $0x60] sm:$0xf] }
   0x8   :  { %v1544_v28 = vld [vmem:[%s2977_s1 + $0x1f8] sm:$0xf]  ;;  %950 = vmatpush.bf16.msra.mxu0 %v1365_v16  ;;  %v1834_v30 = vld [vmem:[%s2977_s1 + $0x200] sm:$0xf0]  ;;  %v1449_v33 = vor.u32 %v1810_v27, %v1448_v26  ;;  %v1783_v36 = vld [vmem:[%s2977_s1 + $0x68] sm:$0xf0] }
   0x9   :  { %v1640_v31 = vld [vmem:[%s2977_s1 + $0x2b8] sm:$0xf]  ;;  %v1858_v32 = vld [vmem:[%s2977_s1 + $0x2c0] sm:$0xf0]  ;;  %969 = vmatpush.bf16.msra.mxu1 %v1461_v17  ;;  %v1545_v34 = vor.u32 %v1834_v30, %v1544_v28  ;;  %v1436_v37 = vld [vmem:[%s2977_s1 + $0x120] sm:$0xf]  ;;  %v1341_v44 = vor.u32 %v1783_v36, %v1340_v35 }
   0xa   :  { %988 = vmatpush.bf16.msra.mxu2 %v1557_v21  ;;  %v1641_v38 = vor.u32 %v1858_v32, %v1640_v31  ;;  %v1807_v39 = vld [vmem:[%s2977_s1 + $0x128] sm:$0xf0]  ;;  %v1532_v40 = vld [vmem:[%s2977_s1 + $0x1e0] sm:$0xf]  ;;  %v1328_v45 = vld [vmem:[%s2977_s1 + $0x48] sm:$0xf] }
   0xb   :  { %1007 = vmatpush.bf16.msra.mxu3 %v1653_v25  ;;  %v1831_v41 = vld [vmem:[%s2977_s1 + $0x1e8] sm:$0xf0]  ;;  %v1628_v42 = vld [vmem:[%s2977_s1 + $0x2a0] sm:$0xf]  ;;  %v1780_v46 = vld [vmem:[%s2977_s1 + $0x50] sm:$0xf0]  ;;  %v1437_v47 = vor.u32 %v1807_v39, %v1436_v37 }
   0xc   :  { %v1855_v43 = vld [vmem:[%s2977_s1 + $0x2a8] sm:$0xf0]  ;;  %951 = vmatpush.bf16.msra.mxu0 %v1353_v29  ;;  %v1533_v48 = vor.u32 %v1831_v41, %v1532_v40  ;;  %v1424_v49 = vld [vmem:[%s2977_s1 + $0x108] sm:$0xf]  ;;  %v1804_v50 = vld [vmem:[%s2977_s1 + $0x110] sm:$0xf0]  ;;  %v1329_v61 = vor.u32 %v1780_v46, %v1328_v45 }
   0xd   :  { %970 = vmatpush.bf16.msra.mxu1 %v1449_v33  ;;  %v1520_v51 = vld [vmem:[%s2977_s1 + $0x1c8] sm:$0xf]  ;;  %v1629_v52 = vor.u32 %v1855_v43, %v1628_v42  ;;  %v1828_v53 = vld [vmem:[%s2977_s1 + $0x1d0] sm:$0xf0]  ;;  %v1316_v56 = vld [vmem:[%s2977_s1 + $0x30] sm:$0xf]  ;;  %v1425_v1 = vor.u32 %v1804_v50, %v1424_v49 }
   0xe   :  { %989 = vmatpush.bf16.msra.mxu2 %v1545_v34  ;;  %v1616_v54 = vld [vmem:[%s2977_s1 + $0x288] sm:$0xf]  ;;  %v1852_v55 = vld [vmem:[%s2977_s1 + $0x290] sm:$0xf0]  ;;  %v1777_v57 = vld [vmem:[%s2977_s1 + $0x38] sm:$0xf0]  ;;  %v1521_v2 = vor.u32 %v1828_v53, %v1520_v51 }
   0xf   :  { %1008 = vmatpush.bf16.msra.mxu3 %v1641_v38  ;;  %v2062_v58 = vld [vmem:[%s2977_s1 + $0xf0] sm:$0xf]  ;;  %v1801_v59 = vld [vmem:[%s2977_s1 + $0xf8] sm:$0xf0]  ;;  %v2084_v3 = vld [vmem:[%s2977_s1 + $0x18] sm:$0xf]  ;;  %v1617_v6 = vor.u32 %v1852_v55, %v1616_v54  ;;  %v1317_v13 = vor.u32 %v1777_v57, %v1316_v56 }
  0x10   :  { %v1508_v60 = vld [vmem:[%s2977_s1 + $0x1b0] sm:$0xf]  ;;  %952 = vmatpush.bf16.msra.mxu0 %v1341_v44  ;;  %v1825_v62 = vld [vmem:[%s2977_s1 + $0x1b8] sm:$0xf0]  ;;  %v2089_v4 = vld [vmem:[%s2977_s1 + $0x20] sm:$0xf0]  ;;  %v1413_v14 = vor.u32 %v1801_v59, %v2062_v58 }
  0x11   :  { %v2076_v63 = vld [vmem:[%s2977_s1 + $0x270] sm:$0xf]  ;;  %v1849_v0 = vld [vmem:[%s2977_s1 + $0x278] sm:$0xf0]  ;;  %971 = vmatpush.bf16.msra.mxu1 %v1437_v47  ;;  %v2094_v5 = vld [vmem:[%s2977_s1 + $0xd8] sm:$0xf]  ;;  %v1509_v15 = vor.u32 %v1825_v62, %v1508_v60  ;;  %v1305_v20 = vor.u32 %v2089_v4, %v2084_v3 }
  0x12   :  { %990 = vmatpush.bf16.msra.mxu2 %v1533_v48  ;;  %v2099_v7 = vld [vmem:[%s2977_s1 + $0xe0] sm:$0xf0]  ;;  %v2104_v8 = vld [vmem:[%s2977_s1 + $0x198] sm:$0xf]  ;;  %v2124_v12 = vld [vmem:[%s2977_s1] sm:$0xf]  ;;  %v1605_v16 = vor.u32 %v1849_v0, %v2076_v63 }
  0x13   :  { %1009 = vmatpush.bf16.msra.mxu3 %v1629_v52  ;;  %v2109_v9 = vld [vmem:[%s2977_s1 + $0x1a0] sm:$0xf0]  ;;  %v2114_v10 = vld [vmem:[%s2977_s1 + $0x258] sm:$0xf]  ;;  %v2131_v17 = vld [vmem:[%s2977_s1 + $0x8] sm:$0xf0]  ;;  %v1401_v21 = vor.u32 %v2099_v7, %v2094_v5 }
  0x14   :  { %v2119_v11 = vld [vmem:[%s2977_s1 + $0x260] sm:$0xf0]  ;;  %953 = vmatpush.bf16.msra.mxu0 %v1329_v61  ;;  %v2136_v18 = vld [vmem:[%s2977_s1 + $0xc0] sm:$0xf]  ;;  %v2141_v19 = vld [vmem:[%s2977_s1 + $0xc8] sm:$0xf0]  ;;  %v1497_v22 = vor.u32 %v2109_v9, %v2104_v8  ;;  %v1293_v27 = vor.u32 %v2131_v17, %v2124_v12 }
  0x15   :  { %972 = vmatpush.bf16.msra.mxu1 %v1425_v1  ;;  %v2152_v23 = vld [vmem:[%s2977_s1 + $0x180] sm:$0xf]  ;;  %v2157_v24 = vld [vmem:[%s2977_s1 + $0x188] sm:$0xf0]  ;;  %v1593_v26 = vor.u32 %v2119_v11, %v2114_v10  ;;  %v1389_v28 = vor.u32 %v2141_v19, %v2136_v18  ;;  %v26_v32 = vld [vmem:[%s2978_s0 + $0x14] sm:$0xff] }
  0x16   :  { %991 = vmatpush.bf16.msra.mxu2 %v1521_v2  ;;  %v2162_v25 = vld [vmem:[%s2977_s1 + $0x240] sm:$0xf]  ;;  %v1485_v29 = vor.u32 %v2157_v24, %v2152_v23  ;;  %v2175_v30 = vld [vmem:[%s2977_s1 + $0x248] sm:$0xf0]  ;;  %v40_v35 = vunpack.c.l.bf16 %v26_v32  ;;  %v41_v42 = vunpack.c.h.bf16 %v26_v32  ;;  %v1474_v58 = vld [vmem:[%s2977_s1 + $0x174] sm:$0xf0] }
  0x17   :  { %1010 = vmatpush.bf16.msra.mxu3 %v1617_v6  ;;  %v23_v31 = vld [vmem:[%s2978_s0] sm:$0xff]  ;;  %v1581_v33 = vor.u32 %v2175_v30, %v2162_v25  ;;  %v24_v39 = vld [vmem:[%s2978_s0 + $0x8] sm:$0xff]  ;;  %v2243_v0 = vld [vmem:[%s2977_s1 + $0x3b0] sm:$0xf0] }
  0x18   :  { %v35_v34 = vunpack.c.l.bf16 %v23_v31  ;;  %v2188_v36 = vld [vmem:[%s2979_s2] sm:$0x1f]  ;;  %v36_v38 = vunpack.c.h.bf16 %v23_v31  ;;  %954 = vmatpush.bf16.msra.mxu0 %v1317_v13  ;;  %v37_v46 = vunpack.c.l.bf16 %v24_v39  ;;  %v38_v56 = vunpack.c.h.bf16 %v24_v39  ;;  %v1815_v57 = vld [vmem:[%s2977_s1 + $0x16c] sm:$0xf]  ;;  %v2238_v63 = vld [vmem:[%s2977_s1 + $0x3a8] sm:$0xf] }
  0x19   :  { %v2193_v37 = vld [vmem:[%s2980_s3] sm:$0x1f]  ;;  %v2199_v40 = vperm.slane %v2188_v36, 0  ;;  %v2205_v43 = vperm.slane %v2188_v36, 1  ;;  %973 = vmatpush.bf16.msra.mxu1 %v1413_v14  ;;  %v2214_v48 = vperm.slane %v2188_v36, 2  ;;  %v2254_v6 = vperm.slane %v2188_v36, 3 }
  0x1a   :  { %v2202_v41 = vperm.slane %v2193_v37, 0  ;;  %v27_v44 = vld [vmem:[%s2978_s0 + $0x1c] sm:$0xff]  ;;  %992 = vmatpush.bf16.msra.mxu2 %v1509_v15  ;;  %v2211_v45 = vperm.slane %v2193_v37, 1  ;;  %v2223_v55 = vperm.slane %v2193_v37, 2  ;;  %v1791_v1 = vld [vmem:[%s2977_s1 + $0xac] sm:$0xf] }
  0x1b   :  { %v42_v47 = vunpack.c.l.bf16 %v27_v44  ;;  %1011 = vmatpush.bf16.msra.mxu3 %v1605_v16  ;;  %v67_v49 = vmul.f32 %v2199_v40, %v35_v34  ;;  %v72_v50 = vmul.f32 %v2199_v40, %v40_v35  ;;  %v68_v51 = vmul.f32 %v2205_v43, %v36_v38  ;;  %v1378_v2 = vld [vmem:[%s2977_s1 + $0xb4] sm:$0xf0]  ;;  %v1839_v7 = vld [vmem:[%s2977_s1 + $0x22c] sm:$0xf]  ;;  %v1812_v15 = vld [vmem:[%s2977_s1 + $0x154] sm:$0xf] }
  0x1c   :  { %v73_v52 = vmul.f32 %v2205_v43, %v41_v42  ;;  %v69_v53 = vmul.f32 %v2214_v48, %v37_v46  ;;  %955 = vmatpush.bf16.msra.mxu0 %v1305_v20  ;;  %v43_v5 = vunpack.c.h.bf16 %v27_v44  ;;  %v1570_v8 = vld [vmem:[%s2977_s1 + $0x234] sm:$0xf0]  ;;  %v2265_v9 = vld [vmem:[%s2978_s0 + $0x28] sm:$0xff]  ;;  %v1462_v16 = vld [vmem:[%s2977_s1 + $0x15c] sm:$0xf0]  ;;  %v2299_v42 = vperm.slane %v2193_v37, 3 }
  0x1d   :  { %v74_v54 = vmul.f32 %v2214_v48, %v42_v47  ;;  %v99_v59 = vadd.f32 %v2202_v41, %v67_v49  ;;  %v104_v60 = vadd.f32 %v2202_v41, %v72_v50  ;;  %v100_v61 = vadd.f32 %v2211_v45, %v68_v51  ;;  %974 = vmatpush.bf16.msra.mxu1 %v1401_v21  ;;  %v2283_v32 = vld [vmem:[%s2977_s1 + $0x398] sm:$0xf0]  ;;  %v1788_v34 = vld [vmem:[%s2977_s1 + $0x94] sm:$0xf]  ;;  %v1366_v35 = vld [vmem:[%s2977_s1 + $0x9c] sm:$0xf0] }
  0x1e   :  { %v105_v62 = vadd.f32 %v2211_v45, %v73_v52  ;;  %993 = vmatpush.bf16.msra.mxu2 %v1497_v22  ;;  %v101_v3 = vadd.f32 %v2223_v55, %v69_v53  ;;  %v70_v22 = vmul.f32 %v2254_v6, %v38_v56  ;;  %v75_v31 = vmul.f32 %v2254_v6, %v43_v5  ;;  %v1836_v46 = vld [vmem:[%s2977_s1 + $0x214] sm:$0xf]  ;;  %v1558_v47 = vld [vmem:[%s2977_s1 + $0x21c] sm:$0xf0]  ;;  %v2310_v12 = vld [vmem:[%s2977_s1 + $0x13c] sm:$0xf] }
  0x1f   :  { %v106_v4 = vadd.f32 %v2223_v55, %v74_v54  ;;  %1012 = vmatpush.bf16.msra.mxu3 %v1593_v26  ;;  %v119_v10 = vmax.f32 %v99_v59, 0.0  ;;  %v124_v11 = vmax.f32 %v104_v60, 0.0  ;;  %v120_v13 = vmax.f32 %v100_v61, 0.0  ;;  %v2278_v26 = vld [vmem:[%s2977_s1 + $0x390] sm:$0xf]  ;;  %v32_v17 = vld [vmem:[%s2978_s0 + $0x3c] sm:$0xff] }
  0x20   :  { %v125_v14 = vmax.f32 %v105_v62, 0.0  ;;  %v121_v20 = vmax.f32 %v101_v3, 0.0  ;;  %956 = vmatpush.bf16.msra.mxu0 %v1293_v27  ;;  %v1477_v44 = vor.u32 %v1815_v57, %v1474_v58  ;;  %v1761_v49 = vor.u32 %v2243_v0, %v2238_v63  ;;  %v1450_v51 = vld [vmem:[%s2977_s1 + $0x144] sm:$0xf0]  ;;  %v2331_v52 = vld [vmem:[%s2977_s1 + $0x378] sm:$0xf] }
  0x21   :  { %v126_v21 = vmax.f32 %v106_v4, 0.0  ;;  %v2294_v38 = vpack.c.bf16 %v124_v11, %v119_v10  ;;  %975 = vmatpush.bf16.msra.mxu1 %v1389_v28  ;;  %v1381_v50 = vor.u32 %v1791_v1, %v1378_v2  ;;  %v2336_v18 = vld [vmem:[%s2977_s1 + $0x380] sm:$0xf0]  ;;  %v102_v19 = vadd.f32 %v2299_v42, %v70_v22  ;;  %v1785_v28 = vld [vmem:[%s2977_s1 + $0x7c] sm:$0xf]  ;;  %v30_v5 = vld [vmem:[%s2978_s0 + $0x30] sm:$0xff] }
  0x22   :  { %v2296_v39 = vpack.c.bf16 %v125_v14, %v120_v13  ;;  %994 = vmatpush.bf16.msra.mxu2 %v1485_v29  ;;  %v107_v23 = vadd.f32 %v2299_v42, %v75_v31  ;;  %v1573_v24 = vor.u32 %v1839_v7, %v1570_v8  ;;  %v1354_v29 = vld [vmem:[%s2977_s1 + $0x84] sm:$0xf0]  ;;  %v2352_v53 = vld [vmem:[%s2977_s1 + $0x1fc] sm:$0xf]  ;;  %v45_v25 = vunpack.c.l.bf16 %v2265_v9  ;;  %v2364_v56 = vld [vmem:[%s2977_s1 + $0x124] sm:$0xf] }
  0x23   :  { %v2321_v27 = vpack.c.bf16 %v126_v21, %v121_v20  ;;  %1013 = vmatpush.bf16.msra.mxu3 %v1581_v33  ;;  %957 = vmatmul.bf16.vlgmr.msra.gmra.mxu0 %v2294_v38  ;;  %v1465_v30 = vor.u32 %v1812_v15, %v1462_v16  ;;  %v1369_v33 = vor.u32 %v1788_v34, %v1366_v35  ;;  %v2359_v54 = vld [vmem:[%s2977_s1 + $0x204] sm:$0xf0]  ;;  %v2369_v57 = vld [vmem:[%s2977_s1 + $0x12c] sm:$0xf0]  ;;  %v50_v58 = vunpack.c.l.bf16 %v32_v17  ;;  %v2379_v63 = vld [vmem:[%s2977_s1 + $0x64] sm:$0xf] }
  0x24   :  { %v46_v59 = vunpack.c.h.bf16 %v2265_v9  ;;  %976 = vmatmul.bf16.vlgmr.msra.gmra.mxu1 %v2296_v39  ;;  %v122_v60 = vmax.f32 %v102_v19, 0.0  ;;  %v127_v61 = vmax.f32 %v107_v23, 0.0  ;;  %v1749_v62 = vor.u32 %v2283_v32, %v2278_v26  ;;  %1025 = vmatpush.bf16.msrb.mxu0 %v1761_v49  ;;  %v1342_v3 = vld [vmem:[%s2977_s1 + $0x6c] sm:$0xf0]  ;;  %v33_v11 = vld [vmem:[%s2978_s0 + $0x44] sm:$0xff] }
  0x25   :  { %1044 = vmatpush.bf16.msrb.mxu1 %v1381_v50  ;;  %995 = vmatmul.bf16.vlgmr.msra.gmra.mxu2 %v2321_v27  ;;  %v1561_v0 = vor.u32 %v1836_v46, %v1558_v47  ;;  %v1453_v1 = vor.u32 %v2310_v12, %v1450_v51  ;;  %v1737_v2 = vor.u32 %v2336_v18, %v2331_v52  ;;  %v51_v4 = vunpack.c.h.bf16 %v32_v17  ;;  %v1724_v26 = vld [vmem:[%s2977_s1 + $0x360] sm:$0xf]  ;;  %v1879_v32 = vld [vmem:[%s2977_s1 + $0x368] sm:$0xf0]  ;;  %v1534_v46 = vld [vmem:[%s2977_s1 + $0x1ec] sm:$0xf0] }
  0x26   :  { %1063 = vmatpush.bf16.msrb.mxu2 %v1477_v44  ;;  %v2390_v7 = vpack.c.bf16 %v127_v61, %v122_v60  ;;  %v1357_v8 = vor.u32 %v1785_v28, %v1354_v29  ;;  %v1549_v9 = vor.u32 %v2352_v53, %v2359_v54  ;;  %v1441_v10 = vor.u32 %v2364_v56, %v2369_v57  ;;  %v1830_v44 = vld [vmem:[%s2977_s1 + $0x1e4] sm:$0xf]  ;;  %v1803_v49 = vld [vmem:[%s2977_s1 + $0x10c] sm:$0xf]  ;;  %v1330_v29 = vld [vmem:[%s2977_s1 + $0x54] sm:$0xf0] }
  0x27   :  { %1082 = vmatpush.bf16.msrb.mxu3 %v1573_v24  ;;  %v1345_v13 = vor.u32 %v2379_v63, %v1342_v3  ;;  %v77_v14 = vmul.f32 %v2199_v40, %v45_v25  ;;  %v82_v15 = vmul.f32 %v2199_v40, %v50_v58  ;;  %v78_v16 = vmul.f32 %v2205_v43, %v46_v59  ;;  %v1779_v28 = vld [vmem:[%s2977_s1 + $0x4c] sm:$0xf]  ;;  %v1800_v60 = vld [vmem:[%s2977_s1 + $0xf4] sm:$0xf]  ;;  %v1414_v61 = vld [vmem:[%s2977_s1 + $0xfc] sm:$0xf0] }
  0x28   :  { %1014 = vmatmul.bf16.vlgmr.msra.gmra.mxu3 %v2390_v7  ;;  %v83_v20 = vmul.f32 %v2205_v43, %v51_v4  ;;  %v47_v21 = vunpack.c.l.bf16 %v30_v5  ;;  %v52_v22 = vunpack.c.l.bf16 %v33_v11  ;;  %v48_v31 = vunpack.c.h.bf16 %v30_v5  ;;  %1026 = vmatpush.bf16.msrb.mxu0 %v1749_v62  ;;  %v1827_v57 = vld [vmem:[%s2977_s1 + $0x1cc] sm:$0xf]  ;;  %v1318_v3 = vld [vmem:[%s2977_s1 + $0x3c] sm:$0xf0] }
  0x29   :  { %1045 = vmatpush.bf16.msrb.mxu1 %v1369_v33  ;;  %v109_v40 = vadd.f32 %v2202_v41, %v77_v14  ;;  %v114_v34 = vadd.f32 %v2202_v41, %v82_v15  ;;  %v110_v35 = vadd.f32 %v2211_v45, %v78_v16  ;;  %v53_v43 = vunpack.c.h.bf16 %v33_v11  ;;  %v1797_v14 = vld [vmem:[%s2977_s1 + $0xdc] sm:$0xf]  ;;  %v1402_v15 = vld [vmem:[%s2977_s1 + $0xe4] sm:$0xf0] }
  0x2a   :  { %1064 = vmatpush.bf16.msrb.mxu2 %v1465_v30  ;;  %v115_v47 = vadd.f32 %v2211_v45, %v83_v20  ;;  %v79_v12 = vmul.f32 %v2214_v48, %v47_v21  ;;  %v84_v17 = vmul.f32 %v2214_v48, %v52_v22  ;;  %v80_v41 = vmul.f32 %v2254_v6, %v48_v31  ;;  %v1426_v45 = vld [vmem:[%s2977_s1 + $0x114] sm:$0xf0]  ;;  %v1876_v30 = vld [vmem:[%s2977_s1 + $0x350] sm:$0xf0]  ;;  %v25_v20 = vld [vmem:[%s2978_s0 + $0x10] sm:$0xf] }
  0x2b   :  { %1083 = vmatpush.bf16.msrb.mxu3 %v1561_v0  ;;  %v129_v50 = vmax.f32 %v109_v40, 0.0  ;;  %v134_v51 = vmax.f32 %v114_v34, 0.0  ;;  %v130_v52 = vmax.f32 %v110_v35, 0.0  ;;  %v85_v18 = vmul.f32 %v2254_v6, %v53_v43  ;;  %v28_v21 = vld [vmem:[%s2978_s0 + $0x24] sm:$0xf] }
  0x2c   :  { %v135_v19 = vmax.f32 %v115_v47, 0.0  ;;  %v111_v23 = vadd.f32 %v2223_v55, %v79_v12  ;;  %v116_v48 = vadd.f32 %v2223_v55, %v84_v17  ;;  %v112_v24 = vadd.f32 %v2299_v42, %v80_v41  ;;  %1027 = vmatpush.bf16.msrb.mxu0 %v1737_v2  ;;  %v1712_v55 = vld [vmem:[%s2977_s1 + $0x348] sm:$0xf]  ;;  %v1776_v2 = vld [vmem:[%s2977_s1 + $0x34] sm:$0xf] }
  0x2d   :  { %1046 = vmatpush.bf16.msrb.mxu1 %v1357_v8  ;;  %v1725_v6 = vor.u32 %v1879_v32, %v1724_v26  ;;  %v1537_v53 = vor.u32 %v1830_v44, %v1534_v46  ;;  %v117_v25 = vadd.f32 %v2299_v42, %v85_v18  ;;  %v1429_v56 = vor.u32 %v1803_v49, %v1426_v45  ;;  %v1522_v42 = vld [vmem:[%s2977_s1 + $0x1d4] sm:$0xf0]  ;;  %v1700_v8 = vld [vmem:[%s2977_s1 + $0x330] sm:$0xf]  ;;  %v1773_v26 = vld [vmem:[%s2977_s1 + $0x1c] sm:$0xf] }
  0x2e   :  { %1065 = vmatpush.bf16.msrb.mxu2 %v1453_v1  ;;  %v131_v33 = vmax.f32 %v111_v23, 0.0  ;;  %v136_v54 = vmax.f32 %v116_v48, 0.0  ;;  %v2453_v58 = vpack.c.bf16 %v134_v51, %v129_v50  ;;  %v1333_v59 = vor.u32 %v1779_v28, %v1330_v29  ;;  %v1306_v32 = vld [vmem:[%s2977_s1 + $0x24] sm:$0xf0]  ;;  %v1688_v44 = vld [vmem:[%s2977_s1 + $0x318] sm:$0xf] }
  0x2f   :  { %1084 = vmatpush.bf16.msrb.mxu3 %v1549_v9  ;;  %v2461_v62 = vpack.c.bf16 %v135_v19, %v130_v52  ;;  %v132_v0 = vmax.f32 %v112_v24, 0.0  ;;  %v137_v1 = vmax.f32 %v117_v25, 0.0  ;;  %v1713_v4 = vor.u32 %v1876_v30, %v1712_v55  ;;  %v1873_v9 = vld [vmem:[%s2977_s1 + $0x338] sm:$0xf0]  ;;  %v1870_v47 = vld [vmem:[%s2977_s1 + $0x320] sm:$0xf0] }
  0x30   :  { %v2463_v63 = vpack.c.bf16 %v136_v54, %v131_v33  ;;  %1028 = vmatpush.bf16.msrb.mxu0 %v1725_v6  ;;  %v1525_v5 = vor.u32 %v1827_v57, %v1522_v42  ;;  %v1417_v11 = vor.u32 %v1800_v60, %v1414_v61  ;;  %v1321_v16 = vor.u32 %v1776_v2, %v1318_v3  ;;  %v1821_v12 = vld [vmem:[%s2977_s1 + $0x19c] sm:$0xf]  ;;  %v1794_v50 = vld [vmem:[%s2977_s1 + $0xc4] sm:$0xf]  ;;  %v1390_v51 = vld [vmem:[%s2977_s1 + $0xcc] sm:$0xf0] }
  0x31   :  { %1047 = vmatpush.bf16.msrb.mxu1 %v1345_v13  ;;  %v1510_v13 = vld [vmem:[%s2977_s1 + $0x1bc] sm:$0xf0]  ;;  %v2497_v22 = vperm.slane %v2188_v36, 4  ;;  %v2501_v31 = vpack.c.bf16 %v137_v1, %v132_v0  ;;  %v39_v40 = vunpack.c.l.bf16 %v25_v20  ;;  %v44_v34 = vunpack.c.l.bf16 %v28_v21  ;;  %v1770_v52 = vld [vmem:[%s2977_s1 + $0x4] sm:$0xf] }
  0x32   :  { %1066 = vmatpush.bf16.msrb.mxu2 %v1441_v10  ;;  %v1824_v10 = vld [vmem:[%s2977_s1 + $0x1b4] sm:$0xf]  ;;  %v2510_v35 = vperm.slane %v2193_v37, 4  ;;  %v1701_v36 = vor.u32 %v1873_v9, %v1700_v8  ;;  %v1405_v46 = vor.u32 %v1797_v14, %v1402_v15  ;;  %v1498_v37 = vld [vmem:[%s2977_s1 + $0x1a4] sm:$0xf0]  ;;  %v1309_v49 = vor.u32 %v1773_v26, %v1306_v32 }
  0x33   :  { %1085 = vmatpush.bf16.msrb.mxu3 %v1537_v53  ;;  %962 = vmatmul.bf16.gmra.mxu0 %v2453_v58  ;;  %v1513_v43 = vor.u32 %v1824_v10, %v1510_v13  ;;  %v71_v17 = vmul.f32 %v2497_v22, %v39_v40  ;;  %v76_v41 = vmul.f32 %v2497_v22, %v44_v34  ;;  %v1676_v18 = vld [vmem:[%s2977_s1 + $0x300] sm:$0xf]  ;;  %v1294_v45 = vld [vmem:[%s2977_s1 + $0xc] sm:$0xf0]  ;;  %v1793_v24 = vld [vmem:[%s2977_s1 + $0xb8] sm:$0xf0] }
  0x34   :  { %981 = vmatmul.bf16.gmra.mxu1 %v2461_v62  ;;  %1029 = vmatpush.bf16.msrb.mxu0 %v1713_v4  ;;  %v1384_v48 = vld [vmem:[%s2977_s1 + $0xb0] sm:$0xf]  ;;  %v1689_v28 = vor.u32 %v1870_v47, %v1688_v44  ;;  %v1501_v29 = vor.u32 %v1821_v12, %v1498_v37  ;;  %v1867_v6 = vld [vmem:[%s2977_s1 + $0x308] sm:$0xf0]  ;;  %v1762_v25 = vld [vmem:[%s2977_s1 + $0x3b4] sm:$0xf0]  ;;  %v1393_v55 = vor.u32 %v1794_v50, %v1390_v51 }
  0x35   :  { %1048 = vmatpush.bf16.msrb.mxu1 %v1333_v59  ;;  %1000 = vmatmul.bf16.gmra.mxu2 %v2463_v63  ;;  %v103_v19 = vadd.f32 %v2510_v35, %v71_v17  ;;  %v108_v23 = vadd.f32 %v2510_v35, %v76_v41  ;;  %v1887_v53 = vld [vmem:[%s2977_s1 + $0x3ac] sm:$0xf]  ;;  %v1818_v30 = vld [vmem:[%s2977_s1 + $0x184] sm:$0xf]  ;;  %v1486_v33 = vld [vmem:[%s2977_s1 + $0x18c] sm:$0xf0]  ;;  %v1385_v57 = vor.u32 %v1793_v24, %v1384_v48 }
  0x36   :  { %1067 = vmatpush.bf16.msrb.mxu2 %v1429_v56  ;;  %v1863_v54 = vld [vmem:[%s2977_s1 + $0x2ec] sm:$0xf]  ;;  %v1297_v56 = vor.u32 %v1770_v52, %v1294_v45  ;;  %v1666_v42 = vld [vmem:[%s2977_s1 + $0x2f4] sm:$0xf0]  ;;  %v1480_v59 = vld [vmem:[%s2977_s1 + $0x170] sm:$0xf]  ;;  %v1765_v1 = vor.u32 %v1887_v53, %v1762_v25  ;;  %v1677_v4 = vor.u32 %v1867_v6, %v1676_v18 }
  0x37   :  { %1086 = vmatpush.bf16.msrb.mxu3 %v1525_v5  ;;  %v1817_v60 = vld [vmem:[%s2977_s1 + $0x178] sm:$0xf0]  ;;  %v123_v61 = vmax.f32 %v103_v19, 0.0  ;;  %v128_v0 = vmax.f32 %v108_v23, 0.0  ;;  %v1372_v2 = vld [vmem:[%s2977_s1 + $0x98] sm:$0xf]  ;;  %v1489_v5 = vor.u32 %v1818_v30, %v1486_v33  ;;  %v1669_v10 = vor.u32 %v1863_v54, %v1666_v42 }
  0x38   :  { %1019 = vmatmul.bf16.gmra.mxu3 %v2501_v31  ;;  %1030 = vmatpush.bf16.msrb.mxu0 %v1701_v36  ;;  %v1790_v3 = vld [vmem:[%s2977_s1 + $0xa0] sm:$0xf0]  ;;  %v1860_v8 = vld [vmem:[%s2977_s1 + $0x2d4] sm:$0xf]  ;;  %v1654_v9 = vld [vmem:[%s2977_s1 + $0x2dc] sm:$0xf0] }
  0x39   :  { %1049 = vmatpush.bf16.msrb.mxu1 %v1321_v16  ;;  %v1884_v13 = vld [vmem:[%s2977_s1 + $0x394] sm:$0xf]  ;;  %v1750_v14 = vld [vmem:[%s2977_s1 + $0x39c] sm:$0xf0]  ;;  %v1468_v15 = vld [vmem:[%s2977_s1 + $0x158] sm:$0xf]  ;;  %v1373_v16 = vor.u32 %v1790_v3, %v1372_v2  ;;  %v2607_v32 = vpack.c.bf16 %v128_v0, %v123_v61 }
  0x3a   :  { %1068 = vmatpush.bf16.msrb.mxu2 %v1417_v11  ;;  %v1481_v11 = vor.u32 %v1817_v60, %v1480_v59  ;;  %v1814_v20 = vld [vmem:[%s2977_s1 + $0x160] sm:$0xf0]  ;;  %v31_v21 = vld [vmem:[%s2978_s0 + $0x38] sm:$0xf]  ;;  %v34_v26 = vld [vmem:[%s2978_s0 + $0x4c] sm:$0xf]  ;;  %v1753_v44 = vor.u32 %v1884_v13, %v1750_v14 }
  0x3b   :  { %1087 = vmatpush.bf16.msrb.mxu3 %v1513_v43  ;;  %v1360_v40 = vld [vmem:[%s2977_s1 + $0x80] sm:$0xf]  ;;  %v1787_v34 = vld [vmem:[%s2977_s1 + $0x88] sm:$0xf0]  ;;  %v49_v36 = vunpack.c.l.bf16 %v31_v21  ;;  %v54_v43 = vunpack.c.l.bf16 %v34_v26  ;;  %v1469_v47 = vor.u32 %v1814_v20, %v1468_v15  ;;  %v1857_v12 = vld [vmem:[%s2977_s1 + $0x2bc] sm:$0xf] }
  0x3c   :  { %1031 = vmatpush.bf16.msrb.mxu0 %v1689_v28  ;;  %v1881_v37 = vld [vmem:[%s2977_s1 + $0x37c] sm:$0xf]  ;;  %v1738_v17 = vld [vmem:[%s2977_s1 + $0x384] sm:$0xf0]  ;;  %v1361_v41 = vor.u32 %v1787_v34, %v1360_v40  ;;  %v1456_v50 = vld [vmem:[%s2977_s1 + $0x140] sm:$0xf] }
  0x3d   :  { %1050 = vmatpush.bf16.msrb.mxu1 %v1309_v49  ;;  %v1642_v49 = vld [vmem:[%s2977_s1 + $0x2c4] sm:$0xf0]  ;;  %v1811_v51 = vld [vmem:[%s2977_s1 + $0x148] sm:$0xf0]  ;;  %v1784_v18 = vld [vmem:[%s2977_s1 + $0x70] sm:$0xf0]  ;;  %v81_v45 = vmul.f32 %v2497_v22, %v49_v36  ;;  %v86_v19 = vmul.f32 %v2497_v22, %v54_v43  ;;  %v1741_v23 = vor.u32 %v1881_v37, %v1738_v17 }
  0x3e   :  { %1069 = vmatpush.bf16.msrb.mxu2 %v1405_v46  ;;  %v1657_v46 = vor.u32 %v1860_v8, %v1654_v9  ;;  %v1348_v52 = vld [vmem:[%s2977_s1 + $0x68] sm:$0xf]  ;;  %v1645_v48 = vor.u32 %v1857_v12, %v1642_v49  ;;  %v1457_v24 = vor.u32 %v1811_v51, %v1456_v50  ;;  %v1854_v28 = vld [vmem:[%s2977_s1 + $0x2a4] sm:$0xf]  ;;  %v1726_v22 = vld [vmem:[%s2977_s1 + $0x36c] sm:$0xf0] }
  0x3f   :  { %1088 = vmatpush.bf16.msrb.mxu3 %v1501_v29  ;;  %v1878_v29 = vld [vmem:[%s2977_s1 + $0x364] sm:$0xf]  ;;  %v1349_v6 = vor.u32 %v1784_v18, %v1348_v52  ;;  %v1630_v53 = vld [vmem:[%s2977_s1 + $0x2ac] sm:$0xf0]  ;;  %v1444_v25 = vld [vmem:[%s2977_s1 + $0x128] sm:$0xf]  ;;  %v113_v30 = vadd.f32 %v2510_v35, %v81_v45  ;;  %v118_v33 = vadd.f32 %v2510_v35, %v86_v19 }
  0x40   :  { %1032 = vmatpush.bf16.msrb.mxu0 %v1677_v4  ;;  %v1336_v54 = vld [vmem:[%s2977_s1 + $0x50] sm:$0xf]  ;;  %v1633_v42 = vor.u32 %v1854_v28, %v1630_v53  ;;  %v1851_v60 = vld [vmem:[%s2977_s1 + $0x28c] sm:$0xf]  ;;  %v1714_v61 = vld [vmem:[%s2977_s1 + $0x354] sm:$0xf0] }
  0x41   :  { %1051 = vmatpush.bf16.msrb.mxu1 %v1297_v56  ;;  %v1781_v56 = vld [vmem:[%s2977_s1 + $0x58] sm:$0xf0]  ;;  %v1875_v35 = vld [vmem:[%s2977_s1 + $0x34c] sm:$0xf]  ;;  %v1432_v2 = vld [vmem:[%s2977_s1 + $0x110] sm:$0xf] }
  0x42   :  { %1070 = vmatpush.bf16.msrb.mxu2 %v1393_v55  ;;  %v1808_v55 = vld [vmem:[%s2977_s1 + $0x130] sm:$0xf0]  ;;  %v1337_v0 = vor.u32 %v1781_v56, %v1336_v54  ;;  %v1805_v3 = vld [vmem:[%s2977_s1 + $0x118] sm:$0xf0]  ;;  %v133_v4 = vmax.f32 %v113_v30, 0.0 }
  0x43   :  { %1089 = vmatpush.bf16.msrb.mxu3 %v1489_v5  ;;  %1033 = vmatmul.bf16.vlgmr.msrb.gmra.mxu0 %v2607_v32  ;;  %v1445_v59 = vor.u32 %v1808_v55, %v1444_v25  ;;  %v138_v5 = vmax.f32 %v118_v33, 0.0  ;;  %v1324_v8 = vld [vmem:[%s2977_s1 + $0x38] sm:$0xf]  ;;  %v1778_v9 = vld [vmem:[%s2977_s1 + $0x40] sm:$0xf0]  ;;  %v1433_v13 = vor.u32 %v1805_v3, %v1432_v2 }
  0x44   :  { %1101 = vmatpush.bf16.msra.mxu0 %v1669_v10  ;;  %1052 = vmatmul.bf16.vlgmr.msrb.gmra.mxu1 %v2294_v38  ;;  %v1717_v10 = vor.u32 %v1875_v35, %v1714_v61  ;;  %v1848_v14 = vld [vmem:[%s2977_s1 + $0x274] sm:$0xf]  ;;  %v1325_v20 = vor.u32 %v1778_v9, %v1324_v8  ;;  %v1606_v21 = vld [vmem:[%s2977_s1 + $0x27c] sm:$0xf0]  ;;  %v1420_v26 = vld [vmem:[%s2977_s1 + $0xf8] sm:$0xf] }
  0x45   :  { %1120 = vmatpush.bf16.msra.mxu1 %v1765_v1  ;;  %1071 = vmatmul.bf16.vlgmr.msrb.gmra.mxu2 %v2296_v39  ;;  %v1618_v1 = vld [vmem:[%s2977_s1 + $0x294] sm:$0xf0]  ;;  %v1872_v15 = vld [vmem:[%s2977_s1 + $0x334] sm:$0xf]  ;;  %v1802_v40 = vld [vmem:[%s2977_s1 + $0x100] sm:$0xf0]  ;;  %v2713_v34 = vpack.c.bf16 %v138_v5, %v133_v4 }
  0x46   :  { %1139 = vmatpush.bf16.msra.mxu2 %v1385_v57  ;;  %v1729_v57 = vor.u32 %v1878_v29, %v1726_v22  ;;  %v1312_v36 = vld [vmem:[%s2977_s1 + $0x20] sm:$0xf]  ;;  %v1775_v43 = vld [vmem:[%s2977_s1 + $0x28] sm:$0xf0]  ;;  %v1845_v12 = vld [vmem:[%s2977_s1 + $0x25c] sm:$0xf] }
  0x47   :  { %1158 = vmatpush.bf16.msra.mxu3 %v1481_v11  ;;  %v1621_v11 = vor.u32 %v1851_v60, %v1618_v1  ;;  %v1869_v37 = vld [vmem:[%s2977_s1 + $0x31c] sm:$0xf]  ;;  %v1690_v17 = vld [vmem:[%s2977_s1 + $0x324] sm:$0xf0]  ;;  %v1408_v50 = vld [vmem:[%s2977_s1 + $0xe0] sm:$0xf] }
  0x48   :  { %1102 = vmatpush.bf16.msra.mxu0 %v1657_v46  ;;  %1090 = vmatmul.bf16.vlgmr.msrb.gmra.mxu3 %v2321_v27  ;;  %v1609_v46 = vor.u32 %v1848_v14, %v1606_v21  ;;  %v1594_v49 = vld [vmem:[%s2977_s1 + $0x264] sm:$0xf0]  ;;  %v1799_v51 = vld [vmem:[%s2977_s1 + $0xe8] sm:$0xf0]  ;;  %v1772_v18 = vld [vmem:[%s2977_s1 + $0x10] sm:$0xf0]  ;;  %v1693_v45 = vor.u32 %v1869_v37, %v1690_v17 }
  0x49   :  { %1121 = vmatpush.bf16.msra.mxu1 %v1753_v44  ;;  %v1300_v52 = vld [vmem:[%s2977_s1 + $0x8] sm:$0xf]  ;;  %v1768_v19 = vld [vmem:[%s2977_s1 + $0x3b0] sm:$0xf]  ;;  %v1842_v28 = vld [vmem:[%s2977_s1 + $0x244] sm:$0xf] }
  0x4a   :  { %1140 = vmatpush.bf16.msra.mxu2 %v1373_v16  ;;  %v1702_v16 = vld [vmem:[%s2977_s1 + $0x33c] sm:$0xf0]  ;;  %v1866_v29 = vld [vmem:[%s2977_s1 + $0x304] sm:$0xf]  ;;  %v1678_v22 = vld [vmem:[%s2977_s1 + $0x30c] sm:$0xf0] }
  0x4b   :  { %1159 = vmatpush.bf16.msra.mxu3 %v1469_v47  ;;  %v1705_v44 = vor.u32 %v1872_v15, %v1702_v16  ;;  %v1421_v47 = vor.u32 %v1802_v40, %v1420_v26  ;;  %v1582_v53 = vld [vmem:[%s2977_s1 + $0x24c] sm:$0xf0]  ;;  %v1396_v25 = vld [vmem:[%s2977_s1 + $0xc8] sm:$0xf]  ;;  %v1796_v55 = vld [vmem:[%s2977_s1 + $0xd0] sm:$0xf0] }
  0x4c   :  { %1103 = vmatpush.bf16.msra.mxu0 %v1645_v48  ;;  %v1597_v48 = vor.u32 %v1845_v12, %v1594_v49  ;;  %v1576_v33 = vld [vmem:[%s2977_s1 + $0x230] sm:$0xf]  ;;  %v1841_v54 = vld [vmem:[%s2977_s1 + $0x238] sm:$0xf0]  ;;  %v1886_v60 = vld [vmem:[%s2977_s1 + $0x3a0] sm:$0xf0]  ;;  %v1585_v35 = vor.u32 %v1842_v28, %v1582_v53  ;;  %v1397_v61 = vor.u32 %v1796_v55, %v1396_v25 }
  0x4d   :  { %1122 = vmatpush.bf16.msra.mxu1 %v1741_v23  ;;  %v1889_v23 = vld [vmem:[%s2977_s1 + $0x3b8] sm:$0xf0]  ;;  %v1672_v56 = vld [vmem:[%s2977_s1 + $0x2f0] sm:$0xf]  ;;  %v1564_v3 = vld [vmem:[%s2977_s1 + $0x218] sm:$0xf] }
  0x4e   :  { %1141 = vmatpush.bf16.msra.mxu2 %v1361_v41  ;;  %v1313_v41 = vor.u32 %v1775_v43, %v1312_v36  ;;  %v1769_v30 = vor.u32 %v1889_v23, %v1768_v19  ;;  %v1838_v4 = vld [vmem:[%s2977_s1 + $0x220] sm:$0xf0]  ;;  %v1660_v5 = vld [vmem:[%s2977_s1 + $0x2d8] sm:$0xf]  ;;  %v1835_v14 = vld [vmem:[%s2977_s1 + $0x208] sm:$0xf0] }
  0x4f   :  { %1160 = vmatpush.bf16.msra.mxu3 %v1457_v24  ;;  %v1409_v24 = vor.u32 %v1799_v51, %v1408_v50  ;;  %v1862_v8 = vld [vmem:[%s2977_s1 + $0x2e0] sm:$0xf0]  ;;  %v1565_v9 = vor.u32 %v1838_v4, %v1564_v3  ;;  %v1859_v21 = vld [vmem:[%s2977_s1 + $0x2c8] sm:$0xf0]  ;;  %v1732_v40 = vld [vmem:[%s2977_s1 + $0x368] sm:$0xf] }
  0x50   :  { %1104 = vmatpush.bf16.msra.mxu0 %v1633_v42  ;;  %v1865_v42 = vld [vmem:[%s2977_s1 + $0x2f8] sm:$0xf0]  ;;  %v1661_v15 = vor.u32 %v1862_v8, %v1660_v5  ;;  %v1880_v36 = vld [vmem:[%s2977_s1 + $0x370] sm:$0xf0]  ;;  %v1540_v43 = vld [vmem:[%s2977_s1 + $0x1e8] sm:$0xf] }
  0x51   :  { %1123 = vmatpush.bf16.msra.mxu1 %v1729_v57  ;;  %v1681_v57 = vor.u32 %v1866_v29, %v1678_v22  ;;  %v1673_v1 = vor.u32 %v1865_v42, %v1672_v56  ;;  %v1636_v12 = vld [vmem:[%s2977_s1 + $0x2a8] sm:$0xf]  ;;  %v1856_v37 = vld [vmem:[%s2977_s1 + $0x2b0] sm:$0xf0]  ;;  %v1528_v49 = vld [vmem:[%s2977_s1 + $0x1d0] sm:$0xf] }
  0x52   :  { %1142 = vmatpush.bf16.msra.mxu2 %v1349_v6  ;;  %v1301_v6 = vor.u32 %v1772_v18, %v1300_v52  ;;  %v1829_v50 = vld [vmem:[%s2977_s1 + $0x1d8] sm:$0xf0]  ;;  %v1637_v51 = vor.u32 %v1856_v37, %v1636_v12  ;;  %v1624_v18 = vld [vmem:[%s2977_s1 + $0x290] sm:$0xf]  ;;  %v1708_v19 = vld [vmem:[%s2977_s1 + $0x338] sm:$0xf] }
  0x53   :  { %1161 = vmatpush.bf16.msra.mxu3 %v1445_v59  ;;  %1038 = vmatmul.bf16.gmra.mxu0 %v2713_v34  ;;  %v1756_v59 = vld [vmem:[%s2977_s1 + $0x398] sm:$0xf]  ;;  %v1874_v23 = vld [vmem:[%s2977_s1 + $0x340] sm:$0xf0]  ;;  %v1696_v25 = vld [vmem:[%s2977_s1 + $0x320] sm:$0xf] }
  0x54   :  { %1105 = vmatpush.bf16.msra.mxu0 %v1621_v11  ;;  %1057 = vmatmul.bf16.gmra.mxu1 %v2453_v58  ;;  %v1757_v2 = vor.u32 %v1886_v60, %v1756_v59  ;;  %v1883_v11 = vld [vmem:[%s2977_s1 + $0x388] sm:$0xf0]  ;;  %v1709_v29 = vor.u32 %v1874_v23, %v1708_v19  ;;  %v1612_v22 = vld [vmem:[%s2977_s1 + $0x278] sm:$0xf]  ;;  %v1684_v60 = vld [vmem:[%s2977_s1 + $0x308] sm:$0xf] }
  0x55   :  { %1124 = vmatpush.bf16.msra.mxu1 %v1717_v10  ;;  %1076 = vmatmul.bf16.gmra.mxu2 %v2461_v62  ;;  %v1744_v10 = vld [vmem:[%s2977_s1 + $0x380] sm:$0xf]  ;;  %v1871_v55 = vld [vmem:[%s2977_s1 + $0x328] sm:$0xf0]  ;;  %v1588_v3 = vld [vmem:[%s2977_s1 + $0x248] sm:$0xf] }
  0x56   :  { %1143 = vmatpush.bf16.msra.mxu2 %v1337_v0  ;;  %v1577_v0 = vor.u32 %v1841_v54, %v1576_v33  ;;  %v1745_v16 = vor.u32 %v1883_v11, %v1744_v10  ;;  %v1823_v33 = vld [vmem:[%s2977_s1 + $0x1a8] sm:$0xf0]  ;;  %v1697_v56 = vor.u32 %v1871_v55, %v1696_v25  ;;  %v1844_v4 = vld [vmem:[%s2977_s1 + $0x250] sm:$0xf0] }
  0x57   :  { %1162 = vmatpush.bf16.msra.mxu3 %v1433_v13  ;;  %v1552_v13 = vld [vmem:[%s2977_s1 + $0x200] sm:$0xf]  ;;  %v1847_v42 = vld [vmem:[%s2977_s1 + $0x268] sm:$0xf0]  ;;  %v1589_v8 = vor.u32 %v1844_v4, %v1588_v3 }
  0x58   :  { %1106 = vmatpush.bf16.msra.mxu0 %v1609_v46  ;;  %1095 = vmatmul.bf16.gmra.mxu3 %v2463_v63  ;;  %v1553_v26 = vor.u32 %v1835_v14, %v1552_v13 }
  0x59   :  { %1125 = vmatpush.bf16.msra.mxu1 %v1705_v44  ;;  %v1832_v44 = vld [vmem:[%s2977_s1 + $0x1f0] sm:$0xf0] }
  0x5a   :  { %1144 = vmatpush.bf16.msra.mxu2 %v1325_v20  ;;  %v1648_v20 = vld [vmem:[%s2977_s1 + $0x2c0] sm:$0xf]  ;;  %v1541_v17 = vor.u32 %v1832_v44, %v1540_v43 }
  0x5b   :  { %1163 = vmatpush.bf16.msra.mxu3 %v1421_v47  ;;  %v1649_v46 = vor.u32 %v1859_v21, %v1648_v20  ;;  %v1733_v47 = vor.u32 %v1880_v36, %v1732_v40  ;;  %v2933_v40 = vld [vmem:[%s2982_s5] sm:$0x7] }
  0x5c   :  { %1107 = vmatpush.bf16.msra.mxu0 %v1597_v48  ;;  %v1516_v48 = vld [vmem:[%s2977_s1 + $0x1b8] sm:$0xf]  ;;  %v1256_v37 = vperm.slane %v2933_v40, 0 }
  0x5d   :  { %1126 = vmatpush.bf16.msra.mxu1 %v1693_v45  ;;  %v1529_v45 = vor.u32 %v1829_v50, %v1528_v49 }
  0x5e   :  { %1145 = vmatpush.bf16.msra.mxu2 %v1313_v41  ;;  %v1720_v41 = vld [vmem:[%s2977_s1 + $0x350] sm:$0xf] }
  0x5f   :  { %1164 = vmatpush.bf16.msra.mxu3 %v1409_v24  ;;  %v1826_v24 = vld [vmem:[%s2977_s1 + $0x1c0] sm:$0xf0] }
  0x60   :  { %1108 = vmatpush.bf16.msra.mxu0 %v1585_v35  ;;  %v1517_v53 = vor.u32 %v1826_v24, %v1516_v48  ;;  %v1868_v35 = vld [vmem:[%s2977_s1 + $0x310] sm:$0xf0] }
  0x61   :  { %1127 = vmatpush.bf16.msra.mxu1 %v1681_v57  ;;  %v1600_v57 = vld [vmem:[%s2977_s1 + $0x260] sm:$0xf] }
  0x62   :  { %1146 = vmatpush.bf16.msra.mxu2 %v1301_v6  ;;  %v1850_v6 = vld [vmem:[%s2977_s1 + $0x280] sm:$0xf0] }
  0x63   :  { %1165 = vmatpush.bf16.msra.mxu3 %v1397_v61  ;;  %1109 = vmatmul.bf16.vlgmr.msra.gmra.mxu0 %v2390_v7  ;;  %v1613_v54 = vor.u32 %v1850_v6, %v1612_v22  ;;  %v1492_v61 = vld [vmem:[%s2977_s1 + $0x188] sm:$0xf] }
  0x64   :  { %1177 = vmatpush.bf16.msrb.mxu0 %v1577_v0  ;;  %1128 = vmatmul.bf16.vlgmr.msra.gmra.mxu1 %v2607_v32 }
  0x65   :  { %1196 = vmatpush.bf16.msrb.mxu1 %v1673_v1  ;;  %1147 = vmatmul.bf16.vlgmr.msra.gmra.mxu2 %v2294_v38  ;;  %v1877_v38 = vld [vmem:[%s2977_s1 + $0x358] sm:$0xf0]  ;;  %v1601_v1 = vor.u32 %v1847_v42, %v1600_v57 }
  0x66   :  { %1215 = vmatpush.bf16.msrb.mxu2 %v1769_v30  ;;  %v1721_v52 = vor.u32 %v1877_v38, %v1720_v41  ;;  %v1504_v30 = vld [vmem:[%s2977_s1 + $0x1a0] sm:$0xf] }
  0x67   :  { %1890 = vmatpush.bf16.msrb.mxu3 %v1577_v0  ;;  %v1505_v59 = vor.u32 %v1823_v33, %v1504_v30  ;;  %v1820_v0 = vld [vmem:[%s2977_s1 + $0x190] sm:$0xf0] }
  0x68   :  { %1178 = vmatpush.bf16.msrb.mxu0 %v1565_v9  ;;  %1166 = vmatmul.bf16.vlgmr.msra.gmra.mxu3 %v2296_v39  ;;  %v1853_v39 = vld [vmem:[%s2977_s1 + $0x298] sm:$0xf0]  ;;  %v1493_v5 = vor.u32 %v1820_v0, %v1492_v61 }
  0x69   :  { %1197 = vmatpush.bf16.msrb.mxu1 %v1661_v15  ;;  %v1625_v28 = vor.u32 %v1853_v39, %v1624_v18 }
  0x6a   :  { %1216 = vmatpush.bf16.msrb.mxu2 %v1757_v2  ;;  %v1685_v2 = vor.u32 %v1868_v35, %v1684_v60 }
  0x6b   :  { %1891 = vmatpush.bf16.msrb.mxu3 %v1565_v9 }
  0x6c   :  { %1179 = vmatpush.bf16.msrb.mxu0 %v1553_v26 }
  0x6d   :  { %1198 = vmatpush.bf16.msrb.mxu1 %v1649_v46 }
  0x6e   :  { %1217 = vmatpush.bf16.msrb.mxu2 %v1745_v16 }
  0x6f   :  { %1892 = vmatpush.bf16.msrb.mxu3 %v1553_v26 }
  0x70   :  { %1180 = vmatpush.bf16.msrb.mxu0 %v1541_v17 }
  0x71   :  { %1199 = vmatpush.bf16.msrb.mxu1 %v1637_v51 }
  0x72   :  { %1218 = vmatpush.bf16.msrb.mxu2 %v1733_v47 }
  0x73   :  { %1893 = vmatpush.bf16.msrb.mxu3 %v1541_v17  ;;  %1114 = vmatmul.bf16.gmra.mxu0 %v2501_v31 }
  0x74   :  { %1181 = vmatpush.bf16.msrb.mxu0 %v1529_v45  ;;  %1133 = vmatmul.bf16.gmra.mxu1 %v2713_v34 }
  0x75   :  { %1200 = vmatpush.bf16.msrb.mxu1 %v1625_v28  ;;  %1152 = vmatmul.bf16.gmra.mxu2 %v2453_v58 }
  0x76   :  { %1219 = vmatpush.bf16.msrb.mxu2 %v1721_v52 }
  0x77   :  { %1894 = vmatpush.bf16.msrb.mxu3 %v1529_v45 }
  0x78   :  { %1182 = vmatpush.bf16.msrb.mxu0 %v1517_v53  ;;  %1171 = vmatmul.bf16.gmra.mxu3 %v2461_v62 }
  0x79   :  { %1201 = vmatpush.bf16.msrb.mxu1 %v1613_v54 }
  0x7a   :  { %1220 = vmatpush.bf16.msrb.mxu2 %v1709_v29 }
  0x7b   :  { %1895 = vmatpush.bf16.msrb.mxu3 %v1517_v53 }
  0x7c   :  { %1183 = vmatpush.bf16.msrb.mxu0 %v1505_v59 }
  0x7d   :  { %1202 = vmatpush.bf16.msrb.mxu1 %v1601_v1 }
  0x7e   :  { %1221 = vmatpush.bf16.msrb.mxu2 %v1697_v56 }
  0x7f   :  { %1896 = vmatpush.bf16.msrb.mxu3 %v1505_v59 }
  0x80   :  { %1184 = vmatpush.bf16.msrb.mxu0 %v1493_v5 }
  0x81   :  { %1203 = vmatpush.bf16.msrb.mxu1 %v1589_v8 }
  0x82   :  { %1222 = vmatpush.bf16.msrb.mxu2 %v1685_v2 }
  0x83   :  { %1897 = vmatpush.bf16.msrb.mxu3 %v1493_v5  ;;  %1185 = vmatmul.bf16.vlgmr.msrb.gmra.mxu0 %v2321_v27 }
  0x84   :  { %1204 = vmatmul.bf16.vlgmr.msrb.gmra.mxu1 %v2390_v7 }
  0x85   :  { %1223 = vmatmul.bf16.vlgmr.msrb.gmra.mxu2 %v2607_v32 }
  0x88   :  { %1190 = vmatmul.bf16.vlgmr.msrb.gmra.mxu3 %v2463_v63 }
  0x94   :  { %1209 = vmatmul.bf16.gmra.mxu1 %v2501_v31  ;;  %v2928_v31 = vld [vmem:[%s2981_s4] sm:$0x7] }
  0x95   :  { %1228 = vmatmul.bf16.gmra.mxu2 %v2713_v34  ;;  %v1236_v43 = vperm.slane %v2928_v31, 0 }
  0xa0   :  { %v958_v58 = vpop.f32.mrf.mxu0 }
  0xa1   :  { %v977_v62 = vpop.f32.mrf.mxu1 }
  0xa2   :  { %v978_v7 = vadd.f32 %v977_v62, %v958_v58  ;;  %v1237_v58 = vperm.slane %v2928_v31, 1 }
  0xa8   :  { %v996_v9 = vpop.f32.mrf.mxu2  ;;  %v960_v10 = vpop.f32.mrf.mxu0 }
  0xa9   :  { %v979_v11 = vpop.f32.mrf.mxu1  ;;  %v997_v63 = vadd.f32 %v996_v9, %v978_v7 }
  0xaa   :  { %v980_v47 = vadd.f32 %v979_v11, %v960_v10  ;;  %v1257_v11 = vperm.slane %v2933_v40, 1 }
  0xab   :  { %v1015_v13 = vpop.f32.mrf.mxu3 }
  0xac   :  { %v1016_v36 = vadd.f32 %v1015_v13, %v997_v63 }
  0xb0   :  { %v998_v14 = vpop.f32.mrf.mxu2  ;;  %v963_v15 = vpop.f32.mrf.mxu0 }
  0xb1   :  { %v982_v16 = vpop.f32.mrf.mxu1  ;;  %v999_v41 = vadd.f32 %v998_v14, %v980_v47 }
  0xb2   :  { %v983_v51 = vadd.f32 %v982_v16, %v963_v15 }
  0xb3   :  { %v1017_v27 = vpop.f32.mrf.mxu3 }
  0xb4   :  { %v1018_v50 = vadd.f32 %v1017_v27, %v999_v41 }
  0xb8   :  { %v1001_v20 = vpop.f32.mrf.mxu2  ;;  %v965_v21 = vpop.f32.mrf.mxu0 }
  0xb9   :  { %v984_v32 = vpop.f32.mrf.mxu1  ;;  %v1002_v23 = vadd.f32 %v1001_v20, %v983_v51 }
  0xba   :  { %v985_v53 = vadd.f32 %v984_v32, %v965_v21 }
  0xbb   :  { %v1020_v26 = vpop.f32.mrf.mxu3 }
  0xbc   :  { %v1021_v28 = vadd.f32 %v1020_v26, %v1002_v23 }
  0xc0   :  { %v1003_v34 = vpop.f32.mrf.mxu2  ;;  %v1034_v44 = vpop.f32.mrf.mxu0 }
  0xc1   :  { %v1053_v46 = vpop.f32.mrf.mxu1  ;;  %v1035_v12 = vadd.f32 %v1034_v44, %v1016_v36  ;;  %v1004_v30 = vadd.f32 %v1003_v34, %v985_v53 }
  0xc3   :  { %v1022_v17 = vpop.f32.mrf.mxu3  ;;  %v1242_v38 = vmul.f32 %v1236_v43, %v1035_v12 }
  0xc4   :  { %v1023_v56 = vadd.f32 %v1022_v17, %v1004_v30 }
  0xc5   :  { %v1262_v49 = vadd.f32 %v1256_v37, %v1242_v38 }
  0xc7   :  { %1274 = vst [vmem:[%s2983_s6] sm:$0xff] %v1262_v49 }
  0xc8   :  { %v1072_v52 = vpop.f32.mrf.mxu2  ;;  %v1036_v18 = vpop.f32.mrf.mxu0 }
  0xc9   :  { %v1055_v39 = vpop.f32.mrf.mxu1  ;;  %v1037_v45 = vadd.f32 %v1036_v18, %v1018_v50  ;;  %v1073_v61 = vadd.f32 %v1072_v52, %v1053_v46 }
  0xcb   :  { %v1091_v19 = vpop.f32.mrf.mxu3  ;;  %v1245_v48 = vmul.f32 %v1236_v43, %v1037_v45 }
  0xcc   :  { %v1092_v2 = vadd.f32 %v1091_v19, %v1073_v61 }
  0xcd   :  { %v1265_v24 = vadd.f32 %v1256_v37, %v1245_v48 }
  0xcf   :  { %1277 = vst [vmem:[%s2983_s6 + $0x18] sm:$0xff] %v1265_v24 }
  0xd0   :  { %v1074_v29 = vpop.f32.mrf.mxu2  ;;  %v1039_v22 = vpop.f32.mrf.mxu0 }
  0xd1   :  { %v1058_v6 = vpop.f32.mrf.mxu1  ;;  %v1040_v25 = vadd.f32 %v1039_v22, %v1021_v28  ;;  %v1075_v9 = vadd.f32 %v1074_v29, %v1055_v39 }
  0xd3   :  { %v1093_v55 = vpop.f32.mrf.mxu3  ;;  %v1248_v33 = vmul.f32 %v1236_v43, %v1040_v25  ;;  %v1238_v25 = vperm.slane %v2928_v31, 2 }
  0xd4   :  { %v1094_v14 = vadd.f32 %v1093_v55, %v1075_v9 }
  0xd5   :  { %v1268_v54 = vadd.f32 %v1256_v37, %v1248_v33 }
  0xd7   :  { %1280 = vst [vmem:[%s2983_s6 + $0x30] sm:$0xff] %v1268_v54  ;;  %v1258_v54 = vperm.slane %v2933_v40, 2 }
  0xd8   :  { %v1077_v57 = vpop.f32.mrf.mxu2  ;;  %v1041_v42 = vpop.f32.mrf.mxu0 }
  0xd9   :  { %v1060_v59 = vpop.f32.mrf.mxu1  ;;  %v1042_v60 = vadd.f32 %v1041_v42, %v1023_v56  ;;  %v1078_v32 = vadd.f32 %v1077_v57, %v1058_v6 }
  0xdb   :  { %v1096_v35 = vpop.f32.mrf.mxu3  ;;  %v1251_v0 = vmul.f32 %v1236_v43, %v1042_v60 }
  0xdc   :  { %v1097_v34 = vadd.f32 %v1096_v35, %v1078_v32 }
  0xdd   :  { %v1271_v1 = vadd.f32 %v1256_v37, %v1251_v0 }
  0xdf   :  { %1283 = vst [vmem:[%s2983_s6 + $0x48] sm:$0xff] %v1271_v1 }
  0xe0   :  { %v1079_v3 = vpop.f32.mrf.mxu2  ;;  %v1110_v4 = vpop.f32.mrf.mxu0 }
  0xe1   :  { %v1129_v5 = vpop.f32.mrf.mxu1  ;;  %v1111_v8 = vadd.f32 %v1110_v4, %v1092_v2  ;;  %v1080_v37 = vadd.f32 %v1079_v3, %v1060_v59 }
  0xe3   :  { %v1098_v62 = vpop.f32.mrf.mxu3  ;;  %v1130_v10 = vadd.f32 %v1129_v5, %v1111_v8 }
  0xe4   :  { %v1099_v38 = vadd.f32 %v1098_v62, %v1080_v37 }
  0xe5   :  { %v1243_v13 = vmul.f32 %v1237_v58, %v1130_v10 }
  0xe7   :  { %v1263_v15 = vadd.f32 %v1257_v11, %v1243_v13 }
  0xe8   :  { %v1148_v16 = vpop.f32.mrf.mxu2  ;;  %v1112_v27 = vpop.f32.mrf.mxu0 }
  0xe9   :  { %v1131_v20 = vpop.f32.mrf.mxu1  ;;  %1275 = vst [vmem:[%s2983_s6 + $0x8] sm:$0xff] %v1263_v15  ;;  %v1113_v7 = vadd.f32 %v1112_v27, %v1094_v14 }
  0xeb   :  { %v1167_v21 = vpop.f32.mrf.mxu3  ;;  %v1132_v26 = vadd.f32 %v1131_v20, %v1113_v7 }
  0xec   :  { %v1168_v24 = vadd.f32 %v1167_v21, %v1148_v16 }
  0xed   :  { %v1246_v63 = vmul.f32 %v1237_v58, %v1132_v26 }
  0xef   :  { %v1266_v36 = vadd.f32 %v1257_v11, %v1246_v63 }
  0xf0   :  { %v1150_v43 = vpop.f32.mrf.mxu2  ;;  %v1115_v44 = vpop.f32.mrf.mxu0 }
  0xf1   :  { %v1134_v46 = vpop.f32.mrf.mxu1  ;;  %1278 = vst [vmem:[%s2983_s6 + $0x20] sm:$0xff] %v1266_v36  ;;  %v1116_v47 = vadd.f32 %v1115_v44, %v1097_v34 }
  0xf3   :  { %v1169_v12 = vpop.f32.mrf.mxu3  ;;  %v1135_v17 = vadd.f32 %v1134_v46, %v1116_v47 }
  0xf4   :  { %v1170_v30 = vadd.f32 %v1169_v12, %v1150_v43 }
  0xf5   :  { %v1249_v41 = vmul.f32 %v1237_v58, %v1135_v17 }
  0xf7   :  { %v1269_v49 = vadd.f32 %v1257_v11, %v1249_v41 }
  0xf8   :  { %v1153_v50 = vpop.f32.mrf.mxu2  ;;  %v1117_v51 = vpop.f32.mrf.mxu0 }
  0xf9   :  { %v1136_v52 = vpop.f32.mrf.mxu1  ;;  %1281 = vst [vmem:[%s2983_s6 + $0x38] sm:$0xff] %v1269_v49  ;;  %v1118_v18 = vadd.f32 %v1117_v51, %v1099_v38 }
  0xfb   :  { %v1172_v39 = vpop.f32.mrf.mxu3  ;;  %v1137_v45 = vadd.f32 %v1136_v52, %v1118_v18 }
  0xfc   :  { %v1173_v31 = vadd.f32 %v1172_v39, %v1153_v50 }
  0xfd   :  { %v1252_v19 = vmul.f32 %v1237_v58, %v1137_v45 }
  0xff   :  { %v1272_v23 = vadd.f32 %v1257_v11, %v1252_v19 }
 0x100   :  { %v1155_v48 = vpop.f32.mrf.mxu2  ;;  %v1186_v28 = vpop.f32.mrf.mxu0 }
 0x101   :  { %v1205_v29 = vpop.f32.mrf.mxu1  ;;  %1284 = vst [vmem:[%s2983_s6 + $0x50] sm:$0xff] %v1272_v23  ;;  %v1187_v22 = vadd.f32 %v1186_v28, %v1168_v24 }
 0x103   :  { %v1174_v6 = vpop.f32.mrf.mxu3  ;;  %v1206_v53 = vadd.f32 %v1205_v29, %v1187_v22 }
 0x104   :  { %v1175_v9 = vadd.f32 %v1174_v6, %v1155_v48 }
 0x108   :  { %v1224_v55 = vpop.f32.mrf.mxu2  ;;  %v1188_v56 = vpop.f32.mrf.mxu0 }
 0x109   :  { %v1225_v33 = vadd.f32 %v1224_v55, %v1206_v53  ;;  %v1207_v57 = vpop.f32.mrf.mxu1  ;;  %v1189_v59 = vadd.f32 %v1188_v56, %v1170_v30 }
 0x10b   :  { %v1244_v42 = vmul.f32 %v1238_v25, %v1225_v33  ;;  %v1208_v35 = vadd.f32 %v1207_v57, %v1189_v59  ;;  %v1191_v61 = vpop.f32.mrf.mxu3 }
 0x10c   :  { %v1192_v4 = vadd.f32 %v1191_v61, %v1173_v31 }
 0x10d   :  { %v1264_v60 = vadd.f32 %v1258_v54, %v1244_v42 }
 0x10f   :  { %1276 = vst [vmem:[%s2983_s6 + $0x10] sm:$0xff] %v1264_v60 }
 0x110   :  { %v1226_v0 = vpop.f32.mrf.mxu2 }
 0x111   :  { %v1227_v1 = vadd.f32 %v1226_v0, %v1208_v35  ;;  %v1210_v2 = vpop.f32.mrf.mxu1 }
 0x112   :  { %v1211_v40 = vadd.f32 %v1210_v2, %v1192_v4 }
 0x113   :  { %v1247_v3 = vmul.f32 %v1238_v25, %v1227_v1  ;;  %v1193_v62 = vpop.f32.mrf.mxu3 }
 0x114   :  { %v1194_v13 = vadd.f32 %v1193_v62, %v1175_v9 }
 0x115   :  { %v1267_v5 = vadd.f32 %v1258_v54, %v1247_v3 }
 0x117   :  { %1279 = vst [vmem:[%s2983_s6 + $0x28] sm:$0xff] %v1267_v5 }
 0x118   :  { %v1229_v8 = vpop.f32.mrf.mxu2 }
 0x119   :  { %v1230_v58 = vadd.f32 %v1229_v8, %v1211_v40  ;;  %v1212_v11 = vpop.f32.mrf.mxu1 }
 0x11a   :  { %v1213_v15 = vadd.f32 %v1212_v11, %v1194_v13 }
 0x11b   :  { %v1250_v10 = vmul.f32 %v1238_v25, %v1230_v58 }
 0x11d   :  { %v1270_v14 = vadd.f32 %v1258_v54, %v1250_v10 }
 0x11f   :  { %1282 = vst [vmem:[%s2983_s6 + $0x40] sm:$0xff] %v1270_v14 }
 0x120   :  { %v1231_v16 = vpop.f32.mrf.mxu2 }
 0x121   :  { %v1232_v27 = vadd.f32 %v1231_v16, %v1213_v15 }
 0x123   :  { %v1253_v20 = vmul.f32 %v1238_v25, %v1232_v27 }
 0x125   :  { %v1273_v7 = vadd.f32 %v1258_v54, %v1253_v20 }
 0x127   :  { %1285 = vst [vmem:[%s2983_s6 + $0x58] sm:$0xff] %v1273_v7 }

// kernel: rot_prediction_forward.136
= control target key start
LH: loop header
LB: loop body
LE: loop exit
PB: predicated region body
PF: predicated region fallthrough
CT: control target
= control target key end

     0   :  { %s645_s1 = inlined_call_operand.vmem [shape: bf16[384,128], index: 1, kind: input, shape index: {}]   ;;  %s646_s0 = inlined_call_operand.vmem [shape: bf16[32,384], index: 0, kind: input, shape index: {}]   ;;  %s647_s2 = inlined_call_operand.vmem [shape: f32[1,128], index: 2, kind: input, shape index: {}]   ;;  %s648_s3 = inlined_call_operand.vmem [shape: f32[1,128], index: 3, kind: input, shape index: {}]   ;;  %s649_s4 = inlined_call_operand.vmem [shape: f32[32,128], index: 4, kind: output, shape index: {}]  }
   0x1   :  { %v467_v0 = vld [vmem:[%s645_s1 + $0x38] sm:$0xff]  ;;  %v466_v3 = vld [vmem:[%s645_s1 + $0x30] sm:$0xff]  ;;  %v465_v6 = vld [vmem:[%s645_s1 + $0x28] sm:$0xff] }
   0x2   :  { %v475_v1 = vld [vmem:[%s645_s1 + $0x78] sm:$0xff]  ;;  %249 = vmatpush.bf16.msra.mxu0 %v467_v0  ;;  %v474_v4 = vld [vmem:[%s645_s1 + $0x70] sm:$0xff]  ;;  %484 = vmatpush.bf16.msra.mxu3 %v467_v0  ;;  %v473_v7 = vld [vmem:[%s645_s1 + $0x68] sm:$0xff] }
   0x3   :  { %v483_v2 = vld [vmem:[%s645_s1 + $0xb8] sm:$0xff]  ;;  %268 = vmatpush.bf16.msra.mxu1 %v475_v1  ;;  %v482_v5 = vld [vmem:[%s645_s1 + $0xb0] sm:$0xff]  ;;  %v481_v8 = vld [vmem:[%s645_s1 + $0xa8] sm:$0xff] }
   0x4   :  { %287 = vmatpush.bf16.msra.mxu2 %v483_v2  ;;  %v464_v9 = vld [vmem:[%s645_s1 + $0x20] sm:$0xff]  ;;  %v463_v12 = vld [vmem:[%s645_s1 + $0x18] sm:$0xff]  ;;  %v462_v15 = vld [vmem:[%s645_s1 + $0x10] sm:$0xff] }
   0x5   :  { %v472_v10 = vld [vmem:[%s645_s1 + $0x60] sm:$0xff]  ;;  %v471_v13 = vld [vmem:[%s645_s1 + $0x58] sm:$0xff]  ;;  %v470_v16 = vld [vmem:[%s645_s1 + $0x50] sm:$0xff] }
   0x6   :  { %250 = vmatpush.bf16.msra.mxu0 %v466_v3  ;;  %485 = vmatpush.bf16.msra.mxu3 %v466_v3  ;;  %v480_v11 = vld [vmem:[%s645_s1 + $0xa0] sm:$0xff]  ;;  %v479_v14 = vld [vmem:[%s645_s1 + $0x98] sm:$0xff]  ;;  %v478_v17 = vld [vmem:[%s645_s1 + $0x90] sm:$0xff] }
   0x7   :  { %269 = vmatpush.bf16.msra.mxu1 %v474_v4  ;;  %v461_v18 = vld [vmem:[%s645_s1 + $0x8] sm:$0xff]  ;;  %v460_v21 = vld [vmem:[%s645_s1] sm:$0xff]  ;;  %v338_v27 = vld [vmem:[%s646_s0 + $0xc] sm:$0xf0] }
   0x8   :  { %288 = vmatpush.bf16.msra.mxu2 %v482_v5  ;;  %v469_v19 = vld [vmem:[%s645_s1 + $0x48] sm:$0xff]  ;;  %v468_v22 = vld [vmem:[%s645_s1 + $0x40] sm:$0xff]  ;;  %v456_v29 = vld [vmem:[%s646_s0 + $0x10] sm:$0xf0] }
   0x9   :  { %v477_v20 = vld [vmem:[%s645_s1 + $0x88] sm:$0xff]  ;;  %v476_v23 = vld [vmem:[%s645_s1 + $0x80] sm:$0xff]  ;;  %v348_v30 = vld [vmem:[%s646_s0 + $0x18] sm:$0xf] }
   0xa   :  { %251 = vmatpush.bf16.msra.mxu0 %v465_v6  ;;  %486 = vmatpush.bf16.msra.mxu3 %v465_v6  ;;  %v336_v24 = vld [vmem:[%s646_s0] sm:$0xf]  ;;  %v455_v25 = vld [vmem:[%s646_s0 + $0x8] sm:$0xf0]  ;;  %v454_v26 = vld [vmem:[%s646_s0 + $0x4] sm:$0xf] }
   0xb   :  { %270 = vmatpush.bf16.msra.mxu1 %v473_v7  ;;  %v344_v28 = vld [vmem:[%s646_s0 + $0x8] sm:$0xf]  ;;  %v458_v31 = vld [vmem:[%s646_s0 + $0x20] sm:$0xf0]  ;;  %v337_v32 = vor.u32 %v455_v25, %v336_v24  ;;  %v341_v33 = vor.u32 %v454_v26, %v338_v27  ;;  %v457_v36 = vld [vmem:[%s646_s0 + $0x1c] sm:$0xf] }
   0xc   :  { %289 = vmatpush.bf16.msra.mxu2 %v481_v8  ;;  %v345_v34 = vor.u32 %v456_v29, %v344_v28  ;;  %v349_v35 = vor.u32 %v458_v31, %v348_v30  ;;  %v350_v37 = vld [vmem:[%s646_s0 + $0x24] sm:$0xf0]  ;;  %v356_v38 = vld [vmem:[%s646_s0 + $0x20] sm:$0xf]  ;;  %v459_v39 = vld [vmem:[%s646_s0 + $0x28] sm:$0xf0] }
   0xd   :  { %v353_v40 = vor.u32 %v457_v36, %v350_v37  ;;  %v357_v41 = vor.u32 %v459_v39, %v356_v38  ;;  %v492_v45 = vld [vmem:[%s647_s2] ss:$0 sm:$0xff] }
   0xe   :  { %252 = vmatpush.bf16.msra.mxu0 %v464_v9  ;;  %487 = vmatpush.bf16.msra.mxu3 %v464_v9  ;;  %v493_v48 = vld [vmem:[%s648_s3] ss:$0 sm:$0xff] }
   0xf   :  { %271 = vmatpush.bf16.msra.mxu1 %v472_v10 }
  0x10   :  { %290 = vmatpush.bf16.msra.mxu2 %v480_v11 }
  0x12   :  { %253 = vmatpush.bf16.msra.mxu0 %v463_v12  ;;  %488 = vmatpush.bf16.msra.mxu3 %v463_v12 }
  0x13   :  { %272 = vmatpush.bf16.msra.mxu1 %v471_v13 }
  0x14   :  { %291 = vmatpush.bf16.msra.mxu2 %v479_v14 }
  0x16   :  { %254 = vmatpush.bf16.msra.mxu0 %v462_v15  ;;  %489 = vmatpush.bf16.msra.mxu3 %v462_v15 }
  0x17   :  { %273 = vmatpush.bf16.msra.mxu1 %v470_v16 }
  0x18   :  { %292 = vmatpush.bf16.msra.mxu2 %v478_v17 }
  0x1a   :  { %255 = vmatpush.bf16.msra.mxu0 %v461_v18  ;;  %490 = vmatpush.bf16.msra.mxu3 %v461_v18 }
  0x1b   :  { %274 = vmatpush.bf16.msra.mxu1 %v469_v19 }
  0x1c   :  { %293 = vmatpush.bf16.msra.mxu2 %v477_v20 }
  0x1e   :  { %256 = vmatpush.bf16.msra.mxu0 %v460_v21  ;;  %491 = vmatpush.bf16.msra.mxu3 %v460_v21 }
  0x1f   :  { %275 = vmatpush.bf16.msra.mxu1 %v468_v22 }
  0x20   :  { %294 = vmatpush.bf16.msra.mxu2 %v476_v23 }
  0x21   :  { %257 = vmatmul.bf16.vlgmr.msra.gmra.mxu0 %v337_v32  ;;  %262 = vmatmul.bf16.vlgmr.msra.gmra.mxu3 %v349_v35 }
  0x22   :  { %276 = vmatmul.bf16.vlgmr.msra.gmra.mxu1 %v341_v33 }
  0x23   :  { %295 = vmatmul.bf16.vlgmr.msra.gmra.mxu2 %v345_v34 }
  0x32   :  { %281 = vmatmul.bf16.gmra.mxu1 %v353_v40 }
  0x33   :  { %300 = vmatmul.bf16.gmra.mxu2 %v357_v41 }
  0x9e   :  { %v258_v43 = vpop.f32.mrf.mxu0 }
  0x9f   :  { %v277_v42 = vpop.f32.mrf.mxu1 }
  0xa0   :  { %v278_v44 = vadd.f32 %v277_v42, %v258_v43 }
  0xa4   :  { %v263_v59 = vpop.f32.mrf.mxu3 }
  0xa6   :  { %v296_v46 = vpop.f32.mrf.mxu2  ;;  %v260_v51 = vpop.f32.mrf.mxu0 }
  0xa7   :  { %v297_v47 = vadd.f32 %v296_v46, %v278_v44  ;;  %v279_v49 = vpop.f32.mrf.mxu1 }
  0xa8   :  { %v280_v54 = vadd.f32 %v279_v49, %v260_v51 }
  0xa9   :  { %v310_v50 = vmul.f32 %v492_v45, %v297_v47 }
  0xab   :  { %v318_v52 = vadd.f32 %v493_v48, %v310_v50 }
  0xac   :  { %v265_v4 = vpop.f32.mrf.mxu3 }
  0xad   :  { %v322_v53 = vmax.f32 %v318_v52, 0.0 }
  0xae   :  { %v298_v55 = vpop.f32.mrf.mxu2 }
  0xaf   :  { %326 = vst [vmem:[%s649_s4] sm:$0xff] %v322_v53  ;;  %v299_v56 = vadd.f32 %v298_v55, %v280_v54  ;;  %v282_v57 = vpop.f32.mrf.mxu1 }
  0xb0   :  { %v283_v61 = vadd.f32 %v282_v57, %v263_v59 }
  0xb1   :  { %v311_v58 = vmul.f32 %v492_v45, %v299_v56 }
  0xb3   :  { %v319_v60 = vadd.f32 %v493_v48, %v311_v58 }
  0xb5   :  { %v323_v62 = vmax.f32 %v319_v60, 0.0 }
  0xb6   :  { %v301_v63 = vpop.f32.mrf.mxu2 }
  0xb7   :  { %327 = vst [vmem:[%s649_s4 + $0x8] sm:$0xff] %v323_v62  ;;  %v302_v0 = vadd.f32 %v301_v63, %v283_v61  ;;  %v284_v2 = vpop.f32.mrf.mxu1 }
  0xb8   :  { %v285_v6 = vadd.f32 %v284_v2, %v265_v4 }
  0xb9   :  { %v312_v1 = vmul.f32 %v492_v45, %v302_v0 }
  0xbb   :  { %v320_v3 = vadd.f32 %v493_v48, %v312_v1 }
  0xbd   :  { %v324_v5 = vmax.f32 %v320_v3, 0.0 }
  0xbe   :  { %v303_v7 = vpop.f32.mrf.mxu2 }
  0xbf   :  { %328 = vst [vmem:[%s649_s4 + $0x10] sm:$0xff] %v324_v5  ;;  %v304_v8 = vadd.f32 %v303_v7, %v285_v6 }
  0xc1   :  { %v313_v9 = vmul.f32 %v492_v45, %v304_v8 }
  0xc3   :  { %v321_v10 = vadd.f32 %v493_v48, %v313_v9 }
  0xc5   :  { %v325_v11 = vmax.f32 %v321_v10, 0.0 }
  0xc7   :  { %329 = vst [vmem:[%s649_s4 + $0x18] sm:$0xff] %v325_v11 }

// kernel: rot_prediction_forward.137
= control target key start
LH: loop header
LB: loop body
LE: loop exit
PB: predicated region body
PF: predicated region fallthrough
CT: control target
= control target key end

     0   :  { %s392_s1 = inlined_call_operand.vmem [shape: bf16[256,128], index: 1, kind: input, shape index: {}]   ;;  %s393_s0 = inlined_call_operand.vmem [shape: bf16[16,256], index: 0, kind: input, shape index: {}]   ;;  %s394_s2 = inlined_call_operand.vmem [shape: f32[1,128], index: 2, kind: input, shape index: {}]   ;;  %s395_s3 = inlined_call_operand.vmem [shape: f32[1,128], index: 3, kind: input, shape index: {}]   ;;  %s396_s4 = inlined_call_operand.vmem [shape: f32[16,128], index: 4, kind: output, shape index: {}]  }
   0x1   :  { %v284_v0 = vld [vmem:[%s392_s1 + $0x38] sm:$0xff]  ;;  %v283_v2 = vld [vmem:[%s392_s1 + $0x30] sm:$0xff]  ;;  %v282_v4 = vld [vmem:[%s392_s1 + $0x28] sm:$0xff] }
   0x2   :  { %v292_v1 = vld [vmem:[%s392_s1 + $0x78] sm:$0xff]  ;;  %157 = vmatpush.bf16.msra.mxu0 %v284_v0  ;;  %v291_v3 = vld [vmem:[%s392_s1 + $0x70] sm:$0xff]  ;;  %v290_v5 = vld [vmem:[%s392_s1 + $0x68] sm:$0xff] }
   0x3   :  { %171 = vmatpush.bf16.msra.mxu1 %v292_v1  ;;  %v281_v6 = vld [vmem:[%s392_s1 + $0x20] sm:$0xff]  ;;  %v280_v8 = vld [vmem:[%s392_s1 + $0x18] sm:$0xff]  ;;  %v279_v10 = vld [vmem:[%s392_s1 + $0x10] sm:$0xff] }
   0x4   :  { %v289_v7 = vld [vmem:[%s392_s1 + $0x60] sm:$0xff]  ;;  %v288_v9 = vld [vmem:[%s392_s1 + $0x58] sm:$0xff]  ;;  %v287_v11 = vld [vmem:[%s392_s1 + $0x50] sm:$0xff] }
   0x5   :  { %v278_v12 = vld [vmem:[%s392_s1 + $0x8] sm:$0xff]  ;;  %v277_v14 = vld [vmem:[%s392_s1] sm:$0xff] }
   0x6   :  { %158 = vmatpush.bf16.msra.mxu0 %v283_v2  ;;  %v286_v13 = vld [vmem:[%s392_s1 + $0x48] sm:$0xff]  ;;  %v285_v15 = vld [vmem:[%s392_s1 + $0x40] sm:$0xff] }
   0x7   :  { %172 = vmatpush.bf16.msra.mxu1 %v291_v3  ;;  %v205_v16 = vld [vmem:[%s393_s0] sm:$0xf]  ;;  %v276_v17 = vld [vmem:[%s393_s0 + $0x4] sm:$0xf0]  ;;  %v275_v18 = vld [vmem:[%s393_s0 + $0x4] sm:$0xf] }
   0x8   :  { %v207_v19 = vld [vmem:[%s393_s0 + $0x8] sm:$0xf0]  ;;  %v206_v20 = vor.u32 %v276_v17, %v205_v16  ;;  %v293_v22 = vld [vmem:[%s394_s2] ss:$0 sm:$0xff] }
   0x9   :  { %v210_v21 = vor.u32 %v275_v18, %v207_v19  ;;  %v294_v26 = vld [vmem:[%s395_s3] ss:$0 sm:$0xff] }
   0xa   :  { %159 = vmatpush.bf16.msra.mxu0 %v282_v4 }
   0xb   :  { %173 = vmatpush.bf16.msra.mxu1 %v290_v5 }
   0xe   :  { %160 = vmatpush.bf16.msra.mxu0 %v281_v6 }
   0xf   :  { %174 = vmatpush.bf16.msra.mxu1 %v289_v7 }
  0x12   :  { %161 = vmatpush.bf16.msra.mxu0 %v280_v8 }
  0x13   :  { %175 = vmatpush.bf16.msra.mxu1 %v288_v9 }
  0x16   :  { %162 = vmatpush.bf16.msra.mxu0 %v279_v10 }
  0x17   :  { %176 = vmatpush.bf16.msra.mxu1 %v287_v11 }
  0x1a   :  { %163 = vmatpush.bf16.msra.mxu0 %v278_v12 }
  0x1b   :  { %177 = vmatpush.bf16.msra.mxu1 %v286_v13 }
  0x1e   :  { %164 = vmatpush.bf16.msra.mxu0 %v277_v14 }
  0x1f   :  { %178 = vmatpush.bf16.msra.mxu1 %v285_v15 }
  0x21   :  { %165 = vmatmul.bf16.vlgmr.msra.gmra.mxu0 %v206_v20 }
  0x22   :  { %179 = vmatmul.bf16.vlgmr.msra.gmra.mxu1 %v210_v21 }
  0x9e   :  { %v166_v23 = vpop.f32.mrf.mxu0 }
  0x9f   :  { %v180_v24 = vpop.f32.mrf.mxu1 }
  0xa0   :  { %v181_v25 = vadd.f32 %v180_v24, %v166_v23 }
  0xa2   :  { %v189_v27 = vmul.f32 %v293_v22, %v181_v25 }
  0xa4   :  { %v195_v28 = vadd.f32 %v294_v26, %v189_v27 }
  0xa6   :  { %197 = vst [vmem:[%s396_s4] sm:$0xff] %v195_v28  ;;  %v168_v29 = vpop.f32.mrf.mxu0 }
  0xa7   :  { %v182_v30 = vpop.f32.mrf.mxu1 }
  0xa8   :  { %v183_v31 = vadd.f32 %v182_v30, %v168_v29 }
  0xaa   :  { %v190_v32 = vmul.f32 %v293_v22, %v183_v31 }
  0xac   :  { %v196_v33 = vadd.f32 %v294_v26, %v190_v32 }
  0xae   :  { %198 = vst [vmem:[%s396_s4 + $0x8] sm:$0xff] %v196_v33 }

</bundles_post_ra>
